<compile_context>
chip_gen: v7x
topology: tpu7x:2x2x1
jax: 0.10.0
libtpu: 0.0.40
codegen_flags: <defaults>
</compile_context>

<pallas_src>
import jax
import jax.numpy as jnp
from jax import lax
from jax.experimental import pallas as pl
from jax.experimental.pallas import tpu as pltpu

F32 = jnp.float32
MXU_DTYPE = jnp.bfloat16     # MXU operand dtype; accumulation stays f32.


# -----------------------------------------------------------------------------
# shared in-kernel helpers
# -----------------------------------------------------------------------------
def _sigmoid(t):
  # sigmoid(t) == 0.5 * (tanh(t/2) + 1): one EUP push instead of exp + recip.
  return 0.5 * (jnp.tanh(0.5 * t) + 1.0)


def _attn_norm(energy, *, chan_axis):
  """softmax over the last axis, then PyTorch's
  `attention / (1e-7 + attention.sum(dim=1, keepdims=True))`.

  `chan_axis` is the slab axis corresponding to dim=1 of the batched PyTorch
  tensor: rows (axis 0) of the global (N, N) energy, channels (axis 0) of the
  per-channel (C, k, k) energies.  The softmax denominator uses an exact
  division; only the 1e-7-regularized secondary sum uses the approximate EUP
  reciprocal (it is insensitive to ~1e-3 relative error).
  """
  m = jnp.max(energy, axis=-1, keepdims=True)
  p = jnp.exp(energy - m)
  attn = p / jnp.sum(p, axis=-1, keepdims=True)
  denom = 1e-7 + jnp.sum(attn, axis=chan_axis, keepdims=True)
  return attn * pl.reciprocal(denom, approx=True)


# -----------------------------------------------------------------------------
# single fused kernel: global branch + 4 div-attentions + trans convs + gating
# -----------------------------------------------------------------------------
def _attention2_kernel(x_ref, wqk_ref, wv_ref, vb_ref, wt_ref, bt_ref, o_ref,
                       tview_ref, sview_ref, flat_ref):
  C, N = x_ref.shape[1], x_ref.shape[2]
  T = N // 5

  x = x_ref[0]                              # (C, N) f32
  xm = x.astype(MXU_DTYPE)

  # ---- flat 1x1-conv helpers (bf16 MXU operands, f32 accumulation) ----
  def qproj(i):
    return jnp.dot(wqk_ref[i], xm, preferred_element_type=F32)

  def vproj(i):
    return jnp.dot(wv_ref[i], xm, preferred_element_type=F32) + vb_ref[i]

  def trans(i, xr_flat):
    # x_view + relu(trans_conv(x_view - x_r)); a 1x1 conv commutes with the
    # row-major time/space view reshapes, so it is applied on the flat slab.
    r = jnp.dot(wt_ref[i], (x - xr_flat).astype(MXU_DTYPE),
                preferred_element_type=F32) + bt_ref[i]
    return x + jnp.maximum(r, 0.0)

  # ---- lane-axis regroupings (row-major views of the flat (C, N) slab) ----
  # Implemented with static contiguous stores through small VMEM scratch
  # buffers (guaranteed-lowerable ops); the permute(0,1,3,2) transposes of the
  # PyTorch modules never materialize -- they are folded into dot_general
  # dimension_numbers below.
  # TODO(synk): for large T replace the unrolled store loops with a Mosaic
  # value reshape / strided copy.
  def to_time(flat):                        # (C, N) -> (C, T, 5)
    for t in range(T):
      tview_ref[:, t, :] = flat[:, t * 5:(t + 1) * 5]
    return tview_ref[...]

  def to_space(flat):                       # (C, N) -> (C, 5, T)
    for i in range(5):
      sview_ref[:, i, :] = flat[:, i * T:(i + 1) * T]
    return sview_ref[...]

  def time_to_flat(v):                      # (C, T, 5) -> (C, N)
    for t in range(T):
      flat_ref[:, t * 5:(t + 1) * 5] = v[:, t, :]
    return flat_ref[...]

  def space_to_flat(v):                     # (C, 5, T) -> (C, N)
    for i in range(5):
      flat_ref[:, i * T:(i + 1) * T] = v[:, i, :]
    return flat_ref[...]

  def bmm(a, b, ca, cb):
    # Channel-batched matmul: batch axis 0, contract axis `ca` of a with axis
    # `cb` of b.  Kept in f32: these dots are tiny / padding-dominated on the
    # MXU and this keeps the channel-normalized attention path in f32.
    return lax.dot_general(a, b, (((ca,), (cb,)), ((0,), (0,))),
                           preferred_element_type=F32)

  # ---------------- Attention_once (global branch) ----------------
  q0 = qproj(0)                                         # q == k (shared weight)
  v0 = vproj(0)
  q0m = q0.astype(MXU_DTYPE)
  # energy0[i, j] = sum_c q0[c, i] * q0[c, j]  (contract the channel axis).
  # TODO(synk): flash-tile this (N, N) energy for large N (v7x 64 MiB VMEM).
  energy0 = lax.dot_general(q0m, q0m, (((0,), (0,)), ((), ())),
                            preferred_element_type=F32)
  attn0 = _attn_norm(energy0, chan_axis=0)
  xr0 = jnp.dot(v0.astype(MXU_DTYPE), attn0.astype(MXU_DTYPE),
                preferred_element_type=F32)
  gf = trans(0, xr0)                                    # global_feat, flat (C,N)

  # ---------------- Attention_div: time (self) ----------------
  p1t = to_time(qproj(1))                               # (C, T, 5)
  attn1 = _attn_norm(bmm(p1t, p1t, 1, 1), chan_axis=0)  # (C, 5, 5)
  xr1 = time_to_flat(bmm(to_time(vproj(1)), attn1, 2, 1))
  ta = trans(1, xr1)                                    # time_attention (flat)

  # ---------------- Attention_div: space (self) ----------------
  p2s = to_space(qproj(2))                              # (C, 5, T)
  attn2 = _attn_norm(bmm(p2s, p2s, 1, 1), chan_axis=0)  # (C, T, T)
  xr2 = space_to_flat(bmm(to_space(vproj(2)), attn2, 2, 1))
  sa = trans(2, xr2)                                    # space_attention (flat)

  # ---------------- Attention_div: time_cor(time_x, space_x) ----------------
  p3 = qproj(3)                                         # projected once
  attn3 = _attn_norm(bmm(to_space(p3), to_time(p3), 2, 1), chan_axis=0)
  xr3 = time_to_flat(bmm(to_time(vproj(3)), attn3, 2, 1))
  tc = trans(3, xr3)                                    # time_attention_cor

  # ---------------- Attention_div: space_cor(space_x, time_x) ----------------
  p4 = qproj(4)                                         # projected once
  attn4 = _attn_norm(bmm(to_time(p4), to_space(p4), 2, 1), chan_axis=0)
  xr4 = space_to_flat(bmm(to_space(vproj(4)), attn4, 2, 1))
  sc = trans(4, xr4)                                    # space_attention_cor

  # ---------------- gating tail (elementwise, flat & lane-dense) -------------
  tu = jnp.tanh(ta * _sigmoid(tc))          # time_update   (flat time view)
  su = jnp.tanh(sa * _sigmoid(sc))          # space_update  (flat space view)
  sgf = _sigmoid(gf)                        # sigmoid(global_feat): both gates
  gres = _sigmoid((tu + su) * sgf)          # sigmoid(tgr + sgr)
  o_ref[0] = x + gres * jnp.tanh(gf)


# -----------------------------------------------------------------------------
# Wrapper (parameter packing only; all compute is inside the fused kernel)
# -----------------------------------------------------------------------------
def attention2_forward(x, params):
  qk_w, v_w, v_b, t_w, t_b = params         # (5,C,C),(5,C,C),(5,C),(5,C,C),(5,C)
  B, C, N = x.shape
  assert N % 5 == 0
  T = N // 5

  # MXU operands stored/loaded in bf16 (half the weight HBM bytes); biases stay
  # f32 and are added after the f32 accumulation.
  wqk = qk_w.astype(MXU_DTYPE)
  wv = v_w.astype(MXU_DTYPE)
  wt = t_w.astype(MXU_DTYPE)
  vb = v_b.reshape(5, C, 1).astype(F32)
  bt = t_b.reshape(5, C, 1).astype(F32)

  def const_spec(shape):
    n = len(shape)
    return pl.BlockSpec(shape, lambda b, n=n: (0,) * n)

  batch_spec = pl.BlockSpec((1, C, N), lambda b: (b, 0, 0))

  # Single fused call: weight blocks have a constant index_map, so they are
  # DMA'd once and stay resident across the (parallel) batch grid.  The default
  # scoped-VMEM limit is ample at these shapes; raise it per-chip for large N.
  return pl.pallas_call(
      _attention2_kernel,
      out_shape=jax.ShapeDtypeStruct((B, C, N), F32),
      grid_spec=pltpu.PrefetchScalarGridSpec(
          num_scalar_prefetch=0,
          grid=(B,),
          in_specs=[
              batch_spec,
              const_spec((5, C, C)), const_spec((5, C, C)),
              const_spec((5, C, 1)),
              const_spec((5, C, C)), const_spec((5, C, 1)),
          ],
          out_specs=batch_spec,
          scratch_shapes=[
              pltpu.VMEM((C, T, 5), F32),     # time-view regroup scratch
              pltpu.VMEM((C, 5, T), F32),     # space-view regroup scratch
              pltpu.VMEM((C, N), F32),        # flat regroup scratch
          ],
      ),
      compiler_params=pltpu.CompilerParams(dimension_semantics=("parallel",)),
  )(x.astype(F32), wqk, wv, vb, wt, bt)


# -----------------------------------------------------------------------------
# Deterministic parameter init (synthetic; matches the module's shapes)
# -----------------------------------------------------------------------------
def init_params(key, C):
  n_mod = 5  # [global_res, time, space, time_cor, space_cor]
  ks = jax.random.split(key, 5)
  bound = 1.0 / (C ** 0.5)
  u = lambda k, shape: jax.random.uniform(k, shape, jnp.float32, -bound, bound)
  qk_w = u(ks[0], (n_mod, C, C))   # q_conv.weight == k_conv.weight (shared)
  v_w = u(ks[1], (n_mod, C, C))
  v_b = u(ks[2], (n_mod, C))
  t_w = u(ks[3], (n_mod, C, C))
  t_b = u(ks[4], (n_mod, C))
  return qk_w, v_w, v_b, t_w, t_b


# -----------------------------------------------------------------------------
# Pure-JAX reference of the PyTorch forward (silent numerical check)
# -----------------------------------------------------------------------------
def _conv1x1_ref(w, b, t):
  out = jnp.einsum('dc,bc...->bd...', w, t)
  if b is not None:
    out = out + b.reshape((1, -1) + (1,) * (t.ndim - 2))
  return out


def _attention_unit_ref(x, y, qkw, vw, vb, tw, tb, self_type):
  x_q = _conv1x1_ref(qkw, None, y)
  if self_type:
    x_q = jnp.swapaxes(x_q, -1, -2)
  x_k = _conv1x1_ref(qkw, None, x)
  x_v = _conv1x1_ref(vw, vb, x)
  energy = jnp.matmul(x_q, x_k)
  attn = jax.nn.softmax(energy, axis=-1)
  attn = attn / (1e-7 + jnp.sum(attn, axis=1, keepdims=True))
  x_r = jnp.matmul(x_v, attn)
  x_r = jax.nn.relu(_conv1x1_ref(tw, tb, x - x_r))
  return x + x_r


def attention2_ref(x, params):
  qk_w, v_w, v_b, t_w, t_b = params
  B, C, N = x.shape
  T = N // 5
  time_x = x.reshape(B, C, T, 5)
  space_x = x.reshape(B, C, 5, T)
  m = lambda i: (qk_w[i], v_w[i], v_b[i], t_w[i], t_b[i])
  gf = _attention_unit_ref(x, x, *m(0), self_type=True)
  ta = _attention_unit_ref(time_x, time_x, *m(1), self_type=True)
  sa = _attention_unit_ref(space_x, space_x, *m(2), self_type=True)
  tc = _attention_unit_ref(time_x, space_x, *m(3), self_type=False)
  sc = _attention_unit_ref(space_x, time_x, *m(4), self_type=False)
  sig = jax.nn.sigmoid
  tu = jnp.tanh(ta * sig(tc))
  su = jnp.tanh(sa * sig(sc))
  tg = sig(gf.reshape(B, C, T, 5))
  sg = sig(gf.reshape(B, C, 5, T))
  tgr = (tu * tg).reshape(B, C, N)
  sgr = (su * sg).reshape(B, C, N)
  gres = sig(tgr + sgr)
  return x + gres * jnp.tanh(gf)


# -----------------------------------------------------------------------------
if __name__ == "__main__":
  B, C, N = 2, 8, 40          # N must be a multiple of 5; T = N // 5 = 8
  key = jax.random.PRNGKey(0)
  kx, kp = jax.random.split(key)
  x = jax.random.normal(kx, (B, C, N), jnp.float32)
  params = init_params(kp, C)

  out = jax.jit(attention2_forward)(x, params)
  out = jax.block_until_ready(out)

  assert out.shape == (B, C, N)
  assert bool(jnp.all(jnp.isfinite(out)))
  ref = attention2_ref(x, params)
  err = float(jnp.max(jnp.abs(out - ref)))
  # bf16 MXU operands (per the perf review) put the typical max-abs deviation
  # vs the pure-f32 reference at ~1e-2; the softmax path itself uses exact
  # reciprocals.  The loose bound below only absorbs bf16 rounding.
  assert err < 5e-2, f"max abs err {err}"
  print("KERNEL_OK")
</pallas_src>

<mosaic_0001>
module attributes {stable_mosaic.version = 11 : i64} {
  func.func @_attention2_kernel(%arg0: i32, %arg1: memref<1x8x40xf32, #tpu.memory_space<vmem>>, %arg2: memref<5x8x8xbf16, #tpu.memory_space<vmem>>, %arg3: memref<5x8x8xbf16, #tpu.memory_space<vmem>>, %arg4: memref<5x8x1xf32, #tpu.memory_space<vmem>>, %arg5: memref<5x8x8xbf16, #tpu.memory_space<vmem>>, %arg6: memref<5x8x1xf32, #tpu.memory_space<vmem>>, %arg7: memref<1x8x40xf32, #tpu.memory_space<vmem>>, %arg8: memref<8x8x5xf32, #tpu.memory_space<vmem>>, %arg9: memref<8x5x8xf32, #tpu.memory_space<vmem>>, %arg10: memref<8x40xf32, #tpu.memory_space<vmem>>) attributes {dimension_semantics = [#tpu.dimension_semantics<parallel>], iteration_bounds = array<i64: 2>, scalar_prefetch = 0 : i64, scratch_operands = 3 : i64, tpu.core_type = #tpu.core_type<tc>, window_params = [{transform_indices = @transform_0, window_bounds = array<i64: 1, 8, 40>}, {pipeline_mode = #tpu.pipeline_mode<synchronous>, transform_indices = @transform_1, window_bounds = array<i64: 5, 8, 8>}, {pipeline_mode = #tpu.pipeline_mode<synchronous>, transform_indices = @transform_2, window_bounds = array<i64: 5, 8, 8>}, {pipeline_mode = #tpu.pipeline_mode<synchronous>, transform_indices = @transform_3, window_bounds = array<i64: 5, 8, 1>}, {pipeline_mode = #tpu.pipeline_mode<synchronous>, transform_indices = @transform_4, window_bounds = array<i64: 5, 8, 8>}, {pipeline_mode = #tpu.pipeline_mode<synchronous>, transform_indices = @transform_5, window_bounds = array<i64: 5, 8, 1>}, {transform_indices = @transform_6, window_bounds = array<i64: 1, 8, 40>}]} {
    %c0 = arith.constant 0 : index
    %c0_0 = arith.constant 0 : index
    %c0_1 = arith.constant 0 : index
    %0 = vector.load %arg1[%c0, %c0_0, %c0_1] : memref<1x8x40xf32, #tpu.memory_space<vmem>>, vector<1x8x40xf32>
    %1 = vector.shape_cast %0 : vector<1x8x40xf32> to vector<8x40xf32>
    %2 = arith.truncf %1 : vector<8x40xf32> to vector<8x40xbf16>
    %c0_2 = arith.constant 0 : index
    %c0_3 = arith.constant 0 : index
    %c0_4 = arith.constant 0 : index
    %3 = vector.load %arg2[%c0_2, %c0_3, %c0_4] : memref<5x8x8xbf16, #tpu.memory_space<vmem>>, vector<1x8x8xbf16>
    %4 = vector.shape_cast %3 : vector<1x8x8xbf16> to vector<8x8xbf16>
    %cst = arith.constant dense<0.000000e+00> : vector<8x40xf32>
    %5 = tpu.matmul %4, %2, %cst {dimension_numbers = #tpu.dot_dimension_numbers<[1], [0], [0], [1], [0, 0, 1, 1], [], []>} : vector<8x8xbf16>, vector<8x40xbf16>, vector<8x40xf32> -> vector<8x40xf32>
    %c0_5 = arith.constant 0 : index
    %c0_6 = arith.constant 0 : index
    %c0_7 = arith.constant 0 : index
    %6 = vector.load %arg3[%c0_5, %c0_6, %c0_7] : memref<5x8x8xbf16, #tpu.memory_space<vmem>>, vector<1x8x8xbf16>
    %7 = vector.shape_cast %6 : vector<1x8x8xbf16> to vector<8x8xbf16>
    %cst_8 = arith.constant dense<0.000000e+00> : vector<8x40xf32>
    %8 = tpu.matmul %7, %2, %cst_8 {dimension_numbers = #tpu.dot_dimension_numbers<[1], [0], [0], [1], [0, 0, 1, 1], [], []>} : vector<8x8xbf16>, vector<8x40xbf16>, vector<8x40xf32> -> vector<8x40xf32>
    %c0_9 = arith.constant 0 : index
    %c0_10 = arith.constant 0 : index
    %c0_11 = arith.constant 0 : index
    %9 = vector.load %arg4[%c0_9, %c0_10, %c0_11] : memref<5x8x1xf32, #tpu.memory_space<vmem>>, vector<1x8x1xf32>
    %10 = vector.shape_cast %9 : vector<1x8x1xf32> to vector<8x1xf32>
    %11 = vector.broadcast %10 : vector<8x1xf32> to vector<8x40xf32>
    %12 = arith.addf %8, %11 : vector<8x40xf32>
    %13 = arith.truncf %5 : vector<8x40xf32> to vector<8x40xbf16>
    %cst_12 = arith.constant dense<0.000000e+00> : vector<40x40xf32>
    %14 = tpu.matmul %13, %13, %cst_12 {dimension_numbers = #tpu.dot_dimension_numbers<[0], [0], [1], [1], [0, 1, 1, 1], [], []>} : vector<8x40xbf16>, vector<8x40xbf16>, vector<40x40xf32> -> vector<40x40xf32>
    %cst_13 = arith.constant dense<0xFF800000> : vector<40xf32>
    %15 = vector.multi_reduction <maximumf>, %14, %cst_13 [1] : vector<40x40xf32> to vector<40xf32>
    %16 = vector.shape_cast %15 : vector<40xf32> to vector<40x1xf32>
    %17 = vector.broadcast %16 : vector<40x1xf32> to vector<40x40xf32>
    %18 = arith.subf %14, %17 : vector<40x40xf32>
    %19 = math.exp %18 : vector<40x40xf32>
    %cst_14 = arith.constant dense<0.000000e+00> : vector<40xf32>
    %20 = vector.multi_reduction <add>, %19, %cst_14 [1] : vector<40x40xf32> to vector<40xf32>
    %21 = vector.shape_cast %20 : vector<40xf32> to vector<40x1xf32>
    %22 = vector.broadcast %21 : vector<40x1xf32> to vector<40x40xf32>
    %23 = arith.divf %19, %22 : vector<40x40xf32>
    %cst_15 = arith.constant dense<0.000000e+00> : vector<40xf32>
    %24 = vector.multi_reduction <add>, %23, %cst_15 [0] : vector<40x40xf32> to vector<40xf32>
    %25 = vector.shape_cast %24 : vector<40xf32> to vector<1x40xf32>
    %cst_16 = arith.constant 1.000000e-07 : f32
    %26 = vector.broadcast %cst_16 : f32 to vector<1x40xf32>
    %27 = arith.addf %26, %25 : vector<1x40xf32>
    %28 = tpu.reciprocal %27 {approx = true} : vector<1x40xf32> -> vector<1x40xf32>
    %29 = vector.broadcast %28 : vector<1x40xf32> to vector<40x40xf32>
    %30 = arith.mulf %23, %29 : vector<40x40xf32>
    %31 = arith.truncf %12 : vector<8x40xf32> to vector<8x40xbf16>
    %32 = arith.truncf %30 : vector<40x40xf32> to vector<40x40xbf16>
    %cst_17 = arith.constant dense<0.000000e+00> : vector<8x40xf32>
    %33 = tpu.matmul %31, %32, %cst_17 {dimension_numbers = #tpu.dot_dimension_numbers<[1], [0], [0], [1], [0, 0, 1, 1], [], []>} : vector<8x40xbf16>, vector<40x40xbf16>, vector<8x40xf32> -> vector<8x40xf32>
    %c0_18 = arith.constant 0 : index
    %c0_19 = arith.constant 0 : index
    %c0_20 = arith.constant 0 : index
    %34 = vector.load %arg5[%c0_18, %c0_19, %c0_20] : memref<5x8x8xbf16, #tpu.memory_space<vmem>>, vector<1x8x8xbf16>
    %35 = vector.shape_cast %34 : vector<1x8x8xbf16> to vector<8x8xbf16>
    %36 = arith.subf %1, %33 : vector<8x40xf32>
    %37 = arith.truncf %36 : vector<8x40xf32> to vector<8x40xbf16>
    %cst_21 = arith.constant dense<0.000000e+00> : vector<8x40xf32>
    %38 = tpu.matmul %35, %37, %cst_21 {dimension_numbers = #tpu.dot_dimension_numbers<[1], [0], [0], [1], [0, 0, 1, 1], [], []>} : vector<8x8xbf16>, vector<8x40xbf16>, vector<8x40xf32> -> vector<8x40xf32>
    %c0_22 = arith.constant 0 : index
    %c0_23 = arith.constant 0 : index
    %c0_24 = arith.constant 0 : index
    %39 = vector.load %arg6[%c0_22, %c0_23, %c0_24] : memref<5x8x1xf32, #tpu.memory_space<vmem>>, vector<1x8x1xf32>
    %40 = vector.shape_cast %39 : vector<1x8x1xf32> to vector<8x1xf32>
    %41 = vector.broadcast %40 : vector<8x1xf32> to vector<8x40xf32>
    %42 = arith.addf %38, %41 : vector<8x40xf32>
    %cst_25 = arith.constant 0.000000e+00 : f32
    %43 = vector.broadcast %cst_25 : f32 to vector<8x40xf32>
    %44 = arith.maximumf %42, %43 : vector<8x40xf32>
    %45 = arith.addf %1, %44 : vector<8x40xf32>
    %c1 = arith.constant 1 : index
    %c0_26 = arith.constant 0 : index
    %c0_27 = arith.constant 0 : index
    %46 = vector.load %arg2[%c1, %c0_26, %c0_27] : memref<5x8x8xbf16, #tpu.memory_space<vmem>>, vector<1x8x8xbf16>
    %47 = vector.shape_cast %46 : vector<1x8x8xbf16> to vector<8x8xbf16>
    %cst_28 = arith.constant dense<0.000000e+00> : vector<8x40xf32>
    %48 = tpu.matmul %47, %2, %cst_28 {dimension_numbers = #tpu.dot_dimension_numbers<[1], [0], [0], [1], [0, 0, 1, 1], [], []>} : vector<8x8xbf16>, vector<8x40xbf16>, vector<8x40xf32> -> vector<8x40xf32>
    %49 = vector.extract_strided_slice %48 {offsets = [0, 0], sizes = [8, 5], strides = [1, 1]} : vector<8x40xf32> to vector<8x5xf32>
    %c0_29 = arith.constant 0 : index
    %c0_30 = arith.constant 0 : index
    %c0_31 = arith.constant 0 : index
    %50 = vector.load %arg8[%c0_29, %c0_30, %c0_31] : memref<8x8x5xf32, #tpu.memory_space<vmem>>, vector<8x1x5xf32>
    %51 = vector.shape_cast %50 : vector<8x1x5xf32> to vector<8x5xf32>
    %52 = vector.shape_cast %49 : vector<8x5xf32> to vector<8x1x5xf32>
    tpu.vector_store %arg8[%c0_29, %c0_30, %c0_31], %52 {strides = array<i32>} : memref<8x8x5xf32, #tpu.memory_space<vmem>>, vector<8x1x5xf32>,
    %53 = vector.extract_strided_slice %48 {offsets = [0, 5], sizes = [8, 5], strides = [1, 1]} : vector<8x40xf32> to vector<8x5xf32>
    %c0_32 = arith.constant 0 : index
    %c1_33 = arith.constant 1 : index
    %c0_34 = arith.constant 0 : index
    %54 = vector.load %arg8[%c0_32, %c1_33, %c0_34] : memref<8x8x5xf32, #tpu.memory_space<vmem>>, vector<8x1x5xf32>
    %55 = vector.shape_cast %54 : vector<8x1x5xf32> to vector<8x5xf32>
    %56 = vector.shape_cast %53 : vector<8x5xf32> to vector<8x1x5xf32>
    tpu.vector_store %arg8[%c0_32, %c1_33, %c0_34], %56 {strides = array<i32>} : memref<8x8x5xf32, #tpu.memory_space<vmem>>, vector<8x1x5xf32>,
    %57 = vector.extract_strided_slice %48 {offsets = [0, 10], sizes = [8, 5], strides = [1, 1]} : vector<8x40xf32> to vector<8x5xf32>
    %c0_35 = arith.constant 0 : index
    %c2 = arith.constant 2 : index
    %c0_36 = arith.constant 0 : index
    %58 = vector.load %arg8[%c0_35, %c2, %c0_36] : memref<8x8x5xf32, #tpu.memory_space<vmem>>, vector<8x1x5xf32>
    %59 = vector.shape_cast %58 : vector<8x1x5xf32> to vector<8x5xf32>
    %60 = vector.shape_cast %57 : vector<8x5xf32> to vector<8x1x5xf32>
    tpu.vector_store %arg8[%c0_35, %c2, %c0_36], %60 {strides = array<i32>} : memref<8x8x5xf32, #tpu.memory_space<vmem>>, vector<8x1x5xf32>,
    %61 = vector.extract_strided_slice %48 {offsets = [0, 15], sizes = [8, 5], strides = [1, 1]} : vector<8x40xf32> to vector<8x5xf32>
    %c0_37 = arith.constant 0 : index
    %c3 = arith.constant 3 : index
    %c0_38 = arith.constant 0 : index
    %62 = vector.load %arg8[%c0_37, %c3, %c0_38] : memref<8x8x5xf32, #tpu.memory_space<vmem>>, vector<8x1x5xf32>
    %63 = vector.shape_cast %62 : vector<8x1x5xf32> to vector<8x5xf32>
    %64 = vector.shape_cast %61 : vector<8x5xf32> to vector<8x1x5xf32>
    tpu.vector_store %arg8[%c0_37, %c3, %c0_38], %64 {strides = array<i32>} : memref<8x8x5xf32, #tpu.memory_space<vmem>>, vector<8x1x5xf32>,
    %65 = vector.extract_strided_slice %48 {offsets = [0, 20], sizes = [8, 5], strides = [1, 1]} : vector<8x40xf32> to vector<8x5xf32>
    %c0_39 = arith.constant 0 : index
    %c4 = arith.constant 4 : index
    %c0_40 = arith.constant 0 : index
    %66 = vector.load %arg8[%c0_39, %c4, %c0_40] : memref<8x8x5xf32, #tpu.memory_space<vmem>>, vector<8x1x5xf32>
    %67 = vector.shape_cast %66 : vector<8x1x5xf32> to vector<8x5xf32>
    %68 = vector.shape_cast %65 : vector<8x5xf32> to vector<8x1x5xf32>
    tpu.vector_store %arg8[%c0_39, %c4, %c0_40], %68 {strides = array<i32>} : memref<8x8x5xf32, #tpu.memory_space<vmem>>, vector<8x1x5xf32>,
    %69 = vector.extract_strided_slice %48 {offsets = [0, 25], sizes = [8, 5], strides = [1, 1]} : vector<8x40xf32> to vector<8x5xf32>
    %c0_41 = arith.constant 0 : index
    %c5 = arith.constant 5 : index
    %c0_42 = arith.constant 0 : index
    %70 = vector.load %arg8[%c0_41, %c5, %c0_42] : memref<8x8x5xf32, #tpu.memory_space<vmem>>, vector<8x1x5xf32>
    %71 = vector.shape_cast %70 : vector<8x1x5xf32> to vector<8x5xf32>
    %72 = vector.shape_cast %69 : vector<8x5xf32> to vector<8x1x5xf32>
    tpu.vector_store %arg8[%c0_41, %c5, %c0_42], %72 {strides = array<i32>} : memref<8x8x5xf32, #tpu.memory_space<vmem>>, vector<8x1x5xf32>,
    %73 = vector.extract_strided_slice %48 {offsets = [0, 30], sizes = [8, 5], strides = [1, 1]} : vector<8x40xf32> to vector<8x5xf32>
    %c0_43 = arith.constant 0 : index
    %c6 = arith.constant 6 : index
    %c0_44 = arith.constant 0 : index
    %74 = vector.load %arg8[%c0_43, %c6, %c0_44] : memref<8x8x5xf32, #tpu.memory_space<vmem>>, vector<8x1x5xf32>
    %75 = vector.shape_cast %74 : vector<8x1x5xf32> to vector<8x5xf32>
    %76 = vector.shape_cast %73 : vector<8x5xf32> to vector<8x1x5xf32>
    tpu.vector_store %arg8[%c0_43, %c6, %c0_44], %76 {strides = array<i32>} : memref<8x8x5xf32, #tpu.memory_space<vmem>>, vector<8x1x5xf32>,
    %77 = vector.extract_strided_slice %48 {offsets = [0, 35], sizes = [8, 5], strides = [1, 1]} : vector<8x40xf32> to vector<8x5xf32>
    %c0_45 = arith.constant 0 : index
    %c7 = arith.constant 7 : index
    %c0_46 = arith.constant 0 : index
    %78 = vector.load %arg8[%c0_45, %c7, %c0_46] : memref<8x8x5xf32, #tpu.memory_space<vmem>>, vector<8x1x5xf32>
    %79 = vector.shape_cast %78 : vector<8x1x5xf32> to vector<8x5xf32>
    %80 = vector.shape_cast %77 : vector<8x5xf32> to vector<8x1x5xf32>
    tpu.vector_store %arg8[%c0_45, %c7, %c0_46], %80 {strides = array<i32>} : memref<8x8x5xf32, #tpu.memory_space<vmem>>, vector<8x1x5xf32>,
    %c0_47 = arith.constant 0 : index
    %c0_48 = arith.constant 0 : index
    %c0_49 = arith.constant 0 : index
    %81 = vector.load %arg8[%c0_47, %c0_48, %c0_49] : memref<8x8x5xf32, #tpu.memory_space<vmem>>, vector<8x8x5xf32>
    %cst_50 = arith.constant dense<0.000000e+00> : vector<8x5x5xf32>
    %82 = tpu.matmul %81, %81, %cst_50 {dimension_numbers = #tpu.dot_dimension_numbers<[1], [1], [2], [2], [0, 0, 0, 2, 1, 2], [0], [0]>} : vector<8x8x5xf32>, vector<8x8x5xf32>, vector<8x5x5xf32> -> vector<8x5x5xf32>
    %cst_51 = arith.constant dense<0xFF800000> : vector<8x5xf32>
    %83 = vector.multi_reduction <maximumf>, %82, %cst_51 [2] : vector<8x5x5xf32> to vector<8x5xf32>
    %84 = vector.shape_cast %83 : vector<8x5xf32> to vector<8x5x1xf32>
    %85 = vector.broadcast %84 : vector<8x5x1xf32> to vector<8x5x5xf32>
    %86 = arith.subf %82, %85 : vector<8x5x5xf32>
    %87 = math.exp %86 : vector<8x5x5xf32>
    %cst_52 = arith.constant dense<0.000000e+00> : vector<8x5xf32>
    %88 = vector.multi_reduction <add>, %87, %cst_52 [2] : vector<8x5x5xf32> to vector<8x5xf32>
    %89 = vector.shape_cast %88 : vector<8x5xf32> to vector<8x5x1xf32>
    %90 = vector.broadcast %89 : vector<8x5x1xf32> to vector<8x5x5xf32>
    %91 = arith.divf %87, %90 : vector<8x5x5xf32>
    %cst_53 = arith.constant dense<0.000000e+00> : vector<5x5xf32>
    %92 = vector.multi_reduction <add>, %91, %cst_53 [0] : vector<8x5x5xf32> to vector<5x5xf32>
    %93 = vector.shape_cast %92 : vector<5x5xf32> to vector<1x5x5xf32>
    %cst_54 = arith.constant 1.000000e-07 : f32
    %94 = vector.broadcast %cst_54 : f32 to vector<1x5x5xf32>
    %95 = arith.addf %94, %93 : vector<1x5x5xf32>
    %96 = tpu.reciprocal %95 {approx = true} : vector<1x5x5xf32> -> vector<1x5x5xf32>
    %97 = vector.broadcast %96 : vector<1x5x5xf32> to vector<8x5x5xf32>
    %98 = arith.mulf %91, %97 : vector<8x5x5xf32>
    %c1_55 = arith.constant 1 : index
    %c0_56 = arith.constant 0 : index
    %c0_57 = arith.constant 0 : index
    %99 = vector.load %arg3[%c1_55, %c0_56, %c0_57] : memref<5x8x8xbf16, #tpu.memory_space<vmem>>, vector<1x8x8xbf16>
    %100 = vector.shape_cast %99 : vector<1x8x8xbf16> to vector<8x8xbf16>
    %cst_58 = arith.constant dense<0.000000e+00> : vector<8x40xf32>
    %101 = tpu.matmul %100, %2, %cst_58 {dimension_numbers = #tpu.dot_dimension_numbers<[1], [0], [0], [1], [0, 0, 1, 1], [], []>} : vector<8x8xbf16>, vector<8x40xbf16>, vector<8x40xf32> -> vector<8x40xf32>
    %c1_59 = arith.constant 1 : index
    %c0_60 = arith.constant 0 : index
    %c0_61 = arith.constant 0 : index
    %102 = vector.load %arg4[%c1_59, %c0_60, %c0_61] : memref<5x8x1xf32, #tpu.memory_space<vmem>>, vector<1x8x1xf32>
    %103 = vector.shape_cast %102 : vector<1x8x1xf32> to vector<8x1xf32>
    %104 = vector.broadcast %103 : vector<8x1xf32> to vector<8x40xf32>
    %105 = arith.addf %101, %104 : vector<8x40xf32>
    %106 = vector.extract_strided_slice %105 {offsets = [0, 0], sizes = [8, 5], strides = [1, 1]} : vector<8x40xf32> to vector<8x5xf32>
    %c0_62 = arith.constant 0 : index
    %c0_63 = arith.constant 0 : index
    %c0_64 = arith.constant 0 : index
    %107 = vector.load %arg8[%c0_62, %c0_63, %c0_64] : memref<8x8x5xf32, #tpu.memory_space<vmem>>, vector<8x1x5xf32>
    %108 = vector.shape_cast %107 : vector<8x1x5xf32> to vector<8x5xf32>
    %109 = vector.shape_cast %106 : vector<8x5xf32> to vector<8x1x5xf32>
    tpu.vector_store %arg8[%c0_62, %c0_63, %c0_64], %109 {strides = array<i32>} : memref<8x8x5xf32, #tpu.memory_space<vmem>>, vector<8x1x5xf32>,
    %110 = vector.extract_strided_slice %105 {offsets = [0, 5], sizes = [8, 5], strides = [1, 1]} : vector<8x40xf32> to vector<8x5xf32>
    %c0_65 = arith.constant 0 : index
    %c1_66 = arith.constant 1 : index
    %c0_67 = arith.constant 0 : index
    %111 = vector.load %arg8[%c0_65, %c1_66, %c0_67] : memref<8x8x5xf32, #tpu.memory_space<vmem>>, vector<8x1x5xf32>
    %112 = vector.shape_cast %111 : vector<8x1x5xf32> to vector<8x5xf32>
    %113 = vector.shape_cast %110 : vector<8x5xf32> to vector<8x1x5xf32>
    tpu.vector_store %arg8[%c0_65, %c1_66, %c0_67], %113 {strides = array<i32>} : memref<8x8x5xf32, #tpu.memory_space<vmem>>, vector<8x1x5xf32>,
    %114 = vector.extract_strided_slice %105 {offsets = [0, 10], sizes = [8, 5], strides = [1, 1]} : vector<8x40xf32> to vector<8x5xf32>
    %c0_68 = arith.constant 0 : index
    %c2_69 = arith.constant 2 : index
    %c0_70 = arith.constant 0 : index
    %115 = vector.load %arg8[%c0_68, %c2_69, %c0_70] : memref<8x8x5xf32, #tpu.memory_space<vmem>>, vector<8x1x5xf32>
    %116 = vector.shape_cast %115 : vector<8x1x5xf32> to vector<8x5xf32>
    %117 = vector.shape_cast %114 : vector<8x5xf32> to vector<8x1x5xf32>
    tpu.vector_store %arg8[%c0_68, %c2_69, %c0_70], %117 {strides = array<i32>} : memref<8x8x5xf32, #tpu.memory_space<vmem>>, vector<8x1x5xf32>,
    %118 = vector.extract_strided_slice %105 {offsets = [0, 15], sizes = [8, 5], strides = [1, 1]} : vector<8x40xf32> to vector<8x5xf32>
    %c0_71 = arith.constant 0 : index
    %c3_72 = arith.constant 3 : index
    %c0_73 = arith.constant 0 : index
    %119 = vector.load %arg8[%c0_71, %c3_72, %c0_73] : memref<8x8x5xf32, #tpu.memory_space<vmem>>, vector<8x1x5xf32>
    %120 = vector.shape_cast %119 : vector<8x1x5xf32> to vector<8x5xf32>
    %121 = vector.shape_cast %118 : vector<8x5xf32> to vector<8x1x5xf32>
    tpu.vector_store %arg8[%c0_71, %c3_72, %c0_73], %121 {strides = array<i32>} : memref<8x8x5xf32, #tpu.memory_space<vmem>>, vector<8x1x5xf32>,
    %122 = vector.extract_strided_slice %105 {offsets = [0, 20], sizes = [8, 5], strides = [1, 1]} : vector<8x40xf32> to vector<8x5xf32>
    %c0_74 = arith.constant 0 : index
    %c4_75 = arith.constant 4 : index
    %c0_76 = arith.constant 0 : index
    %123 = vector.load %arg8[%c0_74, %c4_75, %c0_76] : memref<8x8x5xf32, #tpu.memory_space<vmem>>, vector<8x1x5xf32>
    %124 = vector.shape_cast %123 : vector<8x1x5xf32> to vector<8x5xf32>
    %125 = vector.shape_cast %122 : vector<8x5xf32> to vector<8x1x5xf32>
    tpu.vector_store %arg8[%c0_74, %c4_75, %c0_76], %125 {strides = array<i32>} : memref<8x8x5xf32, #tpu.memory_space<vmem>>, vector<8x1x5xf32>,
    %126 = vector.extract_strided_slice %105 {offsets = [0, 25], sizes = [8, 5], strides = [1, 1]} : vector<8x40xf32> to vector<8x5xf32>
    %c0_77 = arith.constant 0 : index
    %c5_78 = arith.constant 5 : index
    %c0_79 = arith.constant 0 : index
    %127 = vector.load %arg8[%c0_77, %c5_78, %c0_79] : memref<8x8x5xf32, #tpu.memory_space<vmem>>, vector<8x1x5xf32>
    %128 = vector.shape_cast %127 : vector<8x1x5xf32> to vector<8x5xf32>
    %129 = vector.shape_cast %126 : vector<8x5xf32> to vector<8x1x5xf32>
    tpu.vector_store %arg8[%c0_77, %c5_78, %c0_79], %129 {strides = array<i32>} : memref<8x8x5xf32, #tpu.memory_space<vmem>>, vector<8x1x5xf32>,
    %130 = vector.extract_strided_slice %105 {offsets = [0, 30], sizes = [8, 5], strides = [1, 1]} : vector<8x40xf32> to vector<8x5xf32>
    %c0_80 = arith.constant 0 : index
    %c6_81 = arith.constant 6 : index
    %c0_82 = arith.constant 0 : index
    %131 = vector.load %arg8[%c0_80, %c6_81, %c0_82] : memref<8x8x5xf32, #tpu.memory_space<vmem>>, vector<8x1x5xf32>
    %132 = vector.shape_cast %131 : vector<8x1x5xf32> to vector<8x5xf32>
    %133 = vector.shape_cast %130 : vector<8x5xf32> to vector<8x1x5xf32>
    tpu.vector_store %arg8[%c0_80, %c6_81, %c0_82], %133 {strides = array<i32>} : memref<8x8x5xf32, #tpu.memory_space<vmem>>, vector<8x1x5xf32>,
    %134 = vector.extract_strided_slice %105 {offsets = [0, 35], sizes = [8, 5], strides = [1, 1]} : vector<8x40xf32> to vector<8x5xf32>
    %c0_83 = arith.constant 0 : index
    %c7_84 = arith.constant 7 : index
    %c0_85 = arith.constant 0 : index
    %135 = vector.load %arg8[%c0_83, %c7_84, %c0_85] : memref<8x8x5xf32, #tpu.memory_space<vmem>>, vector<8x1x5xf32>
    %136 = vector.shape_cast %135 : vector<8x1x5xf32> to vector<8x5xf32>
    %137 = vector.shape_cast %134 : vector<8x5xf32> to vector<8x1x5xf32>
    tpu.vector_store %arg8[%c0_83, %c7_84, %c0_85], %137 {strides = array<i32>} : memref<8x8x5xf32, #tpu.memory_space<vmem>>, vector<8x1x5xf32>,
    %c0_86 = arith.constant 0 : index
    %c0_87 = arith.constant 0 : index
    %c0_88 = arith.constant 0 : index
    %138 = vector.load %arg8[%c0_86, %c0_87, %c0_88] : memref<8x8x5xf32, #tpu.memory_space<vmem>>, vector<8x8x5xf32>
    %cst_89 = arith.constant dense<0.000000e+00> : vector<8x8x5xf32>
    %139 = tpu.matmul %138, %98, %cst_89 {dimension_numbers = #tpu.dot_dimension_numbers<[2], [1], [1], [2], [0, 0, 0, 1, 1, 2], [0], [0]>} : vector<8x8x5xf32>, vector<8x5x5xf32>, vector<8x8x5xf32> -> vector<8x8x5xf32>
    %140 = vector.extract_strided_slice %139 {offsets = [0, 0, 0], sizes = [8, 1, 5], strides = [1, 1, 1]} : vector<8x8x5xf32> to vector<8x1x5xf32>
    %141 = vector.shape_cast %140 : vector<8x1x5xf32> to vector<8x5xf32>
    %c0_90 = arith.constant 0 : index
    %c0_91 = arith.constant 0 : index
    %142 = vector.load %arg10[%c0_90, %c0_91] : memref<8x40xf32, #tpu.memory_space<vmem>>, vector<8x5xf32>
    tpu.vector_store %arg10[%c0_90, %c0_91], %141 {strides = array<i32>} : memref<8x40xf32, #tpu.memory_space<vmem>>, vector<8x5xf32>,
    %143 = vector.extract_strided_slice %139 {offsets = [0, 1, 0], sizes = [8, 1, 5], strides = [1, 1, 1]} : vector<8x8x5xf32> to vector<8x1x5xf32>
    %144 = vector.shape_cast %143 : vector<8x1x5xf32> to vector<8x5xf32>
    %c0_92 = arith.constant 0 : index
    %c5_93 = arith.constant 5 : index
    %145 = vector.load %arg10[%c0_92, %c5_93] : memref<8x40xf32, #tpu.memory_space<vmem>>, vector<8x5xf32>
    tpu.vector_store %arg10[%c0_92, %c5_93], %144 {strides = array<i32>} : memref<8x40xf32, #tpu.memory_space<vmem>>, vector<8x5xf32>,
    %146 = vector.extract_strided_slice %139 {offsets = [0, 2, 0], sizes = [8, 1, 5], strides = [1, 1, 1]} : vector<8x8x5xf32> to vector<8x1x5xf32>
    %147 = vector.shape_cast %146 : vector<8x1x5xf32> to vector<8x5xf32>
    %c0_94 = arith.constant 0 : index
    %c10 = arith.constant 10 : index
    %148 = vector.load %arg10[%c0_94, %c10] : memref<8x40xf32, #tpu.memory_space<vmem>>, vector<8x5xf32>
    tpu.vector_store %arg10[%c0_94, %c10], %147 {strides = array<i32>} : memref<8x40xf32, #tpu.memory_space<vmem>>, vector<8x5xf32>,
    %149 = vector.extract_strided_slice %139 {offsets = [0, 3, 0], sizes = [8, 1, 5], strides = [1, 1, 1]} : vector<8x8x5xf32> to vector<8x1x5xf32>
    %150 = vector.shape_cast %149 : vector<8x1x5xf32> to vector<8x5xf32>
    %c0_95 = arith.constant 0 : index
    %c15 = arith.constant 15 : index
    %151 = vector.load %arg10[%c0_95, %c15] : memref<8x40xf32, #tpu.memory_space<vmem>>, vector<8x5xf32>
    tpu.vector_store %arg10[%c0_95, %c15], %150 {strides = array<i32>} : memref<8x40xf32, #tpu.memory_space<vmem>>, vector<8x5xf32>,
    %152 = vector.extract_strided_slice %139 {offsets = [0, 4, 0], sizes = [8, 1, 5], strides = [1, 1, 1]} : vector<8x8x5xf32> to vector<8x1x5xf32>
    %153 = vector.shape_cast %152 : vector<8x1x5xf32> to vector<8x5xf32>
    %c0_96 = arith.constant 0 : index
    %c20 = arith.constant 20 : index
    %154 = vector.load %arg10[%c0_96, %c20] : memref<8x40xf32, #tpu.memory_space<vmem>>, vector<8x5xf32>
    tpu.vector_store %arg10[%c0_96, %c20], %153 {strides = array<i32>} : memref<8x40xf32, #tpu.memory_space<vmem>>, vector<8x5xf32>,
    %155 = vector.extract_strided_slice %139 {offsets = [0, 5, 0], sizes = [8, 1, 5], strides = [1, 1, 1]} : vector<8x8x5xf32> to vector<8x1x5xf32>
    %156 = vector.shape_cast %155 : vector<8x1x5xf32> to vector<8x5xf32>
    %c0_97 = arith.constant 0 : index
    %c25 = arith.constant 25 : index
    %157 = vector.load %arg10[%c0_97, %c25] : memref<8x40xf32, #tpu.memory_space<vmem>>, vector<8x5xf32>
    tpu.vector_store %arg10[%c0_97, %c25], %156 {strides = array<i32>} : memref<8x40xf32, #tpu.memory_space<vmem>>, vector<8x5xf32>,
    %158 = vector.extract_strided_slice %139 {offsets = [0, 6, 0], sizes = [8, 1, 5], strides = [1, 1, 1]} : vector<8x8x5xf32> to vector<8x1x5xf32>
    %159 = vector.shape_cast %158 : vector<8x1x5xf32> to vector<8x5xf32>
    %c0_98 = arith.constant 0 : index
    %c30 = arith.constant 30 : index
    %160 = vector.load %arg10[%c0_98, %c30] : memref<8x40xf32, #tpu.memory_space<vmem>>, vector<8x5xf32>
    tpu.vector_store %arg10[%c0_98, %c30], %159 {strides = array<i32>} : memref<8x40xf32, #tpu.memory_space<vmem>>, vector<8x5xf32>,
    %161 = vector.extract_strided_slice %139 {offsets = [0, 7, 0], sizes = [8, 1, 5], strides = [1, 1, 1]} : vector<8x8x5xf32> to vector<8x1x5xf32>
    %162 = vector.shape_cast %161 : vector<8x1x5xf32> to vector<8x5xf32>
    %c0_99 = arith.constant 0 : index
    %c35 = arith.constant 35 : index
    %163 = vector.load %arg10[%c0_99, %c35] : memref<8x40xf32, #tpu.memory_space<vmem>>, vector<8x5xf32>
    tpu.vector_store %arg10[%c0_99, %c35], %162 {strides = array<i32>} : memref<8x40xf32, #tpu.memory_space<vmem>>, vector<8x5xf32>,
    %c0_100 = arith.constant 0 : index
    %c0_101 = arith.constant 0 : index
    %164 = vector.load %arg10[%c0_100, %c0_101] : memref<8x40xf32, #tpu.memory_space<vmem>>, vector<8x40xf32>
    %c1_102 = arith.constant 1 : index
    %c0_103 = arith.constant 0 : index
    %c0_104 = arith.constant 0 : index
    %165 = vector.load %arg5[%c1_102, %c0_103, %c0_104] : memref<5x8x8xbf16, #tpu.memory_space<vmem>>, vector<1x8x8xbf16>
    %166 = vector.shape_cast %165 : vector<1x8x8xbf16> to vector<8x8xbf16>
    %167 = arith.subf %1, %164 : vector<8x40xf32>
    %168 = arith.truncf %167 : vector<8x40xf32> to vector<8x40xbf16>
    %cst_105 = arith.constant dense<0.000000e+00> : vector<8x40xf32>
    %169 = tpu.matmul %166, %168, %cst_105 {dimension_numbers = #tpu.dot_dimension_numbers<[1], [0], [0], [1], [0, 0, 1, 1], [], []>} : vector<8x8xbf16>, vector<8x40xbf16>, vector<8x40xf32> -> vector<8x40xf32>
    %c1_106 = arith.constant 1 : index
    %c0_107 = arith.constant 0 : index
    %c0_108 = arith.constant 0 : index
    %170 = vector.load %arg6[%c1_106, %c0_107, %c0_108] : memref<5x8x1xf32, #tpu.memory_space<vmem>>, vector<1x8x1xf32>
    %171 = vector.shape_cast %170 : vector<1x8x1xf32> to vector<8x1xf32>
    %172 = vector.broadcast %171 : vector<8x1xf32> to vector<8x40xf32>
    %173 = arith.addf %169, %172 : vector<8x40xf32>
    %cst_109 = arith.constant 0.000000e+00 : f32
    %174 = vector.broadcast %cst_109 : f32 to vector<8x40xf32>
    %175 = arith.maximumf %173, %174 : vector<8x40xf32>
    %176 = arith.addf %1, %175 : vector<8x40xf32>
    %c2_110 = arith.constant 2 : index
    %c0_111 = arith.constant 0 : index
    %c0_112 = arith.constant 0 : index
    %177 = vector.load %arg2[%c2_110, %c0_111, %c0_112] : memref<5x8x8xbf16, #tpu.memory_space<vmem>>, vector<1x8x8xbf16>
    %178 = vector.shape_cast %177 : vector<1x8x8xbf16> to vector<8x8xbf16>
    %cst_113 = arith.constant dense<0.000000e+00> : vector<8x40xf32>
    %179 = tpu.matmul %178, %2, %cst_113 {dimension_numbers = #tpu.dot_dimension_numbers<[1], [0], [0], [1], [0, 0, 1, 1], [], []>} : vector<8x8xbf16>, vector<8x40xbf16>, vector<8x40xf32> -> vector<8x40xf32>
    %180 = vector.extract_strided_slice %179 {offsets = [0, 0], sizes = [8, 8], strides = [1, 1]} : vector<8x40xf32> to vector<8x8xf32>
    %c0_114 = arith.constant 0 : index
    %c0_115 = arith.constant 0 : index
    %c0_116 = arith.constant 0 : index
    %181 = vector.load %arg9[%c0_114, %c0_115, %c0_116] : memref<8x5x8xf32, #tpu.memory_space<vmem>>, vector<8x1x8xf32>
    %182 = vector.shape_cast %181 : vector<8x1x8xf32> to vector<8x8xf32>
    %183 = vector.shape_cast %180 : vector<8x8xf32> to vector<8x1x8xf32>
    tpu.vector_store %arg9[%c0_114, %c0_115, %c0_116], %183 {strides = array<i32>} : memref<8x5x8xf32, #tpu.memory_space<vmem>>, vector<8x1x8xf32>,
    %184 = vector.extract_strided_slice %179 {offsets = [0, 8], sizes = [8, 8], strides = [1, 1]} : vector<8x40xf32> to vector<8x8xf32>
    %c0_117 = arith.constant 0 : index
    %c1_118 = arith.constant 1 : index
    %c0_119 = arith.constant 0 : index
    %185 = vector.load %arg9[%c0_117, %c1_118, %c0_119] : memref<8x5x8xf32, #tpu.memory_space<vmem>>, vector<8x1x8xf32>
    %186 = vector.shape_cast %185 : vector<8x1x8xf32> to vector<8x8xf32>
    %187 = vector.shape_cast %184 : vector<8x8xf32> to vector<8x1x8xf32>
    tpu.vector_store %arg9[%c0_117, %c1_118, %c0_119], %187 {strides = array<i32>} : memref<8x5x8xf32, #tpu.memory_space<vmem>>, vector<8x1x8xf32>,
    %188 = vector.extract_strided_slice %179 {offsets = [0, 16], sizes = [8, 8], strides = [1, 1]} : vector<8x40xf32> to vector<8x8xf32>
    %c0_120 = arith.constant 0 : index
    %c2_121 = arith.constant 2 : index
    %c0_122 = arith.constant 0 : index
    %189 = vector.load %arg9[%c0_120, %c2_121, %c0_122] : memref<8x5x8xf32, #tpu.memory_space<vmem>>, vector<8x1x8xf32>
    %190 = vector.shape_cast %189 : vector<8x1x8xf32> to vector<8x8xf32>
    %191 = vector.shape_cast %188 : vector<8x8xf32> to vector<8x1x8xf32>
    tpu.vector_store %arg9[%c0_120, %c2_121, %c0_122], %191 {strides = array<i32>} : memref<8x5x8xf32, #tpu.memory_space<vmem>>, vector<8x1x8xf32>,
    %192 = vector.extract_strided_slice %179 {offsets = [0, 24], sizes = [8, 8], strides = [1, 1]} : vector<8x40xf32> to vector<8x8xf32>
    %c0_123 = arith.constant 0 : index
    %c3_124 = arith.constant 3 : index
    %c0_125 = arith.constant 0 : index
    %193 = vector.load %arg9[%c0_123, %c3_124, %c0_125] : memref<8x5x8xf32, #tpu.memory_space<vmem>>, vector<8x1x8xf32>
    %194 = vector.shape_cast %193 : vector<8x1x8xf32> to vector<8x8xf32>
    %195 = vector.shape_cast %192 : vector<8x8xf32> to vector<8x1x8xf32>
    tpu.vector_store %arg9[%c0_123, %c3_124, %c0_125], %195 {strides = array<i32>} : memref<8x5x8xf32, #tpu.memory_space<vmem>>, vector<8x1x8xf32>,
    %196 = vector.extract_strided_slice %179 {offsets = [0, 32], sizes = [8, 8], strides = [1, 1]} : vector<8x40xf32> to vector<8x8xf32>
    %c0_126 = arith.constant 0 : index
    %c4_127 = arith.constant 4 : index
    %c0_128 = arith.constant 0 : index
    %197 = vector.load %arg9[%c0_126, %c4_127, %c0_128] : memref<8x5x8xf32, #tpu.memory_space<vmem>>, vector<8x1x8xf32>
    %198 = vector.shape_cast %197 : vector<8x1x8xf32> to vector<8x8xf32>
    %199 = vector.shape_cast %196 : vector<8x8xf32> to vector<8x1x8xf32>
    tpu.vector_store %arg9[%c0_126, %c4_127, %c0_128], %199 {strides = array<i32>} : memref<8x5x8xf32, #tpu.memory_space<vmem>>, vector<8x1x8xf32>,
    %c0_129 = arith.constant 0 : index
    %c0_130 = arith.constant 0 : index
    %c0_131 = arith.constant 0 : index
    %200 = vector.load %arg9[%c0_129, %c0_130, %c0_131] : memref<8x5x8xf32, #tpu.memory_space<vmem>>, vector<8x5x8xf32>
    %cst_132 = arith.constant dense<0.000000e+00> : vector<8x8x8xf32>
    %201 = tpu.matmul %200, %200, %cst_132 {dimension_numbers = #tpu.dot_dimension_numbers<[1], [1], [2], [2], [0, 0, 0, 2, 1, 2], [0], [0]>} : vector<8x5x8xf32>, vector<8x5x8xf32>, vector<8x8x8xf32> -> vector<8x8x8xf32>
    %cst_133 = arith.constant dense<0xFF800000> : vector<8x8xf32>
    %202 = vector.multi_reduction <maximumf>, %201, %cst_133 [2] : vector<8x8x8xf32> to vector<8x8xf32>
    %203 = vector.shape_cast %202 : vector<8x8xf32> to vector<8x8x1xf32>
    %204 = vector.broadcast %203 : vector<8x8x1xf32> to vector<8x8x8xf32>
    %205 = arith.subf %201, %204 : vector<8x8x8xf32>
    %206 = math.exp %205 : vector<8x8x8xf32>
    %cst_134 = arith.constant dense<0.000000e+00> : vector<8x8xf32>
    %207 = vector.multi_reduction <add>, %206, %cst_134 [2] : vector<8x8x8xf32> to vector<8x8xf32>
    %208 = vector.shape_cast %207 : vector<8x8xf32> to vector<8x8x1xf32>
    %209 = vector.broadcast %208 : vector<8x8x1xf32> to vector<8x8x8xf32>
    %210 = arith.divf %206, %209 : vector<8x8x8xf32>
    %cst_135 = arith.constant dense<0.000000e+00> : vector<8x8xf32>
    %211 = vector.multi_reduction <add>, %210, %cst_135 [0] : vector<8x8x8xf32> to vector<8x8xf32>
    %212 = vector.shape_cast %211 : vector<8x8xf32> to vector<1x8x8xf32>
    %cst_136 = arith.constant 1.000000e-07 : f32
    %213 = vector.broadcast %cst_136 : f32 to vector<1x8x8xf32>
    %214 = arith.addf %213, %212 : vector<1x8x8xf32>
    %215 = tpu.reciprocal %214 {approx = true} : vector<1x8x8xf32> -> vector<1x8x8xf32>
    %216 = vector.broadcast %215 : vector<1x8x8xf32> to vector<8x8x8xf32>
    %217 = arith.mulf %210, %216 : vector<8x8x8xf32>
    %c2_137 = arith.constant 2 : index
    %c0_138 = arith.constant 0 : index
    %c0_139 = arith.constant 0 : index
    %218 = vector.load %arg3[%c2_137, %c0_138, %c0_139] : memref<5x8x8xbf16, #tpu.memory_space<vmem>>, vector<1x8x8xbf16>
    %219 = vector.shape_cast %218 : vector<1x8x8xbf16> to vector<8x8xbf16>
    %cst_140 = arith.constant dense<0.000000e+00> : vector<8x40xf32>
    %220 = tpu.matmul %219, %2, %cst_140 {dimension_numbers = #tpu.dot_dimension_numbers<[1], [0], [0], [1], [0, 0, 1, 1], [], []>} : vector<8x8xbf16>, vector<8x40xbf16>, vector<8x40xf32> -> vector<8x40xf32>
    %c2_141 = arith.constant 2 : index
    %c0_142 = arith.constant 0 : index
    %c0_143 = arith.constant 0 : index
    %221 = vector.load %arg4[%c2_141, %c0_142, %c0_143] : memref<5x8x1xf32, #tpu.memory_space<vmem>>, vector<1x8x1xf32>
    %222 = vector.shape_cast %221 : vector<1x8x1xf32> to vector<8x1xf32>
    %223 = vector.broadcast %222 : vector<8x1xf32> to vector<8x40xf32>
    %224 = arith.addf %220, %223 : vector<8x40xf32>
    %225 = vector.extract_strided_slice %224 {offsets = [0, 0], sizes = [8, 8], strides = [1, 1]} : vector<8x40xf32> to vector<8x8xf32>
    %c0_144 = arith.constant 0 : index
    %c0_145 = arith.constant 0 : index
    %c0_146 = arith.constant 0 : index
    %226 = vector.load %arg9[%c0_144, %c0_145, %c0_146] : memref<8x5x8xf32, #tpu.memory_space<vmem>>, vector<8x1x8xf32>
    %227 = vector.shape_cast %226 : vector<8x1x8xf32> to vector<8x8xf32>
    %228 = vector.shape_cast %225 : vector<8x8xf32> to vector<8x1x8xf32>
    tpu.vector_store %arg9[%c0_144, %c0_145, %c0_146], %228 {strides = array<i32>} : memref<8x5x8xf32, #tpu.memory_space<vmem>>, vector<8x1x8xf32>,
    %229 = vector.extract_strided_slice %224 {offsets = [0, 8], sizes = [8, 8], strides = [1, 1]} : vector<8x40xf32> to vector<8x8xf32>
    %c0_147 = arith.constant 0 : index
    %c1_148 = arith.constant 1 : index
    %c0_149 = arith.constant 0 : index
    %230 = vector.load %arg9[%c0_147, %c1_148, %c0_149] : memref<8x5x8xf32, #tpu.memory_space<vmem>>, vector<8x1x8xf32>
    %231 = vector.shape_cast %230 : vector<8x1x8xf32> to vector<8x8xf32>
    %232 = vector.shape_cast %229 : vector<8x8xf32> to vector<8x1x8xf32>
    tpu.vector_store %arg9[%c0_147, %c1_148, %c0_149], %232 {strides = array<i32>} : memref<8x5x8xf32, #tpu.memory_space<vmem>>, vector<8x1x8xf32>,
    %233 = vector.extract_strided_slice %224 {offsets = [0, 16], sizes = [8, 8], strides = [1, 1]} : vector<8x40xf32> to vector<8x8xf32>
    %c0_150 = arith.constant 0 : index
    %c2_151 = arith.constant 2 : index
    %c0_152 = arith.constant 0 : index
    %234 = vector.load %arg9[%c0_150, %c2_151, %c0_152] : memref<8x5x8xf32, #tpu.memory_space<vmem>>, vector<8x1x8xf32>
    %235 = vector.shape_cast %234 : vector<8x1x8xf32> to vector<8x8xf32>
    %236 = vector.shape_cast %233 : vector<8x8xf32> to vector<8x1x8xf32>
    tpu.vector_store %arg9[%c0_150, %c2_151, %c0_152], %236 {strides = array<i32>} : memref<8x5x8xf32, #tpu.memory_space<vmem>>, vector<8x1x8xf32>,
    %237 = vector.extract_strided_slice %224 {offsets = [0, 24], sizes = [8, 8], strides = [1, 1]} : vector<8x40xf32> to vector<8x8xf32>
    %c0_153 = arith.constant 0 : index
    %c3_154 = arith.constant 3 : index
    %c0_155 = arith.constant 0 : index
    %238 = vector.load %arg9[%c0_153, %c3_154, %c0_155] : memref<8x5x8xf32, #tpu.memory_space<vmem>>, vector<8x1x8xf32>
    %239 = vector.shape_cast %238 : vector<8x1x8xf32> to vector<8x8xf32>
    %240 = vector.shape_cast %237 : vector<8x8xf32> to vector<8x1x8xf32>
    tpu.vector_store %arg9[%c0_153, %c3_154, %c0_155], %240 {strides = array<i32>} : memref<8x5x8xf32, #tpu.memory_space<vmem>>, vector<8x1x8xf32>,
    %241 = vector.extract_strided_slice %224 {offsets = [0, 32], sizes = [8, 8], strides = [1, 1]} : vector<8x40xf32> to vector<8x8xf32>
    %c0_156 = arith.constant 0 : index
    %c4_157 = arith.constant 4 : index
    %c0_158 = arith.constant 0 : index
    %242 = vector.load %arg9[%c0_156, %c4_157, %c0_158] : memref<8x5x8xf32, #tpu.memory_space<vmem>>, vector<8x1x8xf32>
    %243 = vector.shape_cast %242 : vector<8x1x8xf32> to vector<8x8xf32>
    %244 = vector.shape_cast %241 : vector<8x8xf32> to vector<8x1x8xf32>
    tpu.vector_store %arg9[%c0_156, %c4_157, %c0_158], %244 {strides = array<i32>} : memref<8x5x8xf32, #tpu.memory_space<vmem>>, vector<8x1x8xf32>,
    %c0_159 = arith.constant 0 : index
    %c0_160 = arith.constant 0 : index
    %c0_161 = arith.constant 0 : index
    %245 = vector.load %arg9[%c0_159, %c0_160, %c0_161] : memref<8x5x8xf32, #tpu.memory_space<vmem>>, vector<8x5x8xf32>
    %cst_162 = arith.constant dense<0.000000e+00> : vector<8x5x8xf32>
    %246 = tpu.matmul %245, %217, %cst_162 {dimension_numbers = #tpu.dot_dimension_numbers<[2], [1], [1], [2], [0, 0, 0, 1, 1, 2], [0], [0]>} : vector<8x5x8xf32>, vector<8x8x8xf32>, vector<8x5x8xf32> -> vector<8x5x8xf32>
    %247 = vector.extract_strided_slice %246 {offsets = [0, 0, 0], sizes = [8, 1, 8], strides = [1, 1, 1]} : vector<8x5x8xf32> to vector<8x1x8xf32>
    %248 = vector.shape_cast %247 : vector<8x1x8xf32> to vector<8x8xf32>
    %c0_163 = arith.constant 0 : index
    %c0_164 = arith.constant 0 : index
    %249 = vector.load %arg10[%c0_163, %c0_164] : memref<8x40xf32, #tpu.memory_space<vmem>>, vector<8x8xf32>
    tpu.vector_store %arg10[%c0_163, %c0_164], %248 {strides = array<i32>} : memref<8x40xf32, #tpu.memory_space<vmem>>, vector<8x8xf32>,
    %250 = vector.extract_strided_slice %246 {offsets = [0, 1, 0], sizes = [8, 1, 8], strides = [1, 1, 1]} : vector<8x5x8xf32> to vector<8x1x8xf32>
    %251 = vector.shape_cast %250 : vector<8x1x8xf32> to vector<8x8xf32>
    %c0_165 = arith.constant 0 : index
    %c8 = arith.constant 8 : index
    %252 = vector.load %arg10[%c0_165, %c8] : memref<8x40xf32, #tpu.memory_space<vmem>>, vector<8x8xf32>
    tpu.vector_store %arg10[%c0_165, %c8], %251 {strides = array<i32>} : memref<8x40xf32, #tpu.memory_space<vmem>>, vector<8x8xf32>,
    %253 = vector.extract_strided_slice %246 {offsets = [0, 2, 0], sizes = [8, 1, 8], strides = [1, 1, 1]} : vector<8x5x8xf32> to vector<8x1x8xf32>
    %254 = vector.shape_cast %253 : vector<8x1x8xf32> to vector<8x8xf32>
    %c0_166 = arith.constant 0 : index
    %c16 = arith.constant 16 : index
    %255 = vector.load %arg10[%c0_166, %c16] : memref<8x40xf32, #tpu.memory_space<vmem>>, vector<8x8xf32>
    tpu.vector_store %arg10[%c0_166, %c16], %254 {strides = array<i32>} : memref<8x40xf32, #tpu.memory_space<vmem>>, vector<8x8xf32>,
    %256 = vector.extract_strided_slice %246 {offsets = [0, 3, 0], sizes = [8, 1, 8], strides = [1, 1, 1]} : vector<8x5x8xf32> to vector<8x1x8xf32>
    %257 = vector.shape_cast %256 : vector<8x1x8xf32> to vector<8x8xf32>
    %c0_167 = arith.constant 0 : index
    %c24 = arith.constant 24 : index
    %258 = vector.load %arg10[%c0_167, %c24] : memref<8x40xf32, #tpu.memory_space<vmem>>, vector<8x8xf32>
    tpu.vector_store %arg10[%c0_167, %c24], %257 {strides = array<i32>} : memref<8x40xf32, #tpu.memory_space<vmem>>, vector<8x8xf32>,
    %259 = vector.extract_strided_slice %246 {offsets = [0, 4, 0], sizes = [8, 1, 8], strides = [1, 1, 1]} : vector<8x5x8xf32> to vector<8x1x8xf32>
    %260 = vector.shape_cast %259 : vector<8x1x8xf32> to vector<8x8xf32>
    %c0_168 = arith.constant 0 : index
    %c32 = arith.constant 32 : index
    %261 = vector.load %arg10[%c0_168, %c32] : memref<8x40xf32, #tpu.memory_space<vmem>>, vector<8x8xf32>
    tpu.vector_store %arg10[%c0_168, %c32], %260 {strides = array<i32>} : memref<8x40xf32, #tpu.memory_space<vmem>>, vector<8x8xf32>,
    %c0_169 = arith.constant 0 : index
    %c0_170 = arith.constant 0 : index
    %262 = vector.load %arg10[%c0_169, %c0_170] : memref<8x40xf32, #tpu.memory_space<vmem>>, vector<8x40xf32>
    %c2_171 = arith.constant 2 : index
    %c0_172 = arith.constant 0 : index
    %c0_173 = arith.constant 0 : index
    %263 = vector.load %arg5[%c2_171, %c0_172, %c0_173] : memref<5x8x8xbf16, #tpu.memory_space<vmem>>, vector<1x8x8xbf16>
    %264 = vector.shape_cast %263 : vector<1x8x8xbf16> to vector<8x8xbf16>
    %265 = arith.subf %1, %262 : vector<8x40xf32>
    %266 = arith.truncf %265 : vector<8x40xf32> to vector<8x40xbf16>
    %cst_174 = arith.constant dense<0.000000e+00> : vector<8x40xf32>
    %267 = tpu.matmul %264, %266, %cst_174 {dimension_numbers = #tpu.dot_dimension_numbers<[1], [0], [0], [1], [0, 0, 1, 1], [], []>} : vector<8x8xbf16>, vector<8x40xbf16>, vector<8x40xf32> -> vector<8x40xf32>
    %c2_175 = arith.constant 2 : index
    %c0_176 = arith.constant 0 : index
    %c0_177 = arith.constant 0 : index
    %268 = vector.load %arg6[%c2_175, %c0_176, %c0_177] : memref<5x8x1xf32, #tpu.memory_space<vmem>>, vector<1x8x1xf32>
    %269 = vector.shape_cast %268 : vector<1x8x1xf32> to vector<8x1xf32>
    %270 = vector.broadcast %269 : vector<8x1xf32> to vector<8x40xf32>
    %271 = arith.addf %267, %270 : vector<8x40xf32>
    %cst_178 = arith.constant 0.000000e+00 : f32
    %272 = vector.broadcast %cst_178 : f32 to vector<8x40xf32>
    %273 = arith.maximumf %271, %272 : vector<8x40xf32>
    %274 = arith.addf %1, %273 : vector<8x40xf32>
    %c3_179 = arith.constant 3 : index
    %c0_180 = arith.constant 0 : index
    %c0_181 = arith.constant 0 : index
    %275 = vector.load %arg2[%c3_179, %c0_180, %c0_181] : memref<5x8x8xbf16, #tpu.memory_space<vmem>>, vector<1x8x8xbf16>
    %276 = vector.shape_cast %275 : vector<1x8x8xbf16> to vector<8x8xbf16>
    %cst_182 = arith.constant dense<0.000000e+00> : vector<8x40xf32>
    %277 = tpu.matmul %276, %2, %cst_182 {dimension_numbers = #tpu.dot_dimension_numbers<[1], [0], [0], [1], [0, 0, 1, 1], [], []>} : vector<8x8xbf16>, vector<8x40xbf16>, vector<8x40xf32> -> vector<8x40xf32>
    %278 = vector.extract_strided_slice %277 {offsets = [0, 0], sizes = [8, 8], strides = [1, 1]} : vector<8x40xf32> to vector<8x8xf32>
    %c0_183 = arith.constant 0 : index
    %c0_184 = arith.constant 0 : index
    %c0_185 = arith.constant 0 : index
    %279 = vector.load %arg9[%c0_183, %c0_184, %c0_185] : memref<8x5x8xf32, #tpu.memory_space<vmem>>, vector<8x1x8xf32>
    %280 = vector.shape_cast %279 : vector<8x1x8xf32> to vector<8x8xf32>
    %281 = vector.shape_cast %278 : vector<8x8xf32> to vector<8x1x8xf32>
    tpu.vector_store %arg9[%c0_183, %c0_184, %c0_185], %281 {strides = array<i32>} : memref<8x5x8xf32, #tpu.memory_space<vmem>>, vector<8x1x8xf32>,
    %282 = vector.extract_strided_slice %277 {offsets = [0, 8], sizes = [8, 8], strides = [1, 1]} : vector<8x40xf32> to vector<8x8xf32>
    %c0_186 = arith.constant 0 : index
    %c1_187 = arith.constant 1 : index
    %c0_188 = arith.constant 0 : index
    %283 = vector.load %arg9[%c0_186, %c1_187, %c0_188] : memref<8x5x8xf32, #tpu.memory_space<vmem>>, vector<8x1x8xf32>
    %284 = vector.shape_cast %283 : vector<8x1x8xf32> to vector<8x8xf32>
    %285 = vector.shape_cast %282 : vector<8x8xf32> to vector<8x1x8xf32>
    tpu.vector_store %arg9[%c0_186, %c1_187, %c0_188], %285 {strides = array<i32>} : memref<8x5x8xf32, #tpu.memory_space<vmem>>, vector<8x1x8xf32>,
    %286 = vector.extract_strided_slice %277 {offsets = [0, 16], sizes = [8, 8], strides = [1, 1]} : vector<8x40xf32> to vector<8x8xf32>
    %c0_189 = arith.constant 0 : index
    %c2_190 = arith.constant 2 : index
    %c0_191 = arith.constant 0 : index
    %287 = vector.load %arg9[%c0_189, %c2_190, %c0_191] : memref<8x5x8xf32, #tpu.memory_space<vmem>>, vector<8x1x8xf32>
    %288 = vector.shape_cast %287 : vector<8x1x8xf32> to vector<8x8xf32>
    %289 = vector.shape_cast %286 : vector<8x8xf32> to vector<8x1x8xf32>
    tpu.vector_store %arg9[%c0_189, %c2_190, %c0_191], %289 {strides = array<i32>} : memref<8x5x8xf32, #tpu.memory_space<vmem>>, vector<8x1x8xf32>,
    %290 = vector.extract_strided_slice %277 {offsets = [0, 24], sizes = [8, 8], strides = [1, 1]} : vector<8x40xf32> to vector<8x8xf32>
    %c0_192 = arith.constant 0 : index
    %c3_193 = arith.constant 3 : index
    %c0_194 = arith.constant 0 : index
    %291 = vector.load %arg9[%c0_192, %c3_193, %c0_194] : memref<8x5x8xf32, #tpu.memory_space<vmem>>, vector<8x1x8xf32>
    %292 = vector.shape_cast %291 : vector<8x1x8xf32> to vector<8x8xf32>
    %293 = vector.shape_cast %290 : vector<8x8xf32> to vector<8x1x8xf32>
    tpu.vector_store %arg9[%c0_192, %c3_193, %c0_194], %293 {strides = array<i32>} : memref<8x5x8xf32, #tpu.memory_space<vmem>>, vector<8x1x8xf32>,
    %294 = vector.extract_strided_slice %277 {offsets = [0, 32], sizes = [8, 8], strides = [1, 1]} : vector<8x40xf32> to vector<8x8xf32>
    %c0_195 = arith.constant 0 : index
    %c4_196 = arith.constant 4 : index
    %c0_197 = arith.constant 0 : index
    %295 = vector.load %arg9[%c0_195, %c4_196, %c0_197] : memref<8x5x8xf32, #tpu.memory_space<vmem>>, vector<8x1x8xf32>
    %296 = vector.shape_cast %295 : vector<8x1x8xf32> to vector<8x8xf32>
    %297 = vector.shape_cast %294 : vector<8x8xf32> to vector<8x1x8xf32>
    tpu.vector_store %arg9[%c0_195, %c4_196, %c0_197], %297 {strides = array<i32>} : memref<8x5x8xf32, #tpu.memory_space<vmem>>, vector<8x1x8xf32>,
    %c0_198 = arith.constant 0 : index
    %c0_199 = arith.constant 0 : index
    %c0_200 = arith.constant 0 : index
    %298 = vector.load %arg9[%c0_198, %c0_199, %c0_200] : memref<8x5x8xf32, #tpu.memory_space<vmem>>, vector<8x5x8xf32>
    %299 = vector.extract_strided_slice %277 {offsets = [0, 0], sizes = [8, 5], strides = [1, 1]} : vector<8x40xf32> to vector<8x5xf32>
    %c0_201 = arith.constant 0 : index
    %c0_202 = arith.constant 0 : index
    %c0_203 = arith.constant 0 : index
    %300 = vector.load %arg8[%c0_201, %c0_202, %c0_203] : memref<8x8x5xf32, #tpu.memory_space<vmem>>, vector<8x1x5xf32>
    %301 = vector.shape_cast %300 : vector<8x1x5xf32> to vector<8x5xf32>
    %302 = vector.shape_cast %299 : vector<8x5xf32> to vector<8x1x5xf32>
    tpu.vector_store %arg8[%c0_201, %c0_202, %c0_203], %302 {strides = array<i32>} : memref<8x8x5xf32, #tpu.memory_space<vmem>>, vector<8x1x5xf32>,
    %303 = vector.extract_strided_slice %277 {offsets = [0, 5], sizes = [8, 5], strides = [1, 1]} : vector<8x40xf32> to vector<8x5xf32>
    %c0_204 = arith.constant 0 : index
    %c1_205 = arith.constant 1 : index
    %c0_206 = arith.constant 0 : index
    %304 = vector.load %arg8[%c0_204, %c1_205, %c0_206] : memref<8x8x5xf32, #tpu.memory_space<vmem>>, vector<8x1x5xf32>
    %305 = vector.shape_cast %304 : vector<8x1x5xf32> to vector<8x5xf32>
    %306 = vector.shape_cast %303 : vector<8x5xf32> to vector<8x1x5xf32>
    tpu.vector_store %arg8[%c0_204, %c1_205, %c0_206], %306 {strides = array<i32>} : memref<8x8x5xf32, #tpu.memory_space<vmem>>, vector<8x1x5xf32>,
    %307 = vector.extract_strided_slice %277 {offsets = [0, 10], sizes = [8, 5], strides = [1, 1]} : vector<8x40xf32> to vector<8x5xf32>
    %c0_207 = arith.constant 0 : index
    %c2_208 = arith.constant 2 : index
    %c0_209 = arith.constant 0 : index
    %308 = vector.load %arg8[%c0_207, %c2_208, %c0_209] : memref<8x8x5xf32, #tpu.memory_space<vmem>>, vector<8x1x5xf32>
    %309 = vector.shape_cast %308 : vector<8x1x5xf32> to vector<8x5xf32>
    %310 = vector.shape_cast %307 : vector<8x5xf32> to vector<8x1x5xf32>
    tpu.vector_store %arg8[%c0_207, %c2_208, %c0_209], %310 {strides = array<i32>} : memref<8x8x5xf32, #tpu.memory_space<vmem>>, vector<8x1x5xf32>,
    %311 = vector.extract_strided_slice %277 {offsets = [0, 15], sizes = [8, 5], strides = [1, 1]} : vector<8x40xf32> to vector<8x5xf32>
    %c0_210 = arith.constant 0 : index
    %c3_211 = arith.constant 3 : index
    %c0_212 = arith.constant 0 : index
    %312 = vector.load %arg8[%c0_210, %c3_211, %c0_212] : memref<8x8x5xf32, #tpu.memory_space<vmem>>, vector<8x1x5xf32>
    %313 = vector.shape_cast %312 : vector<8x1x5xf32> to vector<8x5xf32>
    %314 = vector.shape_cast %311 : vector<8x5xf32> to vector<8x1x5xf32>
    tpu.vector_store %arg8[%c0_210, %c3_211, %c0_212], %314 {strides = array<i32>} : memref<8x8x5xf32, #tpu.memory_space<vmem>>, vector<8x1x5xf32>,
    %315 = vector.extract_strided_slice %277 {offsets = [0, 20], sizes = [8, 5], strides = [1, 1]} : vector<8x40xf32> to vector<8x5xf32>
    %c0_213 = arith.constant 0 : index
    %c4_214 = arith.constant 4 : index
    %c0_215 = arith.constant 0 : index
    %316 = vector.load %arg8[%c0_213, %c4_214, %c0_215] : memref<8x8x5xf32, #tpu.memory_space<vmem>>, vector<8x1x5xf32>
    %317 = vector.shape_cast %316 : vector<8x1x5xf32> to vector<8x5xf32>
    %318 = vector.shape_cast %315 : vector<8x5xf32> to vector<8x1x5xf32>
    tpu.vector_store %arg8[%c0_213, %c4_214, %c0_215], %318 {strides = array<i32>} : memref<8x8x5xf32, #tpu.memory_space<vmem>>, vector<8x1x5xf32>,
    %319 = vector.extract_strided_slice %277 {offsets = [0, 25], sizes = [8, 5], strides = [1, 1]} : vector<8x40xf32> to vector<8x5xf32>
    %c0_216 = arith.constant 0 : index
    %c5_217 = arith.constant 5 : index
    %c0_218 = arith.constant 0 : index
    %320 = vector.load %arg8[%c0_216, %c5_217, %c0_218] : memref<8x8x5xf32, #tpu.memory_space<vmem>>, vector<8x1x5xf32>
    %321 = vector.shape_cast %320 : vector<8x1x5xf32> to vector<8x5xf32>
    %322 = vector.shape_cast %319 : vector<8x5xf32> to vector<8x1x5xf32>
    tpu.vector_store %arg8[%c0_216, %c5_217, %c0_218], %322 {strides = array<i32>} : memref<8x8x5xf32, #tpu.memory_space<vmem>>, vector<8x1x5xf32>,
    %323 = vector.extract_strided_slice %277 {offsets = [0, 30], sizes = [8, 5], strides = [1, 1]} : vector<8x40xf32> to vector<8x5xf32>
    %c0_219 = arith.constant 0 : index
    %c6_220 = arith.constant 6 : index
    %c0_221 = arith.constant 0 : index
    %324 = vector.load %arg8[%c0_219, %c6_220, %c0_221] : memref<8x8x5xf32, #tpu.memory_space<vmem>>, vector<8x1x5xf32>
    %325 = vector.shape_cast %324 : vector<8x1x5xf32> to vector<8x5xf32>
    %326 = vector.shape_cast %323 : vector<8x5xf32> to vector<8x1x5xf32>
    tpu.vector_store %arg8[%c0_219, %c6_220, %c0_221], %326 {strides = array<i32>} : memref<8x8x5xf32, #tpu.memory_space<vmem>>, vector<8x1x5xf32>,
    %327 = vector.extract_strided_slice %277 {offsets = [0, 35], sizes = [8, 5], strides = [1, 1]} : vector<8x40xf32> to vector<8x5xf32>
    %c0_222 = arith.constant 0 : index
    %c7_223 = arith.constant 7 : index
    %c0_224 = arith.constant 0 : index
    %328 = vector.load %arg8[%c0_222, %c7_223, %c0_224] : memref<8x8x5xf32, #tpu.memory_space<vmem>>, vector<8x1x5xf32>
    %329 = vector.shape_cast %328 : vector<8x1x5xf32> to vector<8x5xf32>
    %330 = vector.shape_cast %327 : vector<8x5xf32> to vector<8x1x5xf32>
    tpu.vector_store %arg8[%c0_222, %c7_223, %c0_224], %330 {strides = array<i32>} : memref<8x8x5xf32, #tpu.memory_space<vmem>>, vector<8x1x5xf32>,
    %c0_225 = arith.constant 0 : index
    %c0_226 = arith.constant 0 : index
    %c0_227 = arith.constant 0 : index
    %331 = vector.load %arg8[%c0_225, %c0_226, %c0_227] : memref<8x8x5xf32, #tpu.memory_space<vmem>>, vector<8x8x5xf32>
    %cst_228 = arith.constant dense<0.000000e+00> : vector<8x5x5xf32>
    %332 = tpu.matmul %298, %331, %cst_228 {dimension_numbers = #tpu.dot_dimension_numbers<[2], [1], [1], [2], [0, 0, 0, 1, 1, 2], [0], [0]>} : vector<8x5x8xf32>, vector<8x8x5xf32>, vector<8x5x5xf32> -> vector<8x5x5xf32>
    %cst_229 = arith.constant dense<0xFF800000> : vector<8x5xf32>
    %333 = vector.multi_reduction <maximumf>, %332, %cst_229 [2] : vector<8x5x5xf32> to vector<8x5xf32>
    %334 = vector.shape_cast %333 : vector<8x5xf32> to vector<8x5x1xf32>
    %335 = vector.broadcast %334 : vector<8x5x1xf32> to vector<8x5x5xf32>
    %336 = arith.subf %332, %335 : vector<8x5x5xf32>
    %337 = math.exp %336 : vector<8x5x5xf32>
    %cst_230 = arith.constant dense<0.000000e+00> : vector<8x5xf32>
    %338 = vector.multi_reduction <add>, %337, %cst_230 [2] : vector<8x5x5xf32> to vector<8x5xf32>
    %339 = vector.shape_cast %338 : vector<8x5xf32> to vector<8x5x1xf32>
    %340 = vector.broadcast %339 : vector<8x5x1xf32> to vector<8x5x5xf32>
    %341 = arith.divf %337, %340 : vector<8x5x5xf32>
    %cst_231 = arith.constant dense<0.000000e+00> : vector<5x5xf32>
    %342 = vector.multi_reduction <add>, %341, %cst_231 [0] : vector<8x5x5xf32> to vector<5x5xf32>
    %343 = vector.shape_cast %342 : vector<5x5xf32> to vector<1x5x5xf32>
    %cst_232 = arith.constant 1.000000e-07 : f32
    %344 = vector.broadcast %cst_232 : f32 to vector<1x5x5xf32>
    %345 = arith.addf %344, %343 : vector<1x5x5xf32>
    %346 = tpu.reciprocal %345 {approx = true} : vector<1x5x5xf32> -> vector<1x5x5xf32>
    %347 = vector.broadcast %346 : vector<1x5x5xf32> to vector<8x5x5xf32>
    %348 = arith.mulf %341, %347 : vector<8x5x5xf32>
    %c3_233 = arith.constant 3 : index
    %c0_234 = arith.constant 0 : index
    %c0_235 = arith.constant 0 : index
    %349 = vector.load %arg3[%c3_233, %c0_234, %c0_235] : memref<5x8x8xbf16, #tpu.memory_space<vmem>>, vector<1x8x8xbf16>
    %350 = vector.shape_cast %349 : vector<1x8x8xbf16> to vector<8x8xbf16>
    %cst_236 = arith.constant dense<0.000000e+00> : vector<8x40xf32>
    %351 = tpu.matmul %350, %2, %cst_236 {dimension_numbers = #tpu.dot_dimension_numbers<[1], [0], [0], [1], [0, 0, 1, 1], [], []>} : vector<8x8xbf16>, vector<8x40xbf16>, vector<8x40xf32> -> vector<8x40xf32>
    %c3_237 = arith.constant 3 : index
    %c0_238 = arith.constant 0 : index
    %c0_239 = arith.constant 0 : index
    %352 = vector.load %arg4[%c3_237, %c0_238, %c0_239] : memref<5x8x1xf32, #tpu.memory_space<vmem>>, vector<1x8x1xf32>
    %353 = vector.shape_cast %352 : vector<1x8x1xf32> to vector<8x1xf32>
    %354 = vector.broadcast %353 : vector<8x1xf32> to vector<8x40xf32>
    %355 = arith.addf %351, %354 : vector<8x40xf32>
    %356 = vector.extract_strided_slice %355 {offsets = [0, 0], sizes = [8, 5], strides = [1, 1]} : vector<8x40xf32> to vector<8x5xf32>
    %c0_240 = arith.constant 0 : index
    %c0_241 = arith.constant 0 : index
    %c0_242 = arith.constant 0 : index
    %357 = vector.load %arg8[%c0_240, %c0_241, %c0_242] : memref<8x8x5xf32, #tpu.memory_space<vmem>>, vector<8x1x5xf32>
    %358 = vector.shape_cast %357 : vector<8x1x5xf32> to vector<8x5xf32>
    %359 = vector.shape_cast %356 : vector<8x5xf32> to vector<8x1x5xf32>
    tpu.vector_store %arg8[%c0_240, %c0_241, %c0_242], %359 {strides = array<i32>} : memref<8x8x5xf32, #tpu.memory_space<vmem>>, vector<8x1x5xf32>,
    %360 = vector.extract_strided_slice %355 {offsets = [0, 5], sizes = [8, 5], strides = [1, 1]} : vector<8x40xf32> to vector<8x5xf32>
    %c0_243 = arith.constant 0 : index
    %c1_244 = arith.constant 1 : index
    %c0_245 = arith.constant 0 : index
    %361 = vector.load %arg8[%c0_243, %c1_244, %c0_245] : memref<8x8x5xf32, #tpu.memory_space<vmem>>, vector<8x1x5xf32>
    %362 = vector.shape_cast %361 : vector<8x1x5xf32> to vector<8x5xf32>
    %363 = vector.shape_cast %360 : vector<8x5xf32> to vector<8x1x5xf32>
    tpu.vector_store %arg8[%c0_243, %c1_244, %c0_245], %363 {strides = array<i32>} : memref<8x8x5xf32, #tpu.memory_space<vmem>>, vector<8x1x5xf32>,
    %364 = vector.extract_strided_slice %355 {offsets = [0, 10], sizes = [8, 5], strides = [1, 1]} : vector<8x40xf32> to vector<8x5xf32>
    %c0_246 = arith.constant 0 : index
    %c2_247 = arith.constant 2 : index
    %c0_248 = arith.constant 0 : index
    %365 = vector.load %arg8[%c0_246, %c2_247, %c0_248] : memref<8x8x5xf32, #tpu.memory_space<vmem>>, vector<8x1x5xf32>
    %366 = vector.shape_cast %365 : vector<8x1x5xf32> to vector<8x5xf32>
    %367 = vector.shape_cast %364 : vector<8x5xf32> to vector<8x1x5xf32>
    tpu.vector_store %arg8[%c0_246, %c2_247, %c0_248], %367 {strides = array<i32>} : memref<8x8x5xf32, #tpu.memory_space<vmem>>, vector<8x1x5xf32>,
    %368 = vector.extract_strided_slice %355 {offsets = [0, 15], sizes = [8, 5], strides = [1, 1]} : vector<8x40xf32> to vector<8x5xf32>
    %c0_249 = arith.constant 0 : index
    %c3_250 = arith.constant 3 : index
    %c0_251 = arith.constant 0 : index
    %369 = vector.load %arg8[%c0_249, %c3_250, %c0_251] : memref<8x8x5xf32, #tpu.memory_space<vmem>>, vector<8x1x5xf32>
    %370 = vector.shape_cast %369 : vector<8x1x5xf32> to vector<8x5xf32>
    %371 = vector.shape_cast %368 : vector<8x5xf32> to vector<8x1x5xf32>
    tpu.vector_store %arg8[%c0_249, %c3_250, %c0_251], %371 {strides = array<i32>} : memref<8x8x5xf32, #tpu.memory_space<vmem>>, vector<8x1x5xf32>,
    %372 = vector.extract_strided_slice %355 {offsets = [0, 20], sizes = [8, 5], strides = [1, 1]} : vector<8x40xf32> to vector<8x5xf32>
    %c0_252 = arith.constant 0 : index
    %c4_253 = arith.constant 4 : index
    %c0_254 = arith.constant 0 : index
    %373 = vector.load %arg8[%c0_252, %c4_253, %c0_254] : memref<8x8x5xf32, #tpu.memory_space<vmem>>, vector<8x1x5xf32>
    %374 = vector.shape_cast %373 : vector<8x1x5xf32> to vector<8x5xf32>
    %375 = vector.shape_cast %372 : vector<8x5xf32> to vector<8x1x5xf32>
    tpu.vector_store %arg8[%c0_252, %c4_253, %c0_254], %375 {strides = array<i32>} : memref<8x8x5xf32, #tpu.memory_space<vmem>>, vector<8x1x5xf32>,
    %376 = vector.extract_strided_slice %355 {offsets = [0, 25], sizes = [8, 5], strides = [1, 1]} : vector<8x40xf32> to vector<8x5xf32>
    %c0_255 = arith.constant 0 : index
    %c5_256 = arith.constant 5 : index
    %c0_257 = arith.constant 0 : index
    %377 = vector.load %arg8[%c0_255, %c5_256, %c0_257] : memref<8x8x5xf32, #tpu.memory_space<vmem>>, vector<8x1x5xf32>
    %378 = vector.shape_cast %377 : vector<8x1x5xf32> to vector<8x5xf32>
    %379 = vector.shape_cast %376 : vector<8x5xf32> to vector<8x1x5xf32>
    tpu.vector_store %arg8[%c0_255, %c5_256, %c0_257], %379 {strides = array<i32>} : memref<8x8x5xf32, #tpu.memory_space<vmem>>, vector<8x1x5xf32>,
    %380 = vector.extract_strided_slice %355 {offsets = [0, 30], sizes = [8, 5], strides = [1, 1]} : vector<8x40xf32> to vector<8x5xf32>
    %c0_258 = arith.constant 0 : index
    %c6_259 = arith.constant 6 : index
    %c0_260 = arith.constant 0 : index
    %381 = vector.load %arg8[%c0_258, %c6_259, %c0_260] : memref<8x8x5xf32, #tpu.memory_space<vmem>>, vector<8x1x5xf32>
    %382 = vector.shape_cast %381 : vector<8x1x5xf32> to vector<8x5xf32>
    %383 = vector.shape_cast %380 : vector<8x5xf32> to vector<8x1x5xf32>
    tpu.vector_store %arg8[%c0_258, %c6_259, %c0_260], %383 {strides = array<i32>} : memref<8x8x5xf32, #tpu.memory_space<vmem>>, vector<8x1x5xf32>,
    %384 = vector.extract_strided_slice %355 {offsets = [0, 35], sizes = [8, 5], strides = [1, 1]} : vector<8x40xf32> to vector<8x5xf32>
    %c0_261 = arith.constant 0 : index
    %c7_262 = arith.constant 7 : index
    %c0_263 = arith.constant 0 : index
    %385 = vector.load %arg8[%c0_261, %c7_262, %c0_263] : memref<8x8x5xf32, #tpu.memory_space<vmem>>, vector<8x1x5xf32>
    %386 = vector.shape_cast %385 : vector<8x1x5xf32> to vector<8x5xf32>
    %387 = vector.shape_cast %384 : vector<8x5xf32> to vector<8x1x5xf32>
    tpu.vector_store %arg8[%c0_261, %c7_262, %c0_263], %387 {strides = array<i32>} : memref<8x8x5xf32, #tpu.memory_space<vmem>>, vector<8x1x5xf32>,
    %c0_264 = arith.constant 0 : index
    %c0_265 = arith.constant 0 : index
    %c0_266 = arith.constant 0 : index
    %388 = vector.load %arg8[%c0_264, %c0_265, %c0_266] : memref<8x8x5xf32, #tpu.memory_space<vmem>>, vector<8x8x5xf32>
    %cst_267 = arith.constant dense<0.000000e+00> : vector<8x8x5xf32>
    %389 = tpu.matmul %388, %348, %cst_267 {dimension_numbers = #tpu.dot_dimension_numbers<[2], [1], [1], [2], [0, 0, 0, 1, 1, 2], [0], [0]>} : vector<8x8x5xf32>, vector<8x5x5xf32>, vector<8x8x5xf32> -> vector<8x8x5xf32>
    %390 = vector.extract_strided_slice %389 {offsets = [0, 0, 0], sizes = [8, 1, 5], strides = [1, 1, 1]} : vector<8x8x5xf32> to vector<8x1x5xf32>
    %391 = vector.shape_cast %390 : vector<8x1x5xf32> to vector<8x5xf32>
    %c0_268 = arith.constant 0 : index
    %c0_269 = arith.constant 0 : index
    %392 = vector.load %arg10[%c0_268, %c0_269] : memref<8x40xf32, #tpu.memory_space<vmem>>, vector<8x5xf32>
    tpu.vector_store %arg10[%c0_268, %c0_269], %391 {strides = array<i32>} : memref<8x40xf32, #tpu.memory_space<vmem>>, vector<8x5xf32>,
    %393 = vector.extract_strided_slice %389 {offsets = [0, 1, 0], sizes = [8, 1, 5], strides = [1, 1, 1]} : vector<8x8x5xf32> to vector<8x1x5xf32>
    %394 = vector.shape_cast %393 : vector<8x1x5xf32> to vector<8x5xf32>
    %c0_270 = arith.constant 0 : index
    %c5_271 = arith.constant 5 : index
    %395 = vector.load %arg10[%c0_270, %c5_271] : memref<8x40xf32, #tpu.memory_space<vmem>>, vector<8x5xf32>
    tpu.vector_store %arg10[%c0_270, %c5_271], %394 {strides = array<i32>} : memref<8x40xf32, #tpu.memory_space<vmem>>, vector<8x5xf32>,
    %396 = vector.extract_strided_slice %389 {offsets = [0, 2, 0], sizes = [8, 1, 5], strides = [1, 1, 1]} : vector<8x8x5xf32> to vector<8x1x5xf32>
    %397 = vector.shape_cast %396 : vector<8x1x5xf32> to vector<8x5xf32>
    %c0_272 = arith.constant 0 : index
    %c10_273 = arith.constant 10 : index
    %398 = vector.load %arg10[%c0_272, %c10_273] : memref<8x40xf32, #tpu.memory_space<vmem>>, vector<8x5xf32>
    tpu.vector_store %arg10[%c0_272, %c10_273], %397 {strides = array<i32>} : memref<8x40xf32, #tpu.memory_space<vmem>>, vector<8x5xf32>,
    %399 = vector.extract_strided_slice %389 {offsets = [0, 3, 0], sizes = [8, 1, 5], strides = [1, 1, 1]} : vector<8x8x5xf32> to vector<8x1x5xf32>
    %400 = vector.shape_cast %399 : vector<8x1x5xf32> to vector<8x5xf32>
    %c0_274 = arith.constant 0 : index
    %c15_275 = arith.constant 15 : index
    %401 = vector.load %arg10[%c0_274, %c15_275] : memref<8x40xf32, #tpu.memory_space<vmem>>, vector<8x5xf32>
    tpu.vector_store %arg10[%c0_274, %c15_275], %400 {strides = array<i32>} : memref<8x40xf32, #tpu.memory_space<vmem>>, vector<8x5xf32>,
    %402 = vector.extract_strided_slice %389 {offsets = [0, 4, 0], sizes = [8, 1, 5], strides = [1, 1, 1]} : vector<8x8x5xf32> to vector<8x1x5xf32>
    %403 = vector.shape_cast %402 : vector<8x1x5xf32> to vector<8x5xf32>
    %c0_276 = arith.constant 0 : index
    %c20_277 = arith.constant 20 : index
    %404 = vector.load %arg10[%c0_276, %c20_277] : memref<8x40xf32, #tpu.memory_space<vmem>>, vector<8x5xf32>
    tpu.vector_store %arg10[%c0_276, %c20_277], %403 {strides = array<i32>} : memref<8x40xf32, #tpu.memory_space<vmem>>, vector<8x5xf32>,
    %405 = vector.extract_strided_slice %389 {offsets = [0, 5, 0], sizes = [8, 1, 5], strides = [1, 1, 1]} : vector<8x8x5xf32> to vector<8x1x5xf32>
    %406 = vector.shape_cast %405 : vector<8x1x5xf32> to vector<8x5xf32>
    %c0_278 = arith.constant 0 : index
    %c25_279 = arith.constant 25 : index
    %407 = vector.load %arg10[%c0_278, %c25_279] : memref<8x40xf32, #tpu.memory_space<vmem>>, vector<8x5xf32>
    tpu.vector_store %arg10[%c0_278, %c25_279], %406 {strides = array<i32>} : memref<8x40xf32, #tpu.memory_space<vmem>>, vector<8x5xf32>,
    %408 = vector.extract_strided_slice %389 {offsets = [0, 6, 0], sizes = [8, 1, 5], strides = [1, 1, 1]} : vector<8x8x5xf32> to vector<8x1x5xf32>
    %409 = vector.shape_cast %408 : vector<8x1x5xf32> to vector<8x5xf32>
    %c0_280 = arith.constant 0 : index
    %c30_281 = arith.constant 30 : index
    %410 = vector.load %arg10[%c0_280, %c30_281] : memref<8x40xf32, #tpu.memory_space<vmem>>, vector<8x5xf32>
    tpu.vector_store %arg10[%c0_280, %c30_281], %409 {strides = array<i32>} : memref<8x40xf32, #tpu.memory_space<vmem>>, vector<8x5xf32>,
    %411 = vector.extract_strided_slice %389 {offsets = [0, 7, 0], sizes = [8, 1, 5], strides = [1, 1, 1]} : vector<8x8x5xf32> to vector<8x1x5xf32>
    %412 = vector.shape_cast %411 : vector<8x1x5xf32> to vector<8x5xf32>
    %c0_282 = arith.constant 0 : index
    %c35_283 = arith.constant 35 : index
    %413 = vector.load %arg10[%c0_282, %c35_283] : memref<8x40xf32, #tpu.memory_space<vmem>>, vector<8x5xf32>
    tpu.vector_store %arg10[%c0_282, %c35_283], %412 {strides = array<i32>} : memref<8x40xf32, #tpu.memory_space<vmem>>, vector<8x5xf32>,
    %c0_284 = arith.constant 0 : index
    %c0_285 = arith.constant 0 : index
    %414 = vector.load %arg10[%c0_284, %c0_285] : memref<8x40xf32, #tpu.memory_space<vmem>>, vector<8x40xf32>
    %c3_286 = arith.constant 3 : index
    %c0_287 = arith.constant 0 : index
    %c0_288 = arith.constant 0 : index
    %415 = vector.load %arg5[%c3_286, %c0_287, %c0_288] : memref<5x8x8xbf16, #tpu.memory_space<vmem>>, vector<1x8x8xbf16>
    %416 = vector.shape_cast %415 : vector<1x8x8xbf16> to vector<8x8xbf16>
    %417 = arith.subf %1, %414 : vector<8x40xf32>
    %418 = arith.truncf %417 : vector<8x40xf32> to vector<8x40xbf16>
    %cst_289 = arith.constant dense<0.000000e+00> : vector<8x40xf32>
    %419 = tpu.matmul %416, %418, %cst_289 {dimension_numbers = #tpu.dot_dimension_numbers<[1], [0], [0], [1], [0, 0, 1, 1], [], []>} : vector<8x8xbf16>, vector<8x40xbf16>, vector<8x40xf32> -> vector<8x40xf32>
    %c3_290 = arith.constant 3 : index
    %c0_291 = arith.constant 0 : index
    %c0_292 = arith.constant 0 : index
    %420 = vector.load %arg6[%c3_290, %c0_291, %c0_292] : memref<5x8x1xf32, #tpu.memory_space<vmem>>, vector<1x8x1xf32>
    %421 = vector.shape_cast %420 : vector<1x8x1xf32> to vector<8x1xf32>
    %422 = vector.broadcast %421 : vector<8x1xf32> to vector<8x40xf32>
    %423 = arith.addf %419, %422 : vector<8x40xf32>
    %cst_293 = arith.constant 0.000000e+00 : f32
    %424 = vector.broadcast %cst_293 : f32 to vector<8x40xf32>
    %425 = arith.maximumf %423, %424 : vector<8x40xf32>
    %426 = arith.addf %1, %425 : vector<8x40xf32>
    %c4_294 = arith.constant 4 : index
    %c0_295 = arith.constant 0 : index
    %c0_296 = arith.constant 0 : index
    %427 = vector.load %arg2[%c4_294, %c0_295, %c0_296] : memref<5x8x8xbf16, #tpu.memory_space<vmem>>, vector<1x8x8xbf16>
    %428 = vector.shape_cast %427 : vector<1x8x8xbf16> to vector<8x8xbf16>
    %cst_297 = arith.constant dense<0.000000e+00> : vector<8x40xf32>
    %429 = tpu.matmul %428, %2, %cst_297 {dimension_numbers = #tpu.dot_dimension_numbers<[1], [0], [0], [1], [0, 0, 1, 1], [], []>} : vector<8x8xbf16>, vector<8x40xbf16>, vector<8x40xf32> -> vector<8x40xf32>
    %430 = vector.extract_strided_slice %429 {offsets = [0, 0], sizes = [8, 5], strides = [1, 1]} : vector<8x40xf32> to vector<8x5xf32>
    %c0_298 = arith.constant 0 : index
    %c0_299 = arith.constant 0 : index
    %c0_300 = arith.constant 0 : index
    %431 = vector.load %arg8[%c0_298, %c0_299, %c0_300] : memref<8x8x5xf32, #tpu.memory_space<vmem>>, vector<8x1x5xf32>
    %432 = vector.shape_cast %431 : vector<8x1x5xf32> to vector<8x5xf32>
    %433 = vector.shape_cast %430 : vector<8x5xf32> to vector<8x1x5xf32>
    tpu.vector_store %arg8[%c0_298, %c0_299, %c0_300], %433 {strides = array<i32>} : memref<8x8x5xf32, #tpu.memory_space<vmem>>, vector<8x1x5xf32>,
    %434 = vector.extract_strided_slice %429 {offsets = [0, 5], sizes = [8, 5], strides = [1, 1]} : vector<8x40xf32> to vector<8x5xf32>
    %c0_301 = arith.constant 0 : index
    %c1_302 = arith.constant 1 : index
    %c0_303 = arith.constant 0 : index
    %435 = vector.load %arg8[%c0_301, %c1_302, %c0_303] : memref<8x8x5xf32, #tpu.memory_space<vmem>>, vector<8x1x5xf32>
    %436 = vector.shape_cast %435 : vector<8x1x5xf32> to vector<8x5xf32>
    %437 = vector.shape_cast %434 : vector<8x5xf32> to vector<8x1x5xf32>
    tpu.vector_store %arg8[%c0_301, %c1_302, %c0_303], %437 {strides = array<i32>} : memref<8x8x5xf32, #tpu.memory_space<vmem>>, vector<8x1x5xf32>,
    %438 = vector.extract_strided_slice %429 {offsets = [0, 10], sizes = [8, 5], strides = [1, 1]} : vector<8x40xf32> to vector<8x5xf32>
    %c0_304 = arith.constant 0 : index
    %c2_305 = arith.constant 2 : index
    %c0_306 = arith.constant 0 : index
    %439 = vector.load %arg8[%c0_304, %c2_305, %c0_306] : memref<8x8x5xf32, #tpu.memory_space<vmem>>, vector<8x1x5xf32>
    %440 = vector.shape_cast %439 : vector<8x1x5xf32> to vector<8x5xf32>
    %441 = vector.shape_cast %438 : vector<8x5xf32> to vector<8x1x5xf32>
    tpu.vector_store %arg8[%c0_304, %c2_305, %c0_306], %441 {strides = array<i32>} : memref<8x8x5xf32, #tpu.memory_space<vmem>>, vector<8x1x5xf32>,
    %442 = vector.extract_strided_slice %429 {offsets = [0, 15], sizes = [8, 5], strides = [1, 1]} : vector<8x40xf32> to vector<8x5xf32>
    %c0_307 = arith.constant 0 : index
    %c3_308 = arith.constant 3 : index
    %c0_309 = arith.constant 0 : index
    %443 = vector.load %arg8[%c0_307, %c3_308, %c0_309] : memref<8x8x5xf32, #tpu.memory_space<vmem>>, vector<8x1x5xf32>
    %444 = vector.shape_cast %443 : vector<8x1x5xf32> to vector<8x5xf32>
    %445 = vector.shape_cast %442 : vector<8x5xf32> to vector<8x1x5xf32>
    tpu.vector_store %arg8[%c0_307, %c3_308, %c0_309], %445 {strides = array<i32>} : memref<8x8x5xf32, #tpu.memory_space<vmem>>, vector<8x1x5xf32>,
    %446 = vector.extract_strided_slice %429 {offsets = [0, 20], sizes = [8, 5], strides = [1, 1]} : vector<8x40xf32> to vector<8x5xf32>
    %c0_310 = arith.constant 0 : index
    %c4_311 = arith.constant 4 : index
    %c0_312 = arith.constant 0 : index
    %447 = vector.load %arg8[%c0_310, %c4_311, %c0_312] : memref<8x8x5xf32, #tpu.memory_space<vmem>>, vector<8x1x5xf32>
    %448 = vector.shape_cast %447 : vector<8x1x5xf32> to vector<8x5xf32>
    %449 = vector.shape_cast %446 : vector<8x5xf32> to vector<8x1x5xf32>
    tpu.vector_store %arg8[%c0_310, %c4_311, %c0_312], %449 {strides = array<i32>} : memref<8x8x5xf32, #tpu.memory_space<vmem>>, vector<8x1x5xf32>,
    %450 = vector.extract_strided_slice %429 {offsets = [0, 25], sizes = [8, 5], strides = [1, 1]} : vector<8x40xf32> to vector<8x5xf32>
    %c0_313 = arith.constant 0 : index
    %c5_314 = arith.constant 5 : index
    %c0_315 = arith.constant 0 : index
    %451 = vector.load %arg8[%c0_313, %c5_314, %c0_315] : memref<8x8x5xf32, #tpu.memory_space<vmem>>, vector<8x1x5xf32>
    %452 = vector.shape_cast %451 : vector<8x1x5xf32> to vector<8x5xf32>
    %453 = vector.shape_cast %450 : vector<8x5xf32> to vector<8x1x5xf32>
    tpu.vector_store %arg8[%c0_313, %c5_314, %c0_315], %453 {strides = array<i32>} : memref<8x8x5xf32, #tpu.memory_space<vmem>>, vector<8x1x5xf32>,
    %454 = vector.extract_strided_slice %429 {offsets = [0, 30], sizes = [8, 5], strides = [1, 1]} : vector<8x40xf32> to vector<8x5xf32>
    %c0_316 = arith.constant 0 : index
    %c6_317 = arith.constant 6 : index
    %c0_318 = arith.constant 0 : index
    %455 = vector.load %arg8[%c0_316, %c6_317, %c0_318] : memref<8x8x5xf32, #tpu.memory_space<vmem>>, vector<8x1x5xf32>
    %456 = vector.shape_cast %455 : vector<8x1x5xf32> to vector<8x5xf32>
    %457 = vector.shape_cast %454 : vector<8x5xf32> to vector<8x1x5xf32>
    tpu.vector_store %arg8[%c0_316, %c6_317, %c0_318], %457 {strides = array<i32>} : memref<8x8x5xf32, #tpu.memory_space<vmem>>, vector<8x1x5xf32>,
    %458 = vector.extract_strided_slice %429 {offsets = [0, 35], sizes = [8, 5], strides = [1, 1]} : vector<8x40xf32> to vector<8x5xf32>
    %c0_319 = arith.constant 0 : index
    %c7_320 = arith.constant 7 : index
    %c0_321 = arith.constant 0 : index
    %459 = vector.load %arg8[%c0_319, %c7_320, %c0_321] : memref<8x8x5xf32, #tpu.memory_space<vmem>>, vector<8x1x5xf32>
    %460 = vector.shape_cast %459 : vector<8x1x5xf32> to vector<8x5xf32>
    %461 = vector.shape_cast %458 : vector<8x5xf32> to vector<8x1x5xf32>
    tpu.vector_store %arg8[%c0_319, %c7_320, %c0_321], %461 {strides = array<i32>} : memref<8x8x5xf32, #tpu.memory_space<vmem>>, vector<8x1x5xf32>,
    %c0_322 = arith.constant 0 : index
    %c0_323 = arith.constant 0 : index
    %c0_324 = arith.constant 0 : index
    %462 = vector.load %arg8[%c0_322, %c0_323, %c0_324] : memref<8x8x5xf32, #tpu.memory_space<vmem>>, vector<8x8x5xf32>
    %463 = vector.extract_strided_slice %429 {offsets = [0, 0], sizes = [8, 8], strides = [1, 1]} : vector<8x40xf32> to vector<8x8xf32>
    %c0_325 = arith.constant 0 : index
    %c0_326 = arith.constant 0 : index
    %c0_327 = arith.constant 0 : index
    %464 = vector.load %arg9[%c0_325, %c0_326, %c0_327] : memref<8x5x8xf32, #tpu.memory_space<vmem>>, vector<8x1x8xf32>
    %465 = vector.shape_cast %464 : vector<8x1x8xf32> to vector<8x8xf32>
    %466 = vector.shape_cast %463 : vector<8x8xf32> to vector<8x1x8xf32>
    tpu.vector_store %arg9[%c0_325, %c0_326, %c0_327], %466 {strides = array<i32>} : memref<8x5x8xf32, #tpu.memory_space<vmem>>, vector<8x1x8xf32>,
    %467 = vector.extract_strided_slice %429 {offsets = [0, 8], sizes = [8, 8], strides = [1, 1]} : vector<8x40xf32> to vector<8x8xf32>
    %c0_328 = arith.constant 0 : index
    %c1_329 = arith.constant 1 : index
    %c0_330 = arith.constant 0 : index
    %468 = vector.load %arg9[%c0_328, %c1_329, %c0_330] : memref<8x5x8xf32, #tpu.memory_space<vmem>>, vector<8x1x8xf32>
    %469 = vector.shape_cast %468 : vector<8x1x8xf32> to vector<8x8xf32>
    %470 = vector.shape_cast %467 : vector<8x8xf32> to vector<8x1x8xf32>
    tpu.vector_store %arg9[%c0_328, %c1_329, %c0_330], %470 {strides = array<i32>} : memref<8x5x8xf32, #tpu.memory_space<vmem>>, vector<8x1x8xf32>,
    %471 = vector.extract_strided_slice %429 {offsets = [0, 16], sizes = [8, 8], strides = [1, 1]} : vector<8x40xf32> to vector<8x8xf32>
    %c0_331 = arith.constant 0 : index
    %c2_332 = arith.constant 2 : index
    %c0_333 = arith.constant 0 : index
    %472 = vector.load %arg9[%c0_331, %c2_332, %c0_333] : memref<8x5x8xf32, #tpu.memory_space<vmem>>, vector<8x1x8xf32>
    %473 = vector.shape_cast %472 : vector<8x1x8xf32> to vector<8x8xf32>
    %474 = vector.shape_cast %471 : vector<8x8xf32> to vector<8x1x8xf32>
    tpu.vector_store %arg9[%c0_331, %c2_332, %c0_333], %474 {strides = array<i32>} : memref<8x5x8xf32, #tpu.memory_space<vmem>>, vector<8x1x8xf32>,
    %475 = vector.extract_strided_slice %429 {offsets = [0, 24], sizes = [8, 8], strides = [1, 1]} : vector<8x40xf32> to vector<8x8xf32>
    %c0_334 = arith.constant 0 : index
    %c3_335 = arith.constant 3 : index
    %c0_336 = arith.constant 0 : index
    %476 = vector.load %arg9[%c0_334, %c3_335, %c0_336] : memref<8x5x8xf32, #tpu.memory_space<vmem>>, vector<8x1x8xf32>
    %477 = vector.shape_cast %476 : vector<8x1x8xf32> to vector<8x8xf32>
    %478 = vector.shape_cast %475 : vector<8x8xf32> to vector<8x1x8xf32>
    tpu.vector_store %arg9[%c0_334, %c3_335, %c0_336], %478 {strides = array<i32>} : memref<8x5x8xf32, #tpu.memory_space<vmem>>, vector<8x1x8xf32>,
    %479 = vector.extract_strided_slice %429 {offsets = [0, 32], sizes = [8, 8], strides = [1, 1]} : vector<8x40xf32> to vector<8x8xf32>
    %c0_337 = arith.constant 0 : index
    %c4_338 = arith.constant 4 : index
    %c0_339 = arith.constant 0 : index
    %480 = vector.load %arg9[%c0_337, %c4_338, %c0_339] : memref<8x5x8xf32, #tpu.memory_space<vmem>>, vector<8x1x8xf32>
    %481 = vector.shape_cast %480 : vector<8x1x8xf32> to vector<8x8xf32>
    %482 = vector.shape_cast %479 : vector<8x8xf32> to vector<8x1x8xf32>
    tpu.vector_store %arg9[%c0_337, %c4_338, %c0_339], %482 {strides = array<i32>} : memref<8x5x8xf32, #tpu.memory_space<vmem>>, vector<8x1x8xf32>,
    %c0_340 = arith.constant 0 : index
    %c0_341 = arith.constant 0 : index
    %c0_342 = arith.constant 0 : index
    %483 = vector.load %arg9[%c0_340, %c0_341, %c0_342] : memref<8x5x8xf32, #tpu.memory_space<vmem>>, vector<8x5x8xf32>
    %cst_343 = arith.constant dense<0.000000e+00> : vector<8x8x8xf32>
    %484 = tpu.matmul %462, %483, %cst_343 {dimension_numbers = #tpu.dot_dimension_numbers<[2], [1], [1], [2], [0, 0, 0, 1, 1, 2], [0], [0]>} : vector<8x8x5xf32>, vector<8x5x8xf32>, vector<8x8x8xf32> -> vector<8x8x8xf32>
    %cst_344 = arith.constant dense<0xFF800000> : vector<8x8xf32>
    %485 = vector.multi_reduction <maximumf>, %484, %cst_344 [2] : vector<8x8x8xf32> to vector<8x8xf32>
    %486 = vector.shape_cast %485 : vector<8x8xf32> to vector<8x8x1xf32>
    %487 = vector.broadcast %486 : vector<8x8x1xf32> to vector<8x8x8xf32>
    %488 = arith.subf %484, %487 : vector<8x8x8xf32>
    %489 = math.exp %488 : vector<8x8x8xf32>
    %cst_345 = arith.constant dense<0.000000e+00> : vector<8x8xf32>
    %490 = vector.multi_reduction <add>, %489, %cst_345 [2] : vector<8x8x8xf32> to vector<8x8xf32>
    %491 = vector.shape_cast %490 : vector<8x8xf32> to vector<8x8x1xf32>
    %492 = vector.broadcast %491 : vector<8x8x1xf32> to vector<8x8x8xf32>
    %493 = arith.divf %489, %492 : vector<8x8x8xf32>
    %cst_346 = arith.constant dense<0.000000e+00> : vector<8x8xf32>
    %494 = vector.multi_reduction <add>, %493, %cst_346 [0] : vector<8x8x8xf32> to vector<8x8xf32>
    %495 = vector.shape_cast %494 : vector<8x8xf32> to vector<1x8x8xf32>
    %cst_347 = arith.constant 1.000000e-07 : f32
    %496 = vector.broadcast %cst_347 : f32 to vector<1x8x8xf32>
    %497 = arith.addf %496, %495 : vector<1x8x8xf32>
    %498 = tpu.reciprocal %497 {approx = true} : vector<1x8x8xf32> -> vector<1x8x8xf32>
    %499 = vector.broadcast %498 : vector<1x8x8xf32> to vector<8x8x8xf32>
    %500 = arith.mulf %493, %499 : vector<8x8x8xf32>
    %c4_348 = arith.constant 4 : index
    %c0_349 = arith.constant 0 : index
    %c0_350 = arith.constant 0 : index
    %501 = vector.load %arg3[%c4_348, %c0_349, %c0_350] : memref<5x8x8xbf16, #tpu.memory_space<vmem>>, vector<1x8x8xbf16>
    %502 = vector.shape_cast %501 : vector<1x8x8xbf16> to vector<8x8xbf16>
    %cst_351 = arith.constant dense<0.000000e+00> : vector<8x40xf32>
    %503 = tpu.matmul %502, %2, %cst_351 {dimension_numbers = #tpu.dot_dimension_numbers<[1], [0], [0], [1], [0, 0, 1, 1], [], []>} : vector<8x8xbf16>, vector<8x40xbf16>, vector<8x40xf32> -> vector<8x40xf32>
    %c4_352 = arith.constant 4 : index
    %c0_353 = arith.constant 0 : index
    %c0_354 = arith.constant 0 : index
    %504 = vector.load %arg4[%c4_352, %c0_353, %c0_354] : memref<5x8x1xf32, #tpu.memory_space<vmem>>, vector<1x8x1xf32>
    %505 = vector.shape_cast %504 : vector<1x8x1xf32> to vector<8x1xf32>
    %506 = vector.broadcast %505 : vector<8x1xf32> to vector<8x40xf32>
    %507 = arith.addf %503, %506 : vector<8x40xf32>
    %508 = vector.extract_strided_slice %507 {offsets = [0, 0], sizes = [8, 8], strides = [1, 1]} : vector<8x40xf32> to vector<8x8xf32>
    %c0_355 = arith.constant 0 : index
    %c0_356 = arith.constant 0 : index
    %c0_357 = arith.constant 0 : index
    %509 = vector.load %arg9[%c0_355, %c0_356, %c0_357] : memref<8x5x8xf32, #tpu.memory_space<vmem>>, vector<8x1x8xf32>
    %510 = vector.shape_cast %509 : vector<8x1x8xf32> to vector<8x8xf32>
    %511 = vector.shape_cast %508 : vector<8x8xf32> to vector<8x1x8xf32>
    tpu.vector_store %arg9[%c0_355, %c0_356, %c0_357], %511 {strides = array<i32>} : memref<8x5x8xf32, #tpu.memory_space<vmem>>, vector<8x1x8xf32>,
    %512 = vector.extract_strided_slice %507 {offsets = [0, 8], sizes = [8, 8], strides = [1, 1]} : vector<8x40xf32> to vector<8x8xf32>
    %c0_358 = arith.constant 0 : index
    %c1_359 = arith.constant 1 : index
    %c0_360 = arith.constant 0 : index
    %513 = vector.load %arg9[%c0_358, %c1_359, %c0_360] : memref<8x5x8xf32, #tpu.memory_space<vmem>>, vector<8x1x8xf32>
    %514 = vector.shape_cast %513 : vector<8x1x8xf32> to vector<8x8xf32>
    %515 = vector.shape_cast %512 : vector<8x8xf32> to vector<8x1x8xf32>
    tpu.vector_store %arg9[%c0_358, %c1_359, %c0_360], %515 {strides = array<i32>} : memref<8x5x8xf32, #tpu.memory_space<vmem>>, vector<8x1x8xf32>,
    %516 = vector.extract_strided_slice %507 {offsets = [0, 16], sizes = [8, 8], strides = [1, 1]} : vector<8x40xf32> to vector<8x8xf32>
    %c0_361 = arith.constant 0 : index
    %c2_362 = arith.constant 2 : index
    %c0_363 = arith.constant 0 : index
    %517 = vector.load %arg9[%c0_361, %c2_362, %c0_363] : memref<8x5x8xf32, #tpu.memory_space<vmem>>, vector<8x1x8xf32>
    %518 = vector.shape_cast %517 : vector<8x1x8xf32> to vector<8x8xf32>
    %519 = vector.shape_cast %516 : vector<8x8xf32> to vector<8x1x8xf32>
    tpu.vector_store %arg9[%c0_361, %c2_362, %c0_363], %519 {strides = array<i32>} : memref<8x5x8xf32, #tpu.memory_space<vmem>>, vector<8x1x8xf32>,
    %520 = vector.extract_strided_slice %507 {offsets = [0, 24], sizes = [8, 8], strides = [1, 1]} : vector<8x40xf32> to vector<8x8xf32>
    %c0_364 = arith.constant 0 : index
    %c3_365 = arith.constant 3 : index
    %c0_366 = arith.constant 0 : index
    %521 = vector.load %arg9[%c0_364, %c3_365, %c0_366] : memref<8x5x8xf32, #tpu.memory_space<vmem>>, vector<8x1x8xf32>
    %522 = vector.shape_cast %521 : vector<8x1x8xf32> to vector<8x8xf32>
    %523 = vector.shape_cast %520 : vector<8x8xf32> to vector<8x1x8xf32>
    tpu.vector_store %arg9[%c0_364, %c3_365, %c0_366], %523 {strides = array<i32>} : memref<8x5x8xf32, #tpu.memory_space<vmem>>, vector<8x1x8xf32>,
    %524 = vector.extract_strided_slice %507 {offsets = [0, 32], sizes = [8, 8], strides = [1, 1]} : vector<8x40xf32> to vector<8x8xf32>
    %c0_367 = arith.constant 0 : index
    %c4_368 = arith.constant 4 : index
    %c0_369 = arith.constant 0 : index
    %525 = vector.load %arg9[%c0_367, %c4_368, %c0_369] : memref<8x5x8xf32, #tpu.memory_space<vmem>>, vector<8x1x8xf32>
    %526 = vector.shape_cast %525 : vector<8x1x8xf32> to vector<8x8xf32>
    %527 = vector.shape_cast %524 : vector<8x8xf32> to vector<8x1x8xf32>
    tpu.vector_store %arg9[%c0_367, %c4_368, %c0_369], %527 {strides = array<i32>} : memref<8x5x8xf32, #tpu.memory_space<vmem>>, vector<8x1x8xf32>,
    %c0_370 = arith.constant 0 : index
    %c0_371 = arith.constant 0 : index
    %c0_372 = arith.constant 0 : index
    %528 = vector.load %arg9[%c0_370, %c0_371, %c0_372] : memref<8x5x8xf32, #tpu.memory_space<vmem>>, vector<8x5x8xf32>
    %cst_373 = arith.constant dense<0.000000e+00> : vector<8x5x8xf32>
    %529 = tpu.matmul %528, %500, %cst_373 {dimension_numbers = #tpu.dot_dimension_numbers<[2], [1], [1], [2], [0, 0, 0, 1, 1, 2], [0], [0]>} : vector<8x5x8xf32>, vector<8x8x8xf32>, vector<8x5x8xf32> -> vector<8x5x8xf32>
    %530 = vector.extract_strided_slice %529 {offsets = [0, 0, 0], sizes = [8, 1, 8], strides = [1, 1, 1]} : vector<8x5x8xf32> to vector<8x1x8xf32>
    %531 = vector.shape_cast %530 : vector<8x1x8xf32> to vector<8x8xf32>
    %c0_374 = arith.constant 0 : index
    %c0_375 = arith.constant 0 : index
    %532 = vector.load %arg10[%c0_374, %c0_375] : memref<8x40xf32, #tpu.memory_space<vmem>>, vector<8x8xf32>
    tpu.vector_store %arg10[%c0_374, %c0_375], %531 {strides = array<i32>} : memref<8x40xf32, #tpu.memory_space<vmem>>, vector<8x8xf32>,
    %533 = vector.extract_strided_slice %529 {offsets = [0, 1, 0], sizes = [8, 1, 8], strides = [1, 1, 1]} : vector<8x5x8xf32> to vector<8x1x8xf32>
    %534 = vector.shape_cast %533 : vector<8x1x8xf32> to vector<8x8xf32>
    %c0_376 = arith.constant 0 : index
    %c8_377 = arith.constant 8 : index
    %535 = vector.load %arg10[%c0_376, %c8_377] : memref<8x40xf32, #tpu.memory_space<vmem>>, vector<8x8xf32>
    tpu.vector_store %arg10[%c0_376, %c8_377], %534 {strides = array<i32>} : memref<8x40xf32, #tpu.memory_space<vmem>>, vector<8x8xf32>,
    %536 = vector.extract_strided_slice %529 {offsets = [0, 2, 0], sizes = [8, 1, 8], strides = [1, 1, 1]} : vector<8x5x8xf32> to vector<8x1x8xf32>
    %537 = vector.shape_cast %536 : vector<8x1x8xf32> to vector<8x8xf32>
    %c0_378 = arith.constant 0 : index
    %c16_379 = arith.constant 16 : index
    %538 = vector.load %arg10[%c0_378, %c16_379] : memref<8x40xf32, #tpu.memory_space<vmem>>, vector<8x8xf32>
    tpu.vector_store %arg10[%c0_378, %c16_379], %537 {strides = array<i32>} : memref<8x40xf32, #tpu.memory_space<vmem>>, vector<8x8xf32>,
    %539 = vector.extract_strided_slice %529 {offsets = [0, 3, 0], sizes = [8, 1, 8], strides = [1, 1, 1]} : vector<8x5x8xf32> to vector<8x1x8xf32>
    %540 = vector.shape_cast %539 : vector<8x1x8xf32> to vector<8x8xf32>
    %c0_380 = arith.constant 0 : index
    %c24_381 = arith.constant 24 : index
    %541 = vector.load %arg10[%c0_380, %c24_381] : memref<8x40xf32, #tpu.memory_space<vmem>>, vector<8x8xf32>
    tpu.vector_store %arg10[%c0_380, %c24_381], %540 {strides = array<i32>} : memref<8x40xf32, #tpu.memory_space<vmem>>, vector<8x8xf32>,
    %542 = vector.extract_strided_slice %529 {offsets = [0, 4, 0], sizes = [8, 1, 8], strides = [1, 1, 1]} : vector<8x5x8xf32> to vector<8x1x8xf32>
    %543 = vector.shape_cast %542 : vector<8x1x8xf32> to vector<8x8xf32>
    %c0_382 = arith.constant 0 : index
    %c32_383 = arith.constant 32 : index
    %544 = vector.load %arg10[%c0_382, %c32_383] : memref<8x40xf32, #tpu.memory_space<vmem>>, vector<8x8xf32>
    tpu.vector_store %arg10[%c0_382, %c32_383], %543 {strides = array<i32>} : memref<8x40xf32, #tpu.memory_space<vmem>>, vector<8x8xf32>,
    %c0_384 = arith.constant 0 : index
    %c0_385 = arith.constant 0 : index
    %545 = vector.load %arg10[%c0_384, %c0_385] : memref<8x40xf32, #tpu.memory_space<vmem>>, vector<8x40xf32>
    %c4_386 = arith.constant 4 : index
    %c0_387 = arith.constant 0 : index
    %c0_388 = arith.constant 0 : index
    %546 = vector.load %arg5[%c4_386, %c0_387, %c0_388] : memref<5x8x8xbf16, #tpu.memory_space<vmem>>, vector<1x8x8xbf16>
    %547 = vector.shape_cast %546 : vector<1x8x8xbf16> to vector<8x8xbf16>
    %548 = arith.subf %1, %545 : vector<8x40xf32>
    %549 = arith.truncf %548 : vector<8x40xf32> to vector<8x40xbf16>
    %cst_389 = arith.constant dense<0.000000e+00> : vector<8x40xf32>
    %550 = tpu.matmul %547, %549, %cst_389 {dimension_numbers = #tpu.dot_dimension_numbers<[1], [0], [0], [1], [0, 0, 1, 1], [], []>} : vector<8x8xbf16>, vector<8x40xbf16>, vector<8x40xf32> -> vector<8x40xf32>
    %c4_390 = arith.constant 4 : index
    %c0_391 = arith.constant 0 : index
    %c0_392 = arith.constant 0 : index
    %551 = vector.load %arg6[%c4_390, %c0_391, %c0_392] : memref<5x8x1xf32, #tpu.memory_space<vmem>>, vector<1x8x1xf32>
    %552 = vector.shape_cast %551 : vector<1x8x1xf32> to vector<8x1xf32>
    %553 = vector.broadcast %552 : vector<8x1xf32> to vector<8x40xf32>
    %554 = arith.addf %550, %553 : vector<8x40xf32>
    %cst_393 = arith.constant 0.000000e+00 : f32
    %555 = vector.broadcast %cst_393 : f32 to vector<8x40xf32>
    %556 = arith.maximumf %554, %555 : vector<8x40xf32>
    %557 = arith.addf %1, %556 : vector<8x40xf32>
    %cst_394 = arith.constant 5.000000e-01 : f32
    %558 = vector.broadcast %cst_394 : f32 to vector<8x40xf32>
    %559 = arith.mulf %558, %426 : vector<8x40xf32>
    %560 = math.tanh %559 : vector<8x40xf32>
    %cst_395 = arith.constant 1.000000e+00 : f32
    %561 = vector.broadcast %cst_395 : f32 to vector<8x40xf32>
    %562 = arith.addf %560, %561 : vector<8x40xf32>
    %cst_396 = arith.constant 5.000000e-01 : f32
    %563 = vector.broadcast %cst_396 : f32 to vector<8x40xf32>
    %564 = arith.mulf %563, %562 : vector<8x40xf32>
    %565 = arith.mulf %176, %564 : vector<8x40xf32>
    %566 = math.tanh %565 : vector<8x40xf32>
    %cst_397 = arith.constant 5.000000e-01 : f32
    %567 = vector.broadcast %cst_397 : f32 to vector<8x40xf32>
    %568 = arith.mulf %567, %557 : vector<8x40xf32>
    %569 = math.tanh %568 : vector<8x40xf32>
    %cst_398 = arith.constant 1.000000e+00 : f32
    %570 = vector.broadcast %cst_398 : f32 to vector<8x40xf32>
    %571 = arith.addf %569, %570 : vector<8x40xf32>
    %cst_399 = arith.constant 5.000000e-01 : f32
    %572 = vector.broadcast %cst_399 : f32 to vector<8x40xf32>
    %573 = arith.mulf %572, %571 : vector<8x40xf32>
    %574 = arith.mulf %274, %573 : vector<8x40xf32>
    %575 = math.tanh %574 : vector<8x40xf32>
    %cst_400 = arith.constant 5.000000e-01 : f32
    %576 = vector.broadcast %cst_400 : f32 to vector<8x40xf32>
    %577 = arith.mulf %576, %45 : vector<8x40xf32>
    %578 = math.tanh %577 : vector<8x40xf32>
    %cst_401 = arith.constant 1.000000e+00 : f32
    %579 = vector.broadcast %cst_401 : f32 to vector<8x40xf32>
    %580 = arith.addf %578, %579 : vector<8x40xf32>
    %cst_402 = arith.constant 5.000000e-01 : f32
    %581 = vector.broadcast %cst_402 : f32 to vector<8x40xf32>
    %582 = arith.mulf %581, %580 : vector<8x40xf32>
    %583 = arith.addf %566, %575 : vector<8x40xf32>
    %584 = arith.mulf %583, %582 : vector<8x40xf32>
    %cst_403 = arith.constant 5.000000e-01 : f32
    %585 = vector.broadcast %cst_403 : f32 to vector<8x40xf32>
    %586 = arith.mulf %585, %584 : vector<8x40xf32>
    %587 = math.tanh %586 : vector<8x40xf32>
    %cst_404 = arith.constant 1.000000e+00 : f32
    %588 = vector.broadcast %cst_404 : f32 to vector<8x40xf32>
    %589 = arith.addf %587, %588 : vector<8x40xf32>
    %cst_405 = arith.constant 5.000000e-01 : f32
    %590 = vector.broadcast %cst_405 : f32 to vector<8x40xf32>
    %591 = arith.mulf %590, %589 : vector<8x40xf32>
    %592 = math.tanh %45 : vector<8x40xf32>
    %593 = arith.mulf %591, %592 : vector<8x40xf32>
    %594 = arith.addf %1, %593 : vector<8x40xf32>
    %c0_406 = arith.constant 0 : index
    %c0_407 = arith.constant 0 : index
    %c0_408 = arith.constant 0 : index
    %595 = vector.load %arg7[%c0_406, %c0_407, %c0_408] : memref<1x8x40xf32, #tpu.memory_space<vmem>>, vector<1x8x40xf32>
    %596 = vector.shape_cast %595 : vector<1x8x40xf32> to vector<8x40xf32>
    %597 = vector.shape_cast %594 : vector<8x40xf32> to vector<1x8x40xf32>
    tpu.vector_store %arg7[%c0_406, %c0_407, %c0_408], %597 {strides = array<i32>} : memref<1x8x40xf32, #tpu.memory_space<vmem>>, vector<1x8x40xf32>,
    return
  }
  func.func @transform_0(%arg0: i32) -> (i32, i32, i32) {
    %c0_i32 = arith.constant 0 : i32
    %c0_i32_0 = arith.constant 0 : i32
    %c0_i32_1 = arith.constant 0 : i32
    return %arg0, %c0_i32, %c0_i32_0 : i32, i32, i32
  }
  func.func @transform_1(%arg0: i32) -> (i32, i32, i32) {
    %c0_i32 = arith.constant 0 : i32
    %c0_i32_0 = arith.constant 0 : i32
    %c0_i32_1 = arith.constant 0 : i32
    %c0_i32_2 = arith.constant 0 : i32
    return %c0_i32, %c0_i32_0, %c0_i32_1 : i32, i32, i32
  }
  func.func @transform_2(%arg0: i32) -> (i32, i32, i32) {
    %c0_i32 = arith.constant 0 : i32
    %c0_i32_0 = arith.constant 0 : i32
    %c0_i32_1 = arith.constant 0 : i32
    %c0_i32_2 = arith.constant 0 : i32
    return %c0_i32, %c0_i32_0, %c0_i32_1 : i32, i32, i32
  }
  func.func @transform_3(%arg0: i32) -> (i32, i32, i32) {
    %c0_i32 = arith.constant 0 : i32
    %c0_i32_0 = arith.constant 0 : i32
    %c0_i32_1 = arith.constant 0 : i32
    %c0_i32_2 = arith.constant 0 : i32
    return %c0_i32, %c0_i32_0, %c0_i32_1 : i32, i32, i32
  }
  func.func @transform_4(%arg0: i32) -> (i32, i32, i32) {
    %c0_i32 = arith.constant 0 : i32
    %c0_i32_0 = arith.constant 0 : i32
    %c0_i32_1 = arith.constant 0 : i32
    %c0_i32_2 = arith.constant 0 : i32
    return %c0_i32, %c0_i32_0, %c0_i32_1 : i32, i32, i32
  }
  func.func @transform_5(%arg0: i32) -> (i32, i32, i32) {
    %c0_i32 = arith.constant 0 : i32
    %c0_i32_0 = arith.constant 0 : i32
    %c0_i32_1 = arith.constant 0 : i32
    %c0_i32_2 = arith.constant 0 : i32
    return %c0_i32, %c0_i32_0, %c0_i32_1 : i32, i32, i32
  }
  func.func @transform_6(%arg0: i32) -> (i32, i32, i32) {
    %c0_i32 = arith.constant 0 : i32
    %c0_i32_0 = arith.constant 0 : i32
    %c0_i32_1 = arith.constant 0 : i32
    return %arg0, %c0_i32, %c0_i32_0 : i32, i32, i32
  }
}

</mosaic_0001>

<bundles_post_ra>
// kernel: attention2_forward.1
= control target key start
LH: loop header
LB: loop body
LE: loop exit
PB: predicated region body
PF: predicated region fallthrough
CT: control target
= control target key end

     0   :  { %11 = vsyncpa [#allocation6], 0  ;;  %s13780_s0 = inlined_call_operand.vmem [shape: f32[2,8,40], index: 0, kind: input, shape index: {}]   ;;  %s13781_s1 = inlined_call_operand.vmem [shape: bf16[5,8,8], index: 1, kind: input, shape index: {}]   ;;  %s13782_s2 = inlined_call_operand.vmem [shape: bf16[5,8,8], index: 2, kind: input, shape index: {}]   ;;  %s13783_s3 = inlined_call_operand.vmem [shape: f32[5,8,1], index: 3, kind: input, shape index: {}]   ;;  %s13784_s4 = inlined_call_operand.vmem [shape: bf16[5,8,8], index: 4, kind: input, shape index: {}]   ;;  %s13785_s5 = inlined_call_operand.vmem [shape: f32[5,8,1], index: 5, kind: input, shape index: {}]   ;;  %s13786_s6 = inlined_call_operand.hbm [shape: f32[2,8,40], index: 6, kind: output, shape index: {}]  }
   0x1   :  { %13 = vsyncpa [#allocation6 + $0x1], 0  ;;  %s11270_s21 = smov 0   ;;  %s11272_s22 = smov 0  }
   0x2   :  { %s11274_s23 = smov 0   ;;  %s11276_s24 = smov 0  }
   0x3 LB: > { %s11291_s25 = sadd.s32 4294967295, %s11206_s24   ;;  %s10156_s26 = sadd.s32 4294967294, %s11206_s24   ;;  %s11206_s24 = sphi %s11276_s24, %s14176_s24   ;;  %s11202_s23 = sphi %s11274_s23, %s14175_s23   ;;  %s11198_s22 = sphi %s11272_s22, %s14174_s22   ;;  %s11194_s21 = sphi %s11270_s21, %s14173_s21  }
   0x4   : > { %s11295_s27 = sadd.s32 1, %s11206_s24   ;;  %s157_s28 = sadd.s32 1, %s11202_s23 }
   0x5   : > { %s154_s29 = ssub.s32 %s11206_s24, %s11295_s27  ;;  %p167_p0 = scmp.ne.s32.totalorder %s11202_s23, %s11198_s22 }
   0x6   : > { %p155_p1 = scmp.eq.s32.totalorder %s154_s29, 0  ;;  %p168_p2 = scmp.eq.s32.totalorder %s11291_s25, 1 }
   0x7   : > { %p173_p3 = scmp.ne.s32.totalorder %s11198_s22, %s11194_s21  ;;  %p174_p4 = scmp.eq.s32.totalorder %s10156_s26, 1 }
   0x8   : > { %s11306_s30 = scalar_select %p155_p1, %s11202_s23, %s157_s28  }
   0x9   : > { %p11308_p5 = por %p168_p2, %p167_p0  ;;  %p11312_p6 = por %p174_p4, %p173_p3 }
   0xa   : > { %p10159_p7 = scmp.ge.s32.totalorder %s11206_s24, 1  ;;  %p214_p8 = scmp.lt.s32.totalorder %s11206_s24, 3 }
   0xc   : > { %p215_p9 = pnand %p10159_p7, %p214_p8 }
   0xd   : > { %p243_p10 = scmp.lt.s32.totalorder (!%p215_p9), %s11291_s25, 1  ;;  %v11208_v0 = vmov (!%p215_p9), 0.0   ;;  %vm11209_vm0 = vmmov (!%p215_p9), 0   ;;  %vm255_vm1 = vcmask (!%p215_p9), 1043456   ;;  %v250_v4 = vld [vmem:[%s13781_s1] sm:$0xf] (!%p215_p9) }
   0xe   : > { %218 = sbr.rel (%p215_p9) target bundleno = 6543 (0x198f), region = 44  ;;  %10467 = vmatprep.subr.bf16.mxu0 (!%p215_p9), %v11208_v0  ;;  %10469 = vmatprep.mubr.msk.bf16.mxu0 (!%p215_p9), %vm11209_vm0, %v11208_v0  ;;  %vm251_vm2 = vcmask (!%p215_p9), 64512   ;;  %vm13795_vm3 = vcmask (!%p215_p9), 326656   ;;  %v299_v31 = vld [vmem:[%s13782_s2] sm:$0xf] (!%p215_p9)  ;;  %v11210_v32 = vmov (!%p215_p9), 0  }
   0xf   : > { %10473 = vmatprep.subr.bf16.mxu1 (!%p215_p9), %v11208_v0  ;;  %10475 = vmatprep.mubr.msk.bf16.mxu1 (!%p215_p9), %vm11209_vm0, %v11208_v0  ;;  %v300_v58 = vld [vmem:[%s13783_s3] sm:$0xff] (!%p215_p9)  ;;  %vm13797_vm4 = vcmask (!%p215_p9), 32768   ;;  %s11214_s11 = smov (!%p215_p9), 113   ;;  %s11215_s12 = smov (!%p215_p9), 103   ;;  %vm13796_vm5 = vcmask (!%p215_p9), 36864   ;;  %vm2335_vm6 = vcmask (!%p215_p9), 1044480  }
  0x10   : > { %s13843_s14 = smov (!%p215_p9), 108   ;;  %s13847_s15 = smov (!%p215_p9), 93   ;;  %vm13821_vm7 = vcmask (!%p215_p9), 39936   ;;  %vm13800_vm8 = vcmask (!%p215_p9), 1046534   ;;  %vm13802_vm9 = vcmask (!%p215_p9), 1045509   ;;  %vm13801_vm10 = vcmask (!%p215_p9), 1044484  }
  0x11   : > { %s13841_s16 = smov (!%p215_p9), 98   ;;  %vm13799_vm11 = vcmask (!%p215_p9), 1043459   ;;  %vm13798_vm12 = vcmask (!%p215_p9), 1047559   ;;  %vm2950_vm13 = vcmask (!%p215_p9), 1041409   ;;  %vm2953_vm14 = vcmask (!%p215_p9), 1042434   ;;  %s13809_s29 = smov (!%p215_p9), 25  }
  0x12   : > { %s13793_s17 = smov (!%p215_p9), 20   ;;  %s13789_s18 = smov (!%p215_p9), 15   ;;  %vm3247_vm15 = vcmask (!%p215_p9), 57344  }
  0x13   : > { %s13791_s19 = smov (!%p215_p9), 5   ;;  %s13787_s20 = smov (!%p215_p9), 10  }
  0x14   : > { %s11224_s26 = smov (!%p215_p9), 120   ;;  %s13824_s28 = smov (!%p215_p9), 104  }
  0x15   : > { %s244_s9 = scalar_select %p243_p10, %s11291_s25, 1 }
  0x17   : > { %s10161_s10 = sshll.u32 %s244_s9, 3  ;;  %s11212_s9 = smov 123  }
  0x18   : > { %s11329_s13 = scalar_lea.vmem %s13780_s0, %s10161_s10  ;;  %s13845_s10 = smov 118  }
  0x19   : > { %v11332_v1 = vld [vmem:[%s11329_s13] sm:$0xff] }
  0x1a   : > { %v249_v2 = vpack.c.bf16 %v11332_v1, %v11332_v1 }
  0x1c   : > { %v11337_v3 = vsel %vm255_vm1, %v249_v2, 0 }
  0x1d   : > { %10468 = vmatpush3.bf16.msra.mxu0 %v11337_v3  ;;  %10474 = vmatpush3.bf16.msra.mxu1 %v11337_v3 }
  0x1e   : > { %10479 = vmatprep.subr.bf16.mxu0 %v11208_v0  ;;  %10493 = vmatprep.subr.bf16.mxu1 %v11208_v0 }
  0x20   : > { %10470 = vmatmul.mubr.msk.bf16.vlgmr.msra.gmra.mrb[0].mxu0 %vm251_vm2, %v250_v4  ;;  %10476 = vmatmul.mubr.msk.bf16.vlgmr.msra.gmra.mrb[0].mxu1 %vm251_vm2, %v299_v31 }
  0x21   : > { %10481 = vmatprep.mubr.msk.bf16.mxu0 %vm11209_vm0, %v11208_v0  ;;  %10499 = vmatprep.mubr.msk.bf16.mxu1 %vm11209_vm0, %v11208_v0 }
  0xf3   : > { %v293_v5 = vpop.f32.mrb[0].mxu0  ;;  %v343_v59 = vpop.f32.mrb[0].mxu1 }
  0xf4   : > { %v349_v6 = vpack.c.bf16 %v293_v5, %v293_v5  ;;  %v10471_v7 = vpop.f32.mrb[1].mxu0  ;;  %v10477_v60 = vpop.f32.mrb[1].mxu1 }
  0xf5   : > { %v296_v8 = vpop.f32.mrb[2].mxu0  ;;  %v346_v61 = vpop.f32.mrb[2].mxu1 }
  0xf6   : > { %v376_v9 = vsel %vm255_vm1, %v349_v6, 0  ;;  %350 = vxpose.xlu0.c.b16.start.end [1/1] (short) (narrow) %v349_v6, 48  ;;  %v10472_v10 = vpop.f32.mrb[3].mxu0  ;;  %v10478_v62 = vpop.f32.mrb[3].mxu1 }
  0xf7   : > { %10480 = vmatpush3.bf16.msra.mxu0 %v376_v9 }
  0xf8   : > { %10515 = vmatprep.subr.mxu0 %v11208_v0 }
  0xff   : > { %10966 = vset.pattern.permute.xlu0 %v11210_v32 }
 0x15c   : > { %v358_v11 = vpop.trf.xlu0 }
 0x15d   : > { %10482 = vmatmul.mubr.msk.bf16.vlgmr.msra.gmra.mrb[4].mxu0 %vm251_vm2, %v358_v11 }
 0x15e   : > { %10485 = vmatprep.mubr.msk.bf16.mxu0 %vm11209_vm0, %v11208_v0 }
 0x160   : > { %v359_v12 = vpop.trf.xlu0 }
 0x164   : > { %v360_v13 = vpop.trf.xlu0 }
 0x165   : > { %10486 = vmatmul.mubr.msk.bf16.gmra.mrb[8].mxu0 %vm251_vm2, %v359_v12 }
 0x166   : > { %10489 = vmatprep.mubr.msk.bf16.mxu0 %vm11209_vm0, %v11208_v0 }
 0x16d   : > { %10490 = vmatmul.mubr.msk.bf16.gmra.mrb[12].mxu0 %vm251_vm2, %v360_v13 }
 0x16e   : > { %10517 = vmatprep.mubr.msk.f32.mxu0 %vm11209_vm0, %v11208_v0 }
 0x230   : > { %v412_v14 = vpop.f32.mrb[4].mxu0 }
 0x231   : > { %v10483_v15 = vpop.f32.mrb[5].mxu0  ;;  %v435_v16 = vsel %vm13795_vm3, %v412_v14, -inf }
 0x232   : > { %436 = vmax.xlane.f32.xlu0 %v435_v16  ;;  %v415_v17 = vpop.f32.mrb[6].mxu0 }
 0x233   : > { %v10484_v18 = vpop.f32.mrb[7].mxu0  ;;  %v438_v19 = vsel %vm13795_vm3, %v415_v17, -inf }
 0x234   : > { %439 = vmax.xlane.f32.xlu1 %v438_v19 }
 0x238   : > { %v420_v20 = vpop.f32.mrb[8].mxu0 }
 0x239   : > { %v10487_v21 = vpop.f32.mrb[9].mxu0  ;;  %v441_v22 = vsel %vm13795_vm3, %v420_v20, -inf }
 0x23a   : > { %442 = vmax.xlane.f32.xlu1 %v441_v22  ;;  %v423_v23 = vpop.f32.mrb[10].mxu0 }
 0x23b   : > { %v10488_v24 = vpop.f32.mrb[11].mxu0  ;;  %v444_v25 = vsel %vm13795_vm3, %v423_v23, -inf }
 0x23e   : > { %445 = vmax.xlane.f32.xlu1 %v444_v25 }
 0x240   : > { %v428_v26 = vpop.f32.mrb[12].mxu0 }
 0x241   : > { %v10491_v27 = vpop.f32.mrb[13].mxu0  ;;  %v447_v28 = vsel %vm13795_vm3, %v428_v26, -inf }
 0x242   : > { %448 = vmax.xlane.f32.xlu1 %v447_v28  ;;  %v431_v29 = vpop.f32.mrb[14].mxu0 }
 0x243   : > { %v10492_v30 = vpop.f32.mrb[15].mxu0 }
 0x2bf   : > { %v437_v33 = vpop.xlane.xlu0 %436 }
 0x2c0   : > { %v450_v34 = vsub.f32 %v412_v14, %v437_v33 }
 0x2c1   : > { %v440_v35 = vpop.xlane.xlu1 %439 }
 0x2c2   : > { %v455_v36 = vmul.f32 1.442695, %v450_v34  ;;  %v451_v37 = vsub.f32 %v415_v17, %v440_v35 }
 0x2c4   : > { %10968 = vpow2.f32 %v455_v36  ;;  %v457_v38 = vmul.f32 1.442695, %v451_v37 }
 0x2c6   : > { %10970 = vpow2.f32 %v457_v38 }
 0x2c7   : > { %v443_v39 = vpop.xlane.xlu1 %442 }
 0x2c8   : > { %v452_v40 = vsub.f32 %v420_v20, %v443_v39 }
 0x2ca   : > { %v459_v41 = vmul.f32 1.442695, %v452_v40 }
 0x2cb   : > { %v446_v42 = vpop.xlane.xlu1 %445 }
 0x2cc   : > { %10972 = vpow2.f32 %v459_v41  ;;  %v453_v43 = vsub.f32 %v423_v23, %v446_v42 }
 0x2ce   : > { %v10969_v44 = vpop.eup %10968  ;;  %v461_v45 = vmul.f32 1.442695, %v453_v43 }
 0x2cf   : > { %v449_v46 = vpop.xlane.xlu1 %448  ;;  %v465_v47 = vsel %vm13795_vm3, %v10969_v44, 0.0 }
 0x2d0   : > { %v10971_v48 = vpop.eup %10970  ;;  %10974 = vpow2.f32 %v461_v45  ;;  %v454_v49 = vsub.f32 %v428_v26, %v449_v46  ;;  %466 = vadd.xlane.f32.xlu1 %v465_v47 }
 0x2d1   : > { %v468_v51 = vsel %vm13795_vm3, %v10971_v48, 0.0 }
 0x2d2   : > { %v463_v50 = vmul.f32 1.442695, %v454_v49 }
 0x2d4   : > { %10976 = vpow2.f32 %v463_v50  ;;  %469 = vadd.xlane.f32.xlu1 %v468_v51 }
 0x2d6   : > { %v10973_v52 = vpop.eup %10972 }
 0x2d7   : > { %v471_v53 = vsel %vm13795_vm3, %v10973_v52, 0.0 }
 0x2d8   : > { %472 = vadd.xlane.f32.xlu1 %v471_v53 }
 0x2da   : > { %v10975_v54 = vpop.eup %10974 }
 0x2db   : > { %v474_v55 = vsel %vm13795_vm3, %v10975_v54, 0.0 }
 0x2dc   : > { %475 = vadd.xlane.f32.xlu0 %v474_v55  ;;  %v11211_v55 = vmov 1966171168  }
 0x2de   : > { %v10977_v56 = vpop.eup %10976 }
 0x2df   : > { %v477_v57 = vsel %vm13795_vm3, %v10977_v56, 0.0 }
 0x2e0   : > { %478 = vadd.xlane.f32.xlu1 %v477_v57  ;;  %v669_v57 = vlaneseq }
 0x2e2   : > { %v670_v61 = vshrl.u32 %v669_v57, 7 }
 0x2f2   : > { %303 = vperm.xlu0 %10966, %v300_v58  }
 0x35d   : > { %v467_v63 = vpop.xlane.xlu1 %466 }
 0x361   : > { %v470_v2 = vpop.xlane.xlu1 %469 }
 0x362   : > { %10978 = vrcp.f32 %v470_v2 }
 0x363   : > { %10980 = vrcp.f32 %v467_v63 }
 0x365   : > { %v473_v4 = vpop.xlane.xlu1 %472 }
 0x366   : > { %10982 = vrcp.f32 %v473_v4 }
 0x369   : > { %v476_v5 = vpop.xlane.xlu0 %475 }
 0x36a   : > { %10984 = vrcp.f32 %v476_v5 }
 0x36c   : > { %v10979_v6 = vpop.eup %10978 }
 0x36d   : > { %v479_v7 = vpop.xlane.xlu1 %478  ;;  %v10981_v8 = vpop.eup %10980  ;;  %v483_v9 = vmul.f32 %v10979_v6, %v10971_v48 }
 0x36e   : > { %10986 = vrcp.f32 %v479_v7  ;;  %v481_v12 = vmul.f32 %v10981_v8, %v10969_v44  ;;  %v11414_v8 = vsub.s32 0, %v670_v61 }
 0x36f   : > { %v491_v13 = vsel %vm13795_vm3, %v483_v9, 0.0 }
 0x370   : > { %v10983_v10 = vpop.eup %10982  ;;  %v490_v17 = vsel %vm13795_vm3, %v481_v12, 0.0 }
 0x371   : > { %v485_v11 = vmul.f32 %v10983_v10, %v10973_v52  ;;  %v492_v18 = vadd.f32 %v491_v13, %v490_v17  ;;  %v304_v41 = vpop.permute.xlu0 %303 }
 0x372   : > { %v344_v43 = vadd.f32 %v343_v59, %v304_v41 }
 0x373   : > { %v493_v15 = vsel %vm13795_vm3, %v485_v11, 0.0 }
 0x374   : > { %v10985_v14 = vpop.eup %10984  ;;  %v494_v21 = vadd.f32 %v493_v15, %v492_v18  ;;  %v512_v45 = vpack.c.bf16 %v344_v43, %v344_v43 }
 0x375   : > { %v487_v16 = vmul.f32 %v10985_v14, %v10975_v54  ;;  %v562_v54 = vld [vmem:[%s13784_s4] sm:$0xf] }
 0x377   : > { %v495_v19 = vsel %vm13795_vm3, %v487_v16, 0.0 }
 0x378   : > { %v10987_v20 = vpop.eup %10986  ;;  %v496_v23 = vadd.f32 %v495_v19, %v494_v21 }
 0x379   : > { %v489_v22 = vmul.f32 %v10987_v20, %v10977_v56  ;;  %v667_v56 = vunpack.c.l.s4 %v11211_v55 }
 0x37b   : > { %v497_v24 = vsel %vm13795_vm3, %v489_v22, 0.0  ;;  %v668_v60 = vunpack.c.0.s8 %v667_v56 }
 0x37c   : > { %v498_v25 = vadd.f32 %v497_v24, %v496_v23 }
 0x37d   : > { %v11411_v2 = vsub.s32 %v668_v60, %v670_v61 }
 0x37e   : > { %v499_v26 = vrot.slane %v498_v25, 4 }
 0x380   : > { %v500_v27 = vadd.f32 %v499_v26, %v498_v25 }
 0x382   : > { %v501_v28 = vrot.slane %v500_v27, 2 }
 0x384   : > { %v502_v29 = vadd.f32 %v501_v28, %v500_v27 }
 0x386   : > { %v503_v30 = vrot.slane %v502_v29, 1 }
 0x388   : > { %v504_v31 = vadd.f32 %v503_v30, %v502_v29 }
 0x38a   : > { %v505_v33 = vadd.f32 1e-07, %v504_v31 }
 0x38c   : > { %10988 = vrcp.f32 %v505_v33 }
 0x396   : > { %v10989_v34 = vpop.eup %10988 }
 0x397   : > { %v507_v35 = vmul.f32 %v10989_v34, %v481_v12  ;;  %v508_v36 = vmul.f32 %v10989_v34, %v483_v9  ;;  %v509_v38 = vmul.f32 %v10989_v34, %v485_v11  ;;  %v510_v39 = vmul.f32 %v10989_v34, %v487_v16 }
 0x398   : > { %v511_v40 = vmul.f32 %v10989_v34, %v489_v22 }
 0x399   : > { %v513_v37 = vpack.c.bf16 %v508_v36, %v507_v35  ;;  %v514_v42 = vpack.c.bf16 %v510_v39, %v509_v38 }
 0x39a   : > { %v515_v44 = vpack.c.bf16 %v511_v40, %v511_v40 }
 0x39b   : > { %10494 = vmatpush3.bf16.msra.mxu1 %v513_v37 }
 0x39c   : > { %10495 = vmatprep.subr.bf16.mxu1 %v11208_v0  ;;  %v520_v46 = vsel %vm255_vm1, %v515_v44, 0 }
 0x39f   : > { %10496 = vmatpush3.bf16.msra.mxu1 %v514_v42 }
 0x3a0   : > { %10497 = vmatprep.subr.bf16.mxu1 %v11208_v0 }
 0x3a3   : > { %10498 = vmatpush3.bf16.msra.mxu1 %v520_v46 }
 0x3a4   : > { %10503 = vmatprep.subr.bf16.mxu1 %v11208_v0 }
 0x3a6   : > { %10500 = vmatmul.mubr.msk.bf16.vlgmr.msra.gmra.mrb[4].mxu1 %vm13795_vm3, %v512_v45  ;;  %vm13803_vm3 = vcmask 73768  }
 0x3a7   : > { %10505 = vmatprep.mubr.msk.bf16.mxu1 %vm11209_vm0, %v11208_v0 }
 0x479   : > { %v556_v47 = vpop.f32.mrb[4].mxu1 }
 0x47a   : > { %v563_v48 = vsub.f32 %v11332_v1, %v556_v47  ;;  %v10501_v49 = vpop.f32.mrb[5].mxu1  ;;  %v10169_v1 = vld [vmem:[%s13781_s1 + $0x4] sm:$0xf] }
 0x47b   : > { %v559_v50 = vpop.f32.mrb[6].mxu1 }
 0x47c   : > { %v564_v51 = vpack.c.bf16 %v563_v48, %v563_v48  ;;  %v10502_v52 = vpop.f32.mrb[7].mxu1 }
 0x47e   : > { %v575_v53 = vsel %vm255_vm1, %v564_v51, 0 }
 0x47f   : > { %10504 = vmatpush3.bf16.msra.mxu1 %v575_v53 }
 0x480   : > { %10509 = vmatprep.subr.bf16.mxu1 %v11208_v0 }
 0x482   : > { %10506 = vmatmul.mubr.msk.bf16.vlgmr.msra.gmra.mrb[8].mxu1 %vm251_vm2, %v562_v54 }
 0x483   : > { %10510 = vmatpush3.bf16.msra.mxu1 %v11337_v3  ;;  %10511 = vmatprep.mubr.msk.bf16.mxu1 %vm11209_vm0, %v11208_v0 }
 0x484   : > { %10525 = vmatprep.subr.mxu1 %v11208_v0 }
 0x48a   : > { %10512 = vmatmul.mubr.msk.bf16.vlgmr.msra.gmra.mrb[12].mxu1 %vm251_vm2, %v10169_v1 }
 0x48b   : > { %10527 = vmatprep.mubr.msk.f32.mxu1 %vm11209_vm0, %v11208_v0 }
 0x555   : > { %v11409_v58 = vpop.f32.mrb[8].mxu1 }
 0x556   : > { %v10507_v59 = vpop.f32.mrb[9].mxu1 }
 0x557   : > { %v614_v62 = vpop.f32.mrb[10].mxu1 }
 0x558   : > { %v10508_v63 = vpop.f32.mrb[11].mxu1 }
 0x55d   : > { %v658_v4 = vpop.f32.mrb[12].mxu1 }
 0x55e   : > { %v665_v5 = vcombine.high %v658_v4, %v658_v4  ;;  %v672_v6 = vrot.slane %v658_v4, %v11411_v2  ;;  %v10513_v7 = vpop.f32.mrb[13].mxu1 }
 0x55f   : > { %v661_v9 = vpop.f32.mrb[14].mxu1 }
 0x560   : > { %v679_v10 = vrot.slane %v665_v5, %v11411_v2  ;;  %v680_v11 = vcombine.high %v672_v6, %v672_v6  ;;  %v688_v12 = vrot.slane %v672_v6, %v11411_v2  ;;  %v10514_v13 = vpop.f32.mrb[15].mxu1 }
 0x562   : > { %v681_v14 = vcombine.high %v679_v10, %v679_v10  ;;  %v695_v15 = vrot.slane %v679_v10, %v11411_v2  ;;  %v702_v16 = vrot.slane %v680_v11, %v11411_v2  ;;  %v710_v17 = vcombine.high %v688_v12, %v688_v12  ;;  %723 = vst.msk [vmem:[#allocation2] sm:$0x1] %vm13797_vm4, %v688_v12 }
 0x563   : > { %v734_v18 = vrot.slane %v688_v12, %v11414_v8 }
 0x564   : > { %v709_v19 = vrot.slane %v681_v14, %v11411_v2  ;;  %v711_v20 = vcombine.high %v695_v15, %v695_v15  ;;  %v712_v21 = vcombine.high %v702_v16, %v702_v16  ;;  %724 = vst.msk [vmem:[#allocation2 + $0x8] sm:$0x1] %vm13797_vm4, %v702_v16  ;;  %725 = vst.msk [vmem:[#allocation2 + $0x10] sm:$0x1] %vm13797_vm4, %v710_v17 }
 0x565   : > { %727 = vst.msk [vmem:[#allocation2 + $0x20] sm:$0x1] %vm13797_vm4, %v695_v15  ;;  %v738_v22 = vrot.slane %v702_v16, %v11414_v8  ;;  %763 = vrot.lane.b32.xlu1 %v734_v18, %s11212_s9  ;;  %v742_v24 = vrot.slane %v710_v17, %v11414_v8  ;;  %v750_v25 = vrot.slane %v695_v15, %v11414_v8 }
 0x566   : > { %v713_v23 = vcombine.high %v709_v19, %v709_v19  ;;  %726 = vst.msk [vmem:[#allocation2 + $0x18] sm:$0x1] %vm13797_vm4, %v712_v21  ;;  %728 = vst.msk [vmem:[#allocation2 + $0x28] sm:$0x1] %vm13797_vm4, %v709_v19  ;;  %v746_v26 = vrot.slane %v712_v21, %v11414_v8  ;;  %v754_v27 = vrot.slane %v709_v19, %v11414_v8 }
 0x567   : > { %729 = vst.msk [vmem:[#allocation2 + $0x30] sm:$0x1] %vm13797_vm4, %v711_v20  ;;  %765 = vrot.lane.b32.xlu0 %v738_v22, %s11212_s9  ;;  %v758_v28 = vrot.slane %v711_v20, %v11414_v8 }
 0x568   : > { %730 = vst.msk [vmem:[#allocation2 + $0x38] sm:$0x1] %vm13797_vm4, %v713_v23  ;;  %v762_v29 = vrot.slane %v713_v23, %v11414_v8 }
 0x569   : > { %795 = vrot.lane.b32.xlu1 %v734_v18, %s13845_s10 }
 0x56b   : > { %829 = vrot.lane.b32.xlu0 %v738_v22, %s11214_s11 }
 0x56d   : > { %827 = vrot.lane.b32.xlu1 %v734_v18, %s11214_s11 }
 0x56f   : > { %893 = vrot.lane.b32.xlu0 %v738_v22, %s11215_s12 }
 0x571   : > { %859 = vrot.lane.b32.xlu1 %v734_v18, %s13843_s14 }
 0x573   : > { %957 = vrot.lane.b32.xlu0 %v738_v22, %s13847_s15 }
 0x575   : > { %891 = vrot.lane.b32.xlu1 %v734_v18, %s11215_s12 }
 0x577   : > { %799 = vrot.lane.b32.xlu0 %v742_v24, %s13845_s10 }
 0x579   : > { %923 = vrot.lane.b32.xlu1 %v734_v18, %s13841_s16 }
 0x57b   : > { %863 = vrot.lane.b32.xlu0 %v742_v24, %s13843_s14 }
 0x57d   : > { %955 = vrot.lane.b32.xlu1 %v734_v18, %s13847_s15 }
 0x57f   : > { %927 = vrot.lane.b32.xlu0 %v742_v24, %s13841_s16 }
 0x581   : > { %797 = vrot.lane.b32.xlu1 %v738_v22, %s13845_s10 }
 0x583   : > { %803 = vrot.lane.b32.xlu0 %v750_v25, %s13845_s10 }
 0x585   : > { %861 = vrot.lane.b32.xlu1 %v738_v22, %s13843_s14 }
 0x587   : > { %867 = vrot.lane.b32.xlu0 %v750_v25, %s13843_s14 }
 0x589   : > { %925 = vrot.lane.b32.xlu1 %v738_v22, %s13841_s16 }
 0x58b   : > { %931 = vrot.lane.b32.xlu0 %v750_v25, %s13841_s16 }
 0x58d   : > { %767 = vrot.lane.b32.xlu1 %v742_v24, %s11212_s9 }
 0x58f   : > { %769 = vrot.lane.b32.xlu0 %v746_v26, %s11212_s9 }
 0x591   : > { %831 = vrot.lane.b32.xlu1 %v742_v24, %s11214_s11 }
 0x593   : > { %833 = vrot.lane.b32.xlu0 %v746_v26, %s11214_s11 }
 0x595   : > { %895 = vrot.lane.b32.xlu1 %v742_v24, %s11215_s12 }
 0x597   : > { %897 = vrot.lane.b32.xlu0 %v746_v26, %s11215_s12 }
 0x599   : > { %959 = vrot.lane.b32.xlu1 %v742_v24, %s13847_s15 }
 0x59b   : > { %961 = vrot.lane.b32.xlu0 %v746_v26, %s13847_s15 }
 0x59d   : > { %771 = vrot.lane.b32.xlu1 %v750_v25, %s11212_s9 }
 0x59f   : > { %773 = vrot.lane.b32.xlu0 %v754_v27, %s11212_s9 }
 0x5a1   : > { %835 = vrot.lane.b32.xlu1 %v750_v25, %s11214_s11 }
 0x5a3   : > { %837 = vrot.lane.b32.xlu0 %v754_v27, %s11214_s11 }
 0x5a5   : > { %899 = vrot.lane.b32.xlu1 %v750_v25, %s11215_s12 }
 0x5a7   : > { %901 = vrot.lane.b32.xlu0 %v754_v27, %s11215_s12 }
 0x5a9   : > { %963 = vrot.lane.b32.xlu1 %v750_v25, %s13847_s15 }
 0x5ab   : > { %965 = vrot.lane.b32.xlu0 %v754_v27, %s13847_s15 }
 0x5ad   : > { %801 = vrot.lane.b32.xlu1 %v746_v26, %s13845_s10 }
 0x5af   : > { %807 = vrot.lane.b32.xlu0 %v758_v28, %s13845_s10 }
 0x5b1   : > { %865 = vrot.lane.b32.xlu1 %v746_v26, %s13843_s14 }
 0x5b3   : > { %871 = vrot.lane.b32.xlu0 %v758_v28, %s13843_s14 }
 0x5b5   : > { %929 = vrot.lane.b32.xlu1 %v746_v26, %s13841_s16 }
 0x5b7   : > { %935 = vrot.lane.b32.xlu0 %v758_v28, %s13841_s16 }
 0x5b9   : > { %805 = vrot.lane.b32.xlu1 %v754_v27, %s13845_s10 }
 0x5bb   : > { %777 = vrot.lane.b32.xlu0 %v762_v29, %s11212_s9 }
 0x5bd   : > { %869 = vrot.lane.b32.xlu1 %v754_v27, %s13843_s14 }
 0x5bf   : > { %841 = vrot.lane.b32.xlu0 %v762_v29, %s11214_s11 }
 0x5c1   : > { %933 = vrot.lane.b32.xlu1 %v754_v27, %s13841_s16 }
 0x5c3   : > { %905 = vrot.lane.b32.xlu0 %v762_v29, %s11215_s12 }
 0x5c5   : > { %775 = vrot.lane.b32.xlu1 %v758_v28, %s11212_s9 }
 0x5c7   : > { %969 = vrot.lane.b32.xlu0 %v762_v29, %s13847_s15 }
 0x5c9   : > { %839 = vrot.lane.b32.xlu1 %v758_v28, %s11214_s11 }
 0x5cd   : > { %903 = vrot.lane.b32.xlu1 %v758_v28, %s11215_s12 }
 0x5d1   : > { %967 = vrot.lane.b32.xlu1 %v758_v28, %s13847_s15 }
 0x5d5   : > { %809 = vrot.lane.b32.xlu1 %v762_v29, %s13845_s10 }
 0x5d7   : > { %v764_v30 = vpop.permute.xlu1 %763 }
 0x5d8   : > { %787 = vst.msk [vmem:[#allocation2 + $0x1] sm:$0x1] %vm13797_vm4, %v764_v30 }
 0x5d9   : > { %v766_v31 = vpop.permute.xlu0 %765  ;;  %873 = vrot.lane.b32.xlu1 %v762_v29, %s13843_s14 }
 0x5da   : > { %788 = vst.msk [vmem:[#allocation2 + $0x9] sm:$0x1] %vm13797_vm4, %v766_v31 }
 0x5db   : > { %v796_v33 = vpop.permute.xlu1 %795 }
 0x5dc   : > { %819 = vst.msk [vmem:[#allocation2 + $0x2] sm:$0x1] %vm13797_vm4, %v796_v33 }
 0x5dd   : > { %v830_v34 = vpop.permute.xlu0 %829  ;;  %937 = vrot.lane.b32.xlu1 %v762_v29, %s13841_s16 }
 0x5de   : > { %852 = vst.msk [vmem:[#allocation2 + $0xb] sm:$0x1] %vm13797_vm4, %v830_v34 }
 0x5df   : > { %v828_v35 = vpop.permute.xlu1 %827 }
 0x5e0   : > { %851 = vst.msk [vmem:[#allocation2 + $0x3] sm:$0x1] %vm13797_vm4, %v828_v35 }
 0x5e1   : > { %v894_v36 = vpop.permute.xlu0 %893 }
 0x5e2   : > { %916 = vst.msk [vmem:[#allocation2 + $0xd] sm:$0x1] %vm13797_vm4, %v894_v36 }
 0x5e3   : > { %v860_v37 = vpop.permute.xlu1 %859 }
 0x5e4   : > { %883 = vst.msk [vmem:[#allocation2 + $0x4] sm:$0x1] %vm13797_vm4, %v860_v37  ;;  %v10180_v37 = vld [vmem:[%s13783_s3 + $0x8] sm:$0xff] }
 0x5e5   : > { %v958_v38 = vpop.permute.xlu0 %957 }
 0x5e6   : > { %980 = vst.msk [vmem:[#allocation2 + $0xf] sm:$0x1] %vm13797_vm4, %v958_v38 }
 0x5e7   : > { %v892_v39 = vpop.permute.xlu1 %891 }
 0x5e8   : > { %915 = vst.msk [vmem:[#allocation2 + $0x5] sm:$0x1] %vm13797_vm4, %v892_v39 }
 0x5e9   : > { %v800_v40 = vpop.permute.xlu0 %799 }
 0x5ea   : > { %821 = vst.msk [vmem:[#allocation2 + $0x12] sm:$0x1] %vm13797_vm4, %v800_v40 }
 0x5eb   : > { %v924_v41 = vpop.permute.xlu1 %923 }
 0x5ec   : > { %947 = vst.msk [vmem:[#allocation2 + $0x6] sm:$0x1] %vm13797_vm4, %v924_v41 }
 0x5ed   : > { %v864_v42 = vpop.permute.xlu0 %863 }
 0x5ee   : > { %885 = vst.msk [vmem:[#allocation2 + $0x14] sm:$0x1] %vm13797_vm4, %v864_v42 }
 0x5ef   : > { %v956_v43 = vpop.permute.xlu1 %955 }
 0x5f0   : > { %979 = vst.msk [vmem:[#allocation2 + $0x7] sm:$0x1] %vm13797_vm4, %v956_v43 }
 0x5f1   : > { %v928_v44 = vpop.permute.xlu0 %927 }
 0x5f2   : > { %949 = vst.msk [vmem:[#allocation2 + $0x16] sm:$0x1] %vm13797_vm4, %v928_v44 }
 0x5f3   : > { %v798_v45 = vpop.permute.xlu1 %797 }
 0x5f4   : > { %820 = vst.msk [vmem:[#allocation2 + $0xa] sm:$0x1] %vm13797_vm4, %v798_v45  ;;  %v10179_v45 = vld [vmem:[%s13782_s2 + $0x4] sm:$0xf] }
 0x5f5   : > { %v804_v46 = vpop.permute.xlu0 %803 }
 0x5f6   : > { %823 = vst.msk [vmem:[#allocation2 + $0x22] sm:$0x1] %vm13797_vm4, %v804_v46 }
 0x5f7   : > { %v987_v47 = vld [vmem:[#allocation2] sm:$0xff]  ;;  %v862_v48 = vpop.permute.xlu1 %861 }
 0x5f8   : > { %884 = vst.msk [vmem:[#allocation2 + $0xc] sm:$0x1] %vm13797_vm4, %v862_v48  ;;  %10516 = vmatpush3.msra.mxu0 %v987_v47 }
 0x5f9   : > { %v868_v49 = vpop.permute.xlu0 %867  ;;  %10520 = vmatprep.subr.mxu0 %v11208_v0 }
 0x5fa   : > { %887 = vst.msk [vmem:[#allocation2 + $0x24] sm:$0x1] %vm13797_vm4, %v868_v49 }
 0x5fb   : > { %v926_v50 = vpop.permute.xlu1 %925 }
 0x5fc   : > { %948 = vst.msk [vmem:[#allocation2 + $0xe] sm:$0x1] %vm13797_vm4, %v926_v50 }
 0x5fd   : > { %v932_v51 = vpop.permute.xlu0 %931 }
 0x5fe   : > { %951 = vst.msk [vmem:[#allocation2 + $0x26] sm:$0x1] %vm13797_vm4, %v932_v51 }
 0x5ff   : > { %v768_v52 = vpop.permute.xlu1 %767 }
 0x600   : > { %789 = vst.msk [vmem:[#allocation2 + $0x11] sm:$0x1] %vm13797_vm4, %v768_v52 }
 0x601   : > { %v770_v53 = vpop.permute.xlu0 %769 }
 0x602   : > { %790 = vst.msk [vmem:[#allocation2 + $0x19] sm:$0x1] %vm13797_vm4, %v770_v53 }
 0x603   : > { %v11516_v54 = vld [vmem:[#allocation2 + $0x8] sm:$0xff]  ;;  %v832_v1 = vpop.permute.xlu1 %831 }
 0x604   : > { %853 = vst.msk [vmem:[#allocation2 + $0x13] sm:$0x1] %vm13797_vm4, %v832_v1  ;;  %1100 = vxpose.xlu0.b32.start.end [1/1] (short) (narrow) %v11516_v54, 8 }
 0x605   : > { %v834_v55 = vpop.permute.xlu0 %833 }
 0x606   : > { %854 = vst.msk [vmem:[#allocation2 + $0x1b] sm:$0x1] %vm13797_vm4, %v834_v55  ;;  %995 = vxpose.xlu1.b32.start.end [1/1] (short) (narrow) %v987_v47, 8 }
 0x607   : > { %v896_v56 = vpop.permute.xlu1 %895 }
 0x608   : > { %917 = vst.msk [vmem:[#allocation2 + $0x15] sm:$0x1] %vm13797_vm4, %v896_v56 }
 0x609   : > { %v898_v57 = vpop.permute.xlu0 %897 }
 0x60a   : > { %918 = vst.msk [vmem:[#allocation2 + $0x1d] sm:$0x1] %vm13797_vm4, %v898_v57 }
 0x60b   : > { %v960_v59 = vpop.permute.xlu1 %959 }
 0x60c   : > { %981 = vst.msk [vmem:[#allocation2 + $0x17] sm:$0x1] %vm13797_vm4, %v960_v59 }
 0x60d   : > { %v962_v60 = vpop.permute.xlu0 %961 }
 0x60e   : > { %982 = vst.msk [vmem:[#allocation2 + $0x1f] sm:$0x1] %vm13797_vm4, %v962_v60 }
 0x60f   : > { %v772_v61 = vpop.permute.xlu1 %771 }
 0x610   : > { %791 = vst.msk [vmem:[#allocation2 + $0x21] sm:$0x1] %vm13797_vm4, %v772_v61 }
 0x611   : > { %v774_v62 = vpop.permute.xlu0 %773 }
 0x612   : > { %792 = vst.msk [vmem:[#allocation2 + $0x29] sm:$0x1] %vm13797_vm4, %v774_v62 }
 0x613   : > { %v989_v63 = vld [vmem:[#allocation2 + $0x10] sm:$0xff]  ;;  %v836_v4 = vpop.permute.xlu1 %835 }
 0x614   : > { %855 = vst.msk [vmem:[#allocation2 + $0x23] sm:$0x1] %vm13797_vm4, %v836_v4  ;;  %10526 = vmatpush3.msra.mxu1 %v989_v63  ;;  %1205 = vxpose.xlu0.b32.start.end [1/1] (short) (narrow) %v989_v63, 8 }
 0x615   : > { %v838_v5 = vpop.permute.xlu0 %837  ;;  %10535 = vmatprep.subr.mxu1 %v11208_v0 }
 0x616   : > { %856 = vst.msk [vmem:[#allocation2 + $0x2b] sm:$0x1] %vm13797_vm4, %v838_v5 }
 0x617   : > { %v900_v6 = vpop.permute.xlu1 %899 }
 0x618   : > { %919 = vst.msk [vmem:[#allocation2 + $0x25] sm:$0x1] %vm13797_vm4, %v900_v6 }
 0x619   : > { %v902_v7 = vpop.permute.xlu0 %901 }
 0x61a   : > { %920 = vst.msk [vmem:[#allocation2 + $0x2d] sm:$0x1] %vm13797_vm4, %v902_v7 }
 0x61b   : > { %v964_v9 = vpop.permute.xlu1 %963 }
 0x61c   : > { %983 = vst.msk [vmem:[#allocation2 + $0x27] sm:$0x1] %vm13797_vm4, %v964_v9 }
 0x61d   : > { %v966_v10 = vpop.permute.xlu0 %965 }
 0x61e   : > { %984 = vst.msk [vmem:[#allocation2 + $0x2f] sm:$0x1] %vm13797_vm4, %v966_v10 }
 0x61f   : > { %v802_v11 = vpop.permute.xlu1 %801 }
 0x620   : > { %822 = vst.msk [vmem:[#allocation2 + $0x1a] sm:$0x1] %vm13797_vm4, %v802_v11 }
 0x621   : > { %v808_v12 = vpop.permute.xlu0 %807 }
 0x622   : > { %825 = vst.msk [vmem:[#allocation2 + $0x32] sm:$0x1] %vm13797_vm4, %v808_v12 }
 0x623   : > { %v991_v13 = vld [vmem:[#allocation2 + $0x20] sm:$0xff]  ;;  %v866_v14 = vpop.permute.xlu1 %865 }
 0x624   : > { %886 = vst.msk [vmem:[#allocation2 + $0x1c] sm:$0x1] %vm13797_vm4, %v866_v14  ;;  %1415 = vxpose.xlu1.b32.start.end [1/1] (short) (narrow) %v991_v13, 8 }
 0x625   : > { %v872_v15 = vpop.permute.xlu0 %871 }
 0x626   : > { %889 = vst.msk [vmem:[#allocation2 + $0x34] sm:$0x1] %vm13797_vm4, %v872_v15 }
 0x627   : > { %v930_v16 = vpop.permute.xlu1 %929 }
 0x628   : > { %950 = vst.msk [vmem:[#allocation2 + $0x1e] sm:$0x1] %vm13797_vm4, %v930_v16 }
 0x629   : > { %v936_v17 = vpop.permute.xlu0 %935 }
 0x62a   : > { %953 = vst.msk [vmem:[#allocation2 + $0x36] sm:$0x1] %vm13797_vm4, %v936_v17 }
 0x62b   : > { %v806_v18 = vpop.permute.xlu1 %805 }
 0x62c   : > { %824 = vst.msk [vmem:[#allocation2 + $0x2a] sm:$0x1] %vm13797_vm4, %v806_v18 }
 0x62d   : > { %v778_v19 = vpop.permute.xlu0 %777 }
 0x62e   : > { %794 = vst.msk [vmem:[#allocation2 + $0x39] sm:$0x1] %vm13797_vm4, %v778_v19 }
 0x62f   : > { %v990_v20 = vld [vmem:[#allocation2 + $0x18] sm:$0xff]  ;;  %v870_v21 = vpop.permute.xlu1 %869 }
 0x630   : > { %888 = vst.msk [vmem:[#allocation2 + $0x2c] sm:$0x1] %vm13797_vm4, %v870_v21  ;;  %1310 = vxpose.xlu0.b32.start.end [1/1] (short) (narrow) %v990_v20, 8 }
 0x631   : > { %v842_v22 = vpop.permute.xlu0 %841 }
 0x632   : > { %858 = vst.msk [vmem:[#allocation2 + $0x3b] sm:$0x1] %vm13797_vm4, %v842_v22 }
 0x633   : > { %v934_v23 = vpop.permute.xlu1 %933 }
 0x634   : > { %952 = vst.msk [vmem:[#allocation2 + $0x2e] sm:$0x1] %vm13797_vm4, %v934_v23 }
 0x635   : > { %v906_v24 = vpop.permute.xlu0 %905 }
 0x636   : > { %922 = vst.msk [vmem:[#allocation2 + $0x3d] sm:$0x1] %vm13797_vm4, %v906_v24 }
 0x637   : > { %v776_v25 = vpop.permute.xlu1 %775 }
 0x638   : > { %793 = vst.msk [vmem:[#allocation2 + $0x31] sm:$0x1] %vm13797_vm4, %v776_v25 }
 0x639   : > { %v970_v26 = vpop.permute.xlu0 %969 }
 0x63a   : > { %986 = vst.msk [vmem:[#allocation2 + $0x3f] sm:$0x1] %vm13797_vm4, %v970_v26 }
 0x63b   : > { %v992_v27 = vld [vmem:[#allocation2 + $0x28] sm:$0xff]  ;;  %v840_v28 = vpop.permute.xlu1 %839 }
 0x63c   : > { %857 = vst.msk [vmem:[#allocation2 + $0x33] sm:$0x1] %vm13797_vm4, %v840_v28  ;;  %1520 = vxpose.xlu0.b32.start.end [1/1] (short) (narrow) %v992_v27, 8 }
 0x63f   : > { %v904_v29 = vpop.permute.xlu1 %903 }
 0x640   : > { %921 = vst.msk [vmem:[#allocation2 + $0x35] sm:$0x1] %vm13797_vm4, %v904_v29 }
 0x643   : > { %v968_v30 = vpop.permute.xlu1 %967 }
 0x644   : > { %985 = vst.msk [vmem:[#allocation2 + $0x37] sm:$0x1] %vm13797_vm4, %v968_v30 }
 0x647   : > { %v810_v31 = vpop.permute.xlu1 %809 }
 0x648   : > { %826 = vst.msk [vmem:[#allocation2 + $0x3a] sm:$0x1] %vm13797_vm4, %v810_v31 }
 0x64b   : > { %v993_v33 = vld [vmem:[#allocation2 + $0x30] sm:$0xff]  ;;  %v874_v34 = vpop.permute.xlu1 %873 }
 0x64c   : > { %890 = vst.msk [vmem:[#allocation2 + $0x3c] sm:$0x1] %vm13797_vm4, %v874_v34  ;;  %1625 = vxpose.xlu1.b32.start.end [1/1] (short) (narrow) %v993_v33, 8 }
 0x64f   : > { %v938_v35 = vpop.permute.xlu1 %937 }
 0x650   : > { %954 = vst.msk [vmem:[#allocation2 + $0x3e] sm:$0x1] %vm13797_vm4, %v938_v35 }
 0x657   : > { %v994_v36 = vld [vmem:[#allocation2 + $0x38] sm:$0xff] }
 0x658   : > { %1730 = vxpose.xlu0.b32.start.end [1/1] (short) (narrow) %v994_v36, 8 }
 0x681   : > { %1955 = vperm.xlu0 %10966, %v10180_v37  }
 0x684   : > { %v1116_v39 = vpop.trf.xlu0 }
 0x686   : > { %v1011_v38 = vpop.trf.xlu1 }
 0x687   : > { %10518 = vmatmul.mubr.msk.f32.vlgmr.msra.gmra.mrb[16].mxu0 %vm251_vm2, %v1011_v38 }
 0x688   : > { %10521 = vmatpush3.msra.mxu0 %v11516_v54  ;;  %10522 = vmatprep.mubr.msk.f32.mxu0 %vm11209_vm0, %v11208_v0 }
 0x689   : > { %10530 = vmatprep.subr.mxu0 %v11208_v0 }
 0x68b   : > { %10523 = vmatmul.mubr.msk.f32.vlgmr.msra.gmra.mrb[18].mxu0 %vm251_vm2, %v1116_v39 }
 0x68c   : > { %10531 = vmatpush3.msra.mxu0 %v990_v20  ;;  %10532 = vmatprep.mubr.msk.f32.mxu0 %vm11209_vm0, %v11208_v0 }
 0x68d   : > { %10540 = vmatprep.subr.mxu0 %v11208_v0 }
 0x694   : > { %v1221_v40 = vpop.trf.xlu0 }
 0x695   : > { %10528 = vmatmul.mubr.msk.f32.vlgmr.msra.gmra.mrb[16].mxu1 %vm251_vm2, %v1221_v40 }
 0x696   : > { %10536 = vmatpush3.msra.mxu1 %v991_v13  ;;  %10537 = vmatprep.mubr.msk.f32.mxu1 %vm11209_vm0, %v11208_v0 }
 0x697   : > { %10545 = vmatprep.subr.mxu1 %v11208_v0 }
 0x6a4   : > { %v1431_v41 = vpop.trf.xlu1 }
 0x6a5   : > { %10538 = vmatmul.mubr.msk.f32.vlgmr.msra.gmra.mrb[18].mxu1 %vm251_vm2, %v1431_v41 }
 0x6a6   : > { %10546 = vmatpush3.msra.mxu1 %v993_v33  ;;  %10547 = vmatprep.mubr.msk.f32.mxu1 %vm11209_vm0, %v11208_v0 }
 0x6a7   : > { %10555 = vmatprep.subr.bf16.mxu1 %v11208_v0 }
 0x6b0   : > { %v1326_v42 = vpop.trf.xlu0 }
 0x6b1   : > { %10533 = vmatmul.mubr.msk.f32.vlgmr.msra.gmra.mrb[20].mxu0 %vm251_vm2, %v1326_v42 }
 0x6b2   : > { %10541 = vmatpush3.msra.mxu0 %v992_v27  ;;  %10542 = vmatprep.mubr.msk.f32.mxu0 %vm11209_vm0, %v11208_v0 }
 0x6b3   : > { %10550 = vmatprep.subr.mxu0 %v11208_v0 }
 0x6bc   : > { %v1536_v43 = vpop.trf.xlu0 }
 0x6bd   : > { %10543 = vmatmul.mubr.msk.f32.vlgmr.msra.gmra.mrb[22].mxu0 %vm251_vm2, %v1536_v43 }
 0x6be   : > { %10551 = vmatpush3.msra.mxu0 %v994_v36  ;;  %10552 = vmatprep.mubr.msk.f32.mxu0 %vm11209_vm0, %v11208_v0 }
 0x6bf   : > { %10561 = vmatprep.subr.mxu0 %v11208_v0 }
 0x6cc   : > { %v1641_v44 = vpop.trf.xlu1 }
 0x6cd   : > { %10548 = vmatmul.mubr.msk.f32.vlgmr.msra.gmra.mrb[20].mxu1 %vm251_vm2, %v1641_v44 }
 0x6ce   : > { %10556 = vmatpush3.bf16.msra.mxu1 %v11337_v3  ;;  %10557 = vmatprep.mubr.msk.bf16.mxu1 %vm11209_vm0, %v11208_v0 }
 0x6cf   : > { %10571 = vmatprep.subr.mxu1 %v11208_v0 }
 0x6d1   : > { %10558 = vmatmul.mubr.msk.bf16.vlgmr.msra.gmra.mrb[24].mxu1 %vm251_vm2, %v10179_v45 }
 0x6d2   : > { %10573 = vmatprep.mubr.msk.f32.mxu1 %vm11209_vm0, %v11208_v0 }
 0x6d8   : > { %v1746_v46 = vpop.trf.xlu0 }
 0x6d9   : > { %10553 = vmatmul.mubr.msk.f32.vlgmr.msra.gmra.mrb[24].mxu0 %vm251_vm2, %v1746_v46 }
 0x6da   : > { %10563 = vmatprep.mubr.msk.f32.mxu0 %vm11209_vm0, %v11208_v0 }
 0x700   : > { %v1956_v9 = vpop.permute.xlu0 %1955 }
 0x75a   : > { %v11596_v47 = vpop.f32.mrb[16].mxu0 }
 0x75b   : > { %v1836_v48 = vsel %vm13796_vm5, %v11596_v47, -inf  ;;  %v10519_v49 = vpop.f32.mrb[17].mxu0 }
 0x75c   : > { %1837 = vmax.xlane.f32.xlu1 %v1836_v48 }
 0x75e   : > { %v11600_v50 = vpop.f32.mrb[18].mxu0 }
 0x75f   : > { %v1839_v51 = vsel %vm13796_vm5, %v11600_v50, -inf  ;;  %v10524_v52 = vpop.f32.mrb[19].mxu0 }
 0x760   : > { %1840 = vmax.xlane.f32.xlu0 %v1839_v51 }
 0x768   : > { %v11604_v53 = vpop.f32.mrb[16].mxu1 }
 0x769   : > { %v1842_v54 = vsel %vm13796_vm5, %v11604_v53, -inf  ;;  %v10529_v1 = vpop.f32.mrb[17].mxu1 }
 0x76a   : > { %1843 = vmax.xlane.f32.xlu1 %v1842_v54 }
 0x778   : > { %v11608_v55 = vpop.f32.mrb[18].mxu1 }
 0x779   : > { %v1848_v56 = vsel %vm13796_vm5, %v11608_v55, -inf  ;;  %v10539_v57 = vpop.f32.mrb[19].mxu1 }
 0x77a   : > { %1849 = vmax.xlane.f32.xlu0 %v1848_v56 }
 0x784   : > { %v11612_v59 = vpop.f32.mrb[20].mxu0 }
 0x785   : > { %v1845_v60 = vsel %vm13796_vm5, %v11612_v59, -inf  ;;  %v10534_v61 = vpop.f32.mrb[21].mxu0 }
 0x786   : > { %1846 = vmax.xlane.f32.xlu1 %v1845_v60 }
 0x790   : > { %v11616_v62 = vpop.f32.mrb[22].mxu0 }
 0x791   : > { %v1851_v63 = vsel %vm13796_vm5, %v11616_v62, -inf  ;;  %v10544_v4 = vpop.f32.mrb[23].mxu0 }
 0x792   : > { %1852 = vmax.xlane.f32.xlu1 %v1851_v63 }
 0x7a0   : > { %v11620_v5 = vpop.f32.mrb[20].mxu1 }
 0x7a1   : > { %v1854_v6 = vsel %vm13796_vm5, %v11620_v5, -inf  ;;  %v10549_v7 = vpop.f32.mrb[21].mxu1 }
 0x7a2   : > { %1855 = vmax.xlane.f32.xlu0 %v1854_v6 }
 0x7a4   : > { %v1995_v10 = vpop.f32.mrb[24].mxu1 }
 0x7a5   : > { %v1996_v11 = vadd.f32 %v1995_v10, %v1956_v9  ;;  %v10559_v12 = vpop.f32.mrb[25].mxu1 }
 0x7a6   : > { %v1998_v13 = vpop.f32.mrb[26].mxu1 }
 0x7a7   : > { %v2002_v14 = vcombine.high %v1996_v11, %v1996_v11  ;;  %v2009_v15 = vrot.slane %v1996_v11, %v11411_v2  ;;  %v10560_v16 = vpop.f32.mrb[27].mxu1 }
 0x7a9   : > { %v2016_v17 = vrot.slane %v2002_v14, %v11411_v2  ;;  %v2017_v18 = vcombine.high %v2009_v15, %v2009_v15  ;;  %v2025_v19 = vrot.slane %v2009_v15, %v11411_v2 }
 0x7ab   : > { %v2018_v20 = vcombine.high %v2016_v17, %v2016_v17  ;;  %v11628_v21 = vrot.slane %v2016_v17, %v11411_v2  ;;  %v2039_v22 = vrot.slane %v2017_v18, %v11411_v2  ;;  %v11631_v23 = vcombine.high %v2025_v19, %v2025_v19  ;;  %2059 = vst.msk [vmem:[#allocation2] sm:$0x1] %vm13797_vm4, %v2025_v19 }
 0x7ac   : > { %v11634_v24 = vpop.f32.mrb[24].mxu0  ;;  %v2070_v31 = vrot.slane %v2025_v19, %v11414_v8 }
 0x7ad   : > { %v2046_v25 = vrot.slane %v2018_v20, %v11411_v2  ;;  %v11639_v26 = vcombine.high %v11628_v21, %v11628_v21  ;;  %v2049_v27 = vcombine.high %v2039_v22, %v2039_v22  ;;  %2060 = vst.msk [vmem:[#allocation2 + $0x8] sm:$0x1] %vm13797_vm4, %v2039_v22  ;;  %2061 = vst.msk [vmem:[#allocation2 + $0x10] sm:$0x1] %vm13797_vm4, %v11631_v23  ;;  %v10554_v28 = vpop.f32.mrb[25].mxu0  ;;  %v1857_v29 = vsel %vm13796_vm5, %v11634_v24, -inf }
 0x7ae   : > { %2063 = vst.msk [vmem:[#allocation2 + $0x20] sm:$0x1] %vm13797_vm4, %v11628_v21  ;;  %1858 = vmax.xlane.f32.xlu1 %v1857_v29  ;;  %v2074_v33 = vrot.slane %v2039_v22, %v11414_v8 }
 0x7af   : > { %v2050_v30 = vcombine.high %v2046_v25, %v2046_v25  ;;  %2062 = vst.msk [vmem:[#allocation2 + $0x18] sm:$0x1] %vm13797_vm4, %v2049_v27  ;;  %2064 = vst.msk [vmem:[#allocation2 + $0x28] sm:$0x1] %vm13797_vm4, %v2046_v25  ;;  %v2082_v34 = vrot.slane %v2049_v27, %v11414_v8  ;;  %v2090_v35 = vrot.slane %v2046_v25, %v11414_v8 }
 0x7b0   : > { %2065 = vst.msk [vmem:[#allocation2 + $0x30] sm:$0x1] %vm13797_vm4, %v11639_v26 }
 0x7b1   : > { %2066 = vst.msk [vmem:[#allocation2 + $0x38] sm:$0x1] %vm13797_vm4, %v2050_v30  ;;  %v11676_v36 = vrot.slane %v2050_v30, %v11414_v8 }
 0x7b8   : > { %2195 = vrot.lane.b32.xlu0 %v2070_v31, %s13843_s14 }
 0x7bc   : > { %2197 = vrot.lane.b32.xlu0 %v2074_v33, %s13843_s14 }
 0x7bf   : > { %2099 = vrot.lane.b32.xlu1 %v2070_v31, %s11212_s9 }
 0x7c0   : > { %2261 = vrot.lane.b32.xlu0 %v2074_v33, %s13841_s16 }
 0x7c3   : > { %2131 = vrot.lane.b32.xlu1 %v2070_v31, %s13845_s10 }
 0x7c4   : > { %2105 = vrot.lane.b32.xlu0 %v2082_v34, %s11212_s9 }
 0x7c7   : > { %2163 = vrot.lane.b32.xlu1 %v2070_v31, %s11214_s11 }
 0x7c8   : > { %2169 = vrot.lane.b32.xlu0 %v2082_v34, %s11214_s11 }
 0x7cb   : > { %2227 = vrot.lane.b32.xlu1 %v2070_v31, %s11215_s12 }
 0x7cc   : > { %2233 = vrot.lane.b32.xlu0 %v2082_v34, %s11215_s12 }
 0x7cf   : > { %2259 = vrot.lane.b32.xlu1 %v2070_v31, %s13841_s16 }
 0x7d0   : > { %2297 = vrot.lane.b32.xlu0 %v2082_v34, %s13847_s15 }
 0x7d3   : > { %2291 = vrot.lane.b32.xlu1 %v2070_v31, %s13847_s15 }
 0x7d4   : > { %2141 = vrot.lane.b32.xlu0 %v2090_v35, %s13845_s10 }
 0x7d7   : > { %2101 = vrot.lane.b32.xlu1 %v2074_v33, %s11212_s9 }
 0x7d8   : > { %2205 = vrot.lane.b32.xlu0 %v2090_v35, %s13843_s14 }
 0x7db   : > { %2133 = vrot.lane.b32.xlu1 %v2074_v33, %s13845_s10 }
 0x7dc   : > { %2269 = vrot.lane.b32.xlu0 %v2090_v35, %s13841_s16 }
 0x7df   : > { %2165 = vrot.lane.b32.xlu1 %v2074_v33, %s11214_s11 }
 0x7e0   : > { %2113 = vrot.lane.b32.xlu0 %v11676_v36, %s11212_s9 }
 0x7e3   : > { %2229 = vrot.lane.b32.xlu1 %v2074_v33, %s11215_s12 }
 0x7e7   : > { %2293 = vrot.lane.b32.xlu1 %v2074_v33, %s13847_s15 }
 0x7e9   : > { %v1838_v37 = vpop.xlane.xlu1 %1837 }
 0x7ea   : > { %v1860_v38 = vsub.f32 %v11596_v47, %v1838_v37  ;;  %v2078_v37 = vrot.slane %v11631_v23, %v11414_v8 }
 0x7eb   : > { %2137 = vrot.lane.b32.xlu1 %v2082_v34, %s13845_s10 }
 0x7ec   : > { %v1868_v40 = vmul.f32 1.442695, %v1860_v38 }
 0x7ed   : > { %v1841_v42 = vpop.xlane.xlu0 %1840 }
 0x7ee   : > { %10990 = vpow2.f32 %v1868_v40  ;;  %v1861_v43 = vsub.f32 %v11600_v50, %v1841_v42 }
 0x7ef   : > { %2201 = vrot.lane.b32.xlu1 %v2082_v34, %s13843_s14 }
 0x7f0   : > { %v1870_v46 = vmul.f32 1.442695, %v1861_v43 }
 0x7f3   : > { %2265 = vrot.lane.b32.xlu1 %v2082_v34, %s13841_s16 }
 0x7f7   : > { %2109 = vrot.lane.b32.xlu1 %v2090_v35, %s11212_s9  ;;  %v1844_v39 = vpop.xlane.xlu1 %1843 }
 0x7f8   : > { %v1862_v41 = vsub.f32 %v11604_v53, %v1844_v39  ;;  %v11697_v47 = vpop.eup %10990 }
 0x7f9   : > { %v1884_v53 = vsel %vm13796_vm5, %v11697_v47, 0.0 }
 0x7fa   : > { %v1872_v44 = vmul.f32 1.442695, %v1862_v41 }
 0x7fb   : > { %2173 = vrot.lane.b32.xlu1 %v2090_v35, %s11214_s11 }
 0x7fc   : > { %10992 = vpow2.f32 %v1872_v44 }
 0x7fd   : > { %10994 = vpow2.f32 %v1870_v46 }
 0x7ff   : > { %2237 = vrot.lane.b32.xlu1 %v2090_v35, %s11215_s12 }
 0x803   : > { %2301 = vrot.lane.b32.xlu1 %v2090_v35, %s13847_s15 }
 0x806   : > { %v11701_v1 = vpop.eup %10992 }
 0x807   : > { %2145 = vrot.lane.b32.xlu1 %v11676_v36, %s13845_s10  ;;  %v1850_v45 = vpop.xlane.xlu0 %1849  ;;  %v11705_v56 = vpop.eup %10994 }
 0x808   : > { %v1864_v48 = vsub.f32 %v11608_v55, %v1850_v45  ;;  %v1890_v55 = vsel %vm13796_vm5, %v11701_v1, 0.0  ;;  %v1887_v61 = vsel %vm13796_vm5, %v11705_v56, 0.0 }
 0x80a   : > { %v1876_v51 = vmul.f32 1.442695, %v1864_v48 }
 0x80c   : > { %10996 = vpow2.f32 %v1876_v51 }
 0x813   : > { %v1847_v49 = vpop.xlane.xlu1 %1846 }
 0x814   : > { %v1863_v52 = vsub.f32 %v11612_v59, %v1847_v49  ;;  %v2094_v49 = vrot.slane %v11639_v26, %v11414_v8 }
 0x816   : > { %v1874_v54 = vmul.f32 1.442695, %v1863_v52  ;;  %v11710_v63 = vpop.eup %10996 }
 0x817   : > { %v1896_v6 = vsel %vm13796_vm5, %v11710_v63, 0.0 }
 0x818   : > { %10998 = vpow2.f32 %v1874_v54 }
 0x81f   : > { %v1853_v9 = vpop.xlane.xlu1 %1852 }
 0x820   : > { %v1865_v35 = vsub.f32 %v11616_v62, %v1853_v9  ;;  %v2086_v62 = vrot.slane %v11628_v21, %v11414_v8 }
 0x822   : > { %v11715_v7 = vpop.eup %10998  ;;  %v1878_v39 = vmul.f32 1.442695, %v1865_v35 }
 0x823   : > { %v1893_v10 = vsel %vm13796_vm5, %v11715_v7, 0.0 }
 0x82b   : > { %1885 = vadd.xlane.f32.xlu1 %v1884_v53 }
 0x82f   : > { %v1856_v50 = vpop.xlane.xlu0 %1855  ;;  %1891 = vadd.xlane.f32.xlu1 %v1890_v55 }
 0x830   : > { %v1866_v57 = vsub.f32 %v11620_v5, %v1856_v50 }
 0x832   : > { %v1880_v59 = vmul.f32 1.442695, %v1866_v57 }
 0x833   : > { %v2196_v60 = vpop.permute.xlu0 %2195  ;;  %1888 = vadd.xlane.f32.xlu1 %v1887_v61 }
 0x834   : > { %11000 = vpow2.f32 %v1880_v59  ;;  %2219 = vst.msk [vmem:[#allocation2 + $0x4] sm:$0x1] %vm13797_vm4, %v2196_v60 }
 0x835   : > { %11002 = vpow2.f32 %v1878_v39 }
 0x837   : > { %v2198_v4 = vpop.permute.xlu0 %2197  ;;  %1897 = vadd.xlane.f32.xlu1 %v1896_v6 }
 0x838   : > { %2220 = vst.msk [vmem:[#allocation2 + $0xc] sm:$0x1] %vm13797_vm4, %v2198_v4 }
 0x83b   : > { %v2262_v5 = vpop.permute.xlu0 %2261  ;;  %1894 = vadd.xlane.f32.xlu1 %v1893_v10  ;;  %v1859_v11 = vpop.xlane.xlu1 %1858 }
 0x83c   : > { %2284 = vst.msk [vmem:[#allocation2 + $0xe] sm:$0x1] %vm13797_vm4, %v2262_v5  ;;  %v1867_v40 = vsub.f32 %v11634_v24, %v1859_v11 }
 0x83e   : > { %v11721_v12 = vpop.eup %11000 }
 0x83f   : > { %v2106_v13 = vpop.permute.xlu0 %2105  ;;  %v1902_v14 = vsel %vm13796_vm5, %v11721_v12, 0.0  ;;  %v2100_v15 = vpop.permute.xlu1 %2099 }
 0x840   : > { %2126 = vst.msk [vmem:[#allocation2 + $0x19] sm:$0x1] %vm13797_vm4, %v2106_v13  ;;  %1903 = vadd.xlane.f32.xlu0 %v1902_v14  ;;  %2123 = vst.msk [vmem:[#allocation2 + $0x1] sm:$0x1] %vm13797_vm4, %v2100_v15  ;;  %v11765_v43 = vpop.eup %11002 }
 0x841   : > { %v1899_v45 = vsel %vm13796_vm5, %v11765_v43, 0.0 }
 0x843   : > { %v2170_v16 = vpop.permute.xlu0 %2169  ;;  %v2132_v17 = vpop.permute.xlu1 %2131 }
 0x844   : > { %2190 = vst.msk [vmem:[#allocation2 + $0x1b] sm:$0x1] %vm13797_vm4, %v2170_v16  ;;  %2155 = vst.msk [vmem:[#allocation2 + $0x2] sm:$0x1] %vm13797_vm4, %v2132_v17 }
 0x847   : > { %v2234_v18 = vpop.permute.xlu0 %2233  ;;  %v2164_v19 = vpop.permute.xlu1 %2163 }
 0x848   : > { %2254 = vst.msk [vmem:[#allocation2 + $0x1d] sm:$0x1] %vm13797_vm4, %v2234_v18  ;;  %2187 = vst.msk [vmem:[#allocation2 + $0x3] sm:$0x1] %vm13797_vm4, %v2164_v19 }
 0x84b   : > { %v2298_v20 = vpop.permute.xlu0 %2297  ;;  %v2228_v22 = vpop.permute.xlu1 %2227 }
 0x84c   : > { %2318 = vst.msk [vmem:[#allocation2 + $0x1f] sm:$0x1] %vm13797_vm4, %v2298_v20  ;;  %2251 = vst.msk [vmem:[#allocation2 + $0x5] sm:$0x1] %vm13797_vm4, %v2228_v22  ;;  %2209 = vrot.lane.b32.xlu1 %v11676_v36, %s13843_s14 }
 0x84f   : > { %v2142_v25 = vpop.permute.xlu0 %2141  ;;  %v2260_v27 = vpop.permute.xlu1 %2259 }
 0x850   : > { %2160 = vst.msk [vmem:[#allocation2 + $0x2a] sm:$0x1] %vm13797_vm4, %v2142_v25  ;;  %2283 = vst.msk [vmem:[#allocation2 + $0x6] sm:$0x1] %vm13797_vm4, %v2260_v27  ;;  %2273 = vrot.lane.b32.xlu1 %v11676_v36, %s13841_s16 }
 0x853   : > { %v2206_v28 = vpop.permute.xlu0 %2205  ;;  %v2292_v29 = vpop.permute.xlu1 %2291 }
 0x854   : > { %2224 = vst.msk [vmem:[#allocation2 + $0x2c] sm:$0x1] %vm13797_vm4, %v2206_v28  ;;  %2315 = vst.msk [vmem:[#allocation2 + $0x7] sm:$0x1] %vm13797_vm4, %v2292_v29 }
 0x856   : > { %2177 = vrot.lane.b32.xlu0 %v11676_v36, %s11214_s11 }
 0x857   : > { %v2270_v30 = vpop.permute.xlu0 %2269  ;;  %v2102_v31 = vpop.permute.xlu1 %2101 }
 0x858   : > { %2288 = vst.msk [vmem:[#allocation2 + $0x2e] sm:$0x1] %vm13797_vm4, %v2270_v30  ;;  %2124 = vst.msk [vmem:[#allocation2 + $0x9] sm:$0x1] %vm13797_vm4, %v2102_v31 }
 0x85a   : > { %2241 = vrot.lane.b32.xlu0 %v11676_v36, %s11215_s12 }
 0x85b   : > { %v2114_v33 = vpop.permute.xlu0 %2113  ;;  %v2134_v34 = vpop.permute.xlu1 %2133 }
 0x85c   : > { %2130 = vst.msk [vmem:[#allocation2 + $0x39] sm:$0x1] %vm13797_vm4, %v2114_v33  ;;  %2156 = vst.msk [vmem:[#allocation2 + $0xa] sm:$0x1] %vm13797_vm4, %v2134_v34 }
 0x85e   : > { %2305 = vrot.lane.b32.xlu0 %v11676_v36, %s13847_s15  ;;  %v1882_v36 = vmul.f32 1.442695, %v1867_v40 }
 0x85f   : > { %v2166_v38 = vpop.permute.xlu1 %2165 }
 0x860   : > { %2188 = vst.msk [vmem:[#allocation2 + $0xb] sm:$0x1] %vm13797_vm4, %v2166_v38  ;;  %11004 = vpow2.f32 %v1882_v36 }
 0x862   : > { %2135 = vrot.lane.b32.xlu0 %v2078_v37, %s13845_s10 }
 0x863   : > { %v2230_v41 = vpop.permute.xlu1 %2229 }
 0x864   : > { %2252 = vst.msk [vmem:[#allocation2 + $0xd] sm:$0x1] %vm13797_vm4, %v2230_v41 }
 0x866   : > { %2199 = vrot.lane.b32.xlu0 %v2078_v37, %s13843_s14 }
 0x867   : > { %v2294_v42 = vpop.permute.xlu1 %2293 }
 0x868   : > { %2316 = vst.msk [vmem:[#allocation2 + $0xf] sm:$0x1] %vm13797_vm4, %v2294_v42 }
 0x86a   : > { %2263 = vrot.lane.b32.xlu0 %v2078_v37, %s13841_s16  ;;  %v11771_v46 = vpop.eup %11004 }
 0x86b   : > { %v2138_v23 = vpop.permute.xlu1 %2137  ;;  %v1905_v48 = vsel %vm13796_vm5, %v11771_v46, 0.0 }
 0x86c   : > { %2158 = vst.msk [vmem:[#allocation2 + $0x1a] sm:$0x1] %vm13797_vm4, %v2138_v23 }
 0x86e   : > { %2107 = vrot.lane.b32.xlu0 %v2086_v62, %s11212_s9 }
 0x86f   : > { %v2202_v24 = vpop.permute.xlu1 %2201 }
 0x870   : > { %2222 = vst.msk [vmem:[#allocation2 + $0x1c] sm:$0x1] %vm13797_vm4, %v2202_v24 }
 0x872   : > { %2171 = vrot.lane.b32.xlu0 %v2086_v62, %s11214_s11 }
 0x873   : > { %v2266_v44 = vpop.permute.xlu1 %2265 }
 0x874   : > { %2286 = vst.msk [vmem:[#allocation2 + $0x1e] sm:$0x1] %vm13797_vm4, %v2266_v44  ;;  %1900 = vadd.xlane.f32.xlu1 %v1899_v45 }
 0x876   : > { %2235 = vrot.lane.b32.xlu0 %v2086_v62, %s11215_s12 }
 0x877   : > { %v2110_v21 = vpop.permute.xlu1 %2109 }
 0x878   : > { %2128 = vst.msk [vmem:[#allocation2 + $0x29] sm:$0x1] %vm13797_vm4, %v2110_v21  ;;  %1906 = vadd.xlane.f32.xlu1 %v1905_v48 }
 0x87a   : > { %2299 = vrot.lane.b32.xlu0 %v2086_v62, %s13847_s15 }
 0x87b   : > { %v2174_v51 = vpop.permute.xlu1 %2173 }
 0x87c   : > { %2192 = vst.msk [vmem:[#allocation2 + $0x2b] sm:$0x1] %vm13797_vm4, %v2174_v51 }
 0x87e   : > { %2143 = vrot.lane.b32.xlu0 %v2094_v49, %s13845_s10 }
 0x87f   : > { %v2238_v52 = vpop.permute.xlu1 %2237 }
 0x880   : > { %2256 = vst.msk [vmem:[#allocation2 + $0x2d] sm:$0x1] %vm13797_vm4, %v2238_v52 }
 0x882   : > { %2207 = vrot.lane.b32.xlu0 %v2094_v49, %s13843_s14 }
 0x883   : > { %v2302_v54 = vpop.permute.xlu1 %2301 }
 0x884   : > { %2320 = vst.msk [vmem:[#allocation2 + $0x2f] sm:$0x1] %vm13797_vm4, %v2302_v54 }
 0x886   : > { %2271 = vrot.lane.b32.xlu0 %v2094_v49, %s13841_s16 }
 0x887   : > { %v2146_v53 = vpop.permute.xlu1 %2145 }
 0x888   : > { %2162 = vst.msk [vmem:[#allocation2 + $0x3a] sm:$0x1] %vm13797_vm4, %v2146_v53 }
 0x889   : > { %2103 = vrot.lane.b32.xlu1 %v2078_v37, %s11212_s9 }
 0x88d   : > { %2167 = vrot.lane.b32.xlu1 %v2078_v37, %s11214_s11 }
 0x891   : > { %2231 = vrot.lane.b32.xlu1 %v2078_v37, %s11215_s12 }
 0x895   : > { %2295 = vrot.lane.b32.xlu1 %v2078_v37, %s13847_s15 }
 0x899   : > { %2139 = vrot.lane.b32.xlu1 %v2086_v62, %s13845_s10 }
 0x89d   : > { %2203 = vrot.lane.b32.xlu1 %v2086_v62, %s13843_s14 }
 0x8a1   : > { %2267 = vrot.lane.b32.xlu1 %v2086_v62, %s13841_s16 }
 0x8a5   : > { %2111 = vrot.lane.b32.xlu1 %v2094_v49, %s11212_s9 }
 0x8a9   : > { %2175 = vrot.lane.b32.xlu1 %v2094_v49, %s11214_s11 }
 0x8ad   : > { %2239 = vrot.lane.b32.xlu1 %v2094_v49, %s11215_s12 }
 0x8b1   : > { %2303 = vrot.lane.b32.xlu1 %v2094_v49, %s13847_s15 }
 0x8b8   : > { %v1886_v26 = vpop.xlane.xlu1 %1885 }
 0x8bc   : > { %v1892_v50 = vpop.xlane.xlu1 %1891 }
 0x8c0   : > { %v1889_v55 = vpop.xlane.xlu1 %1888 }
 0x8c1   : > { %11006 = vrcp.f32 %v1889_v55 }
 0x8c2   : > { %11008 = vrcp.f32 %v1886_v26 }
 0x8c3   : > { %11010 = vrcp.f32 %v1892_v50 }
 0x8c4   : > { %v1898_v57 = vpop.xlane.xlu1 %1897 }
 0x8c8   : > { %v1895_v59 = vpop.xlane.xlu1 %1894 }
 0x8c9   : > { %11012 = vrcp.f32 %v1895_v59 }
 0x8ca   : > { %11014 = vrcp.f32 %v1898_v57 }
 0x8cb   : > { %v11007_v19 = vpop.eup %11006 }
 0x8cc   : > { %v2210_v60 = vpop.permute.xlu1 %2209  ;;  %v11009_v20 = vpop.eup %11008  ;;  %v11813_v25 = vmul.f32 %v11007_v19, %v11705_v56 }
 0x8cd   : > { %v1904_v61 = vpop.xlane.xlu0 %1903  ;;  %2226 = vst.msk [vmem:[#allocation2 + $0x3c] sm:$0x1] %vm13797_vm4, %v2210_v60  ;;  %v11011_v27 = vpop.eup %11010  ;;  %v1909_v28 = vmul.f32 %v11009_v20, %v11697_v47 }
 0x8ce   : > { %11016 = vrcp.f32 %v1904_v61  ;;  %v1925_v31 = vsel %vm13796_vm5, %v11813_v25, 0.0  ;;  %v1913_v56 = vmul.f32 %v11011_v27, %v11701_v1 }
 0x8cf   : > { %v1924_v34 = vsel %vm13796_vm5, %v1909_v28, 0.0 }
 0x8d0   : > { %v2274_v4 = vpop.permute.xlu1 %2273  ;;  %v1926_v37 = vadd.f32 %v1925_v31, %v1924_v34  ;;  %v1927_v39 = vsel %vm13796_vm5, %v1913_v56, 0.0 }
 0x8d1   : > { %v2178_v6 = vpop.permute.xlu0 %2177  ;;  %2290 = vst.msk [vmem:[#allocation2 + $0x3e] sm:$0x1] %vm13797_vm4, %v2274_v4  ;;  %v2323_v4 = vld [vmem:[#allocation2] sm:$0xff] }
 0x8d2   : > { %2194 = vst.msk [vmem:[#allocation2 + $0x3b] sm:$0x1] %vm13797_vm4, %v2178_v6  ;;  %v1928_v41 = vadd.f32 %v1927_v39, %v1926_v37 }
 0x8d3   : > { %v11013_v29 = vpop.eup %11012 }
 0x8d4   : > { %v11823_v35 = vmul.f32 %v11013_v29, %v11715_v7  ;;  %v11015_v47 = vpop.eup %11014 }
 0x8d5   : > { %v2242_v9 = vpop.permute.xlu0 %2241  ;;  %v1917_v36 = vmul.f32 %v11015_v47, %v11710_v63 }
 0x8d6   : > { %2258 = vst.msk [vmem:[#allocation2 + $0x3d] sm:$0x1] %vm13797_vm4, %v2242_v9  ;;  %v1929_v40 = vsel %vm13796_vm5, %v11823_v35, 0.0 }
 0x8d7   : > { %v1930_v23 = vadd.f32 %v1929_v40, %v1928_v41  ;;  %v1931_v7 = vsel %vm13796_vm5, %v1917_v36, 0.0 }
 0x8d8   : > { %v11017_v62 = vpop.eup %11016 }
 0x8d9   : > { %v2306_v5 = vpop.permute.xlu0 %2305  ;;  %v1921_v24 = vmul.f32 %v11017_v62, %v11721_v12  ;;  %v1932_v21 = vadd.f32 %v1931_v7, %v1930_v23 }
 0x8da   : > { %2322 = vst.msk [vmem:[#allocation2 + $0x3f] sm:$0x1] %vm13797_vm4, %v2306_v5 }
 0x8db   : > { %v1935_v51 = vsel %vm13796_vm5, %v1921_v24, 0.0 }
 0x8dd   : > { %v2136_v10 = vpop.permute.xlu0 %2135 }
 0x8de   : > { %2157 = vst.msk [vmem:[#allocation2 + $0x12] sm:$0x1] %vm13797_vm4, %v2136_v10 }
 0x8e1   : > { %v2200_v11 = vpop.permute.xlu0 %2199  ;;  %v2330_v27 = vld [vmem:[#allocation2 + $0x38] sm:$0xff] }
 0x8e2   : > { %2221 = vst.msk [vmem:[#allocation2 + $0x14] sm:$0x1] %vm13797_vm4, %v2200_v11 }
 0x8e5   : > { %v2264_v13 = vpop.permute.xlu0 %2263 }
 0x8e6   : > { %2285 = vst.msk [vmem:[#allocation2 + $0x16] sm:$0x1] %vm13797_vm4, %v2264_v13 }
 0x8e9   : > { %v2108_v14 = vpop.permute.xlu0 %2107 }
 0x8ea   : > { %2127 = vst.msk [vmem:[#allocation2 + $0x21] sm:$0x1] %vm13797_vm4, %v2108_v14  ;;  %v2324_v14 = vld [vmem:[#allocation2 + $0x8] sm:$0xff] }
 0x8ed   : > { %v2172_v15 = vpop.permute.xlu0 %2171 }
 0x8ee   : > { %2191 = vst.msk [vmem:[#allocation2 + $0x23] sm:$0x1] %vm13797_vm4, %v2172_v15 }
 0x8f1   : > { %v2236_v16 = vpop.permute.xlu0 %2235 }
 0x8f2   : > { %2255 = vst.msk [vmem:[#allocation2 + $0x25] sm:$0x1] %vm13797_vm4, %v2236_v16 }
 0x8f5   : > { %v2300_v17 = vpop.permute.xlu0 %2299 }
 0x8f6   : > { %2319 = vst.msk [vmem:[#allocation2 + $0x27] sm:$0x1] %vm13797_vm4, %v2300_v17 }
 0x8f9   : > { %v2144_v18 = vpop.permute.xlu0 %2143 }
 0x8fa   : > { %2161 = vst.msk [vmem:[#allocation2 + $0x32] sm:$0x1] %vm13797_vm4, %v2144_v18  ;;  %v2326_v18 = vld [vmem:[#allocation2 + $0x18] sm:$0xff] }
 0x8fd   : > { %v2208_v22 = vpop.permute.xlu0 %2207 }
 0x8fe   : > { %2225 = vst.msk [vmem:[#allocation2 + $0x34] sm:$0x1] %vm13797_vm4, %v2208_v22  ;;  %v2328_v22 = vld [vmem:[#allocation2 + $0x28] sm:$0xff] }
 0x901   : > { %v2272_v30 = vpop.permute.xlu0 %2271  ;;  %v1901_v33 = vpop.xlane.xlu1 %1900 }
 0x902   : > { %2289 = vst.msk [vmem:[#allocation2 + $0x36] sm:$0x1] %vm13797_vm4, %v2272_v30  ;;  %11018 = vrcp.f32 %v1901_v33 }
 0x905   : > { %v1907_v38 = vpop.xlane.xlu1 %1906 }
 0x906   : > { %11020 = vrcp.f32 %v1907_v38 }
 0x909   : > { %v2104_v42 = vpop.permute.xlu1 %2103 }
 0x90a   : > { %2125 = vst.msk [vmem:[#allocation2 + $0x11] sm:$0x1] %vm13797_vm4, %v2104_v42 }
 0x90c   : > { %v11019_v1 = vpop.eup %11018 }
 0x90d   : > { %v1919_v44 = vmul.f32 %v11019_v1, %v11765_v43  ;;  %v2168_v45 = vpop.permute.xlu1 %2167 }
 0x90e   : > { %2189 = vst.msk [vmem:[#allocation2 + $0x13] sm:$0x1] %vm13797_vm4, %v2168_v45 }
 0x90f   : > { %v1933_v48 = vsel %vm13796_vm5, %v1919_v44, 0.0 }
 0x910   : > { %v11021_v49 = vpop.eup %11020  ;;  %v1934_v63 = vadd.f32 %v1933_v48, %v1932_v21 }
 0x911   : > { %v11837_v52 = vmul.f32 %v11021_v49, %v11771_v46  ;;  %v2232_v54 = vpop.permute.xlu1 %2231 }
 0x912   : > { %v1936_v53 = vadd.f32 %v1935_v51, %v1934_v63  ;;  %2253 = vst.msk [vmem:[#allocation2 + $0x15] sm:$0x1] %vm13797_vm4, %v2232_v54 }
 0x913   : > { %v1937_v12 = vsel %vm13796_vm5, %v11837_v52, 0.0  ;;  %vm13820_vm5 = vcmask 80937  }
 0x914   : > { %v1938_v43 = vadd.f32 %v1937_v12, %v1936_v53 }
 0x915   : > { %v2296_v26 = vpop.permute.xlu1 %2295 }
 0x916   : > { %v1939_v50 = vadd.f32 1e-07, %v1938_v43  ;;  %2317 = vst.msk [vmem:[#allocation2 + $0x17] sm:$0x1] %vm13797_vm4, %v2296_v26 }
 0x918   : > { %11022 = vrcp.f32 %v1939_v50 }
 0x919   : > { %v2140_v55 = vpop.permute.xlu1 %2139 }
 0x91a   : > { %2159 = vst.msk [vmem:[#allocation2 + $0x22] sm:$0x1] %vm13797_vm4, %v2140_v55 }
 0x91d   : > { %v2204_v57 = vpop.permute.xlu1 %2203  ;;  %v2325_v9 = vld [vmem:[#allocation2 + $0x10] sm:$0xff] }
 0x91e   : > { %2223 = vst.msk [vmem:[#allocation2 + $0x24] sm:$0x1] %vm13797_vm4, %v2204_v57 }
 0x921   : > { %v2268_v46 = vpop.permute.xlu1 %2267 }
 0x922   : > { %v11023_v59 = vpop.eup %11022  ;;  %2287 = vst.msk [vmem:[#allocation2 + $0x26] sm:$0x1] %vm13797_vm4, %v2268_v46 }
 0x923   : > { %v1941_v60 = vmul.f32 %v11023_v59, %v1909_v28  ;;  %v1943_v61 = vmul.f32 %v11023_v59, %v1913_v56  ;;  %v1942_v5 = vmul.f32 %v11023_v59, %v11813_v25  ;;  %v1945_v10 = vmul.f32 %v11023_v59, %v1917_v36  ;;  %v10201_v28 = vld [vmem:[%s13781_s1 + $0x8] sm:$0xf] }
 0x924   : > { %v1944_v15 = vmul.f32 %v11023_v59, %v11823_v35  ;;  %v1947_v16 = vmul.f32 %v11023_v59, %v1921_v24  ;;  %v1946_v19 = vmul.f32 %v11023_v59, %v1919_v44  ;;  %v1948_v25 = vmul.f32 %v11023_v59, %v11837_v52 }
 0x925   : > { %10562 = vmatpush3.msk.msra.mxu0 %vm2335_vm6, %v1941_v60  ;;  %10572 = vmatpush3.msk.msra.mxu1 %vm2335_vm6, %v1943_v61  ;;  %v2112_v6 = vpop.permute.xlu1 %2111 }
 0x926   : > { %2129 = vst.msk [vmem:[#allocation2 + $0x31] sm:$0x1] %vm13797_vm4, %v2112_v6  ;;  %10564 = vmatmul.mubr.msk.f32.vlgmr.msra.gmra.mrb[26].mxu0 %vm13821_vm7, %v2323_v4  ;;  %10566 = vmatprep.subr.mxu0 %v11208_v0 }
 0x927   : > { %10574 = vmatmul.mubr.msk.f32.vlgmr.msra.gmra.mrb[22].mxu1 %vm13821_vm7, %v2325_v9  ;;  %10581 = vmatprep.subr.mxu1 %v11208_v0 }
 0x928   : > { %10567 = vmatpush3.msk.msra.mxu0 %vm2335_vm6, %v1942_v5  ;;  %10582 = vmatpush3.msk.msra.mxu1 %vm2335_vm6, %v1945_v10 }
 0x929   : > { %v2327_v11 = vld [vmem:[#allocation2 + $0x20] sm:$0xff]  ;;  %10568 = vmatprep.mubr.msk.f32.mxu0 %vm11209_vm0, %v11208_v0  ;;  %10576 = vmatprep.subr.mxu0 %v11208_v0  ;;  %v2176_v13 = vpop.permute.xlu1 %2175 }
 0x92a   : > { %10583 = vmatprep.mubr.msk.f32.mxu1 %vm11209_vm0, %v11208_v0  ;;  %10591 = vmatprep.subr.mxu1 %v11208_v0  ;;  %2193 = vst.msk [vmem:[#allocation2 + $0x33] sm:$0x1] %vm13797_vm4, %v2176_v13 }
 0x92b   : > { %10569 = vmatmul.mubr.msk.f32.vlgmr.msra.gmra.mrb[28].mxu0 %vm13821_vm7, %v2324_v14  ;;  %10584 = vmatmul.mubr.msk.f32.vlgmr.msra.gmra.mrb[28].mxu1 %vm13821_vm7, %v2327_v11 }
 0x92c   : > { %10577 = vmatpush3.msk.msra.mxu0 %vm2335_vm6, %v1944_v15  ;;  %10592 = vmatpush3.msk.msra.mxu1 %vm2335_vm6, %v1947_v16 }
 0x92d   : > { %10578 = vmatprep.mubr.msk.f32.mxu0 %vm11209_vm0, %v11208_v0  ;;  %10586 = vmatprep.subr.mxu0 %v11208_v0  ;;  %v2240_v17 = vpop.permute.xlu1 %2239 }
 0x92e   : > { %2257 = vst.msk [vmem:[#allocation2 + $0x35] sm:$0x1] %vm13797_vm4, %v2240_v17  ;;  %10593 = vmatprep.mubr.msk.f32.mxu1 %vm11209_vm0, %v11208_v0  ;;  %10601 = vmatprep.subr.bf16.mxu1 %v11208_v0 }
 0x92f   : > { %10579 = vmatmul.mubr.msk.f32.vlgmr.msra.gmra.mrb[30].mxu0 %vm13821_vm7, %v2326_v18 }
 0x930   : > { %10587 = vmatpush3.msk.msra.mxu0 %vm2335_vm6, %v1946_v19  ;;  %10588 = vmatprep.mubr.msk.f32.mxu0 %vm11209_vm0, %v11208_v0 }
 0x931   : > { %10596 = vmatprep.subr.mxu0 %v11208_v0  ;;  %v2304_v20 = vpop.permute.xlu1 %2303 }
 0x932   : > { %2321 = vst.msk [vmem:[#allocation2 + $0x37] sm:$0x1] %vm13797_vm4, %v2304_v20  ;;  %vm13804_vm4 = vcmask 121938  }
 0x933   : > { %10589 = vmatmul.mubr.msk.f32.vlgmr.msra.gmra.mrb[32].mxu0 %vm13821_vm7, %v2328_v22 }
 0x934   : > { %10597 = vmatpush3.msk.msra.mxu0 %vm2335_vm6, %v1948_v25  ;;  %10598 = vmatprep.mubr.msk.f32.mxu0 %vm11209_vm0, %v11208_v0 }
 0x935   : > { %10607 = vmatprep.subr.bf16.mxu0 %v11208_v0 }
 0x937   : > { %10599 = vmatmul.mubr.msk.f32.vlgmr.msra.gmra.mrb[34].mxu0 %vm13821_vm7, %v2330_v27 }
 0x938   : > { %10608 = vmatpush3.bf16.msra.mxu0 %v11337_v3  ;;  %10609 = vmatprep.mubr.msk.bf16.mxu0 %vm11209_vm0, %v11208_v0 }
 0x939   : > { %v2329_v29 = vld [vmem:[#allocation2 + $0x30] sm:$0xff]  ;;  %10618 = vmatprep.subr.mxu0 %v11208_v0 }
 0x93a   : > { %10594 = vmatmul.mubr.msk.f32.vlgmr.msra.gmra.mrb[30].mxu1 %vm13821_vm7, %v2329_v29 }
 0x93b   : > { %10610 = vmatmul.mubr.msk.bf16.vlgmr.msra.gmra.mrb[36].mxu0 %vm251_vm2, %v10201_v28  ;;  %10603 = vmatprep.mubr.msk.bf16.mxu1 %vm11209_vm0, %v11208_v0 }
 0x93c   : > { %10620 = vmatprep.mubr.msk.f32.mxu0 %vm11209_vm0, %v11208_v0 }
 0x9f9   : > { %v11901_v30 = vpop.f32.mrb[26].mxu0 }
 0x9fa   : > { %v2557_v31 = vpop.f32.mrb[22].mxu1  ;;  %v10565_v33 = vpop.f32.mrb[27].mxu0 }
 0x9fb   : > { %v10575_v34 = vpop.f32.mrb[23].mxu1  ;;  %v2952_v39 = vrot.slane %v2557_v31, 6 }
 0x9fe   : > { %v2481_v56 = vpop.f32.mrb[28].mxu0  ;;  %v2709_v35 = vpop.f32.mrb[28].mxu1 }
 0x9ff   : > { %v2949_v37 = vrot.slane %v2481_v56, 7  ;;  %v10570_v38 = vpop.f32.mrb[29].mxu0  ;;  %v10585_v47 = vpop.f32.mrb[29].mxu1  ;;  %v2958_v63 = vrot.slane %v2709_v35, 4 }
 0xa01   : > { %v3036_v40 = vsel %vm13800_vm8, %v2949_v37, %v11901_v30  ;;  %v3020_v41 = vsel %vm13802_vm9, %v2949_v37, %v11901_v30  ;;  %v3004_v36 = vsel %vm13801_vm10, %v2949_v37, %v11901_v30  ;;  %v2988_v42 = vsel %vm13799_vm11, %v2949_v37, %v11901_v30 }
 0xa02   : > { %v2633_v62 = vpop.f32.mrb[30].mxu0  ;;  %v3037_v23 = vsel %vm13798_vm12, %v2952_v39, %v3036_v40  ;;  %v3021_v1 = vsel %vm13800_vm8, %v2952_v39, %v3020_v41  ;;  %v3005_v7 = vsel %vm13802_vm9, %v2952_v39, %v3004_v36  ;;  %v2989_v24 = vsel %vm13801_vm10, %v2952_v39, %v2988_v42 }
 0xa03   : > { %v2955_v44 = vrot.slane %v2633_v62, 5  ;;  %3042 = vrot.lane.b32.xlu0 %v3037_v23, %s13809_s29  ;;  %v10580_v45 = vpop.f32.mrb[31].mxu0  ;;  %v2972_v21 = vsel %vm2953_vm14, %v2949_v37, %v11901_v30  ;;  %v11920_v48 = vsel %vm13798_vm12, %v2949_v37, %v11901_v30  ;;  %v3068_v49 = vsel %vm2950_vm13, %v2952_v39, %v2949_v37 }
 0xa04   : > { %v2973_v51 = vsel %vm13799_vm11, %v2952_v39, %v2972_v21  ;;  %v2951_v52 = vsel %vm2950_vm13, %v2949_v37, %v11901_v30 }
 0xa05   : > { %v3022_v54 = vsel %vm13798_vm12, %v2955_v44, %v3021_v1  ;;  %v3006_v53 = vsel %vm13800_vm8, %v2955_v44, %v3005_v7  ;;  %v2990_v12 = vsel %vm13802_vm9, %v2955_v44, %v2989_v24  ;;  %v2974_v43 = vsel %vm13801_vm10, %v2955_v44, %v2973_v51 }
 0xa06   : > { %v2785_v26 = vpop.f32.mrb[32].mxu0  ;;  %v3007_v50 = vsel %vm13798_vm12, %v2958_v63, %v3006_v53  ;;  %v2991_v55 = vsel %vm13800_vm8, %v2958_v63, %v2990_v12  ;;  %v2975_v57 = vsel %vm13802_vm9, %v2958_v63, %v2974_v43  ;;  %v3038_v46 = vsel %vm2950_vm13, %v2958_v63, %v2955_v44 }
 0xa07   : > { %v2961_v59 = vrot.slane %v2785_v26, 3  ;;  %3026 = vrot.lane.b32.xlu0 %v3022_v54, %s13793_s17  ;;  %v10590_v60 = vpop.f32.mrb[33].mxu0  ;;  %v3053_v61 = vsel %vm2950_vm13, %v2955_v44, %v2952_v39  ;;  %v3069_v4 = vsel %vm2953_vm14, %v2955_v44, %v3068_v49  ;;  %v2954_v6 = vsel %vm2953_vm14, %v2952_v39, %v2951_v52 }
 0xa08   : > { %v3054_v9 = vsel %vm2953_vm14, %v2958_v63, %v3053_v61  ;;  %v3070_v5 = vsel %vm13799_vm11, %v2958_v63, %v3069_v4  ;;  %v2957_v10 = vsel %vm13799_vm11, %v2955_v44, %v2954_v6 }
 0xa09   : > { %v2992_v11 = vsel %vm13798_vm12, %v2961_v59, %v2991_v55  ;;  %v2976_v13 = vsel %vm13800_vm8, %v2961_v59, %v2975_v57  ;;  %v3023_v14 = vsel %vm2950_vm13, %v2961_v59, %v2958_v63  ;;  %v3039_v15 = vsel %vm2953_vm14, %v2961_v59, %v3038_v46 }
 0xa0a   : > { %v2937_v16 = vpop.f32.mrb[34].mxu0  ;;  %v3055_v17 = vsel %vm13799_vm11, %v2961_v59, %v3054_v9  ;;  %v3071_v18 = vsel %vm13801_vm10, %v2961_v59, %v3070_v5  ;;  %v2960_v19 = vsel %vm13801_vm10, %v2958_v63, %v2957_v10 }
 0xa0b   : > { %v2967_v20 = vrot.slane %v2937_v16, 1  ;;  %3010 = vrot.lane.b32.xlu0 %v3007_v50, %s13789_s18  ;;  %v10600_v22 = vpop.f32.mrb[35].mxu0  ;;  %v2963_v25 = vsel %vm13802_vm9, %v2961_v59, %v2960_v19 }
 0xa0d   : > { %2980 = vrot.lane.b32.xlu1 %v2967_v20, %s13791_s19  ;;  %v2861_v27 = vpop.f32.mrb[30].mxu1 }
 0xa0e   : > { %v2964_v28 = vrot.slane %v2861_v27, 2  ;;  %v10595_v29 = vpop.f32.mrb[31].mxu1  ;;  %v3183_v31 = vpop.f32.mrb[36].mxu0 }
 0xa0f   : > { %2994 = vrot.lane.b32.xlu0 %v2992_v11, %s13787_s20  ;;  %v3190_v33 = vcombine.high %v3183_v31, %v3183_v31  ;;  %v3197_v34 = vrot.slane %v3183_v31, %v11411_v2  ;;  %v10611_v56 = vpop.f32.mrb[37].mxu0 }
 0xa10   : > { %v2993_v35 = vsel %vm2950_vm13, %v2967_v20, %v2964_v28  ;;  %v2977_v37 = vsel %vm13798_vm12, %v2964_v28, %v2976_v13  ;;  %v3008_v38 = vsel %vm2950_vm13, %v2964_v28, %v2961_v59  ;;  %v3024_v47 = vsel %vm2953_vm14, %v2964_v28, %v3023_v14  ;;  %v3186_v39 = vpop.f32.mrb[38].mxu0 }
 0xa11   : > { %v3204_v40 = vrot.slane %v3190_v33, %v11411_v2  ;;  %v3205_v41 = vcombine.high %v3197_v34, %v3197_v34  ;;  %v3213_v36 = vrot.slane %v3197_v34, %v11411_v2  ;;  %2996 = vrot.lane.b32.xlu1 %v2993_v35, %s13787_s20  ;;  %v3009_v42 = vsel %vm2953_vm14, %v2967_v20, %v3008_v38  ;;  %v10612_v62 = vpop.f32.mrb[39].mxu0  ;;  %s11226_s20 = smov 112  }
 0xa12   : > { %v3025_v23 = vsel %vm13799_vm11, %v2967_v20, %v3024_v47  ;;  %v3040_v1 = vsel %vm13799_vm11, %v2964_v28, %v3039_v15  ;;  %v3056_v7 = vsel %vm13801_vm10, %v2964_v28, %v3055_v17  ;;  %v3072_v24 = vsel %vm13802_vm9, %v2964_v28, %v3071_v18 }
 0xa13   : > { %v3206_v44 = vcombine.high %v3204_v40, %v3204_v40  ;;  %v3220_v45 = vrot.slane %v3204_v40, %v11411_v2  ;;  %v3227_v21 = vrot.slane %v3205_v41, %v11411_v2  ;;  %v3235_v49 = vcombine.high %v3213_v36, %v3213_v36  ;;  %3248 = vst.msk [vmem:[#allocation3] sm:$0x1] %vm3247_vm15, %v3213_v36 }
 0xa14   : > { %2978 = vrot.lane.b32.xlu0 %v2977_v37, %s13791_s19  ;;  %v3259_v63 = vrot.slane %v3213_v36, %v11414_v8  ;;  %v3041_v51 = vsel %vm13801_vm10, %v2967_v20, %v3040_v1  ;;  %v11972_v52 = vsel %vm13802_vm9, %v2967_v20, %v3056_v7  ;;  %v11975_v54 = vsel %vm13800_vm8, %v2967_v20, %v3072_v24  ;;  %s13811_s19 = smov 30  }
 0xa15   : > { %v3234_v53 = vrot.slane %v3206_v44, %v11411_v2  ;;  %3249 = vst.msk [vmem:[#allocation3 + $0x8] sm:$0x1] %vm3247_vm15, %v3227_v21  ;;  %3250 = vst.msk [vmem:[#allocation3 + $0x10] sm:$0x1] %vm3247_vm15, %v3235_v49  ;;  %3012 = vrot.lane.b32.xlu1 %v3009_v42, %s13789_s18  ;;  %v3237_v12 = vcombine.high %v3227_v21, %v3227_v21  ;;  %v3236_v43 = vcombine.high %v3220_v45, %v3220_v45  ;;  %s11227_s18 = smov 96   ;;  %vm13818_vm11 = vcmask 162939  }
 0xa16   : > { %3252 = vst.msk [vmem:[#allocation3 + $0x20] sm:$0x1] %vm3247_vm15, %v3220_v45  ;;  %v2966_v26 = vsel %vm13800_vm8, %v2964_v28, %v2963_v25  ;;  %v3263_v57 = vrot.slane %v3227_v21, %v11414_v8  ;;  %v3267_v46 = vrot.slane %v3235_v49, %v11414_v8  ;;  %v3275_v59 = vrot.slane %v3220_v45, %v11414_v8 }
 0xa17   : > { %3253 = vst.msk [vmem:[#allocation3 + $0x28] sm:$0x1] %vm3247_vm15, %v3234_v53  ;;  %v3238_v50 = vcombine.high %v3234_v53, %v3234_v53  ;;  %v2969_v55 = vsel %vm13798_vm12, %v2967_v20, %v2966_v26  ;;  %3251 = vst.msk [vmem:[#allocation3 + $0x18] sm:$0x1] %vm3247_vm15, %v3237_v12  ;;  %v3271_v60 = vrot.slane %v3237_v12, %v11414_v8  ;;  %vm13819_vm12 = vcmask 115792  }
 0xa18   : > { %3288 = vrot.lane.b32.xlu0 %v3259_v63, %s11224_s26  ;;  %3254 = vst.msk [vmem:[#allocation3 + $0x30] sm:$0x1] %vm3247_vm15, %v3236_v43  ;;  %v3279_v61 = vrot.slane %v3234_v53, %v11414_v8  ;;  %v3283_v4 = vrot.slane %v3236_v43, %v11414_v8  ;;  %vm13817_vm8 = vcmask 157816   ;;  %vm13808_vm10 = vcmask 203940  }
 0xa19   : > { %2971 = vst.msk [vmem:[#allocation4] sm:$0xff] %vm13821_vm7, %v2969_v55  ;;  %3028 = vrot.lane.b32.xlu1 %v3025_v23, %s13793_s17  ;;  %v3287_v6 = vrot.slane %v3238_v50, %v11414_v8  ;;  %s13822_s17 = smov 35   ;;  %vm13806_vm9 = vcmask 244941  }
 0xa1a   : > { %3255 = vst.msk [vmem:[#allocation3 + $0x38] sm:$0x1] %vm3247_vm15, %v3238_v50 }
 0xa1c   : > { %3352 = vrot.lane.b32.xlu0 %v3259_v63, %s13824_s28 }
 0xa1d   : > { %3044 = vrot.lane.b32.xlu1 %v3041_v51, %s13809_s29  ;;  %s13826_s29 = smov 32  }
 0xa20   : > { %3290 = vrot.lane.b32.xlu0 %v3263_v57, %s11224_s26 }
 0xa21   : > { %3320 = vrot.lane.b32.xlu1 %v3259_v63, %s11226_s20 }
 0xa24   : > { %3354 = vrot.lane.b32.xlu0 %v3263_v57, %s13824_s28 }
 0xa25   : > { %3384 = vrot.lane.b32.xlu1 %v3259_v63, %s11227_s18 }
 0xa28   : > { %3292 = vrot.lane.b32.xlu0 %v3267_v46, %s11224_s26 }
 0xa29   : > { %3322 = vrot.lane.b32.xlu1 %v3263_v57, %s11226_s20 }
 0xa2c   : > { %3356 = vrot.lane.b32.xlu0 %v3267_v46, %s13824_s28 }
 0xa2d   : > { %3386 = vrot.lane.b32.xlu1 %v3263_v57, %s11227_s18 }
 0xa30   : > { %3296 = vrot.lane.b32.xlu0 %v3275_v59, %s11224_s26 }
 0xa31   : > { %3324 = vrot.lane.b32.xlu1 %v3267_v46, %s11226_s20 }
 0xa34   : > { %3360 = vrot.lane.b32.xlu0 %v3275_v59, %s13824_s28 }
 0xa35   : > { %3388 = vrot.lane.b32.xlu1 %v3267_v46, %s11227_s18 }
 0xa38   : > { %3294 = vrot.lane.b32.xlu0 %v3271_v60, %s11224_s26 }
 0xa39   : > { %3328 = vrot.lane.b32.xlu1 %v3275_v59, %s11226_s20 }
 0xa3c   : > { %3358 = vrot.lane.b32.xlu0 %v3271_v60, %s13824_s28 }
 0xa3d   : > { %3392 = vrot.lane.b32.xlu1 %v3275_v59, %s11227_s18 }
 0xa40   : > { %3298 = vrot.lane.b32.xlu0 %v3279_v61, %s11224_s26 }
 0xa41   : > { %3326 = vrot.lane.b32.xlu1 %v3271_v60, %s11226_s20 }
 0xa44   : > { %3362 = vrot.lane.b32.xlu0 %v3279_v61, %s13824_s28 }
 0xa45   : > { %3390 = vrot.lane.b32.xlu1 %v3271_v60, %s11227_s18 }
 0xa48   : > { %3300 = vrot.lane.b32.xlu0 %v3283_v4, %s11224_s26 }
 0xa49   : > { %3330 = vrot.lane.b32.xlu1 %v3279_v61, %s11226_s20 }
 0xa4c   : > { %3364 = vrot.lane.b32.xlu0 %v3283_v4, %s13824_s28 }
 0xa4d   : > { %3394 = vrot.lane.b32.xlu1 %v3279_v61, %s11227_s18  ;;  %v11140_v61 = vld [vmem:[%s11329_s13] sm:$0xff] }
 0xa50   : > { %3302 = vrot.lane.b32.xlu0 %v3287_v6, %s11224_s26 }
 0xa51   : > { %3332 = vrot.lane.b32.xlu1 %v3283_v4, %s11226_s20 }
 0xa54   : > { %3366 = vrot.lane.b32.xlu0 %v3287_v6, %s13824_s28 }
 0xa55   : > { %3396 = vrot.lane.b32.xlu1 %v3283_v4, %s11227_s18 }
 0xa58   : > { %3058 = vrot.lane.b32.xlu0 %v11920_v48, %s13811_s19 }
 0xa59   : > { %3334 = vrot.lane.b32.xlu1 %v3287_v6, %s11226_s20 }
 0xa5c   : > { %3074 = vrot.lane.b32.xlu0 %v11901_v30, %s13822_s17 }
 0xa5d   : > { %3398 = vrot.lane.b32.xlu1 %v3287_v6, %s11227_s18 }
 0xa61   : > { %3060 = vrot.lane.b32.xlu1 %v11972_v52, %s13811_s19  ;;  %s13839_s19 = smov 24  }
 0xa65   : > { %3076 = vrot.lane.b32.xlu1 %v11975_v54, %s13822_s17  ;;  %s13831_s17 = smov 8  }
 0xa75   : > { %v3043_v9 = vpop.permute.xlu0 %3042 }
 0xa79   : > { %v3027_v5 = vpop.permute.xlu0 %3026 }
 0xa7d   : > { %v3011_v10 = vpop.permute.xlu0 %3010 }
 0xa7f   : > { %v2981_v11 = vpop.permute.xlu1 %2980 }
 0xa80   : > { %2987 = vst.msk [vmem:[#allocation4 + $0x7] sm:$0x1] %vm13803_vm3, %v2981_v11  ;;  %vm13807_vm3 = vcmask 199840  }
 0xa81   : > { %v2995_v48 = vpop.permute.xlu0 %2994 }
 0xa83   : > { %v2997_v13 = vpop.permute.xlu1 %2996 }
 0xa86   : > { %v2979_v30 = vpop.permute.xlu0 %2978 }
 0xa87   : > { %2985 = vst.msk [vmem:[#allocation4 - $0x1] sm:$0xfe] %vm13820_vm5, %v2979_v30  ;;  %v3013_v14 = vpop.permute.xlu1 %3012 }
 0xa88   : > { %3001 = vst.msk [vmem:[#allocation4 - $0x2] sm:$0xfc] %vm13804_vm4, %v2995_v48  ;;  %vm13805_vm4 = vcmask 241864  }
 0xa89   : > { %3003 = vst.msk [vmem:[#allocation4 + $0x6] sm:$0x3] %vm13819_vm12, %v2997_v13 }
 0xa8a   : > { %3017 = vst.msk [vmem:[#allocation4 - $0x3] sm:$0xf8] %vm13818_vm11, %v3011_v10  ;;  %v3289_v15 = vpop.permute.xlu0 %3288 }
 0xa8b   : > { %3019 = vst.msk [vmem:[#allocation4 + $0x5] sm:$0x7] %vm13817_vm8, %v3013_v14  ;;  %v3029_v16 = vpop.permute.xlu1 %3028  ;;  %vm13855_vm8 = vcmask 1043459  }
 0xa8c   : > { %3033 = vst.msk [vmem:[#allocation4 - $0x4] sm:$0xf0] %vm13808_vm10, %v3027_v5  ;;  %vm13813_vm10 = vcmask 325912   ;;  %v10198_v5 = vld [vmem:[%s13784_s4 + $0x4] sm:$0xf]  ;;  %vm13857_vm12 = vmmov %vm13855_vm8 }
 0xa8d   : > { %3312 = vst.msk [vmem:[#allocation3 + $0x1] sm:$0x1] %vm3247_vm15, %v3289_v15  ;;  %v10219_v15 = vld [vmem:[%s13782_s2 + $0x8] sm:$0xf] }
 0xa8e   : > { %3049 = vst.msk [vmem:[#allocation4 - $0x5] sm:$0xe0] %vm13806_vm9, %v3043_v9  ;;  %v3353_v17 = vpop.permute.xlu0 %3352  ;;  %vm13815_vm9 = vcmask 326943  }
 0xa8f   : > { %3035 = vst.msk [vmem:[#allocation4 + $0x4] sm:$0xf] %vm13807_vm3, %v3029_v16  ;;  %v3045_v18 = vpop.permute.xlu1 %3044  ;;  %vm13814_vm3 = vcmask 283888  }
 0xa90   : > { %3376 = vst.msk [vmem:[#allocation3 + $0x3] sm:$0x1] %vm3247_vm15, %v3353_v17 }
 0xa91   : > { %3051 = vst.msk [vmem:[#allocation4 + $0x3] sm:$0x1f] %vm13805_vm4, %v3045_v18  ;;  %vm13816_vm4 = vcmask 285942  }
 0xa92   : > { %v3291_v19 = vpop.permute.xlu0 %3290 }
 0xa93   : > { %3313 = vst.msk [vmem:[#allocation3 + $0x9] sm:$0x1] %vm3247_vm15, %v3291_v19  ;;  %v3321_v20 = vpop.permute.xlu1 %3320 }
 0xa94   : > { %3344 = vst.msk [vmem:[#allocation3 + $0x2] sm:$0x1] %vm3247_vm15, %v3321_v20 }
 0xa96   : > { %v3355_v22 = vpop.permute.xlu0 %3354 }
 0xa97   : > { %3377 = vst.msk [vmem:[#allocation3 + $0xb] sm:$0x1] %vm3247_vm15, %v3355_v22  ;;  %v3385_v25 = vpop.permute.xlu1 %3384 }
 0xa98   : > { %3408 = vst.msk [vmem:[#allocation3 + $0x4] sm:$0x1] %vm3247_vm15, %v3385_v25 }
 0xa9a   : > { %v3293_v27 = vpop.permute.xlu0 %3292 }
 0xa9b   : > { %3314 = vst.msk [vmem:[#allocation3 + $0x11] sm:$0x1] %vm3247_vm15, %v3293_v27  ;;  %v3323_v28 = vpop.permute.xlu1 %3322 }
 0xa9c   : > { %3345 = vst.msk [vmem:[#allocation3 + $0xa] sm:$0x1] %vm3247_vm15, %v3323_v28 }
 0xa9e   : > { %v3357_v29 = vpop.permute.xlu0 %3356 }
 0xa9f   : > { %3378 = vst.msk [vmem:[#allocation3 + $0x13] sm:$0x1] %vm3247_vm15, %v3357_v29  ;;  %v12057_v31 = vld [vmem:[#allocation3] sm:$0x1f]  ;;  %v3387_v33 = vpop.permute.xlu1 %3386 }
 0xaa0   : > { %3409 = vst.msk [vmem:[#allocation3 + $0xc] sm:$0x1] %vm3247_vm15, %v3387_v33  ;;  %3424 = vxpose.xlu0.b32.start.end [1/1] (short) (narrow) %v12057_v31, 8 }
 0xaa2   : > { %v3297_v34 = vpop.permute.xlu0 %3296 }
 0xaa3   : > { %3316 = vst.msk [vmem:[#allocation3 + $0x21] sm:$0x1] %vm3247_vm15, %v3297_v34  ;;  %v3325_v56 = vpop.permute.xlu1 %3324 }
 0xaa4   : > { %3346 = vst.msk [vmem:[#allocation3 + $0x12] sm:$0x1] %vm3247_vm15, %v3325_v56 }
 0xaa6   : > { %v3361_v35 = vpop.permute.xlu0 %3360 }
 0xaa7   : > { %3380 = vst.msk [vmem:[#allocation3 + $0x23] sm:$0x1] %vm3247_vm15, %v3361_v35  ;;  %v3417_v37 = vld [vmem:[#allocation3 + $0x8] sm:$0x1f]  ;;  %v3389_v38 = vpop.permute.xlu1 %3388 }
 0xaa8   : > { %3410 = vst.msk [vmem:[#allocation3 + $0x14] sm:$0x1] %vm3247_vm15, %v3389_v38  ;;  %10619 = vmatpush3.msk.msra.mxu0 %vm2335_vm6, %v3417_v37  ;;  %3532 = vxpose.xlu1.b32.start.end [1/1] (short) (narrow) %v3417_v37, 8 }
 0xaa9   : > { %10628 = vmatprep.subr.mxu0 %v11208_v0 }
 0xaaa   : > { %v3295_v47 = vpop.permute.xlu0 %3294 }
 0xaab   : > { %3315 = vst.msk [vmem:[#allocation3 + $0x19] sm:$0x1] %vm3247_vm15, %v3295_v47  ;;  %v3329_v39 = vpop.permute.xlu1 %3328 }
 0xaac   : > { %3348 = vst.msk [vmem:[#allocation3 + $0x22] sm:$0x1] %vm3247_vm15, %v3329_v39 }
 0xaae   : > { %v3359_v40 = vpop.permute.xlu0 %3358 }
 0xaaf   : > { %3379 = vst.msk [vmem:[#allocation3 + $0x1b] sm:$0x1] %vm3247_vm15, %v3359_v40  ;;  %v12070_v41 = vld [vmem:[#allocation3 + $0x10] sm:$0x1f]  ;;  %v3393_v36 = vpop.permute.xlu1 %3392 }
 0xab0   : > { %3412 = vst.msk [vmem:[#allocation3 + $0x24] sm:$0x1] %vm3247_vm15, %v3393_v36  ;;  %3640 = vxpose.xlu0.b32.start.end [1/1] (short) (narrow) %v12070_v41, 8 }
 0xab2   : > { %v3299_v42 = vpop.permute.xlu0 %3298 }
 0xab3   : > { %3317 = vst.msk [vmem:[#allocation3 + $0x29] sm:$0x1] %vm3247_vm15, %v3299_v42  ;;  %v3327_v62 = vpop.permute.xlu1 %3326 }
 0xab4   : > { %3347 = vst.msk [vmem:[#allocation3 + $0x1a] sm:$0x1] %vm3247_vm15, %v3327_v62 }
 0xab6   : > { %v3363_v23 = vpop.permute.xlu0 %3362 }
 0xab7   : > { %3381 = vst.msk [vmem:[#allocation3 + $0x2b] sm:$0x1] %vm3247_vm15, %v3363_v23  ;;  %v12077_v1 = vld [vmem:[#allocation3 + $0x20] sm:$0x1f]  ;;  %v3391_v7 = vpop.permute.xlu1 %3390 }
 0xab8   : > { %3411 = vst.msk [vmem:[#allocation3 + $0x1c] sm:$0x1] %vm3247_vm15, %v3391_v7  ;;  %3856 = vxpose.xlu0.b32.start.end [1/1] (short) (narrow) %v12077_v1, 8 }
 0xaba   : > { %v3301_v24 = vpop.permute.xlu0 %3300 }
 0xabb   : > { %3318 = vst.msk [vmem:[#allocation3 + $0x31] sm:$0x1] %vm3247_vm15, %v3301_v24  ;;  %v3331_v44 = vpop.permute.xlu1 %3330 }
 0xabc   : > { %3349 = vst.msk [vmem:[#allocation3 + $0x2a] sm:$0x1] %vm3247_vm15, %v3331_v44 }
 0xabe   : > { %v3365_v45 = vpop.permute.xlu0 %3364 }
 0xabf   : > { %3382 = vst.msk [vmem:[#allocation3 + $0x33] sm:$0x1] %vm3247_vm15, %v3365_v45  ;;  %v3419_v21 = vld [vmem:[#allocation3 + $0x18] sm:$0x1f]  ;;  %v3395_v49 = vpop.permute.xlu1 %3394 }
 0xac0   : > { %3413 = vst.msk [vmem:[#allocation3 + $0x2c] sm:$0x1] %vm3247_vm15, %v3395_v49  ;;  %3748 = vxpose.xlu0.b32.start.end [1/1] (short) (narrow) %v3419_v21, 8 }
 0xac2   : > { %v3303_v63 = vpop.permute.xlu0 %3302 }
 0xac3   : > { %3319 = vst.msk [vmem:[#allocation3 + $0x39] sm:$0x1] %vm3247_vm15, %v3303_v63  ;;  %v3333_v51 = vpop.permute.xlu1 %3332 }
 0xac4   : > { %3350 = vst.msk [vmem:[#allocation3 + $0x32] sm:$0x1] %vm3247_vm15, %v3333_v51 }
 0xac6   : > { %v3367_v52 = vpop.permute.xlu0 %3366 }
 0xac7   : > { %3383 = vst.msk [vmem:[#allocation3 + $0x3b] sm:$0x1] %vm3247_vm15, %v3367_v52  ;;  %v3421_v54 = vld [vmem:[#allocation3 + $0x28] sm:$0x1f]  ;;  %v3397_v53 = vpop.permute.xlu1 %3396 }
 0xac8   : > { %3414 = vst.msk [vmem:[#allocation3 + $0x34] sm:$0x1] %vm3247_vm15, %v3397_v53  ;;  %3964 = vxpose.xlu0.b32.start.end [1/1] (short) (narrow) %v3421_v54, 8 }
 0xaca   : > { %v3059_v12 = vpop.permute.xlu0 %3058 }
 0xacb   : > { %3065 = vst.msk [vmem:[#allocation4 - $0x6] sm:$0xc0] %vm13816_vm4, %v3059_v12  ;;  %v3335_v43 = vpop.permute.xlu1 %3334 }
 0xacc   : > { %3351 = vst.msk [vmem:[#allocation3 + $0x3a] sm:$0x1] %vm3247_vm15, %v3335_v43 }
 0xace   : > { %v3075_v26 = vpop.permute.xlu0 %3074 }
 0xacf   : > { %3081 = vst.msk [vmem:[#allocation4 - $0x7] sm:$0x80] %vm13815_vm9, %v3075_v26  ;;  %v3422_v50 = vld [vmem:[#allocation3 + $0x30] sm:$0x1f]  ;;  %v3399_v55 = vpop.permute.xlu1 %3398  ;;  %vm13853_vm9 = vcmask 1046534  }
 0xad0   : > { %3415 = vst.msk [vmem:[#allocation3 + $0x3c] sm:$0x1] %vm3247_vm15, %v3399_v55  ;;  %4072 = vxpose.xlu1.b32.start.end [1/1] (short) (narrow) %v3422_v50, 8  ;;  %vm13860_vm5 = vmmov %vm13853_vm9 }
 0xad3   : > { %v3061_v57 = vpop.permute.xlu1 %3060 }
 0xad4   : > { %3067 = vst.msk [vmem:[#allocation4 + $0x2] sm:$0x3f] %vm13814_vm3, %v3061_v57  ;;  %vm13852_vm3 = vcmask 1044484  }
 0xad5   : > { %vm13856_vm11 = vmmov %vm13852_vm3 }
 0xad7   : > { %v3423_v46 = vld [vmem:[#allocation3 + $0x38] sm:$0x1f]  ;;  %v3077_v59 = vpop.permute.xlu1 %3076 }
 0xad8   : > { %3083 = vst.msk [vmem:[#allocation4 + $0x1] sm:$0x7f] %vm13813_vm10, %v3077_v59  ;;  %4180 = vxpose.xlu0.b32.start.end [1/1] (short) (narrow) %v3423_v46, 8  ;;  %vm13851_vm10 = vcmask 1045509  }
 0xad9   : > { %vm13854_vm4 = vmmov %vm13851_vm10 }
 0xadf   : > { %v3084_v60 = vld [vmem:[#allocation4] sm:$0xff] }
 0xae0   : > { %v3087_v4 = vsub.f32 %v11140_v61, %v3084_v60 }
 0xae2   : > { %v3088_v6 = vpack.c.bf16 %v3087_v4, %v3087_v4 }
 0xae4   : > { %v3100_v9 = vsel %vm255_vm1, %v3088_v6, 0 }
 0xae5   : > { %10602 = vmatpush3.bf16.msra.mxu1 %v3100_v9 }
 0xae6   : > { %10613 = vmatprep.subr.mxu1 %v11208_v0 }
 0xae8   : > { %10604 = vmatmul.mubr.msk.bf16.vlgmr.msra.gmra.mrb[32].mxu1 %vm251_vm2, %v10198_v5 }
 0xae9   : > { %10614 = vmatpush3.msk.msra.mxu1 %vm2335_vm6, %v12057_v31  ;;  %10615 = vmatprep.mubr.msk.f32.mxu1 %vm11209_vm0, %v11208_v0 }
 0xaea   : > { %10623 = vmatprep.subr.mxu1 %v11208_v0 }
 0xaee   : > { %10967 = vset.pattern.permute.xlu1 %v11210_v32 }
 0xb20   : > { %v3440_v10 = vpop.trf.xlu0 }
 0xb21   : > { %10616 = vmatmul.mubr.msk.f32.vlgmr.msra.gmra.mrb[36].mxu1 %vm13821_vm7, %v3440_v10 }
 0xb22   : > { %10624 = vmatpush3.msk.msra.mxu1 %vm2335_vm6, %v12070_v41  ;;  %10625 = vmatprep.mubr.msk.f32.mxu1 %vm11209_vm0, %v11208_v0 }
 0xb23   : > { %10633 = vmatprep.subr.mxu1 %v11208_v0 }
 0xb28   : > { %v3548_v11 = vpop.trf.xlu1 }
 0xb29   : > { %10621 = vmatmul.mubr.msk.f32.vlgmr.msra.gmra.mrb[40].mxu0 %vm13821_vm7, %v3548_v11 }
 0xb2a   : > { %10629 = vmatpush3.msk.msra.mxu0 %vm2335_vm6, %v3419_v21  ;;  %10630 = vmatprep.mubr.msk.f32.mxu0 %vm11209_vm0, %v11208_v0  ;;  %v10220_v21 = vld [vmem:[%s13783_s3 + $0x10] sm:$0xff] }
 0xb2b   : > { %10638 = vmatprep.subr.mxu0 %v11208_v0 }
 0xb30   : > { %v3656_v32 = vpop.trf.xlu0 }
 0xb31   : > { %10626 = vmatmul.mubr.msk.f32.vlgmr.msra.gmra.mrb[38].mxu1 %vm13821_vm7, %v3656_v32 }
 0xb32   : > { %10634 = vmatpush3.msk.msra.mxu1 %vm2335_vm6, %v12077_v1  ;;  %10635 = vmatprep.mubr.msk.f32.mxu1 %vm11209_vm0, %v11208_v0 }
 0xb33   : > { %10643 = vmatprep.subr.mxu1 %v11208_v0 }
 0xb38   : > { %v3872_v48 = vpop.trf.xlu0 }
 0xb39   : > { %10636 = vmatmul.mubr.msk.f32.vlgmr.msra.gmra.mrb[40].mxu1 %vm13821_vm7, %v3872_v48 }
 0xb3a   : > { %10644 = vmatpush3.msk.msra.mxu1 %vm2335_vm6, %v3422_v50  ;;  %10645 = vmatprep.mubr.msk.f32.mxu1 %vm11209_vm0, %v11208_v0 }
 0xb3b   : > { %10653 = vmatprep.subr.bf16.mxu1 %v11208_v0 }
 0xb40   : > { %v3764_v13 = vpop.trf.xlu0 }
 0xb41   : > { %10631 = vmatmul.mubr.msk.f32.vlgmr.msra.gmra.mrb[42].mxu0 %vm13821_vm7, %v3764_v13 }
 0xb42   : > { %10639 = vmatpush3.msk.msra.mxu0 %vm2335_vm6, %v3421_v54  ;;  %10640 = vmatprep.mubr.msk.f32.mxu0 %vm11209_vm0, %v11208_v0 }
 0xb43   : > { %10648 = vmatprep.subr.mxu0 %v11208_v0 }
 0xb48   : > { %v3980_v30 = vpop.trf.xlu0 }
 0xb49   : > { %10641 = vmatmul.mubr.msk.f32.vlgmr.msra.gmra.mrb[44].mxu0 %vm13821_vm7, %v3980_v30 }
 0xb4a   : > { %10649 = vmatpush3.msk.msra.mxu0 %vm2335_vm6, %v3423_v46  ;;  %10650 = vmatprep.mubr.msk.f32.mxu0 %vm11209_vm0, %v11208_v0 }
 0xb4b   : > { %10659 = vmatprep.subr.mxu0 %v11208_v0 }
 0xb50   : > { %v4088_v14 = vpop.trf.xlu1 }
 0xb51   : > { %10646 = vmatmul.mubr.msk.f32.vlgmr.msra.gmra.mrb[42].mxu1 %vm13821_vm7, %v4088_v14 }
 0xb52   : > { %10654 = vmatpush3.bf16.msra.mxu1 %v11337_v3  ;;  %10655 = vmatprep.mubr.msk.bf16.mxu1 %vm11209_vm0, %v11208_v0 }
 0xb53   : > { %10669 = vmatprep.subr.mxu1 %v11208_v0 }
 0xb55   : > { %10656 = vmatmul.mubr.msk.bf16.vlgmr.msra.gmra.mrb[44].mxu1 %vm251_vm2, %v10219_v15 }
 0xb56   : > { %10671 = vmatprep.mubr.msk.f32.mxu1 %vm11209_vm0, %v11208_v0 }
 0xb58   : > { %v4196_v16 = vpop.trf.xlu0 }
 0xb59   : > { %10651 = vmatmul.mubr.msk.f32.vlgmr.msra.gmra.mrb[46].mxu0 %vm13821_vm7, %v4196_v16  ;;  %vm13861_vm7 = vmmov %vm13854_vm4 }
 0xb5a   : > { %10661 = vmatprep.mubr.msk.f32.mxu0 %vm11209_vm0, %v11208_v0 }
 0xbbb   : > { %v12154_v17 = vpop.f32.mrb[32].mxu1 }
 0xbbc   : > { %v10605_v18 = vpop.f32.mrb[33].mxu1 }
 0xbbd   : > { %v3139_v19 = vpop.f32.mrb[34].mxu1 }
 0xbbe   : > { %v10606_v20 = vpop.f32.mrb[35].mxu1 }
 0xbf4   : > { %v12156_v22 = vpop.f32.mrb[36].mxu1 }
 0xbf5   : > { %v4288_v25 = vsel %vm251_vm2, %v12156_v22, -inf  ;;  %v10617_v27 = vpop.f32.mrb[37].mxu1 }
 0xbf6   : > { %4289 = vmax.xlane.f32.xlu1 %v4288_v25 }
 0xbfc   : > { %v12160_v28 = vpop.f32.mrb[40].mxu0 }
 0xbfd   : > { %v4291_v29 = vsel %vm251_vm2, %v12160_v28, -inf  ;;  %v10622_v31 = vpop.f32.mrb[41].mxu0 }
 0xbfe   : > { %4292 = vmax.xlane.f32.xlu0 %v4291_v29 }
 0xc04   : > { %v12164_v33 = vpop.f32.mrb[38].mxu1 }
 0xc05   : > { %v4294_v34 = vsel %vm251_vm2, %v12164_v33, -inf  ;;  %v10627_v56 = vpop.f32.mrb[39].mxu1 }
 0xc06   : > { %4295 = vmax.xlane.f32.xlu1 %v4294_v34 }
 0xc0c   : > { %v12168_v35 = vpop.f32.mrb[40].mxu1 }
 0xc0d   : > { %v4300_v37 = vsel %vm251_vm2, %v12168_v35, -inf  ;;  %v10637_v38 = vpop.f32.mrb[41].mxu1 }
 0xc0e   : > { %4301 = vmax.xlane.f32.xlu0 %v4300_v37 }
 0xc14   : > { %v12172_v47 = vpop.f32.mrb[42].mxu0 }
 0xc15   : > { %v4297_v39 = vsel %vm251_vm2, %v12172_v47, -inf  ;;  %v10632_v40 = vpop.f32.mrb[43].mxu0 }
 0xc16   : > { %4298 = vmax.xlane.f32.xlu1 %v4297_v39 }
 0xc1c   : > { %v12176_v41 = vpop.f32.mrb[44].mxu0 }
 0xc1d   : > { %v4303_v36 = vsel %vm251_vm2, %v12176_v41, -inf  ;;  %v10642_v42 = vpop.f32.mrb[45].mxu0 }
 0xc1e   : > { %4304 = vmax.xlane.f32.xlu1 %v4303_v36 }
 0xc24   : > { %v4176_v62 = vpop.f32.mrb[42].mxu1 }
 0xc25   : > { %v10647_v23 = vpop.f32.mrb[43].mxu1  ;;  %v4306_v1 = vsel %vm251_vm2, %v4176_v62, -inf }
 0xc26   : > { %4307 = vmax.xlane.f32.xlu0 %v4306_v1 }
 0xc28   : > { %v4447_v45 = vpop.f32.mrb[44].mxu1 }
 0xc29   : > { %v10657_v49 = vpop.f32.mrb[45].mxu1 }
 0xc2a   : > { %v4450_v63 = vpop.f32.mrb[46].mxu1 }
 0xc2b   : > { %v10658_v51 = vpop.f32.mrb[47].mxu1 }
 0xc2c   : > { %v12181_v7 = vpop.f32.mrb[46].mxu0 }
 0xc2d   : > { %v4309_v24 = vsel %vm251_vm2, %v12181_v7, -inf  ;;  %v10652_v44 = vpop.f32.mrb[47].mxu0 }
 0xc2e   : > { %4310 = vmax.xlane.f32.xlu1 %v4309_v24 }
 0xc3c   : > { %4407 = vperm.xlu0 %10966, %v10220_v21  }
 0xc83   : > { %v4290_v18 = vpop.xlane.xlu1 %4289 }
 0xc84   : > { %v4312_v19 = vsub.f32 %v12156_v22, %v4290_v18 }
 0xc86   : > { %v4320_v20 = vmul.f32 1.442695, %v4312_v19 }
 0xc8b   : > { %v4293_v52 = vpop.xlane.xlu0 %4292 }
 0xc8c   : > { %v4313_v25 = vsub.f32 %v12160_v28, %v4293_v52 }
 0xc8e   : > { %v4322_v31 = vmul.f32 1.442695, %v4313_v25 }
 0xc93   : > { %v4296_v27 = vpop.xlane.xlu1 %4295 }
 0xc94   : > { %v4314_v34 = vsub.f32 %v12164_v33, %v4296_v27 }
 0xc96   : > { %v4324_v37 = vmul.f32 1.442695, %v4314_v34 }
 0xc9b   : > { %v12188_v54 = vpop.xlane.xlu0 %4301 }
 0xc9c   : > { %v4316_v28 = vsub.f32 %v12168_v35, %v12188_v54 }
 0xc9e   : > { %v4328_v36 = vmul.f32 1.442695, %v4316_v28 }
 0xca3   : > { %v4299_v56 = vpop.xlane.xlu1 %4298 }
 0xca4   : > { %v4315_v38 = vsub.f32 %v12172_v47, %v4299_v56 }
 0xca6   : > { %v4326_v39 = vmul.f32 1.442695, %v4315_v38 }
 0xcab   : > { %v4305_v40 = vpop.xlane.xlu1 %4304 }
 0xcac   : > { %v4317_v47 = vsub.f32 %v12176_v41, %v4305_v40 }
 0xcae   : > { %v4330_v35 = vmul.f32 1.442695, %v4317_v47 }
 0xcb3   : > { %v4308_v53 = vpop.xlane.xlu0 %4307 }
 0xcb4   : > { %v4318_v30 = vsub.f32 %v4176_v62, %v4308_v53 }
 0xcb6   : > { %v4332_v14 = vmul.f32 1.442695, %v4318_v30 }
 0xcb8   : > { %11024 = vpow2.f32 %v4332_v14 }
 0xcb9   : > { %11026 = vpow2.f32 %v4320_v20 }
 0xcba   : > { %11028 = vpow2.f32 %v4322_v31 }
 0xcbb   : > { %v4408_v12 = vpop.permute.xlu0 %4407  ;;  %11030 = vpow2.f32 %v4324_v37  ;;  %v4311_v54 = vpop.xlane.xlu1 %4310 }
 0xcbc   : > { %v4448_v43 = vadd.f32 %v4447_v45, %v4408_v12  ;;  %11032 = vpow2.f32 %v4326_v39 }
 0xcbd   : > { %11034 = vpow2.f32 %v4328_v36 }
 0xcbe   : > { %v4454_v26 = vcombine.high %v4448_v43, %v4448_v43  ;;  %v4461_v50 = vrot.slane %v4448_v43, %v11411_v2  ;;  %11036 = vpow2.f32 %v4330_v35 }
 0xcc0   : > { %v4468_v55 = vrot.slane %v4454_v26, %v11411_v2  ;;  %v4469_v57 = vcombine.high %v4461_v50, %v4461_v50  ;;  %v4477_v46 = vrot.slane %v4461_v50, %v11411_v2 }
 0xcc2   : > { %v4470_v59 = vcombine.high %v4468_v55, %v4468_v55  ;;  %v4484_v60 = vrot.slane %v4468_v55, %v11411_v2  ;;  %v4491_v61 = vrot.slane %v4469_v57, %v11411_v2  ;;  %4511 = vst.msk [vmem:[#allocation3] sm:$0x1] %vm3247_vm15, %v4477_v46  ;;  %v4522_v4 = vrot.slane %v4477_v46, %v11414_v8  ;;  %v12225_v15 = vpop.eup %11024 }
 0xcc3   : > { %v4499_v6 = vcombine.high %v4477_v46, %v4477_v46  ;;  %v4354_v16 = vsel %vm251_vm2, %v12225_v15, 0.0  ;;  %v12245_v33 = vpop.eup %11026 }
 0xcc4   : > { %v4498_v9 = vrot.slane %v4470_v59, %v11411_v2  ;;  %4512 = vst.msk [vmem:[#allocation3 + $0x8] sm:$0x1] %vm3247_vm15, %v4491_v61  ;;  %4515 = vst.msk [vmem:[#allocation3 + $0x20] sm:$0x1] %vm3247_vm15, %v4484_v60  ;;  %4647 = vrot.lane.b32.xlu0 %v4522_v4, %s11227_s18  ;;  %4551 = vrot.lane.b32.xlu1 %v4522_v4, %s11224_s26  ;;  %v4501_v5 = vcombine.high %v4491_v61, %v4491_v61  ;;  %v4336_v42 = vsel %vm251_vm2, %v12245_v33, 0.0  ;;  %v12255_v23 = vpop.eup %11028 }
 0xcc5   : > { %4513 = vst.msk [vmem:[#allocation3 + $0x10] sm:$0x1] %vm3247_vm15, %v4499_v6  ;;  %v4500_v10 = vcombine.high %v4484_v60, %v4484_v60  ;;  %v4530_v11 = vrot.slane %v4499_v6, %v11414_v8  ;;  %v4526_v13 = vrot.slane %v4491_v61, %v11414_v8  ;;  %v4538_v29 = vrot.slane %v4484_v60, %v11414_v8  ;;  %v12261_v24 = vpop.eup %11030 }
 0xcc6   : > { %4516 = vst.msk [vmem:[#allocation3 + $0x28] sm:$0x1] %vm3247_vm15, %v4498_v9  ;;  %4514 = vst.msk [vmem:[#allocation3 + $0x18] sm:$0x1] %vm3247_vm15, %v4501_v5  ;;  %v12206_v32 = vcombine.high %v4498_v9, %v4498_v9  ;;  %v4534_v48 = vrot.slane %v4501_v5, %v11414_v8  ;;  %v12239_v22 = vrot.slane %v4498_v9, %v11414_v8  ;;  %v4339_v1 = vsel %vm251_vm2, %v12255_v23, 0.0  ;;  %v12271_v45 = vpop.eup %11032 }
 0xcc7   : > { %4517 = vst.msk [vmem:[#allocation3 + $0x30] sm:$0x1] %vm3247_vm15, %v4500_v10  ;;  %v12253_v62 = vrot.slane %v4500_v10, %v11414_v8  ;;  %v4342_v41 = vsel %vm251_vm2, %v12261_v24, 0.0  ;;  %v4345_v21 = vsel %vm251_vm2, %v12271_v45, 0.0  ;;  %v12277_v49 = vpop.eup %11034  ;;  %v4319_v61 = vsub.f32 %v12181_v7, %v4311_v54 }
 0xcc8   : > { %4619 = vrot.lane.b32.xlu0 %v4530_v11, %s13824_s28  ;;  %4583 = vrot.lane.b32.xlu1 %v4522_v4, %s11226_s20  ;;  %4518 = vst.msk [vmem:[#allocation3 + $0x38] sm:$0x1] %vm3247_vm15, %v12206_v32  ;;  %v12269_v44 = vrot.slane %v12206_v32, %v11414_v8  ;;  %v4348_v63 = vsel %vm251_vm2, %v12277_v49, 0.0  ;;  %v12283_v51 = vpop.eup %11036 }
 0xcc9   : > { %v4351_v52 = vsel %vm251_vm2, %v12283_v51, 0.0  ;;  %v4334_v6 = vmul.f32 1.442695, %v4319_v61 }
 0xccb   : > { %11038 = vpow2.f32 %v4334_v6 }
 0xccc   : > { %4557 = vrot.lane.b32.xlu0 %v4534_v48, %s11224_s26  ;;  %4615 = vrot.lane.b32.xlu1 %v4522_v4, %s13824_s28 }
 0xcd0   : > { %4621 = vrot.lane.b32.xlu0 %v4534_v48, %s13824_s28  ;;  %4553 = vrot.lane.b32.xlu1 %v4526_v13, %s11224_s26 }
 0xcd4   : > { %4585 = vrot.lane.b32.xlu1 %v4526_v13, %s11226_s20 }
 0xcd8   : > { %4617 = vrot.lane.b32.xlu1 %v4526_v13, %s13824_s28 }
 0xcdc   : > { %4649 = vrot.lane.b32.xlu1 %v4526_v13, %s11227_s18 }
 0xce0   : > { %4555 = vrot.lane.b32.xlu1 %v4530_v11, %s11224_s26 }
 0xce4   : > { %4587 = vrot.lane.b32.xlu1 %v4530_v11, %s11226_s20 }
 0xce8   : > { %4651 = vrot.lane.b32.xlu1 %v4530_v11, %s11227_s18  ;;  %v12304_v11 = vpop.eup %11038 }
 0xce9   : > { %v4357_v7 = vsel %vm251_vm2, %v12304_v11, 0.0 }
 0xcec   : > { %4589 = vrot.lane.b32.xlu1 %v4534_v48, %s11226_s20 }
 0xcef   : > { %4355 = vadd.xlane.f32.xlu0 %v4354_v16 }
 0xcf0   : > { %4653 = vrot.lane.b32.xlu1 %v4534_v48, %s11227_s18 }
 0xd05   : > { %4559 = vrot.lane.b32.xlu0 %v4538_v29, %s11224_s26 }
 0xd09   : > { %4623 = vrot.lane.b32.xlu0 %v4538_v29, %s13824_s28 }
 0xd0d   : > { %4561 = vrot.lane.b32.xlu0 %v12239_v22, %s11224_s26 }
 0xd11   : > { %4625 = vrot.lane.b32.xlu0 %v12239_v22, %s13824_s28 }
 0xd14   : > { %4337 = vadd.xlane.f32.xlu1 %v4336_v42 }
 0xd15   : > { %4563 = vrot.lane.b32.xlu0 %v12253_v62, %s11224_s26 }
 0xd18   : > { %4340 = vadd.xlane.f32.xlu1 %v4339_v1 }
 0xd19   : > { %4627 = vrot.lane.b32.xlu0 %v12253_v62, %s13824_s28 }
 0xd1c   : > { %4343 = vadd.xlane.f32.xlu1 %v4342_v41 }
 0xd1d   : > { %4565 = vrot.lane.b32.xlu0 %v12269_v44, %s11224_s26 }
 0xd20   : > { %4346 = vadd.xlane.f32.xlu1 %v4345_v21 }
 0xd21   : > { %4629 = vrot.lane.b32.xlu0 %v12269_v44, %s13824_s28  ;;  %s13833_s28 = smov 16  }
 0xd24   : > { %4349 = vadd.xlane.f32.xlu1 %v4348_v63 }
 0xd28   : > { %4352 = vadd.xlane.f32.xlu1 %v4351_v52 }
 0xd36   : > { %v4648_v53 = vpop.permute.xlu0 %4647  ;;  %v4552_v12 = vpop.permute.xlu1 %4551 }
 0xd37   : > { %4671 = vst.msk [vmem:[#allocation3 + $0x4] sm:$0x1] %vm3247_vm15, %v4648_v53  ;;  %4575 = vst.msk [vmem:[#allocation3 + $0x1] sm:$0x1] %vm3247_vm15, %v4552_v12 }
 0xd39   : > { %4591 = vrot.lane.b32.xlu1 %v4538_v29, %s11226_s20 }
 0xd3a   : > { %v4620_v43 = vpop.permute.xlu0 %4619  ;;  %v4584_v26 = vpop.permute.xlu1 %4583 }
 0xd3b   : > { %4641 = vst.msk [vmem:[#allocation3 + $0x13] sm:$0x1] %vm3247_vm15, %v4620_v43  ;;  %4607 = vst.msk [vmem:[#allocation3 + $0x2] sm:$0x1] %vm3247_vm15, %v4584_v26 }
 0xd3d   : > { %4655 = vrot.lane.b32.xlu1 %v4538_v29, %s11227_s18 }
 0xd3e   : > { %v4558_v50 = vpop.permute.xlu0 %4557  ;;  %v4616_v55 = vpop.permute.xlu1 %4615 }
 0xd3f   : > { %4578 = vst.msk [vmem:[#allocation3 + $0x19] sm:$0x1] %vm3247_vm15, %v4558_v50  ;;  %4639 = vst.msk [vmem:[#allocation3 + $0x3] sm:$0x1] %vm3247_vm15, %v4616_v55 }
 0xd42   : > { %v4622_v57 = vpop.permute.xlu0 %4621  ;;  %v4554_v46 = vpop.permute.xlu1 %4553 }
 0xd43   : > { %4642 = vst.msk [vmem:[#allocation3 + $0x1b] sm:$0x1] %vm3247_vm15, %v4622_v57  ;;  %4576 = vst.msk [vmem:[#allocation3 + $0x9] sm:$0x1] %vm3247_vm15, %v4554_v46 }
 0xd46   : > { %v4586_v59 = vpop.permute.xlu1 %4585 }
 0xd47   : > { %4608 = vst.msk [vmem:[#allocation3 + $0xa] sm:$0x1] %vm3247_vm15, %v4586_v59 }
 0xd4a   : > { %v4618_v60 = vpop.permute.xlu1 %4617 }
 0xd4b   : > { %4640 = vst.msk [vmem:[#allocation3 + $0xb] sm:$0x1] %vm3247_vm15, %v4618_v60 }
 0xd4e   : > { %v4650_v4 = vpop.permute.xlu1 %4649 }
 0xd4f   : > { %4672 = vst.msk [vmem:[#allocation3 + $0xc] sm:$0x1] %vm3247_vm15, %v4650_v4 }
 0xd52   : > { %v4556_v9 = vpop.permute.xlu1 %4555 }
 0xd53   : > { %4577 = vst.msk [vmem:[#allocation3 + $0x11] sm:$0x1] %vm3247_vm15, %v4556_v9 }
 0xd56   : > { %v4588_v5 = vpop.permute.xlu1 %4587 }
 0xd57   : > { %4609 = vst.msk [vmem:[#allocation3 + $0x12] sm:$0x1] %vm3247_vm15, %v4588_v5 }
 0xd5a   : > { %v4652_v10 = vpop.permute.xlu1 %4651 }
 0xd5b   : > { %4673 = vst.msk [vmem:[#allocation3 + $0x14] sm:$0x1] %vm3247_vm15, %v4652_v10 }
 0xd5e   : > { %v4590_v32 = vpop.permute.xlu1 %4589 }
 0xd5f   : > { %4610 = vst.msk [vmem:[#allocation3 + $0x1a] sm:$0x1] %vm3247_vm15, %v4590_v32 }
 0xd61   : > { %4358 = vadd.xlane.f32.xlu1 %v4357_v7 }
 0xd62   : > { %v4654_v48 = vpop.permute.xlu1 %4653 }
 0xd63   : > { %4674 = vst.msk [vmem:[#allocation3 + $0x1c] sm:$0x1] %vm3247_vm15, %v4654_v48 }
 0xd72   : > { %4593 = vrot.lane.b32.xlu1 %v12239_v22, %s11226_s20 }
 0xd76   : > { %4657 = vrot.lane.b32.xlu1 %v12239_v22, %s11227_s18 }
 0xd7a   : > { %4595 = vrot.lane.b32.xlu1 %v12253_v62, %s11226_s20 }
 0xd7c   : > { %v4356_v13 = vpop.xlane.xlu0 %4355 }
 0xd7e   : > { %4659 = vrot.lane.b32.xlu1 %v12253_v62, %s11227_s18 }
 0xd80   : > { %v4560_v30 = vpop.permute.xlu0 %4559 }
 0xd81   : > { %4579 = vst.msk [vmem:[#allocation3 + $0x21] sm:$0x1] %vm3247_vm15, %v4560_v30  ;;  %v4679_v30 = vld [vmem:[#allocation3] sm:$0x1f] }
 0xd82   : > { %4597 = vrot.lane.b32.xlu1 %v12269_v44, %s11226_s20 }
 0xd84   : > { %v4624_v14 = vpop.permute.xlu0 %4623 }
 0xd85   : > { %4643 = vst.msk [vmem:[#allocation3 + $0x23] sm:$0x1] %vm3247_vm15, %v4624_v14  ;;  %v4681_v14 = vld [vmem:[#allocation3 + $0x10] sm:$0x1f] }
 0xd86   : > { %4661 = vrot.lane.b32.xlu1 %v12269_v44, %s11227_s18 }
 0xd88   : > { %v4562_v16 = vpop.permute.xlu0 %4561 }
 0xd89   : > { %4580 = vst.msk [vmem:[#allocation3 + $0x29] sm:$0x1] %vm3247_vm15, %v4562_v16 }
 0xd8c   : > { %v4626_v18 = vpop.permute.xlu0 %4625 }
 0xd8d   : > { %4644 = vst.msk [vmem:[#allocation3 + $0x2b] sm:$0x1] %vm3247_vm15, %v4626_v18 }
 0xd90   : > { %v4564_v19 = vpop.permute.xlu0 %4563 }
 0xd91   : > { %4581 = vst.msk [vmem:[#allocation3 + $0x31] sm:$0x1] %vm3247_vm15, %v4564_v19  ;;  %v4680_v19 = vld [vmem:[#allocation3 + $0x8] sm:$0x1f] }
 0xd94   : > { %v4628_v20 = vpop.permute.xlu0 %4627 }
 0xd95   : > { %4645 = vst.msk [vmem:[#allocation3 + $0x33] sm:$0x1] %vm3247_vm15, %v4628_v20 }
 0xd98   : > { %v4566_v25 = vpop.permute.xlu0 %4565 }
 0xd99   : > { %4582 = vst.msk [vmem:[#allocation3 + $0x39] sm:$0x1] %vm3247_vm15, %v4566_v25 }
 0xd9c   : > { %v4630_v27 = vpop.permute.xlu0 %4629 }
 0xd9d   : > { %4646 = vst.msk [vmem:[#allocation3 + $0x3b] sm:$0x1] %vm3247_vm15, %v4630_v27 }
 0xda1   : > { %v4338_v29 = vpop.xlane.xlu1 %4337 }
 0xda5   : > { %v4341_v31 = vpop.xlane.xlu1 %4340 }
 0xda6   : > { %11040 = vrcp.f32 %v4341_v31 }
 0xda7   : > { %11042 = vrcp.f32 %v4338_v29  ;;  %v4682_v29 = vld [vmem:[#allocation3 + $0x18] sm:$0x1f] }
 0xda9   : > { %v4344_v34 = vpop.xlane.xlu1 %4343 }
 0xdaa   : > { %11044 = vrcp.f32 %v4344_v34 }
 0xdad   : > { %v4347_v56 = vpop.xlane.xlu1 %4346 }
 0xdae   : > { %11046 = vrcp.f32 %v4347_v56 }
 0xdb0   : > { %v11041_v39 = vpop.eup %11040 }
 0xdb1   : > { %v4350_v37 = vpop.xlane.xlu1 %4349  ;;  %v11043_v40 = vpop.eup %11042  ;;  %v4363_v47 = vmul.f32 %v11041_v39, %v12255_v23 }
 0xdb2   : > { %11048 = vrcp.f32 %v4350_v37  ;;  %v4361_v35 = vmul.f32 %v11043_v40, %v12245_v33 }
 0xdb3   : > { %v4377_v44 = vsel %vm251_vm2, %v4363_v47, 0.0 }
 0xdb4   : > { %v11045_v36 = vpop.eup %11044  ;;  %v4376_v53 = vsel %vm251_vm2, %v4361_v35, 0.0 }
 0xdb5   : > { %v4353_v38 = vpop.xlane.xlu1 %4352  ;;  %v4365_v62 = vmul.f32 %v11045_v36, %v12261_v24  ;;  %v4378_v23 = vadd.f32 %v4377_v44, %v4376_v53 }
 0xdb6   : > { %11050 = vrcp.f32 %v4353_v38 }
 0xdb7   : > { %11052 = vrcp.f32 %v4356_v13  ;;  %v4379_v63 = vsel %vm251_vm2, %v4365_v62, 0.0 }
 0xdb8   : > { %v11047_v42 = vpop.eup %11046  ;;  %v4380_v33 = vadd.f32 %v4379_v63, %v4378_v23 }
 0xdb9   : > { %v4592_v22 = vpop.permute.xlu1 %4591  ;;  %v4367_v41 = vmul.f32 %v11047_v42, %v12271_v45 }
 0xdba   : > { %4611 = vst.msk [vmem:[#allocation3 + $0x22] sm:$0x1] %vm3247_vm15, %v4592_v22  ;;  %v10233_v22 = vld [vmem:[%s13781_s1 + $0xc] sm:$0xf] }
 0xdbb   : > { %v4381_v12 = vsel %vm251_vm2, %v4367_v41, 0.0 }
 0xdbc   : > { %v11049_v1 = vpop.eup %11048  ;;  %v4382_v50 = vadd.f32 %v4381_v12, %v4380_v33 }
 0xdbd   : > { %v4656_v28 = vpop.permute.xlu1 %4655  ;;  %v4369_v52 = vmul.f32 %v11049_v1, %v12277_v49 }
 0xdbe   : > { %4675 = vst.msk [vmem:[#allocation3 + $0x24] sm:$0x1] %vm3247_vm15, %v4656_v28 }
 0xdbf   : > { %v4383_v43 = vsel %vm251_vm2, %v4369_v52, 0.0 }
 0xdc0   : > { %v11051_v21 = vpop.eup %11050  ;;  %v4384_v49 = vadd.f32 %v4383_v43, %v4382_v50 }
 0xdc1   : > { %v4371_v24 = vmul.f32 %v11051_v21, %v12283_v51  ;;  %v11053_v26 = vpop.eup %11052 }
 0xdc2   : > { %v4373_v57 = vmul.f32 %v11053_v26, %v12225_v15 }
 0xdc3   : > { %v4385_v55 = vsel %vm251_vm2, %v4371_v24, 0.0 }
 0xdc4   : > { %v4386_v59 = vadd.f32 %v4385_v55, %v4384_v49  ;;  %v4387_v51 = vsel %vm251_vm2, %v4373_v57, 0.0 }
 0xdc5   : > { %v4683_v20 = vld [vmem:[#allocation3 + $0x20] sm:$0x1f] }
 0xdc6   : > { %v4388_v6 = vadd.f32 %v4387_v51, %v4386_v59 }
 0xdee   : > { %v4359_v54 = vpop.xlane.xlu1 %4358 }
 0xdef   : > { %11054 = vrcp.f32 %v4359_v54 }
 0xdf2   : > { %v4594_v45 = vpop.permute.xlu1 %4593 }
 0xdf3   : > { %4612 = vst.msk [vmem:[#allocation3 + $0x2a] sm:$0x1] %vm3247_vm15, %v4594_v45 }
 0xdf6   : > { %v4658_v46 = vpop.permute.xlu1 %4657 }
 0xdf7   : > { %4676 = vst.msk [vmem:[#allocation3 + $0x2c] sm:$0x1] %vm3247_vm15, %v4658_v46 }
 0xdf9   : > { %v11055_v60 = vpop.eup %11054 }
 0xdfa   : > { %v4375_v61 = vmul.f32 %v11055_v60, %v12304_v11  ;;  %v4596_v4 = vpop.permute.xlu1 %4595 }
 0xdfb   : > { %4613 = vst.msk [vmem:[#allocation3 + $0x32] sm:$0x1] %vm3247_vm15, %v4596_v4 }
 0xdfc   : > { %v4389_v9 = vsel %vm251_vm2, %v4375_v61, 0.0 }
 0xdfd   : > { %v4390_v5 = vadd.f32 %v4389_v9, %v4388_v6 }
 0xdfe   : > { %v4660_v10 = vpop.permute.xlu1 %4659  ;;  %v4684_v56 = vld [vmem:[#allocation3 + $0x28] sm:$0x1f] }
 0xdff   : > { %4677 = vst.msk [vmem:[#allocation3 + $0x34] sm:$0x1] %vm3247_vm15, %v4660_v10  ;;  %v4391_v15 = vadd.f32 1e-07, %v4390_v5 }
 0xe01   : > { %11056 = vrcp.f32 %v4391_v15 }
 0xe02   : > { %v4598_v32 = vpop.permute.xlu1 %4597 }
 0xe03   : > { %4614 = vst.msk [vmem:[#allocation3 + $0x3a] sm:$0x1] %vm3247_vm15, %v4598_v32 }
 0xe06   : > { %v4662_v7 = vpop.permute.xlu1 %4661  ;;  %v4685_v31 = vld [vmem:[#allocation3 + $0x30] sm:$0x1f] }
 0xe07   : > { %4678 = vst.msk [vmem:[#allocation3 + $0x3c] sm:$0x1] %vm3247_vm15, %v4662_v7 }
 0xe0b   : > { %v11057_v48 = vpop.eup %11056 }
 0xe0c   : > { %v4393_v11 = vmul.f32 %v11057_v48, %v4361_v35  ;;  %v4395_v13 = vmul.f32 %v11057_v48, %v4365_v62  ;;  %v4394_v16 = vmul.f32 %v11057_v48, %v4363_v47  ;;  %v4397_v18 = vmul.f32 %v11057_v48, %v4369_v52 }
 0xe0d   : > { %v4396_v25 = vmul.f32 %v11057_v48, %v4367_v41  ;;  %v4399_v27 = vmul.f32 %v11057_v48, %v4373_v57  ;;  %v4398_v34 = vmul.f32 %v11057_v48, %v4371_v24  ;;  %v4400_v37 = vmul.f32 %v11057_v48, %v4375_v61 }
 0xe0e   : > { %10660 = vmatpush3.msra.mxu0 %v4393_v11  ;;  %10670 = vmatpush3.msra.mxu1 %v4395_v13  ;;  %v4686_v38 = vld [vmem:[#allocation3 + $0x38] sm:$0x1f] }
 0xe0f   : > { %10662 = vmatmul.mubr.msk.f32.vlgmr.msra.gmra.mrb[48].mxu0 %vm251_vm2, %v4679_v30  ;;  %10664 = vmatprep.subr.mxu0 %v11208_v0 }
 0xe10   : > { %10672 = vmatmul.mubr.msk.f32.vlgmr.msra.gmra.mrb[48].mxu1 %vm251_vm2, %v4681_v14  ;;  %10679 = vmatprep.subr.mxu1 %v11208_v0 }
 0xe11   : > { %10665 = vmatpush3.msra.mxu0 %v4394_v16  ;;  %10680 = vmatpush3.msra.mxu1 %v4397_v18 }
 0xe12   : > { %10666 = vmatprep.mubr.msk.f32.mxu0 %vm11209_vm0, %v11208_v0  ;;  %10674 = vmatprep.subr.mxu0 %v11208_v0 }
 0xe13   : > { %10681 = vmatprep.mubr.msk.f32.mxu1 %vm11209_vm0, %v11208_v0  ;;  %10689 = vmatprep.subr.mxu1 %v11208_v0 }
 0xe14   : > { %10667 = vmatmul.mubr.msk.f32.vlgmr.msra.gmra.mrb[50].mxu0 %vm251_vm2, %v4680_v19  ;;  %10682 = vmatmul.mubr.msk.f32.vlgmr.msra.gmra.mrb[50].mxu1 %vm251_vm2, %v4683_v20 }
 0xe15   : > { %10675 = vmatpush3.msra.mxu0 %v4396_v25  ;;  %10690 = vmatpush3.msra.mxu1 %v4399_v27 }
 0xe16   : > { %10676 = vmatprep.mubr.msk.f32.mxu0 %vm11209_vm0, %v11208_v0  ;;  %10684 = vmatprep.subr.mxu0 %v11208_v0 }
 0xe17   : > { %10691 = vmatprep.mubr.msk.f32.mxu1 %vm11209_vm0, %v11208_v0  ;;  %10699 = vmatprep.subr.bf16.mxu1 %v11208_v0 }
 0xe18   : > { %10677 = vmatmul.mubr.msk.f32.vlgmr.msra.gmra.mrb[52].mxu0 %vm251_vm2, %v4682_v29  ;;  %10692 = vmatmul.mubr.msk.f32.vlgmr.msra.gmra.mrb[52].mxu1 %vm251_vm2, %v4685_v31 }
 0xe19   : > { %10685 = vmatpush3.msra.mxu0 %v4398_v34  ;;  %10686 = vmatprep.mubr.msk.f32.mxu0 %vm11209_vm0, %v11208_v0 }
 0xe1a   : > { %10694 = vmatprep.subr.mxu0 %v11208_v0  ;;  %10701 = vmatprep.mubr.msk.bf16.mxu1 %vm11209_vm0, %v11208_v0 }
 0xe1c   : > { %10687 = vmatmul.mubr.msk.f32.vlgmr.msra.gmra.mrb[54].mxu0 %vm251_vm2, %v4684_v56 }
 0xe1d   : > { %10695 = vmatpush3.msra.mxu0 %v4400_v37  ;;  %10696 = vmatprep.mubr.msk.f32.mxu0 %vm11209_vm0, %v11208_v0 }
 0xe1e   : > { %10705 = vmatprep.subr.bf16.mxu0 %v11208_v0 }
 0xe20   : > { %10697 = vmatmul.mubr.msk.f32.vlgmr.msra.gmra.mrb[56].mxu0 %vm251_vm2, %v4686_v38 }
 0xe21   : > { %10706 = vmatpush3.bf16.msra.mxu0 %v11337_v3  ;;  %10707 = vmatprep.mubr.msk.bf16.mxu0 %vm11209_vm0, %v11208_v0 }
 0xe22   : > { %10716 = vmatprep.subr.mxu0 %v11208_v0 }
 0xe24   : > { %10708 = vmatmul.mubr.msk.bf16.vlgmr.msra.gmra.mrb[60].mxu0 %vm251_vm2, %v10233_v22 }
 0xe25   : > { %10718 = vmatprep.mubr.msk.f32.mxu0 %vm11209_vm0, %v11208_v0 }
 0xee2   : > { %v4756_v28 = vpop.f32.mrb[48].mxu0 }
 0xee3   : > { %v4902_v39 = vpop.f32.mrb[48].mxu1  ;;  %v10663_v40 = vpop.f32.mrb[49].mxu0 }
 0xee4   : > { %v10673_v36 = vpop.f32.mrb[49].mxu1  ;;  %v5281_v41 = vrot.slane %v4902_v39, 6 }
 0xee7   : > { %v4829_v47 = vpop.f32.mrb[50].mxu0  ;;  %v5048_v42 = vpop.f32.mrb[50].mxu1 }
 0xee8   : > { %v5279_v62 = vrot.slane %v4829_v47, 7  ;;  %v10668_v35 = vpop.f32.mrb[51].mxu0  ;;  %v10683_v1 = vpop.f32.mrb[51].mxu1  ;;  %v5285_v49 = vrot.slane %v5048_v42, 4 }
 0xeea   : > { %v5280_v44 = vsel %vm2950_vm13, %v5279_v62, %v4756_v28  ;;  %v5295_v21 = vsel %vm2953_vm14, %v5279_v62, %v4756_v28  ;;  %v5343_v63 = vsel %vm13851_vm10, %v5279_v62, %v4756_v28  ;;  %v5327_v52 = vsel %vm13852_vm3, %v5279_v62, %v4756_v28  ;;  %vm13858_vm10 = vmmov %vm13855_vm8 }
 0xeeb   : > { %v4975_v54 = vpop.f32.mrb[52].mxu0  ;;  %v5282_v53 = vsel %vm2953_vm14, %v5281_v41, %v5280_v44  ;;  %v5194_v23 = vpop.f32.mrb[52].mxu1  ;;  %v5344_v12 = vsel %vm13853_vm9, %v5281_v41, %v5343_v63  ;;  %v5328_v24 = vsel %vm13854_vm4, %v5281_v41, %v5327_v52  ;;  %v5311_v33 = vsel %vm13855_vm8, %v5279_v62, %v4756_v28  ;;  %vm13862_vm4 = vmmov %vm13856_vm11 }
 0xeec   : > { %v5283_v43 = vrot.slane %v4975_v54, 5  ;;  %v10678_v45 = vpop.f32.mrb[53].mxu0  ;;  %v10693_v26 = vpop.f32.mrb[53].mxu1  ;;  %v5312_v50 = vsel %vm13856_vm11, %v5281_v41, %v5311_v33  ;;  %v5296_v55 = vsel %vm13857_vm12, %v5281_v41, %v5295_v21  ;;  %vm13859_vm3 = vcmask 1047559   ;;  %vm13864_vm9 = vmmov %vm13860_vm5 }
 0xeed   : > { %vm13863_vm8 = vmmov %vm13859_vm3  ;;  %v5289_v5 = vrot.slane %v5194_v23, 2 }
 0xeee   : > { %v5284_v57 = vsel %vm13858_vm10, %v5283_v43, %v5282_v53  ;;  %v5345_v46 = vsel %vm13859_vm3, %v5283_v43, %v5344_v12  ;;  %v5329_v59 = vsel %vm13860_vm5, %v5283_v43, %v5328_v24  ;;  %v5313_v60 = vsel %vm13861_vm7, %v5283_v43, %v5312_v50  ;;  %vm13865_vm11 = vmmov %vm13862_vm4 }
 0xeef   : > { %5349 = vrot.lane.b32.xlu0 %v5345_v46, %s13826_s29  ;;  %v5121_v51 = vpop.f32.mrb[54].mxu0  ;;  %v5286_v61 = vsel %vm13862_vm4, %v5285_v49, %v5284_v57  ;;  %v5330_v4 = vsel %vm13863_vm8, %v5285_v49, %v5329_v59  ;;  %v5314_v6 = vsel %vm13864_vm9, %v5285_v49, %v5313_v60  ;;  %v5297_v9 = vsel %vm13865_vm11, %v5283_v43, %v5296_v55  ;;  %vm13866_vm12 = vmmov %vm13861_vm7 }
 0xef0   : > { %v5287_v10 = vrot.slane %v5121_v51, 3  ;;  %v10688_v15 = vpop.f32.mrb[55].mxu0  ;;  %v5298_v32 = vsel %vm13866_vm12, %v5285_v49, %v5297_v9  ;;  %vm13867_vm5 = vmmov %vm13861_vm7  ;;  %vm13871_vm8 = vcmask 1043459   ;;  %vm13873_vm11 = vcmask 32768   ;;  %v11141_v9 = vld [vmem:[%s11329_s13] sm:$0xff] }
 0xef1   : > { %vm13868_vm7 = vmmov %vm13859_vm3 }
 0xef2   : > { %v5288_v7 = vsel %vm13867_vm5, %v5287_v10, %v5286_v61  ;;  %v5315_v48 = vsel %vm13868_vm7, %v5287_v10, %v5314_v6  ;;  %vm13869_vm10 = vmmov %vm13864_vm9  ;;  %v5331_v13 = vsel %vm2950_vm13, %v5289_v5, %v5287_v10  ;;  %v5346_v16 = vsel %vm2950_vm13, %v5287_v10, %v5285_v49 }
 0xef3   : > { %v5299_v11 = vsel %vm13869_vm10, %v5287_v10, %v5298_v32  ;;  %5333 = vrot.lane.b32.xlu0 %v5330_v4, %s13839_s19  ;;  %v5267_v30 = vpop.f32.mrb[56].mxu0  ;;  %vm13870_vm4 = vmmov %vm13864_vm9  ;;  %v5347_v25 = vsel %vm2953_vm14, %v5289_v5, %v5346_v16 }
 0xef4   : > { %v5300_v14 = vsel %vm13859_vm3, %v5289_v5, %v5299_v11  ;;  %v5290_v18 = vsel %vm13870_vm4, %v5289_v5, %v5288_v7  ;;  %v5291_v19 = vrot.slane %v5267_v30, 1  ;;  %v10698_v20 = vpop.f32.mrb[57].mxu0  ;;  %vm13872_vm9 = vmmov %vm13859_vm3  ;;  %v10230_v11 = vld [vmem:[%s13784_s4 + $0x8] sm:$0xf] }
 0xef5   : > { %vm13874_vm12 = vmmov %vm13873_vm11 }
 0xef6   : > { %5303 = vrot.lane.b32.xlu1 %v5291_v19, %s13831_s17  ;;  %v5316_v27 = vsel %vm2950_vm13, %v5291_v19, %v5289_v5  ;;  %v5332_v29 = vsel %vm2953_vm14, %v5291_v19, %v5331_v13  ;;  %v5348_v31 = vsel %vm13871_vm8, %v5291_v19, %v5347_v25  ;;  %v5292_v34 = vsel %vm13872_vm9, %v5291_v19, %v5290_v18  ;;  %vm13875_vm5 = vmmov %vm13873_vm11 }
 0xef7   : > { %5317 = vrot.lane.b32.xlu0 %v5315_v48, %s13833_s28  ;;  %v5458_v56 = vpop.f32.mrb[60].mxu0  ;;  %5294 = vst.msk [vmem:[#allocation4] sm:$0xff] %vm251_vm2, %v5292_v34  ;;  %vm13876_vm7 = vmmov %vm13875_vm5  ;;  %vm5309_vm9 = vcmask 122944  }
 0xef8   : > { %v5465_v37 = vcombine.high %v5458_v56, %v5458_v56  ;;  %v5472_v38 = vrot.slane %v5458_v56, %v11411_v2  ;;  %v10709_v22 = vpop.f32.mrb[61].mxu0  ;;  %vm13877_vm10 = vmmov %vm13875_vm5 }
 0xef9   : > { %v5461_v28 = vpop.f32.mrb[62].mxu0  ;;  %vm13878_vm3 = vmmov %vm13875_vm5 }
 0xefa   : > { %v5479_v39 = vrot.slane %v5465_v37, %v11411_v2  ;;  %v5480_v40 = vcombine.high %v5472_v38, %v5472_v38  ;;  %v5488_v36 = vrot.slane %v5472_v38, %v11411_v2  ;;  %5319 = vrot.lane.b32.xlu1 %v5316_v27, %s13833_s28  ;;  %v10710_v47 = vpop.f32.mrb[63].mxu0  ;;  %vm13879_vm4 = vmmov %vm13878_vm3  ;;  %s14029_s28 = smov 25  }
 0xefb   : > { %5301 = vrot.lane.b32.xlu0 %v5300_v14, %s13831_s17  ;;  %vm13880_vm8 = vmmov %vm13878_vm3  ;;  %s14018_s17 = smov 30  }
 0xefc   : > { %v5481_v42 = vcombine.high %v5479_v39, %v5479_v39  ;;  %v5495_v62 = vrot.slane %v5479_v39, %v11411_v2  ;;  %v5502_v35 = vrot.slane %v5480_v40, %v11411_v2  ;;  %v5510_v1 = vcombine.high %v5488_v36, %v5488_v36  ;;  %5522 = vst.msk [vmem:[#allocation3] sm:$0x1] %vm3247_vm15, %v5488_v36 }
 0xefd   : > { %5698 = vst.msk [vmem:[#allocation2] sm:$0x1] %vm13873_vm11, %v5488_v36  ;;  %v5533_v41 = vrot.slane %v5488_v36, %v11414_v8  ;;  %vm13838_vm11 = vcmask 130113  }
 0xefe   : > { %v12441_v44 = vrot.slane %v5481_v42, %v11411_v2  ;;  %v12443_v21 = vcombine.high %v5495_v62, %v5495_v62  ;;  %v12445_v63 = vcombine.high %v5502_v35, %v5502_v35  ;;  %5523 = vst.msk [vmem:[#allocation3 + $0x8] sm:$0x1] %vm3247_vm15, %v5502_v35  ;;  %5524 = vst.msk [vmem:[#allocation3 + $0x10] sm:$0x1] %vm3247_vm15, %v5510_v1  ;;  %5335 = vrot.lane.b32.xlu1 %v5332_v29, %s13839_s19  ;;  %s14013_s19 = smov 35  }
 0xeff   : > { %5526 = vst.msk [vmem:[#allocation3 + $0x20] sm:$0x1] %vm3247_vm15, %v5495_v62  ;;  %5706 = vrot.lane.b32.xlu0 %v5533_v41, %s11212_s9  ;;  %v5537_v54 = vrot.slane %v5502_v35, %v11414_v8  ;;  %v5541_v53 = vrot.slane %v5510_v1, %v11414_v8  ;;  %v5549_v23 = vrot.slane %v5495_v62, %v11414_v8 }
 0xf00   : > { %5699 = vst.msk [vmem:[#allocation2 + $0x8] sm:$0x1] %vm13874_vm12, %v5502_v35  ;;  %v12457_v52 = vcombine.high %v12441_v44, %v12441_v44  ;;  %v5545_v12 = vrot.slane %v12445_v63, %v11414_v8  ;;  %vm13837_vm12 = vcmask 195714   ;;  %v5553_v50 = vrot.slane %v12441_v44, %v11414_v8 }
 0xf01   : > { %5700 = vst.msk [vmem:[#allocation2 + $0x10] sm:$0x1] %vm13875_vm5, %v5510_v1  ;;  %vm13828_vm5 = vcmask 189568   ;;  %v5557_v32 = vrot.slane %v12443_v21, %v11414_v8 }
 0xf02   : > { %5702 = vst.msk [vmem:[#allocation2 + $0x20] sm:$0x1] %vm13876_vm7, %v5495_v62  ;;  %5351 = vrot.lane.b32.xlu1 %v5348_v31, %s13826_s29  ;;  %s13881_s29 = smov 104   ;;  %vm13836_vm7 = vcmask 261315   ;;  %v5561_v37 = vrot.slane %v12457_v52, %v11414_v8 }
 0xf03   : > { %5525 = vst.msk [vmem:[#allocation3 + $0x18] sm:$0x1] %vm3247_vm15, %v12445_v63  ;;  %5527 = vst.msk [vmem:[#allocation3 + $0x28] sm:$0x1] %vm3247_vm15, %v12441_v44  ;;  %5770 = vrot.lane.b32.xlu0 %v5533_v41, %s11214_s11 }
 0xf04   : > { %5528 = vst.msk [vmem:[#allocation3 + $0x30] sm:$0x1] %vm3247_vm15, %v12443_v21  ;;  %5529 = vst.msk [vmem:[#allocation3 + $0x38] sm:$0x1] %vm3247_vm15, %v12457_v52 }
 0xf05   : > { %5701 = vst.msk [vmem:[#allocation2 + $0x18] sm:$0x1] %vm13877_vm10, %v12445_v63  ;;  %vm13835_vm10 = vcmask 326916  }
 0xf06   : > { %5703 = vst.msk [vmem:[#allocation2 + $0x28] sm:$0x1] %vm13878_vm3, %v12441_v44  ;;  %5738 = vrot.lane.b32.xlu1 %v5533_v41, %s13845_s10  ;;  %vm13829_vm3 = vcmask 256192  }
 0xf07   : > { %5704 = vst.msk [vmem:[#allocation2 + $0x30] sm:$0x1] %vm13879_vm4, %v12443_v21  ;;  %5834 = vrot.lane.b32.xlu0 %v5533_v41, %s11215_s12 }
 0xf08   : > { %5705 = vst.msk [vmem:[#allocation2 + $0x38] sm:$0x1] %vm13880_vm8, %v12457_v52  ;;  %vm13830_vm8 = vcmask 322816   ;;  %v10244_v52 = vld [vmem:[%s13783_s3 + $0x18] sm:$0xff] }
 0xf0a   : > { %5802 = vrot.lane.b32.xlu1 %v5533_v41, %s13843_s14 }
 0xf0b   : > { %5898 = vrot.lane.b32.xlu0 %v5533_v41, %s13847_s15 }
 0xf0e   : > { %5866 = vrot.lane.b32.xlu1 %v5533_v41, %s13841_s16 }
 0xf0f   : > { %5594 = vrot.lane.b32.xlu0 %v5533_v41, %s11226_s20 }
 0xf12   : > { %5562 = vrot.lane.b32.xlu1 %v5533_v41, %s11224_s26 }
 0xf13   : > { %5658 = vrot.lane.b32.xlu0 %v5533_v41, %s11227_s18 }
 0xf16   : > { %5626 = vrot.lane.b32.xlu1 %v5533_v41, %s13881_s29 }
 0xf17   : > { %5740 = vrot.lane.b32.xlu0 %v5537_v54, %s13845_s10 }
 0xf1a   : > { %5708 = vrot.lane.b32.xlu1 %v5537_v54, %s11212_s9 }
 0xf1b   : > { %5804 = vrot.lane.b32.xlu0 %v5537_v54, %s13843_s14 }
 0xf1e   : > { %5772 = vrot.lane.b32.xlu1 %v5537_v54, %s11214_s11 }
 0xf1f   : > { %5868 = vrot.lane.b32.xlu0 %v5537_v54, %s13841_s16 }
 0xf22   : > { %5836 = vrot.lane.b32.xlu1 %v5537_v54, %s11215_s12 }
 0xf23   : > { %5564 = vrot.lane.b32.xlu0 %v5537_v54, %s11224_s26 }
 0xf26   : > { %5900 = vrot.lane.b32.xlu1 %v5537_v54, %s13847_s15 }
 0xf27   : > { %5628 = vrot.lane.b32.xlu0 %v5537_v54, %s13881_s29 }
 0xf2a   : > { %5596 = vrot.lane.b32.xlu1 %v5537_v54, %s11226_s20 }
 0xf2b   : > { %5710 = vrot.lane.b32.xlu0 %v5541_v53, %s11212_s9 }
 0xf2e   : > { %5660 = vrot.lane.b32.xlu1 %v5537_v54, %s11227_s18 }
 0xf2f   : > { %5774 = vrot.lane.b32.xlu0 %v5541_v53, %s11214_s11 }
 0xf32   : > { %5742 = vrot.lane.b32.xlu1 %v5541_v53, %s13845_s10 }
 0xf33   : > { %5838 = vrot.lane.b32.xlu0 %v5541_v53, %s11215_s12 }
 0xf36   : > { %5806 = vrot.lane.b32.xlu1 %v5541_v53, %s13843_s14 }
 0xf37   : > { %5902 = vrot.lane.b32.xlu0 %v5541_v53, %s13847_s15 }
 0xf3a   : > { %5870 = vrot.lane.b32.xlu1 %v5541_v53, %s13841_s16 }
 0xf3b   : > { %5598 = vrot.lane.b32.xlu0 %v5541_v53, %s11226_s20 }
 0xf3e   : > { %5566 = vrot.lane.b32.xlu1 %v5541_v53, %s11224_s26 }
 0xf3f   : > { %5662 = vrot.lane.b32.xlu0 %v5541_v53, %s11227_s18 }
 0xf42   : > { %5630 = vrot.lane.b32.xlu1 %v5541_v53, %s13881_s29 }
 0xf43   : > { %5714 = vrot.lane.b32.xlu0 %v5549_v23, %s11212_s9 }
 0xf46   : > { %5746 = vrot.lane.b32.xlu1 %v5549_v23, %s13845_s10 }
 0xf47   : > { %5778 = vrot.lane.b32.xlu0 %v5549_v23, %s11214_s11 }
 0xf4a   : > { %5810 = vrot.lane.b32.xlu1 %v5549_v23, %s13843_s14 }
 0xf4b   : > { %5842 = vrot.lane.b32.xlu0 %v5549_v23, %s11215_s12 }
 0xf4e   : > { %5874 = vrot.lane.b32.xlu1 %v5549_v23, %s13841_s16 }
 0xf4f   : > { %5906 = vrot.lane.b32.xlu0 %v5549_v23, %s13847_s15 }
 0xf52   : > { %5570 = vrot.lane.b32.xlu1 %v5549_v23, %s11224_s26 }
 0xf53   : > { %5602 = vrot.lane.b32.xlu0 %v5549_v23, %s11226_s20 }
 0xf56   : > { %5634 = vrot.lane.b32.xlu1 %v5549_v23, %s13881_s29 }
 0xf57   : > { %5666 = vrot.lane.b32.xlu0 %v5549_v23, %s11227_s18 }
 0xf5a   : > { %5712 = vrot.lane.b32.xlu1 %v5545_v12, %s11212_s9 }
 0xf5b   : > { %5744 = vrot.lane.b32.xlu0 %v5545_v12, %s13845_s10 }
 0xf5e   : > { %5776 = vrot.lane.b32.xlu1 %v5545_v12, %s11214_s11 }
 0xf5f   : > { %5808 = vrot.lane.b32.xlu0 %v5545_v12, %s13843_s14 }
 0xf61   : > { %v5350_v24 = vpop.permute.xlu0 %5349 }
 0xf62   : > { %5840 = vrot.lane.b32.xlu1 %v5545_v12, %s11215_s12 }
 0xf63   : > { %5872 = vrot.lane.b32.xlu0 %v5545_v12, %s13841_s16 }
 0xf65   : > { %v5334_v33 = vpop.permute.xlu0 %5333 }
 0xf66   : > { %5904 = vrot.lane.b32.xlu1 %v5545_v12, %s13847_s15 }
 0xf67   : > { %5568 = vrot.lane.b32.xlu0 %v5545_v12, %s11224_s26 }
 0xf68   : > { %v5304_v43 = vpop.permute.xlu1 %5303 }
 0xf69   : > { %5310 = vst.msk [vmem:[#allocation4 + $0x7] sm:$0x1] %vm5309_vm9, %v5304_v43  ;;  %v5318_v45 = vpop.permute.xlu0 %5317 }
 0xf6a   : > { %5600 = vrot.lane.b32.xlu1 %v5545_v12, %s11226_s20 }
 0xf6b   : > { %5632 = vrot.lane.b32.xlu0 %v5545_v12, %s13881_s29 }
 0xf6c   : > { %v5320_v26 = vpop.permute.xlu1 %5319 }
 0xf6d   : > { %v5302_v55 = vpop.permute.xlu0 %5301 }
 0xf6e   : > { %5308 = vst.msk [vmem:[#allocation4 - $0x1] sm:$0xfe] %vm13838_vm11, %v5302_v55  ;;  %5664 = vrot.lane.b32.xlu1 %v5545_v12, %s11227_s18 }
 0xf6f   : > { %5324 = vst.msk [vmem:[#allocation4 - $0x2] sm:$0xfc] %vm13837_vm12, %v5318_v45  ;;  %5748 = vrot.lane.b32.xlu0 %v5553_v50, %s13845_s10 }
 0xf70   : > { %5326 = vst.msk [vmem:[#allocation4 + $0x6] sm:$0x3] %vm13828_vm5, %v5320_v26  ;;  %v5336_v49 = vpop.permute.xlu1 %5335  ;;  %vm13882_vm5 = vmmov %vm13879_vm4 }
 0xf71   : > { %5340 = vst.msk [vmem:[#allocation4 - $0x3] sm:$0xf8] %vm13836_vm7, %v5334_v33  ;;  %v5707_v57 = vpop.permute.xlu0 %5706 }
 0xf72   : > { %5356 = vst.msk [vmem:[#allocation4 - $0x4] sm:$0xf0] %vm13835_vm10, %v5350_v24  ;;  %5716 = vrot.lane.b32.xlu1 %v5553_v50, %s11212_s9 }
 0xf73   : > { %5342 = vst.msk [vmem:[#allocation4 + $0x5] sm:$0x7] %vm13829_vm3, %v5336_v49  ;;  %5812 = vrot.lane.b32.xlu0 %v5553_v50, %s13843_s14  ;;  %vm13883_vm3 = vmmov %vm13879_vm4 }
 0xf74   : > { %5730 = vst.msk [vmem:[#allocation2 + $0x1] sm:$0x1] %vm13879_vm4, %v5707_v57  ;;  %v5352_v46 = vpop.permute.xlu1 %5351  ;;  %vm13884_vm4 = vmmov %vm13883_vm3 }
 0xf75   : > { %5358 = vst.msk [vmem:[#allocation4 + $0x4] sm:$0xf] %vm13830_vm8, %v5352_v46  ;;  %v5771_v59 = vpop.permute.xlu0 %5770  ;;  %vm13885_vm8 = vmmov %vm13883_vm3 }
 0xf76   : > { %5794 = vst.msk [vmem:[#allocation2 + $0x3] sm:$0x1] %vm13882_vm5, %v5771_v59  ;;  %5780 = vrot.lane.b32.xlu1 %v5553_v50, %s11214_s11  ;;  %vm13886_vm5 = vmmov %vm13883_vm3 }
 0xf77   : > { %5876 = vrot.lane.b32.xlu0 %v5553_v50, %s13841_s16  ;;  %vm13901_vm10 = vmmov %vm13883_vm3 }
 0xf78   : > { %v5739_v60 = vpop.permute.xlu1 %5738 }
 0xf79   : > { %5762 = vst.msk [vmem:[#allocation2 + $0x2] sm:$0x1] %vm13883_vm3, %v5739_v60  ;;  %v5835_v51 = vpop.permute.xlu0 %5834 }
 0xf7a   : > { %5858 = vst.msk [vmem:[#allocation2 + $0x5] sm:$0x1] %vm13884_vm4, %v5835_v51  ;;  %5844 = vrot.lane.b32.xlu1 %v5553_v50, %s11215_s12  ;;  %vm13888_vm4 = vmmov %vm13883_vm3 }
 0xf7b   : > { %5572 = vrot.lane.b32.xlu0 %v5553_v50, %s11224_s26 }
 0xf7c   : > { %v5803_v61 = vpop.permute.xlu1 %5802  ;;  %v5359_v4 = vld [vmem:[#allocation4] sm:$0xff] }
 0xf7d   : > { %5826 = vst.msk [vmem:[#allocation2 + $0x4] sm:$0x1] %vm13885_vm8, %v5803_v61  ;;  %v5899_v6 = vpop.permute.xlu0 %5898  ;;  %v5362_v5 = vsub.f32 %v11141_v9, %v5359_v4  ;;  %vm13887_vm8 = vmmov %vm13883_vm3 }
 0xf7e   : > { %5922 = vst.msk [vmem:[#allocation2 + $0x7] sm:$0x1] %vm13886_vm5, %v5899_v6  ;;  %5908 = vrot.lane.b32.xlu1 %v5553_v50, %s13847_s15  ;;  %vm13889_vm5 = vmmov %vm13883_vm3 }
 0xf7f   : > { %5636 = vrot.lane.b32.xlu0 %v5553_v50, %s13881_s29  ;;  %v5363_v10 = vpack.c.bf16 %v5362_v5, %v5362_v5 }
 0xf80   : > { %v5867_v15 = vpop.permute.xlu1 %5866 }
 0xf81   : > { %5890 = vst.msk [vmem:[#allocation2 + $0x6] sm:$0x1] %vm13883_vm3, %v5867_v15  ;;  %v5595_v7 = vpop.permute.xlu0 %5594  ;;  %v5375_v48 = vsel %vm255_vm1, %v5363_v10, 0 }
 0xf82   : > { %5618 = vst.msk [vmem:[#allocation3 + $0x2] sm:$0x1] %vm3247_vm15, %v5595_v7  ;;  %10700 = vmatpush3.bf16.msra.mxu1 %v5375_v48  ;;  %5604 = vrot.lane.b32.xlu1 %v5553_v50, %s11226_s20 }
 0xf83   : > { %5718 = vrot.lane.b32.xlu0 %v5557_v32, %s11212_s9  ;;  %10711 = vmatprep.subr.mxu1 %v11208_v0 }
 0xf84   : > { %v5563_v13 = vpop.permute.xlu1 %5562 }
 0xf85   : > { %5586 = vst.msk [vmem:[#allocation3 + $0x1] sm:$0x1] %vm3247_vm15, %v5563_v13  ;;  %v5659_v30 = vpop.permute.xlu0 %5658  ;;  %10702 = vmatmul.mubr.msk.bf16.vlgmr.msra.gmra.mrb[56].mxu1 %vm251_vm2, %v10230_v11 }
 0xf86   : > { %5682 = vst.msk [vmem:[#allocation3 + $0x4] sm:$0x1] %vm3247_vm15, %v5659_v30  ;;  %5668 = vrot.lane.b32.xlu1 %v5553_v50, %s11227_s18  ;;  %10713 = vmatprep.mubr.msk.f32.mxu1 %vm11209_vm0, %v11208_v0 }
 0xf87   : > { %5782 = vrot.lane.b32.xlu0 %v5557_v32, %s11214_s11 }
 0xf88   : > { %v5930_v14 = vld [vmem:[#allocation2] sm:$0xff]  ;;  %v5627_v16 = vpop.permute.xlu1 %5626 }
 0xf89   : > { %5650 = vst.msk [vmem:[#allocation3 + $0x3] sm:$0x1] %vm3247_vm15, %v5627_v16  ;;  %10712 = vmatpush3.msra.mxu1 %v5930_v14  ;;  %v5741_v18 = vpop.permute.xlu0 %5740 }
 0xf8a   : > { %5763 = vst.msk [vmem:[#allocation2 + $0xa] sm:$0x1] %vm13887_vm8, %v5741_v18  ;;  %5750 = vrot.lane.b32.xlu1 %v5557_v32, %s13845_s10  ;;  %10721 = vmatprep.subr.mxu1 %v11208_v0  ;;  %vm13890_vm8 = vmmov %vm13883_vm3 }
 0xf8b   : > { %5846 = vrot.lane.b32.xlu0 %v5557_v32, %s11215_s12 }
 0xf8c   : > { %v5709_v19 = vpop.permute.xlu1 %5708 }
 0xf8d   : > { %5731 = vst.msk [vmem:[#allocation2 + $0x9] sm:$0x1] %vm13888_vm4, %v5709_v19  ;;  %v5805_v20 = vpop.permute.xlu0 %5804  ;;  %vm13891_vm4 = vmmov %vm13883_vm3 }
 0xf8e   : > { %5827 = vst.msk [vmem:[#allocation2 + $0xc] sm:$0x1] %vm13889_vm5, %v5805_v20  ;;  %5814 = vrot.lane.b32.xlu1 %v5557_v32, %s13843_s14  ;;  %vm13892_vm5 = vmmov %vm13883_vm3 }
 0xf8f   : > { %5910 = vrot.lane.b32.xlu0 %v5557_v32, %s13847_s15 }
 0xf90   : > { %v5773_v25 = vpop.permute.xlu1 %5772  ;;  %v5690_v27 = vld [vmem:[#allocation3] sm:$0x1f] }
 0xf91   : > { %5795 = vst.msk [vmem:[#allocation2 + $0xb] sm:$0x1] %vm13883_vm3, %v5773_v25  ;;  %10714 = vmatmul.mubr.msk.f32.vlgmr.msra.gmra.mrb[54].mxu1 %vm251_vm2, %v5690_v27  ;;  %v5869_v29 = vpop.permute.xlu0 %5868 }
 0xf92   : > { %5891 = vst.msk [vmem:[#allocation2 + $0xe] sm:$0x1] %vm13890_vm8, %v5869_v29  ;;  %5878 = vrot.lane.b32.xlu1 %v5557_v32, %s13841_s16  ;;  %10723 = vmatprep.mubr.msk.f32.mxu1 %vm11209_vm0, %v11208_v0  ;;  %vm13893_vm8 = vmmov %vm13883_vm3 }
 0xf93   : > { %5606 = vrot.lane.b32.xlu0 %v5557_v32, %s11226_s20 }
 0xf94   : > { %v5837_v31 = vpop.permute.xlu1 %5836 }
 0xf95   : > { %5859 = vst.msk [vmem:[#allocation2 + $0xd] sm:$0x1] %vm13891_vm4, %v5837_v31  ;;  %v5565_v34 = vpop.permute.xlu0 %5564  ;;  %vm13894_vm4 = vmmov %vm13883_vm3 }
 0xf96   : > { %5587 = vst.msk [vmem:[#allocation3 + $0x9] sm:$0x1] %vm3247_vm15, %v5565_v34  ;;  %5574 = vrot.lane.b32.xlu1 %v5557_v32, %s11224_s26 }
 0xf97   : > { %5670 = vrot.lane.b32.xlu0 %v5557_v32, %s11227_s18 }
 0xf98   : > { %v5901_v56 = vpop.permute.xlu1 %5900 }
 0xf99   : > { %5923 = vst.msk [vmem:[#allocation2 + $0xf] sm:$0x1] %vm13892_vm5, %v5901_v56  ;;  %v5629_v38 = vpop.permute.xlu0 %5628  ;;  %vm13895_vm5 = vmmov %vm13883_vm3 }
 0xf9a   : > { %5651 = vst.msk [vmem:[#allocation3 + $0xb] sm:$0x1] %vm3247_vm15, %v5629_v38  ;;  %5638 = vrot.lane.b32.xlu1 %v5557_v32, %s13881_s29 }
 0xf9b   : > { %5752 = vrot.lane.b32.xlu0 %v5561_v37, %s13845_s10 }
 0xf9c   : > { %v5597_v22 = vpop.permute.xlu1 %5596 }
 0xf9d   : > { %5619 = vst.msk [vmem:[#allocation3 + $0xa] sm:$0x1] %vm3247_vm15, %v5597_v22  ;;  %v5711_v28 = vpop.permute.xlu0 %5710 }
 0xf9e   : > { %5732 = vst.msk [vmem:[#allocation2 + $0x11] sm:$0x1] %vm13883_vm3, %v5711_v28  ;;  %5720 = vrot.lane.b32.xlu1 %v5561_v37, %s11212_s9 }
 0xf9f   : > { %5816 = vrot.lane.b32.xlu0 %v5561_v37, %s13843_s14 }
 0xfa0   : > { %v5931_v39 = vld [vmem:[#allocation2 + $0x8] sm:$0xff]  ;;  %v5661_v40 = vpop.permute.xlu1 %5660 }
 0xfa1   : > { %5683 = vst.msk [vmem:[#allocation3 + $0xc] sm:$0x1] %vm3247_vm15, %v5661_v40  ;;  %v5775_v36 = vpop.permute.xlu0 %5774  ;;  %10717 = vmatpush3.msra.mxu0 %v5931_v39 }
 0xfa2   : > { %5796 = vst.msk [vmem:[#allocation2 + $0x13] sm:$0x1] %vm13893_vm8, %v5775_v36  ;;  %5784 = vrot.lane.b32.xlu1 %v5561_v37, %s11214_s11  ;;  %10726 = vmatprep.subr.mxu0 %v11208_v0  ;;  %vm13896_vm8 = vmmov %vm13883_vm3 }
 0xfa3   : > { %5880 = vrot.lane.b32.xlu0 %v5561_v37, %s13841_s16 }
 0xfa4   : > { %v5743_v47 = vpop.permute.xlu1 %5742 }
 0xfa5   : > { %5764 = vst.msk [vmem:[#allocation2 + $0x12] sm:$0x1] %vm13894_vm4, %v5743_v47  ;;  %v5839_v42 = vpop.permute.xlu0 %5838  ;;  %vm13897_vm4 = vmmov %vm13883_vm3 }
 0xfa6   : > { %5860 = vst.msk [vmem:[#allocation2 + $0x15] sm:$0x1] %vm13895_vm5, %v5839_v42  ;;  %5848 = vrot.lane.b32.xlu1 %v5561_v37, %s11215_s12  ;;  %vm13898_vm5 = vmmov %vm13883_vm3 }
 0xfa7   : > { %5576 = vrot.lane.b32.xlu0 %v5561_v37, %s11224_s26 }
 0xfa8   : > { %v5807_v62 = vpop.permute.xlu1 %5806  ;;  %v5691_v35 = vld [vmem:[#allocation3 + $0x8] sm:$0x1f] }
 0xfa9   : > { %5828 = vst.msk [vmem:[#allocation2 + $0x14] sm:$0x1] %vm13883_vm3, %v5807_v62  ;;  %v5903_v1 = vpop.permute.xlu0 %5902  ;;  %10719 = vmatmul.mubr.msk.f32.vlgmr.msra.gmra.mrb[58].mxu0 %vm251_vm2, %v5691_v35 }
 0xfaa   : > { %5924 = vst.msk [vmem:[#allocation2 + $0x17] sm:$0x1] %vm13896_vm8, %v5903_v1  ;;  %5912 = vrot.lane.b32.xlu1 %v5561_v37, %s13847_s15  ;;  %10728 = vmatprep.mubr.msk.f32.mxu0 %vm11209_vm0, %v11208_v0  ;;  %vm13899_vm8 = vmmov %vm13883_vm3 }
 0xfab   : > { %5640 = vrot.lane.b32.xlu0 %v5561_v37, %s13881_s29 }
 0xfac   : > { %v5871_v41 = vpop.permute.xlu1 %5870 }
 0xfad   : > { %5892 = vst.msk [vmem:[#allocation2 + $0x16] sm:$0x1] %vm13897_vm4, %v5871_v41  ;;  %v5599_v44 = vpop.permute.xlu0 %5598  ;;  %vm13900_vm4 = vmmov %vm13883_vm3 }
 0xfae   : > { %5620 = vst.msk [vmem:[#allocation3 + $0x12] sm:$0x1] %vm3247_vm15, %v5599_v44  ;;  %5608 = vrot.lane.b32.xlu1 %v5561_v37, %s11226_s20 }
 0xfb0   : > { %v5567_v21 = vpop.permute.xlu1 %5566 }
 0xfb1   : > { %5588 = vst.msk [vmem:[#allocation3 + $0x11] sm:$0x1] %vm3247_vm15, %v5567_v21  ;;  %v5663_v63 = vpop.permute.xlu0 %5662 }
 0xfb2   : > { %5684 = vst.msk [vmem:[#allocation3 + $0x14] sm:$0x1] %vm3247_vm15, %v5663_v63  ;;  %5672 = vrot.lane.b32.xlu1 %v5561_v37, %s11227_s18 }
 0xfb4   : > { %v5932_v54 = vld [vmem:[#allocation2 + $0x10] sm:$0xff]  ;;  %v5631_v53 = vpop.permute.xlu1 %5630 }
 0xfb5   : > { %5652 = vst.msk [vmem:[#allocation3 + $0x13] sm:$0x1] %vm3247_vm15, %v5631_v53  ;;  %10722 = vmatpush3.msra.mxu1 %v5932_v54  ;;  %v5715_v23 = vpop.permute.xlu0 %5714 }
 0xfb6   : > { %5734 = vst.msk [vmem:[#allocation2 + $0x21] sm:$0x1] %vm13898_vm5, %v5715_v23  ;;  %10731 = vmatprep.subr.mxu1 %v11208_v0  ;;  %6641 = vperm.xlu1 %10967, %v10244_v52   ;;  %vm13902_vm5 = vmmov %vm13883_vm3  ;;  %v10243_v23 = vld [vmem:[%s13782_s2 + $0xc] sm:$0xf] }
 0xfb8   : > { %v5747_v12 = vpop.permute.xlu1 %5746 }
 0xfb9   : > { %5766 = vst.msk [vmem:[#allocation2 + $0x22] sm:$0x1] %vm13883_vm3, %v5747_v12  ;;  %v5779_v24 = vpop.permute.xlu0 %5778 }
 0xfba   : > { %5798 = vst.msk [vmem:[#allocation2 + $0x23] sm:$0x1] %vm13899_vm8, %v5779_v24  ;;  %vm13904_vm8 = vmmov %vm13883_vm3 }
 0xfbc   : > { %v5811_v33 = vpop.permute.xlu1 %5810  ;;  %v5692_v43 = vld [vmem:[#allocation3 + $0x10] sm:$0x1f] }
 0xfbd   : > { %5830 = vst.msk [vmem:[#allocation2 + $0x24] sm:$0x1] %vm13900_vm4, %v5811_v33  ;;  %10724 = vmatmul.mubr.msk.f32.vlgmr.msra.gmra.mrb[60].mxu1 %vm251_vm2, %v5692_v43  ;;  %v5843_v45 = vpop.permute.xlu0 %5842  ;;  %vm13905_vm4 = vmmov %vm13883_vm3 }
 0xfbe   : > { %5862 = vst.msk [vmem:[#allocation2 + $0x25] sm:$0x1] %vm13901_vm10, %v5843_v45  ;;  %10733 = vmatprep.mubr.msk.f32.mxu1 %vm11209_vm0, %v11208_v0  ;;  %vm13903_vm10 = vmmov %vm13883_vm3 }
 0xfc0   : > { %v5875_v26 = vpop.permute.xlu1 %5874 }
 0xfc1   : > { %5894 = vst.msk [vmem:[#allocation2 + $0x26] sm:$0x1] %vm13902_vm5, %v5875_v26  ;;  %v5907_v50 = vpop.permute.xlu0 %5906  ;;  %vm13906_vm5 = vmmov %vm13883_vm3 }
 0xfc2   : > { %5926 = vst.msk [vmem:[#allocation2 + $0x27] sm:$0x1] %vm13883_vm3, %v5907_v50 }
 0xfc4   : > { %v5571_v55 = vpop.permute.xlu1 %5570 }
 0xfc5   : > { %5590 = vst.msk [vmem:[#allocation3 + $0x21] sm:$0x1] %vm3247_vm15, %v5571_v55  ;;  %v5603_v49 = vpop.permute.xlu0 %5602 }
 0xfc6   : > { %5622 = vst.msk [vmem:[#allocation3 + $0x22] sm:$0x1] %vm3247_vm15, %v5603_v49 }
 0xfc8   : > { %v5635_v57 = vpop.permute.xlu1 %5634 }
 0xfc9   : > { %v5934_v46 = vld [vmem:[#allocation2 + $0x20] sm:$0xff]  ;;  %5654 = vst.msk [vmem:[#allocation3 + $0x23] sm:$0x1] %vm3247_vm15, %v5635_v57  ;;  %v5667_v59 = vpop.permute.xlu0 %5666 }
 0xfca   : > { %5686 = vst.msk [vmem:[#allocation3 + $0x24] sm:$0x1] %vm3247_vm15, %v5667_v59  ;;  %10732 = vmatpush3.msra.mxu1 %v5934_v46 }
 0xfcb   : > { %10741 = vmatprep.subr.mxu1 %v11208_v0 }
 0xfcc   : > { %v5713_v60 = vpop.permute.xlu1 %5712 }
 0xfcd   : > { %5733 = vst.msk [vmem:[#allocation2 + $0x19] sm:$0x1] %vm13903_vm10, %v5713_v60  ;;  %v5745_v51 = vpop.permute.xlu0 %5744  ;;  %vm13907_vm10 = vmmov %vm13883_vm3 }
 0xfce   : > { %5765 = vst.msk [vmem:[#allocation2 + $0x1a] sm:$0x1] %vm13904_vm8, %v5745_v51  ;;  %vm13908_vm8 = vmmov %vm13883_vm3 }
 0xfd0   : > { %v5777_v61 = vpop.permute.xlu1 %5776 }
 0xfd1   : > { %5797 = vst.msk [vmem:[#allocation2 + $0x1b] sm:$0x1] %vm13905_vm4, %v5777_v61  ;;  %v5809_v4 = vpop.permute.xlu0 %5808  ;;  %v5694_v6 = vld [vmem:[#allocation3 + $0x20] sm:$0x1f]  ;;  %vm13909_vm4 = vmmov %vm13883_vm3 }
 0xfd2   : > { %5829 = vst.msk [vmem:[#allocation2 + $0x1c] sm:$0x1] %vm13906_vm5, %v5809_v4  ;;  %10734 = vmatmul.mubr.msk.f32.vlgmr.msra.gmra.mrb[62].mxu1 %vm251_vm2, %v5694_v6  ;;  %vm13910_vm5 = vmmov %vm13883_vm3 }
 0xfd3   : > { %10743 = vmatprep.mubr.msk.f32.mxu1 %vm11209_vm0, %v11208_v0 }
 0xfd4   : > { %v5841_v9 = vpop.permute.xlu1 %5840 }
 0xfd5   : > { %5861 = vst.msk [vmem:[#allocation2 + $0x1d] sm:$0x1] %vm13883_vm3, %v5841_v9  ;;  %v5873_v5 = vpop.permute.xlu0 %5872 }
 0xfd6   : > { %5893 = vst.msk [vmem:[#allocation2 + $0x1e] sm:$0x1] %vm13907_vm10, %v5873_v5  ;;  %vm13911_vm10 = vmmov %vm13883_vm3 }
 0xfd8   : > { %v5905_v10 = vpop.permute.xlu1 %5904 }
 0xfd9   : > { %5925 = vst.msk [vmem:[#allocation2 + $0x1f] sm:$0x1] %vm13908_vm8, %v5905_v10  ;;  %v5569_v15 = vpop.permute.xlu0 %5568  ;;  %vm13912_vm8 = vmmov %vm13883_vm3 }
 0xfda   : > { %5589 = vst.msk [vmem:[#allocation3 + $0x19] sm:$0x1] %vm3247_vm15, %v5569_v15 }
 0xfdc   : > { %v5601_v32 = vpop.permute.xlu1 %5600 }
 0xfdd   : > { %5621 = vst.msk [vmem:[#allocation3 + $0x1a] sm:$0x1] %vm3247_vm15, %v5601_v32  ;;  %v5633_v7 = vpop.permute.xlu0 %5632 }
 0xfde   : > { %5653 = vst.msk [vmem:[#allocation3 + $0x1b] sm:$0x1] %vm3247_vm15, %v5633_v7 }
 0xfe0   : > { %v5933_v48 = vld [vmem:[#allocation2 + $0x18] sm:$0xff]  ;;  %v5665_v11 = vpop.permute.xlu1 %5664 }
 0xfe1   : > { %5685 = vst.msk [vmem:[#allocation3 + $0x1c] sm:$0x1] %vm3247_vm15, %v5665_v11  ;;  %10727 = vmatpush3.msra.mxu0 %v5933_v48  ;;  %v5749_v13 = vpop.permute.xlu0 %5748 }
 0xfe2   : > { %5767 = vst.msk [vmem:[#allocation2 + $0x2a] sm:$0x1] %vm13909_vm4, %v5749_v13  ;;  %10736 = vmatprep.subr.mxu0 %v11208_v0  ;;  %vm13913_vm4 = vmmov %vm13883_vm3 }
 0xfe4   : > { %v5717_v30 = vpop.permute.xlu1 %5716 }
 0xfe5   : > { %5735 = vst.msk [vmem:[#allocation2 + $0x29] sm:$0x1] %vm13910_vm5, %v5717_v30  ;;  %v5813_v14 = vpop.permute.xlu0 %5812  ;;  %vm13914_vm5 = vmmov %vm13883_vm3 }
 0xfe6   : > { %5831 = vst.msk [vmem:[#allocation2 + $0x2c] sm:$0x1] %vm13883_vm3, %v5813_v14 }
 0xfe8   : > { %v5781_v16 = vpop.permute.xlu1 %5780  ;;  %v5693_v18 = vld [vmem:[#allocation3 + $0x18] sm:$0x1f] }
 0xfe9   : > { %5799 = vst.msk [vmem:[#allocation2 + $0x2b] sm:$0x1] %vm13911_vm10, %v5781_v16  ;;  %10729 = vmatmul.mubr.msk.f32.vlgmr.msra.gmra.mrb[64].mxu0 %vm251_vm2, %v5693_v18  ;;  %v5877_v19 = vpop.permute.xlu0 %5876  ;;  %vm13915_vm10 = vmmov %vm13883_vm3 }
 0xfea   : > { %5895 = vst.msk [vmem:[#allocation2 + $0x2e] sm:$0x1] %vm13912_vm8, %v5877_v19  ;;  %10738 = vmatprep.mubr.msk.f32.mxu0 %vm11209_vm0, %v11208_v0  ;;  %vm13916_vm8 = vmmov %vm13883_vm3 }
 0xfec   : > { %v5845_v20 = vpop.permute.xlu1 %5844 }
 0xfed   : > { %5863 = vst.msk [vmem:[#allocation2 + $0x2d] sm:$0x1] %vm13913_vm4, %v5845_v20  ;;  %v5573_v25 = vpop.permute.xlu0 %5572  ;;  %vm13917_vm4 = vmmov %vm13883_vm3 }
 0xfee   : > { %5591 = vst.msk [vmem:[#allocation3 + $0x29] sm:$0x1] %vm3247_vm15, %v5573_v25 }
 0xff0   : > { %v5909_v27 = vpop.permute.xlu1 %5908 }
 0xff1   : > { %5927 = vst.msk [vmem:[#allocation2 + $0x2f] sm:$0x1] %vm13914_vm5, %v5909_v27  ;;  %v5637_v29 = vpop.permute.xlu0 %5636  ;;  %vm13918_vm5 = vmmov %vm13883_vm3 }
 0xff2   : > { %5655 = vst.msk [vmem:[#allocation3 + $0x2b] sm:$0x1] %vm3247_vm15, %v5637_v29 }
 0xff4   : > { %v5605_v31 = vpop.permute.xlu1 %5604 }
 0xff5   : > { %5623 = vst.msk [vmem:[#allocation3 + $0x2a] sm:$0x1] %vm3247_vm15, %v5605_v31  ;;  %v5719_v34 = vpop.permute.xlu0 %5718 }
 0xff6   : > { %5736 = vst.msk [vmem:[#allocation2 + $0x31] sm:$0x1] %vm13883_vm3, %v5719_v34 }
 0xff8   : > { %v5935_v56 = vld [vmem:[#allocation2 + $0x28] sm:$0xff]  ;;  %v5669_v37 = vpop.permute.xlu1 %5668 }
 0xff9   : > { %5687 = vst.msk [vmem:[#allocation3 + $0x2c] sm:$0x1] %vm3247_vm15, %v5669_v37  ;;  %v5783_v38 = vpop.permute.xlu0 %5782  ;;  %10737 = vmatpush3.msra.mxu0 %v5935_v56 }
 0xffa   : > { %5800 = vst.msk [vmem:[#allocation2 + $0x33] sm:$0x1] %vm13915_vm10, %v5783_v38  ;;  %10746 = vmatprep.subr.mxu0 %v11208_v0  ;;  %vm13919_vm10 = vmmov %vm13883_vm3 }
 0xffc   : > { %v5751_v22 = vpop.permute.xlu1 %5750 }
 0xffd   : > { %5768 = vst.msk [vmem:[#allocation2 + $0x32] sm:$0x1] %vm13916_vm8, %v5751_v22  ;;  %v5847_v28 = vpop.permute.xlu0 %5846  ;;  %vm13920_vm8 = vmmov %vm13883_vm3 }
 0xffe   : > { %5864 = vst.msk [vmem:[#allocation2 + $0x35] sm:$0x1] %vm13917_vm4, %v5847_v28  ;;  %vm13921_vm4 = vmmov %vm13883_vm3 }
0x1000   : > { %v5815_v39 = vpop.permute.xlu1 %5814  ;;  %v5695_v40 = vld [vmem:[#allocation3 + $0x28] sm:$0x1f] }
0x1001   : > { %5832 = vst.msk [vmem:[#allocation2 + $0x34] sm:$0x1] %vm13918_vm5, %v5815_v39  ;;  %v5911_v36 = vpop.permute.xlu0 %5910  ;;  %10739 = vmatmul.mubr.msk.f32.vlgmr.msra.gmra.mrb[66].mxu0 %vm251_vm2, %v5695_v40  ;;  %vm13922_vm5 = vmmov %vm13883_vm3 }
0x1002   : > { %5928 = vst.msk [vmem:[#allocation2 + $0x37] sm:$0x1] %vm13883_vm3, %v5911_v36  ;;  %10748 = vmatprep.mubr.msk.f32.mxu0 %vm11209_vm0, %v11208_v0 }
0x1004   : > { %v5879_v47 = vpop.permute.xlu1 %5878 }
0x1005   : > { %5896 = vst.msk [vmem:[#allocation2 + $0x36] sm:$0x1] %vm13919_vm10, %v5879_v47  ;;  %v5607_v42 = vpop.permute.xlu0 %5606  ;;  %vm13923_vm10 = vmmov %vm13883_vm3 }
0x1006   : > { %5624 = vst.msk [vmem:[#allocation3 + $0x32] sm:$0x1] %vm3247_vm15, %v5607_v42 }
0x1008   : > { %v5575_v62 = vpop.permute.xlu1 %5574 }
0x1009   : > { %5592 = vst.msk [vmem:[#allocation3 + $0x31] sm:$0x1] %vm3247_vm15, %v5575_v62  ;;  %v5671_v35 = vpop.permute.xlu0 %5670 }
0x100a   : > { %5688 = vst.msk [vmem:[#allocation3 + $0x34] sm:$0x1] %vm3247_vm15, %v5671_v35 }
0x100c   : > { %v5936_v1 = vld [vmem:[#allocation2 + $0x30] sm:$0xff]  ;;  %v5639_v41 = vpop.permute.xlu1 %5638 }
0x100d   : > { %5656 = vst.msk [vmem:[#allocation3 + $0x33] sm:$0x1] %vm3247_vm15, %v5639_v41  ;;  %10742 = vmatpush3.msra.mxu1 %v5936_v1  ;;  %v5753_v44 = vpop.permute.xlu0 %5752 }
0x100e   : > { %5769 = vst.msk [vmem:[#allocation2 + $0x3a] sm:$0x1] %vm13920_vm8, %v5753_v44  ;;  %10751 = vmatprep.subr.bf16.mxu1 %v11208_v0  ;;  %vm13924_vm8 = vmmov %vm13883_vm3 }
0x1010   : > { %v5721_v21 = vpop.permute.xlu1 %5720 }
0x1011   : > { %5737 = vst.msk [vmem:[#allocation2 + $0x39] sm:$0x1] %vm13921_vm4, %v5721_v21  ;;  %v5817_v63 = vpop.permute.xlu0 %5816  ;;  %vm13925_vm4 = vmmov %vm13883_vm3 }
0x1012   : > { %5833 = vst.msk [vmem:[#allocation2 + $0x3c] sm:$0x1] %vm13922_vm5, %v5817_v63  ;;  %vm13926_vm5 = vcmask 36864  }
0x1014   : > { %v5785_v52 = vpop.permute.xlu1 %5784  ;;  %v5696_v54 = vld [vmem:[#allocation3 + $0x30] sm:$0x1f] }
0x1015   : > { %5801 = vst.msk [vmem:[#allocation2 + $0x3b] sm:$0x1] %vm13883_vm3, %v5785_v52  ;;  %10744 = vmatmul.mubr.msk.f32.vlgmr.msra.gmra.mrb[64].mxu1 %vm251_vm2, %v5696_v54  ;;  %v5881_v53 = vpop.permute.xlu0 %5880  ;;  %vm13927_vm3 = vmmov %vm13926_vm5 }
0x1016   : > { %5897 = vst.msk [vmem:[#allocation2 + $0x3e] sm:$0x1] %vm13923_vm10, %v5881_v53  ;;  %10752 = vmatpush3.bf16.msra.mxu1 %v11337_v3  ;;  %10753 = vmatprep.mubr.msk.bf16.mxu1 %vm11209_vm0, %v11208_v0  ;;  %vm13928_vm10 = vmmov %vm13927_vm3 }
0x1017   : > { %10767 = vmatprep.subr.mxu1 %v11208_v0 }
0x1018   : > { %v5849_v12 = vpop.permute.xlu1 %5848 }
0x1019   : > { %5865 = vst.msk [vmem:[#allocation2 + $0x3d] sm:$0x1] %vm13924_vm8, %v5849_v12  ;;  %v5577_v24 = vpop.permute.xlu0 %5576  ;;  %10754 = vmatmul.mubr.msk.bf16.vlgmr.msra.gmra.mrb[68].mxu1 %vm251_vm2, %v10243_v23  ;;  %vm13929_vm8 = vmmov %vm13927_vm3 }
0x101a   : > { %5593 = vst.msk [vmem:[#allocation3 + $0x39] sm:$0x1] %vm3247_vm15, %v5577_v24  ;;  %10769 = vmatprep.mubr.msk.f32.mxu1 %vm11209_vm0, %v11208_v0 }
0x101c   : > { %v5913_v33 = vpop.permute.xlu1 %5912 }
0x101d   : > { %5929 = vst.msk [vmem:[#allocation2 + $0x3f] sm:$0x1] %vm13925_vm4, %v5913_v33  ;;  %v5641_v43 = vpop.permute.xlu0 %5640  ;;  %vm13930_vm4 = vmmov %vm13927_vm3 }
0x101e   : > { %5657 = vst.msk [vmem:[#allocation3 + $0x3b] sm:$0x1] %vm3247_vm15, %v5641_v43 }
0x1020   : > { %v5609_v45 = vpop.permute.xlu1 %5608 }
0x1021   : > { %5625 = vst.msk [vmem:[#allocation3 + $0x3a] sm:$0x1] %vm3247_vm15, %v5609_v45 }
0x1024   : > { %v5937_v26 = vld [vmem:[#allocation2 + $0x38] sm:$0xff]  ;;  %v5673_v50 = vpop.permute.xlu1 %5672 }
0x1025   : > { %5689 = vst.msk [vmem:[#allocation3 + $0x3c] sm:$0x1] %vm3247_vm15, %v5673_v50  ;;  %10747 = vmatpush3.msra.mxu0 %v5937_v26 }
0x1026   : > { %10757 = vmatprep.subr.mxu0 %v11208_v0 }
0x102c   : > { %v5697_v55 = vld [vmem:[#allocation3 + $0x38] sm:$0x1f] }
0x102d   : > { %10749 = vmatmul.mubr.msk.f32.vlgmr.msra.gmra.mrb[68].mxu0 %vm251_vm2, %v5697_v55 }
0x102e   : > { %10759 = vmatprep.mubr.msk.f32.mxu0 %vm11209_vm0, %v11208_v0 }
0x1035   : > { %v6642_v27 = vpop.permute.xlu1 %6641 }
0x1058   : > { %v12722_v49 = vpop.f32.mrb[56].mxu1 }
0x1059   : > { %v10703_v57 = vpop.f32.mrb[57].mxu1 }
0x105a   : > { %v5414_v46 = vpop.f32.mrb[58].mxu1 }
0x105b   : > { %v10704_v59 = vpop.f32.mrb[59].mxu1 }
0x1064   : > { %v12724_v60 = vpop.f32.mrb[54].mxu1 }
0x1065   : > { %v10715_v51 = vpop.f32.mrb[55].mxu1  ;;  %v6522_v13 = vsel %vm13929_vm8, %v12724_v60, -inf }
0x107c   : > { %v12726_v61 = vpop.f32.mrb[58].mxu0 }
0x107d   : > { %v10720_v4 = vpop.f32.mrb[59].mxu0  ;;  %v6525_v6 = vsel %vm13926_vm5, %v12726_v61, -inf  ;;  %vm13931_vm5 = vmmov %vm13927_vm3 }
0x107e   : > { %6526 = vmax.xlane.f32.xlu1 %v6525_v6 }
0x1090   : > { %v12730_v9 = vpop.f32.mrb[60].mxu1 }
0x1091   : > { %v10725_v5 = vpop.f32.mrb[61].mxu1  ;;  %v6528_v18 = vsel %vm13931_vm5, %v12730_v9, -inf }
0x10a5   : > { %v12732_v10 = vpop.f32.mrb[62].mxu1 }
0x10a6   : > { %v10735_v15 = vpop.f32.mrb[63].mxu1  ;;  %v6534_v32 = vsel %vm13927_vm3, %v12732_v10, -inf }
0x10a7   : > { %6535 = vmax.xlane.f32.xlu1 %v6534_v32 }
0x10bc   : > { %v12736_v7 = vpop.f32.mrb[64].mxu0 }
0x10bd   : > { %v10730_v48 = vpop.f32.mrb[65].mxu0  ;;  %v6531_v11 = vsel %vm13928_vm10, %v12736_v7, -inf  ;;  %vm13932_vm10 = vcmask 32768  }
0x10be   : > { %6532 = vmax.xlane.f32.xlu0 %v6531_v11  ;;  %vm13933_vm8 = vmmov %vm13932_vm10 }
0x10c2   : > { %6523 = vmax.xlane.f32.xlu0 %v6522_v13 }
0x10d4   : > { %v12742_v30 = vpop.f32.mrb[66].mxu0 }
0x10d5   : > { %v10740_v14 = vpop.f32.mrb[67].mxu0  ;;  %v6537_v16 = vsel %vm13930_vm4, %v12742_v30, -inf  ;;  %vm13934_vm4 = vmmov %vm13933_vm8 }
0x10d6   : > { %6538 = vmax.xlane.f32.xlu0 %v6537_v16  ;;  %vm13935_vm5 = vmmov %vm13934_vm4 }
0x10da   : > { %6529 = vmax.xlane.f32.xlu0 %v6528_v18 }
0x10e8   : > { %v12748_v19 = vpop.f32.mrb[64].mxu1 }
0x10e9   : > { %v10745_v20 = vpop.f32.mrb[65].mxu1  ;;  %v6540_v25 = vsel %vm13927_vm3, %v12748_v19, -inf  ;;  %vm13936_vm3 = vmmov %vm13934_vm4 }
0x10ea   : > { %6541 = vmax.xlane.f32.xlu1 %v6540_v25  ;;  %vm13937_vm7 = vmmov %vm13936_vm3 }
0x10eb   : > { %vm13938_vm12 = vmmov %vm13936_vm3 }
0x10ec   : > { %v6681_v29 = vpop.f32.mrb[68].mxu1  ;;  %vm13969_vm11 = vmmov %vm13936_vm3 }
0x10ed   : > { %v6682_v31 = vadd.f32 %v6681_v29, %v6642_v27  ;;  %v10755_v34 = vpop.f32.mrb[69].mxu1 }
0x10ee   : > { %v6684_v56 = vpop.f32.mrb[70].mxu1 }
0x10ef   : > { %v6688_v37 = vcombine.high %v6682_v31, %v6682_v31  ;;  %v6695_v38 = vrot.slane %v6682_v31, %v11411_v2  ;;  %v10756_v22 = vpop.f32.mrb[71].mxu1 }
0x10f1   : > { %v6702_v28 = vrot.slane %v6688_v37, %v11411_v2  ;;  %v6703_v39 = vcombine.high %v6695_v38, %v6695_v38  ;;  %v6711_v40 = vrot.slane %v6695_v38, %v11411_v2 }
0x10f3   : > { %v6704_v36 = vcombine.high %v6702_v28, %v6702_v28  ;;  %v6718_v47 = vrot.slane %v6702_v28, %v11411_v2  ;;  %v6725_v42 = vrot.slane %v6703_v39, %v11411_v2  ;;  %v6733_v62 = vcombine.high %v6711_v40, %v6711_v40  ;;  %6745 = vst.msk [vmem:[#allocation2] sm:$0x1] %vm13932_vm10, %v6711_v40  ;;  %vm13939_vm10 = vmmov %vm13936_vm3 }
0x10f4   : > { %v6756_v21 = vrot.slane %v6711_v40, %v11414_v8 }
0x10f5   : > { %v6732_v35 = vrot.slane %v6704_v36, %v11411_v2  ;;  %v12759_v1 = vcombine.high %v6718_v47, %v6718_v47  ;;  %v6735_v41 = vcombine.high %v6725_v42, %v6725_v42  ;;  %6746 = vst.msk [vmem:[#allocation2 + $0x8] sm:$0x1] %vm13933_vm8, %v6725_v42  ;;  %v6760_v63 = vrot.slane %v6725_v42, %v11414_v8 }
0x10f6   : > { %6747 = vst.msk [vmem:[#allocation2 + $0x10] sm:$0x1] %vm13934_vm4, %v6733_v62  ;;  %vm13940_vm8 = vcmask 36864   ;;  %v6764_v23 = vrot.slane %v6733_v62, %v11414_v8  ;;  %v6772_v12 = vrot.slane %v6718_v47, %v11414_v8  ;;  %vm13943_vm4 = vmmov %vm13936_vm3 }
0x10f7   : > { %6749 = vst.msk [vmem:[#allocation2 + $0x20] sm:$0x1] %vm13935_vm5, %v6718_v47  ;;  %v12764_v44 = vcombine.high %v6732_v35, %v6732_v35  ;;  %v6768_v24 = vrot.slane %v6735_v41, %v11414_v8  ;;  %v12805_v33 = vrot.slane %v6732_v35, %v11414_v8  ;;  %vm13944_vm5 = vmmov %vm13936_vm3 }
0x10f8   : > { %6748 = vst.msk [vmem:[#allocation2 + $0x18] sm:$0x1] %vm13936_vm3, %v6735_v41 }
0x10f9   : > { %6750 = vst.msk [vmem:[#allocation2 + $0x28] sm:$0x1] %vm13937_vm7, %v6732_v35  ;;  %vm13942_vm7 = vmmov %vm13936_vm3  ;;  %v12875_v36 = vrot.slane %v12764_v44, %v11414_v8 }
0x10fa   : > { %6751 = vst.msk [vmem:[#allocation2 + $0x30] sm:$0x1] %vm13938_vm12, %v12759_v1  ;;  %vm13941_vm12 = vmmov %vm13940_vm8 }
0x10fb   : > { %6752 = vst.msk [vmem:[#allocation2 + $0x38] sm:$0x1] %vm13939_vm10, %v12764_v44  ;;  %6849 = vrot.lane.b32.xlu1 %v6756_v21, %s11214_s11  ;;  %vm13945_vm10 = vmmov %vm13940_vm8 }
0x10ff   : > { %6787 = vrot.lane.b32.xlu1 %v6760_v63, %s11212_s9 }
0x1100   : > { %v12776_v52 = vpop.f32.mrb[68].mxu0 }
0x1101   : > { %v10750_v54 = vpop.f32.mrb[69].mxu0  ;;  %v6543_v53 = vsel %vm13940_vm8, %v12776_v52, -inf  ;;  %vm13946_vm8 = vmmov %vm13936_vm3 }
0x1102   : > { %6544 = vmax.xlane.f32.xlu0 %v6543_v53 }
0x1103   : > { %6851 = vrot.lane.b32.xlu1 %v6760_v63, %s11214_s11 }
0x1107   : > { %6915 = vrot.lane.b32.xlu1 %v6760_v63, %s11215_s12 }
0x110b   : > { %6979 = vrot.lane.b32.xlu1 %v6760_v63, %s13847_s15  ;;  %v6527_v57 = vpop.xlane.xlu1 %6526 }
0x110c   : > { %v6547_v4 = vsub.f32 %v12726_v61, %v6527_v57 }
0x110e   : > { %v6556_v5 = vmul.f32 1.442695, %v6547_v4 }
0x110f   : > { %6821 = vrot.lane.b32.xlu1 %v6764_v23, %s13845_s10 }
0x1113   : > { %6885 = vrot.lane.b32.xlu1 %v6764_v23, %s13843_s14 }
0x1117   : > { %6949 = vrot.lane.b32.xlu1 %v6764_v23, %s13841_s16 }
0x1118   : > { %6785 = vrot.lane.b32.xlu0 %v6756_v21, %s11212_s9 }
0x111b   : > { %6825 = vrot.lane.b32.xlu1 %v6772_v12, %s13845_s10 }
0x111c   : > { %6817 = vrot.lane.b32.xlu0 %v6756_v21, %s13845_s10 }
0x111f   : > { %6889 = vrot.lane.b32.xlu1 %v6772_v12, %s13843_s14 }
0x1120   : > { %6881 = vrot.lane.b32.xlu0 %v6756_v21, %s13843_s14 }
0x1123   : > { %6953 = vrot.lane.b32.xlu1 %v6772_v12, %s13841_s16 }
0x1124   : > { %6913 = vrot.lane.b32.xlu0 %v6756_v21, %s11215_s12 }
0x1127   : > { %6791 = vrot.lane.b32.xlu1 %v6768_v24, %s11212_s9 }
0x1128   : > { %6945 = vrot.lane.b32.xlu0 %v6756_v21, %s13841_s16 }
0x112b   : > { %6855 = vrot.lane.b32.xlu1 %v6768_v24, %s11214_s11 }
0x112c   : > { %6977 = vrot.lane.b32.xlu0 %v6756_v21, %s13847_s15 }
0x112f   : > { %6919 = vrot.lane.b32.xlu1 %v6768_v24, %s11215_s12 }
0x1130   : > { %6819 = vrot.lane.b32.xlu0 %v6760_v63, %s13845_s10 }
0x1133   : > { %6983 = vrot.lane.b32.xlu1 %v6768_v24, %s13847_s15 }
0x1134   : > { %6883 = vrot.lane.b32.xlu0 %v6760_v63, %s13843_s14  ;;  %v6536_v59 = vpop.xlane.xlu1 %6535 }
0x1135   : > { %v6550_v29 = vsub.f32 %v12732_v10, %v6536_v59 }
0x1137   : > { %6795 = vrot.lane.b32.xlu1 %v12805_v33, %s11212_s9  ;;  %v6562_v22 = vmul.f32 1.442695, %v6550_v29 }
0x1138   : > { %6947 = vrot.lane.b32.xlu0 %v6760_v63, %s13841_s16 }
0x113b   : > { %6859 = vrot.lane.b32.xlu1 %v12805_v33, %s11214_s11 }
0x113c   : > { %6789 = vrot.lane.b32.xlu0 %v6764_v23, %s11212_s9 }
0x113f   : > { %6923 = vrot.lane.b32.xlu1 %v12805_v33, %s11215_s12 }
0x1140   : > { %6853 = vrot.lane.b32.xlu0 %v6764_v23, %s11214_s11 }
0x1144   : > { %6917 = vrot.lane.b32.xlu0 %v6764_v23, %s11215_s12 }
0x1148   : > { %6981 = vrot.lane.b32.xlu0 %v6764_v23, %s13847_s15 }
0x114b   : > { %v6533_v43 = vpop.xlane.xlu0 %6532 }
0x114c   : > { %6793 = vrot.lane.b32.xlu0 %v6772_v12, %s11212_s9  ;;  %v6549_v15 = vsub.f32 %v12736_v7, %v6533_v43 }
0x114e   : > { %v6560_v48 = vmul.f32 1.442695, %v6549_v15 }
0x114f   : > { %v6524_v45 = vpop.xlane.xlu0 %6523 }
0x1150   : > { %6857 = vrot.lane.b32.xlu0 %v6772_v12, %s11214_s11  ;;  %v6546_v11 = vsub.f32 %v12724_v60, %v6524_v45  ;;  %v12847_v60 = vrot.slane %v12759_v1, %v11414_v8 }
0x1152   : > { %v6554_v14 = vmul.f32 1.442695, %v6546_v11 }
0x1154   : > { %6921 = vrot.lane.b32.xlu0 %v6772_v12, %s11215_s12 }
0x1158   : > { %6985 = vrot.lane.b32.xlu0 %v6772_v12, %s13847_s15 }
0x115c   : > { %6823 = vrot.lane.b32.xlu0 %v6768_v24, %s13845_s10 }
0x1160   : > { %6887 = vrot.lane.b32.xlu0 %v6768_v24, %s13843_s14 }
0x1163   : > { %v6539_v26 = vpop.xlane.xlu0 %6538 }
0x1164   : > { %v6551_v50 = vsub.f32 %v12742_v30, %v6539_v26  ;;  %6951 = vrot.lane.b32.xlu0 %v6768_v24, %s13841_s16 }
0x1166   : > { %v6564_v55 = vmul.f32 1.442695, %v6551_v50 }
0x1167   : > { %v6530_v13 = vpop.xlane.xlu0 %6529 }
0x1168   : > { %11058 = vpow2.f32 %v6564_v55  ;;  %6827 = vrot.lane.b32.xlu0 %v12805_v33, %s13845_s10  ;;  %v6548_v16 = vsub.f32 %v12730_v9, %v6530_v13 }
0x1169   : > { %11060 = vpow2.f32 %v6556_v5 }
0x116a   : > { %11062 = vpow2.f32 %v6560_v48  ;;  %v6558_v7 = vmul.f32 1.442695, %v6548_v16 }
0x116b   : > { %11064 = vpow2.f32 %v6554_v14 }
0x116c   : > { %6891 = vrot.lane.b32.xlu0 %v12805_v33, %s13843_s14  ;;  %11066 = vpow2.f32 %v6558_v7 }
0x1172   : > { %v12830_v46 = vpop.eup %11058 }
0x1173   : > { %v6585_v51 = vsel %vm13941_vm12, %v12830_v46, 0.0  ;;  %v12843_v18 = vpop.eup %11060  ;;  %vm13947_vm12 = vmmov %vm13945_vm10 }
0x1174   : > { %6586 = vadd.xlane.f32.xlu1 %v6585_v51  ;;  %v6573_v9 = vsel %vm13945_vm10, %v12843_v18, 0.0  ;;  %v12854_v25 = vpop.eup %11062 }
0x1175   : > { %v6579_v31 = vsel %vm13947_vm12, %v12854_v25, 0.0  ;;  %v12862_v34 = vpop.eup %11064  ;;  %vm13953_vm12 = vmmov %vm13936_vm3 }
0x1176   : > { %v12871_v40 = vpop.eup %11066 }
0x1177   : > { %v6542_v6 = vpop.xlane.xlu1 %6541 }
0x1178   : > { %v6552_v28 = vsub.f32 %v12748_v19, %v6542_v6 }
0x117a   : > { %v6566_v19 = vmul.f32 1.442695, %v6552_v28 }
0x117b   : > { %v6850_v32 = vpop.permute.xlu1 %6849 }
0x117c   : > { %6873 = vst.msk [vmem:[#allocation2 + $0x3] sm:$0x1] %vm13942_vm7, %v6850_v32  ;;  %vm13948_vm7 = vmmov %vm13936_vm3 }
0x117f   : > { %v6788_v30 = vpop.permute.xlu1 %6787 }
0x1180   : > { %6810 = vst.msk [vmem:[#allocation2 + $0x9] sm:$0x1] %vm13943_vm4, %v6788_v30  ;;  %vm13949_vm4 = vmmov %vm13945_vm10 }
0x1181   : > { %v6570_v10 = vsel %vm13949_vm4, %v12862_v34, 0.0  ;;  %vm13951_vm10 = vmmov %vm13949_vm4 }
0x1182   : > { %v6576_v62 = vsel %vm13951_vm10, %v12871_v40, 0.0  ;;  %vm13955_vm4 = vmmov %vm13936_vm3 }
0x1183   : > { %v6852_v61 = vpop.permute.xlu1 %6851 }
0x1184   : > { %6874 = vst.msk [vmem:[#allocation2 + $0xb] sm:$0x1] %vm13944_vm5, %v6852_v61  ;;  %vm13950_vm5 = vmmov %vm13936_vm3 }
0x1185   : > { %6987 = vrot.lane.b32.xlu1 %v12805_v33, %s13847_s15 }
0x1187   : > { %v6916_v20 = vpop.permute.xlu1 %6915 }
0x1188   : > { %6938 = vst.msk [vmem:[#allocation2 + $0xd] sm:$0x1] %vm13936_vm3, %v6916_v20 }
0x1189   : > { %6829 = vrot.lane.b32.xlu1 %v12847_v60, %s13845_s10 }
0x118b   : > { %v6980_v27 = vpop.permute.xlu1 %6979  ;;  %6574 = vadd.xlane.f32.xlu0 %v6573_v9 }
0x118c   : > { %7002 = vst.msk [vmem:[#allocation2 + $0xf] sm:$0x1] %vm13946_vm8, %v6980_v27  ;;  %vm13952_vm8 = vmmov %vm13936_vm3 }
0x118d   : > { %6893 = vrot.lane.b32.xlu1 %v12847_v60, %s13843_s14 }
0x118f   : > { %v6822_v56 = vpop.permute.xlu1 %6821  ;;  %6580 = vadd.xlane.f32.xlu0 %v6579_v31  ;;  %v6545_v37 = vpop.xlane.xlu0 %6544 }
0x1190   : > { %6843 = vst.msk [vmem:[#allocation2 + $0x12] sm:$0x1] %vm13948_vm7, %v6822_v56  ;;  %v6553_v38 = vsub.f32 %v12776_v52, %v6545_v37  ;;  %vm13954_vm7 = vmmov %vm13936_vm3 }
0x1191   : > { %6957 = vrot.lane.b32.xlu1 %v12847_v60, %s13841_s16 }
0x1192   : > { %v6568_v39 = vmul.f32 1.442695, %v6553_v38 }
0x1193   : > { %v6886_v47 = vpop.permute.xlu1 %6885  ;;  %6571 = vadd.xlane.f32.xlu0 %v6570_v10  ;;  %v6786_v42 = vpop.permute.xlu0 %6785 }
0x1194   : > { %11068 = vpow2.f32 %v6568_v39  ;;  %6907 = vst.msk [vmem:[#allocation2 + $0x14] sm:$0x1] %vm13950_vm5, %v6886_v47  ;;  %vm13956_vm5 = vmmov %vm13951_vm10 }
0x1195   : > { %6809 = vst.msk [vmem:[#allocation2 + $0x1] sm:$0x1] %vm13936_vm3, %v6786_v42  ;;  %6799 = vrot.lane.b32.xlu1 %v12875_v36, %s11212_s9  ;;  %11070 = vpow2.f32 %v6562_v22  ;;  %vm13957_vm10 = vmmov %vm13936_vm3 }
0x1196   : > { %11072 = vpow2.f32 %v6566_v19 }
0x1197   : > { %v6950_v35 = vpop.permute.xlu1 %6949  ;;  %6577 = vadd.xlane.f32.xlu0 %v6576_v62  ;;  %v6818_v1 = vpop.permute.xlu0 %6817 }
0x1198   : > { %6971 = vst.msk [vmem:[#allocation2 + $0x16] sm:$0x1] %vm13952_vm8, %v6950_v35  ;;  %vm13958_vm8 = vmmov %vm13956_vm5 }
0x1199   : > { %6841 = vst.msk [vmem:[#allocation2 + $0x2] sm:$0x1] %vm13953_vm12, %v6818_v1  ;;  %6863 = vrot.lane.b32.xlu1 %v12875_v36, %s11214_s11  ;;  %vm13959_vm12 = vmmov %vm13936_vm3 }
0x119b   : > { %v6826_v41 = vpop.permute.xlu1 %6825  ;;  %v6882_v44 = vpop.permute.xlu0 %6881 }
0x119c   : > { %6845 = vst.msk [vmem:[#allocation2 + $0x22] sm:$0x1] %vm13954_vm7, %v6826_v41  ;;  %vm13960_vm7 = vmmov %vm13936_vm3 }
0x119d   : > { %6905 = vst.msk [vmem:[#allocation2 + $0x4] sm:$0x1] %vm13955_vm4, %v6882_v44  ;;  %6927 = vrot.lane.b32.xlu1 %v12875_v36, %s11215_s12  ;;  %vm13961_vm4 = vmmov %vm13956_vm5 }
0x119e   : > { %v12891_v21 = vpop.eup %11068 }
0x119f   : > { %v6890_v63 = vpop.permute.xlu1 %6889  ;;  %v6914_v52 = vpop.permute.xlu0 %6913  ;;  %v6591_v54 = vsel %vm13956_vm5, %v12891_v21, 0.0  ;;  %vm13962_vm5 = vmmov %vm13936_vm3 }
0x11a0   : > { %v12895_v53 = vpop.eup %11070  ;;  %6909 = vst.msk [vmem:[#allocation2 + $0x24] sm:$0x1] %vm13936_vm3, %v6890_v63  ;;  %6592 = vadd.xlane.f32.xlu0 %v6591_v54 }
0x11a1   : > { %6937 = vst.msk [vmem:[#allocation2 + $0x5] sm:$0x1] %vm13957_vm10, %v6914_v52  ;;  %6991 = vrot.lane.b32.xlu1 %v12875_v36, %s13847_s15  ;;  %v6582_v24 = vsel %vm13958_vm8, %v12895_v53, 0.0  ;;  %v12903_v43 = vpop.eup %11072  ;;  %vm13963_vm10 = vmmov %vm13936_vm3 }
0x11a2   : > { %v6588_v50 = vsel %vm13961_vm4, %v12903_v43, 0.0  ;;  %vm13964_vm8 = vmmov %vm13936_vm3 }
0x11a3   : > { %v6954_v23 = vpop.permute.xlu1 %6953  ;;  %v6946_v12 = vpop.permute.xlu0 %6945  ;;  %vm13967_vm4 = vmmov %vm13936_vm3 }
0x11a4   : > { %6973 = vst.msk [vmem:[#allocation2 + $0x26] sm:$0x1] %vm13959_vm12, %v6954_v23  ;;  %6583 = vadd.xlane.f32.xlu0 %v6582_v24  ;;  %vm13965_vm12 = vmmov %vm13936_vm3 }
0x11a5   : > { %6969 = vst.msk [vmem:[#allocation2 + $0x6] sm:$0x1] %vm13960_vm7, %v6946_v12  ;;  %vm13966_vm7 = vmmov %vm13936_vm3 }
0x11a7   : > { %v6792_v45 = vpop.permute.xlu1 %6791  ;;  %v6978_v26 = vpop.permute.xlu0 %6977 }
0x11a8   : > { %6812 = vst.msk [vmem:[#allocation2 + $0x19] sm:$0x1] %vm13962_vm5, %v6792_v45  ;;  %6589 = vadd.xlane.f32.xlu0 %v6588_v50  ;;  %vm13968_vm5 = vmmov %vm13936_vm3 }
0x11a9   : > { %7001 = vst.msk [vmem:[#allocation2 + $0x7] sm:$0x1] %vm13936_vm3, %v6978_v26 }
0x11ab   : > { %v6856_v55 = vpop.permute.xlu1 %6855  ;;  %v6820_v57 = vpop.permute.xlu0 %6819 }
0x11ac   : > { %6876 = vst.msk [vmem:[#allocation2 + $0x1b] sm:$0x1] %vm13963_vm10, %v6856_v55  ;;  %vm13970_vm10 = vmmov %vm13936_vm3 }
0x11ad   : > { %6842 = vst.msk [vmem:[#allocation2 + $0xa] sm:$0x1] %vm13964_vm8, %v6820_v57  ;;  %vm13971_vm8 = vmmov %vm13936_vm3 }
0x11af   : > { %v6920_v59 = vpop.permute.xlu1 %6919  ;;  %v6884_v51 = vpop.permute.xlu0 %6883 }
0x11b0   : > { %6940 = vst.msk [vmem:[#allocation2 + $0x1d] sm:$0x1] %vm13965_vm12, %v6920_v59  ;;  %vm13972_vm12 = vmmov %vm13936_vm3 }
0x11b1   : > { %6906 = vst.msk [vmem:[#allocation2 + $0xc] sm:$0x1] %vm13966_vm7, %v6884_v51  ;;  %vm13973_vm7 = vmmov %vm13936_vm3 }
0x11b3   : > { %v6984_v4 = vpop.permute.xlu1 %6983  ;;  %v6948_v6 = vpop.permute.xlu0 %6947 }
0x11b4   : > { %7004 = vst.msk [vmem:[#allocation2 + $0x1f] sm:$0x1] %vm13967_vm4, %v6984_v4  ;;  %vm13975_vm4 = vmmov %vm13936_vm3 }
0x11b5   : > { %6970 = vst.msk [vmem:[#allocation2 + $0xe] sm:$0x1] %vm13968_vm5, %v6948_v6  ;;  %vm13976_vm5 = vmmov %vm13936_vm3 }
0x11b7   : > { %v6796_v5 = vpop.permute.xlu1 %6795  ;;  %v6790_v15 = vpop.permute.xlu0 %6789 }
0x11b8   : > { %6814 = vst.msk [vmem:[#allocation2 + $0x29] sm:$0x1] %vm13936_vm3, %v6796_v5 }
0x11b9   : > { %6811 = vst.msk [vmem:[#allocation2 + $0x11] sm:$0x1] %vm13969_vm11, %v6790_v15  ;;  %vm13974_vm11 = vmmov %vm13936_vm3 }
0x11bb   : > { %v6860_v32 = vpop.permute.xlu1 %6859  ;;  %v6854_v48 = vpop.permute.xlu0 %6853 }
0x11bc   : > { %6878 = vst.msk [vmem:[#allocation2 + $0x2b] sm:$0x1] %vm13970_vm10, %v6860_v32  ;;  %vm13977_vm10 = vmmov %vm13936_vm3 }
0x11bd   : > { %6875 = vst.msk [vmem:[#allocation2 + $0x13] sm:$0x1] %vm13971_vm8, %v6854_v48  ;;  %vm13978_vm8 = vmmov %vm13936_vm3 }
0x11be   : > { %6955 = vrot.lane.b32.xlu0 %v12805_v33, %s13841_s16 }
0x11bf   : > { %v6924_v11 = vpop.permute.xlu1 %6923  ;;  %v6918_v13 = vpop.permute.xlu0 %6917 }
0x11c0   : > { %6942 = vst.msk [vmem:[#allocation2 + $0x2d] sm:$0x1] %vm13972_vm12, %v6924_v11  ;;  %vm13979_vm12 = vmmov %vm13936_vm3 }
0x11c1   : > { %6939 = vst.msk [vmem:[#allocation2 + $0x15] sm:$0x1] %vm13973_vm7, %v6918_v13  ;;  %vm13980_vm7 = vmmov %vm13936_vm3 }
0x11c2   : > { %6797 = vrot.lane.b32.xlu0 %v12847_v60, %s11212_s9 }
0x11c3   : > { %v6982_v30 = vpop.permute.xlu0 %6981 }
0x11c4   : > { %7003 = vst.msk [vmem:[#allocation2 + $0x17] sm:$0x1] %vm13974_vm11, %v6982_v30  ;;  %vm13981_vm11 = vmmov %vm13936_vm3 }
0x11c6   : > { %6861 = vrot.lane.b32.xlu0 %v12847_v60, %s11214_s11 }
0x11c7   : > { %v6794_v14 = vpop.permute.xlu0 %6793 }
0x11c8   : > { %6813 = vst.msk [vmem:[#allocation2 + $0x21] sm:$0x1] %vm13975_vm4, %v6794_v14  ;;  %vm13982_vm4 = vmmov %vm13936_vm3 }
0x11ca   : > { %6925 = vrot.lane.b32.xlu0 %v12847_v60, %s11215_s12 }
0x11cb   : > { %v6858_v33 = vpop.permute.xlu0 %6857 }
0x11cc   : > { %6877 = vst.msk [vmem:[#allocation2 + $0x23] sm:$0x1] %vm13976_vm5, %v6858_v33  ;;  %vm13983_vm5 = vmmov %vm13936_vm3 }
0x11ce   : > { %6989 = vrot.lane.b32.xlu0 %v12847_v60, %s13847_s15  ;;  %s14053_s15 = smov 10  }
0x11cf   : > { %v6922_v16 = vpop.permute.xlu0 %6921 }
0x11d0   : > { %6941 = vst.msk [vmem:[#allocation2 + $0x25] sm:$0x1] %vm13936_vm3, %v6922_v16 }
0x11d2   : > { %6831 = vrot.lane.b32.xlu0 %v12875_v36, %s13845_s10  ;;  %s14047_s10 = smov 15  }
0x11d3   : > { %v6986_v61 = vpop.permute.xlu0 %6985 }
0x11d4   : > { %7005 = vst.msk [vmem:[#allocation2 + $0x27] sm:$0x1] %vm13977_vm10, %v6986_v61  ;;  %vm13984_vm10 = vmmov %vm13936_vm3 }
0x11d6   : > { %6895 = vrot.lane.b32.xlu0 %v12875_v36, %s13843_s14  ;;  %s14044_s14 = smov 5  }
0x11d7   : > { %v6824_v7 = vpop.permute.xlu0 %6823 }
0x11d8   : > { %6844 = vst.msk [vmem:[#allocation2 + $0x1a] sm:$0x1] %vm13978_vm8, %v6824_v7  ;;  %vm13985_vm8 = vmmov %vm13936_vm3 }
0x11da   : > { %6959 = vrot.lane.b32.xlu0 %v12875_v36, %s13841_s16  ;;  %s14036_s16 = smov 20  }
0x11db   : > { %v6888_v20 = vpop.permute.xlu0 %6887 }
0x11dc   : > { %6908 = vst.msk [vmem:[#allocation2 + $0x1c] sm:$0x1] %vm13979_vm12, %v6888_v20  ;;  %vm13986_vm12 = vmmov %vm13936_vm3 }
0x11df   : > { %v6952_v60 = vpop.permute.xlu0 %6951 }
0x11e0   : > { %6972 = vst.msk [vmem:[#allocation2 + $0x1e] sm:$0x1] %vm13980_vm7, %v6952_v60  ;;  %vm13987_vm7 = vmmov %vm13936_vm3 }
0x11e3   : > { %v6828_v9 = vpop.permute.xlu0 %6827 }
0x11e4   : > { %6846 = vst.msk [vmem:[#allocation2 + $0x2a] sm:$0x1] %vm13981_vm11, %v6828_v9  ;;  %vm13988_vm11 = vmmov %vm13936_vm3 }
0x11e7   : > { %v6892_v27 = vpop.permute.xlu0 %6891 }
0x11e8   : > { %6910 = vst.msk [vmem:[#allocation2 + $0x2c] sm:$0x1] %vm13982_vm4, %v6892_v27  ;;  %vm13989_vm4 = vmmov %vm13936_vm3 }
0x1201   : > { %v6587_v29 = vpop.xlane.xlu1 %6586 }
0x1205   : > { %v6988_v31 = vpop.permute.xlu1 %6987 }
0x1206   : > { %7006 = vst.msk [vmem:[#allocation2 + $0x2f] sm:$0x1] %vm13983_vm5, %v6988_v31  ;;  %vm13990_vm5 = vcmask 36864  }
0x1209   : > { %v6830_v56 = vpop.permute.xlu1 %6829 }
0x120a   : > { %6847 = vst.msk [vmem:[#allocation2 + $0x32] sm:$0x1] %vm13936_vm3, %v6830_v56  ;;  %vm13991_vm3 = vmmov %vm13990_vm5  ;;  %v7009_v56 = vld [vmem:[#allocation2] sm:$0xff] }
0x120d   : > { %v6894_v37 = vpop.permute.xlu1 %6893 }
0x120e   : > { %6911 = vst.msk [vmem:[#allocation2 + $0x34] sm:$0x1] %vm13984_vm10, %v6894_v37  ;;  %vm13992_vm10 = vmmov %vm13991_vm3  ;;  %v7011_v37 = vld [vmem:[#allocation2 + $0x10] sm:$0xff] }
0x1211   : > { %v6958_v38 = vpop.permute.xlu1 %6957 }
0x1212   : > { %6975 = vst.msk [vmem:[#allocation2 + $0x36] sm:$0x1] %vm13985_vm8, %v6958_v38  ;;  %vm13993_vm8 = vmmov %vm13989_vm4 }
0x1215   : > { %v6800_v22 = vpop.permute.xlu1 %6799 }
0x1216   : > { %6816 = vst.msk [vmem:[#allocation2 + $0x39] sm:$0x1] %vm13986_vm12, %v6800_v22  ;;  %vm13994_vm12 = vmmov %vm13991_vm3 }
0x1218   : > { %v6575_v28 = vpop.xlane.xlu0 %6574 }
0x1219   : > { %v6864_v39 = vpop.permute.xlu1 %6863 }
0x121a   : > { %6880 = vst.msk [vmem:[#allocation2 + $0x3b] sm:$0x1] %vm13987_vm7, %v6864_v39  ;;  %vm13995_vm7 = vmmov %vm13989_vm4 }
0x121c   : > { %v6581_v10 = vpop.xlane.xlu0 %6580 }
0x121d   : > { %v6928_v36 = vpop.permute.xlu1 %6927 }
0x121e   : > { %6944 = vst.msk [vmem:[#allocation2 + $0x3d] sm:$0x1] %vm13988_vm11, %v6928_v36  ;;  %vm13996_vm11 = vmmov %vm13991_vm3 }
0x1220   : > { %v6572_v47 = vpop.xlane.xlu0 %6571 }
0x1221   : > { %v6992_v42 = vpop.permute.xlu1 %6991  ;;  %11074 = vrcp.f32 %v6572_v47  ;;  %v7012_v47 = vld [vmem:[#allocation2 + $0x18] sm:$0xff] }
0x1222   : > { %7008 = vst.msk [vmem:[#allocation2 + $0x3f] sm:$0x1] %vm13989_vm4, %v6992_v42  ;;  %11076 = vrcp.f32 %v6575_v28  ;;  %vm13997_vm4 = vmmov %vm13991_vm3  ;;  %v7010_v28 = vld [vmem:[#allocation2 + $0x8] sm:$0xff] }
0x1224   : > { %v6578_v19 = vpop.xlane.xlu0 %6577 }
0x1225   : > { %11078 = vrcp.f32 %v6578_v19 }
0x1226   : > { %11080 = vrcp.f32 %v6581_v10  ;;  %v7013_v10 = vld [vmem:[#allocation2 + $0x20] sm:$0xff] }
0x1227   : > { %11082 = vrcp.f32 %v6587_v29 }
0x122b   : > { %v11075_v35 = vpop.eup %11074 }
0x122c   : > { %v11077_v1 = vpop.eup %11076  ;;  %v6595_v44 = vmul.f32 %v11075_v35, %v12862_v34 }
0x122d   : > { %v6593_v62 = vpop.xlane.xlu0 %6592  ;;  %v6597_v52 = vmul.f32 %v11077_v1, %v12843_v18 }
0x122e   : > { %v6610_v23 = vsel %vm13990_vm5, %v6595_v44, 0.0  ;;  %vm13998_vm5 = vmmov %vm13995_vm7 }
0x122f   : > { %v11079_v41 = vpop.eup %11078  ;;  %v6611_v45 = vsel %vm13991_vm3, %v6597_v52, 0.0 }
0x1230   : > { %v6599_v54 = vmul.f32 %v11079_v41, %v12871_v40  ;;  %v11081_v24 = vpop.eup %11080  ;;  %v6612_v50 = vadd.f32 %v6611_v45, %v6610_v23  ;;  %v10265_v41 = vld [vmem:[%s13781_s1 + $0x10] sm:$0xf] }
0x1231   : > { %v6584_v63 = vpop.xlane.xlu0 %6583  ;;  %v6601_v55 = vmul.f32 %v11081_v24, %v12854_v25  ;;  %v11083_v57 = vpop.eup %11082 }
0x1232   : > { %11084 = vrcp.f32 %v6584_v63  ;;  %v6613_v26 = vsel %vm13992_vm10, %v6599_v54, 0.0  ;;  %v12966_v40 = vmul.f32 %v11083_v57, %v12830_v46  ;;  %vm13999_vm10 = vmmov %vm13991_vm3 }
0x1233   : > { %11086 = vrcp.f32 %v6593_v62  ;;  %v6614_v59 = vadd.f32 %v6613_v26, %v6612_v50  ;;  %v6615_v51 = vsel %vm13994_vm12, %v6601_v55, 0.0  ;;  %vm14001_vm12 = vmmov %vm13998_vm5 }
0x1234   : > { %v6619_v11 = vsel %vm13997_vm4, %v12966_v40, 0.0  ;;  %vm14004_vm4 = vmmov %vm13998_vm5 }
0x1235   : > { %v6590_v12 = vpop.xlane.xlu0 %6589  ;;  %v6616_v15 = vadd.f32 %v6615_v51, %v6614_v59 }
0x1236   : > { %11088 = vrcp.f32 %v6590_v12 }
0x1239   : > { %v6956_v34 = vpop.permute.xlu0 %6955 }
0x123a   : > { %6974 = vst.msk [vmem:[#allocation2 + $0x2e] sm:$0x1] %vm13993_vm8, %v6956_v34  ;;  %vm14000_vm8 = vmmov %vm13998_vm5 }
0x123c   : > { %v11085_v18 = vpop.eup %11084 }
0x123d   : > { %v6603_v4 = vmul.f32 %v11085_v18, %v12895_v53  ;;  %v6798_v6 = vpop.permute.xlu0 %6797  ;;  %v11087_v5 = vpop.eup %11086 }
0x123e   : > { %6815 = vst.msk [vmem:[#allocation2 + $0x31] sm:$0x1] %vm13995_vm7, %v6798_v6  ;;  %v6609_v13 = vmul.f32 %v11087_v5, %v12891_v21  ;;  %vm14002_vm7 = vmmov %vm13998_vm5 }
0x123f   : > { %v6617_v25 = vsel %vm13996_vm11, %v6603_v4, 0.0  ;;  %vm14003_vm11 = vmmov %vm13998_vm5 }
0x1240   : > { %v11089_v32 = vpop.eup %11088  ;;  %v6618_v48 = vadd.f32 %v6617_v25, %v6616_v15  ;;  %v6623_v16 = vsel %vm13999_vm10, %v6609_v13, 0.0 }
0x1241   : > { %v6607_v46 = vmul.f32 %v11089_v32, %v12903_v43  ;;  %v6862_v30 = vpop.permute.xlu0 %6861  ;;  %v7014_v62 = vld [vmem:[#allocation2 + $0x28] sm:$0xff] }
0x1242   : > { %v6620_v14 = vadd.f32 %v6619_v11, %v6618_v48  ;;  %6879 = vst.msk [vmem:[#allocation2 + $0x33] sm:$0x1] %vm13998_vm5, %v6862_v30  ;;  %vm14005_vm5 = vcmask 39936  }
0x1243   : > { %v6621_v53 = vsel %vm13991_vm3, %v6607_v46, 0.0  ;;  %vm14006_vm3 = vmmov %vm14005_vm5 }
0x1244   : > { %v6622_v33 = vadd.f32 %v6621_v53, %v6620_v14  ;;  %vm14007_vm10 = vmmov %vm14006_vm3 }
0x1245   : > { %v6926_v61 = vpop.permute.xlu0 %6925 }
0x1246   : > { %v6624_v7 = vadd.f32 %v6623_v16, %v6622_v33  ;;  %6943 = vst.msk [vmem:[#allocation2 + $0x35] sm:$0x1] %vm14000_vm8, %v6926_v61  ;;  %vm14008_vm8 = vmmov %vm14006_vm3 }
0x1248   : > { %v6625_v20 = vadd.f32 1e-07, %v6624_v7 }
0x1249   : > { %v6990_v60 = vpop.permute.xlu0 %6989 }
0x124a   : > { %11090 = vrcp.f32 %v6625_v20  ;;  %7007 = vst.msk [vmem:[#allocation2 + $0x37] sm:$0x1] %vm14001_vm12, %v6990_v60  ;;  %vm14009_vm12 = vmmov %vm14006_vm3 }
0x124d   : > { %v6832_v21 = vpop.permute.xlu0 %6831 }
0x124e   : > { %6848 = vst.msk [vmem:[#allocation2 + $0x3a] sm:$0x1] %vm14002_vm7, %v6832_v21  ;;  %vm14010_vm7 = vmmov %vm14006_vm3 }
0x1251   : > { %v6896_v43 = vpop.permute.xlu0 %6895  ;;  %v7015_v19 = vld [vmem:[#allocation2 + $0x30] sm:$0xff] }
0x1252   : > { %6912 = vst.msk [vmem:[#allocation2 + $0x3c] sm:$0x1] %vm14003_vm11, %v6896_v43  ;;  %vm14011_vm11 = vmmov %vm14006_vm3 }
0x1254   : > { %v11091_v9 = vpop.eup %11090 }
0x1255   : > { %v6960_v27 = vpop.permute.xlu0 %6959  ;;  %v6627_v29 = vmul.f32 %v11091_v9, %v6595_v44  ;;  %v6629_v31 = vmul.f32 %v11091_v9, %v6599_v54  ;;  %v6628_v38 = vmul.f32 %v11091_v9, %v6597_v52  ;;  %v6631_v22 = vmul.f32 %v11091_v9, %v6603_v4 }
0x1256   : > { %6976 = vst.msk [vmem:[#allocation2 + $0x3e] sm:$0x1] %vm14004_vm4, %v6960_v27  ;;  %v6630_v39 = vmul.f32 %v11091_v9, %v6601_v55  ;;  %v6633_v36 = vmul.f32 %v11091_v9, %v6607_v46  ;;  %v6632_v42 = vmul.f32 %v11091_v9, %v12966_v40  ;;  %v6634_v35 = vmul.f32 %v11091_v9, %v6609_v13  ;;  %vm14012_vm4 = vmmov %vm14006_vm3 }
0x1257   : > { %10758 = vmatpush3.msk.msra.mxu0 %vm2335_vm6, %v6627_v29  ;;  %10768 = vmatpush3.msk.msra.mxu1 %vm2335_vm6, %v6629_v31 }
0x1258   : > { %10760 = vmatmul.mubr.msk.f32.vlgmr.msra.gmra.mrb[70].mxu0 %vm14005_vm5, %v7009_v56  ;;  %10762 = vmatprep.subr.mxu0 %v11208_v0  ;;  %vm14014_vm5 = vcmask 1047559  }
0x1259   : > { %10770 = vmatmul.mubr.msk.f32.vlgmr.msra.gmra.mrb[66].mxu1 %vm14006_vm3, %v7011_v37  ;;  %10777 = vmatprep.subr.mxu1 %v11208_v0  ;;  %vm14015_vm3 = vcmask 1046534  }
0x125a   : > { %10763 = vmatpush3.msk.msra.mxu0 %vm2335_vm6, %v6628_v38  ;;  %10778 = vmatpush3.msk.msra.mxu1 %vm2335_vm6, %v6631_v22 }
0x125b   : > { %10764 = vmatprep.mubr.msk.f32.mxu0 %vm11209_vm0, %v11208_v0  ;;  %10772 = vmatprep.subr.mxu0 %v11208_v0 }
0x125c   : > { %10779 = vmatprep.mubr.msk.f32.mxu1 %vm11209_vm0, %v11208_v0  ;;  %10787 = vmatprep.subr.mxu1 %v11208_v0 }
0x125d   : > { %10765 = vmatmul.mubr.msk.f32.vlgmr.msra.gmra.mrb[72].mxu0 %vm14007_vm10, %v7010_v28  ;;  %10780 = vmatmul.mubr.msk.f32.vlgmr.msra.gmra.mrb[72].mxu1 %vm14008_vm8, %v7013_v10  ;;  %v7016_v1 = vld [vmem:[#allocation2 + $0x38] sm:$0xff]  ;;  %vm14016_vm10 = vcmask 1045509   ;;  %vm14017_vm8 = vcmask 1044484  }
0x125e   : > { %10773 = vmatpush3.msk.msra.mxu0 %vm2335_vm6, %v6630_v39  ;;  %10788 = vmatpush3.msk.msra.mxu1 %vm2335_vm6, %v6633_v36 }
0x125f   : > { %10774 = vmatprep.mubr.msk.f32.mxu0 %vm11209_vm0, %v11208_v0  ;;  %10782 = vmatprep.subr.mxu0 %v11208_v0 }
0x1260   : > { %10789 = vmatprep.mubr.msk.f32.mxu1 %vm11209_vm0, %v11208_v0  ;;  %10797 = vmatprep.subr.bf16.mxu1 %v11208_v0 }
0x1261   : > { %10775 = vmatmul.mubr.msk.f32.vlgmr.msra.gmra.mrb[74].mxu0 %vm14009_vm12, %v7012_v47  ;;  %10790 = vmatmul.mubr.msk.f32.vlgmr.msra.gmra.mrb[74].mxu1 %vm14010_vm7, %v7015_v19  ;;  %vm14019_vm12 = vmmov %vm14014_vm5 }
0x1262   : > { %10783 = vmatpush3.msk.msra.mxu0 %vm2335_vm6, %v6632_v42  ;;  %10784 = vmatprep.mubr.msk.f32.mxu0 %vm11209_vm0, %v11208_v0  ;;  %vm14020_vm7 = vmmov %vm14015_vm3 }
0x1263   : > { %10792 = vmatprep.subr.mxu0 %v11208_v0  ;;  %10799 = vmatprep.mubr.msk.bf16.mxu1 %vm11209_vm0, %v11208_v0 }
0x1265   : > { %10785 = vmatmul.mubr.msk.f32.vlgmr.msra.gmra.mrb[76].mxu0 %vm14011_vm11, %v7014_v62  ;;  %vm14021_vm11 = vmmov %vm14016_vm10 }
0x1266   : > { %10793 = vmatpush3.msk.msra.mxu0 %vm2335_vm6, %v6634_v35  ;;  %10794 = vmatprep.mubr.msk.f32.mxu0 %vm11209_vm0, %v11208_v0 }
0x1267   : > { %10803 = vmatprep.subr.bf16.mxu0 %v11208_v0 }
0x1269   : > { %10795 = vmatmul.mubr.msk.f32.vlgmr.msra.gmra.mrb[78].mxu0 %vm14012_vm4, %v7016_v1  ;;  %vm14022_vm4 = vcmask 1043459  }
0x126a   : > { %10804 = vmatpush3.bf16.msra.mxu0 %v11337_v3  ;;  %10805 = vmatprep.mubr.msk.bf16.mxu0 %vm11209_vm0, %v11208_v0 }
0x126b   : > { %10814 = vmatprep.subr.mxu0 %v11208_v0 }
0x126d   : > { %10806 = vmatmul.mubr.msk.bf16.vlgmr.msra.gmra.mrb[80].mxu0 %vm251_vm2, %v10265_v41 }
0x126e   : > { %10816 = vmatprep.mubr.msk.f32.mxu0 %vm11209_vm0, %v11208_v0 }
0x132b   : > { %v7089_v44 = vpop.f32.mrb[70].mxu0 }
0x132c   : > { %v7241_v63 = vpop.f32.mrb[66].mxu1  ;;  %7739 = vrot.lane.b32.xlu0 %v7089_v44, %s14013_s19  ;;  %v10761_v52 = vpop.f32.mrb[71].mxu0 }
0x132d   : > { %v10771_v54 = vpop.f32.mrb[67].mxu1  ;;  %v7635_v50 = vrot.slane %v7241_v63, 6 }
0x1330   : > { %v7165_v23 = vpop.f32.mrb[72].mxu0  ;;  %v7393_v12 = vpop.f32.mrb[72].mxu1 }
0x1331   : > { %v7633_v24 = vrot.slane %v7165_v23, 7  ;;  %v10766_v45 = vpop.f32.mrb[73].mxu0  ;;  %v10781_v26 = vpop.f32.mrb[73].mxu1  ;;  %v7639_v15 = vrot.slane %v7393_v12, 4 }
0x1333   : > { %v7719_v55 = vsel %vm14014_vm5, %v7633_v24, %v7089_v44  ;;  %v7705_v34 = vsel %vm14015_vm3, %v7633_v24, %v7089_v44  ;;  %v7691_v57 = vsel %vm14016_vm10, %v7633_v24, %v7089_v44  ;;  %v7677_v59 = vsel %vm14017_vm8, %v7633_v24, %v7089_v44  ;;  %vm14023_vm5 = vmmov %vm14017_vm8 }
0x1334   : > { %v7545_v18 = vpop.f32.mrb[74].mxu1  ;;  %7725 = vrot.lane.b32.xlu0 %v7719_v55, %s14018_s17  ;;  %v7317_v40 = vpop.f32.mrb[74].mxu0  ;;  %v7706_v51 = vsel %vm14019_vm12, %v7635_v50, %v7705_v34  ;;  %v7692_v4 = vsel %vm14020_vm7, %v7635_v50, %v7691_v57  ;;  %v7678_v6 = vsel %vm14021_vm11, %v7635_v50, %v7677_v59  ;;  %v7663_v5 = vsel %vm14022_vm4, %v7633_v24, %v7089_v44  ;;  %vm14024_vm3 = vmmov %vm14022_vm4 }
0x1335   : > { %v7637_v25 = vrot.slane %v7317_v40, 5  ;;  %v10776_v32 = vpop.f32.mrb[75].mxu0  ;;  %v10791_v48 = vpop.f32.mrb[75].mxu1  ;;  %v7664_v11 = vsel %vm14023_vm5, %v7635_v50, %v7663_v5  ;;  %v7649_v13 = vsel %vm2953_vm14, %v7633_v24, %v7089_v44  ;;  %v7643_v46 = vrot.slane %v7545_v18, 2  ;;  %vm14025_vm10 = vmmov %vm14019_vm12 }
0x1336   : > { %v7650_v30 = vsel %vm14024_vm3, %v7635_v50, %v7649_v13  ;;  %v7733_v14 = vsel %vm2950_vm13, %v7635_v50, %v7633_v24  ;;  %v7634_v53 = vsel %vm2950_vm13, %v7633_v24, %v7089_v44  ;;  %vm14026_vm8 = vmmov %vm14020_vm7 }
0x1337   : > { %v7693_v33 = vsel %vm14025_vm10, %v7637_v25, %v7692_v4  ;;  %v7679_v16 = vsel %vm14026_vm8, %v7637_v25, %v7678_v6  ;;  %vm14027_vm12 = vmmov %vm14021_vm11  ;;  %v7707_v9 = vsel %vm2950_vm13, %v7639_v15, %v7637_v25  ;;  %v7720_v31 = vsel %vm2950_vm13, %v7637_v25, %v7635_v50 }
0x1338   : > { %v7665_v61 = vsel %vm14027_vm12, %v7637_v25, %v7664_v11  ;;  %vm14028_vm7 = vmmov %vm14023_vm5  ;;  %7711 = vrot.lane.b32.xlu0 %v7706_v51, %s14029_s28  ;;  %v7469_v20 = vpop.f32.mrb[76].mxu0  ;;  %v7734_v56 = vsel %vm2953_vm14, %v7637_v25, %v7733_v14  ;;  %v7636_v37 = vsel %vm2953_vm14, %v7635_v50, %v7634_v53  ;;  %v7721_v38 = vsel %vm2953_vm14, %v7639_v15, %v7720_v31 }
0x1339   : > { %v7651_v7 = vsel %vm14028_vm7, %v7637_v25, %v7650_v30  ;;  %vm14030_vm11 = vmmov %vm14025_vm10  ;;  %v7641_v27 = vrot.slane %v7469_v20, 3  ;;  %v10786_v29 = vpop.f32.mrb[77].mxu0  ;;  %v7735_v22 = vsel %vm14024_vm3, %v7639_v15, %v7734_v56 }
0x133a   : > { %v7680_v60 = vsel %vm14030_vm11, %v7639_v15, %v7679_v16  ;;  %vm14031_vm4 = vmmov %vm14026_vm8 }
0x133b   : > { %v7666_v21 = vsel %vm14031_vm4, %v7639_v15, %v7665_v61  ;;  %vm14032_vm5 = vmmov %vm14027_vm12  ;;  %v7681_v10 = vsel %vm2950_vm13, %v7643_v46, %v7641_v27  ;;  %v7694_v47 = vsel %vm2950_vm13, %v7641_v27, %v7639_v15  ;;  %v7708_v35 = vsel %vm2953_vm14, %v7641_v27, %v7707_v9 }
0x133c   : > { %v7652_v43 = vsel %vm14032_vm5, %v7639_v15, %v7651_v7  ;;  %vm14033_vm10 = vmmov %vm14024_vm3  ;;  %7697 = vrot.lane.b32.xlu0 %v7693_v33, %s14036_s16  ;;  %v7621_v42 = vpop.f32.mrb[78].mxu0  ;;  %v7695_v62 = vsel %vm2953_vm14, %v7643_v46, %v7694_v47  ;;  %vm14040_vm5 = vcmask 1044484  }
0x133d   : > { %v7638_v28 = vsel %vm14033_vm10, %v7637_v25, %v7636_v37  ;;  %vm14034_vm8 = vmmov %vm14030_vm11  ;;  %v7645_v41 = vrot.slane %v7621_v42, 1  ;;  %v10796_v44 = vpop.f32.mrb[79].mxu0  ;;  %vm14042_vm10 = vcmask 1045509  }
0x133e   : > { %v7667_v39 = vsel %vm14034_vm8, %v7641_v27, %v7666_v21  ;;  %vm14035_vm12 = vmmov %vm14031_vm4 }
0x133f   : > { %v7653_v36 = vsel %vm14035_vm12, %v7641_v27, %v7652_v43  ;;  %vm14037_vm7 = vmmov %vm14034_vm8  ;;  %7657 = vrot.lane.b32.xlu1 %v7645_v41, %s14044_s14  ;;  %v7668_v24 = vsel %vm2950_vm13, %v7645_v41, %v7643_v46  ;;  %v7682_v45 = vsel %vm2953_vm14, %v7645_v41, %v7681_v10 }
0x1340   : > { %v7654_v19 = vsel %vm14037_vm7, %v7643_v46, %v7653_v36  ;;  %vm14038_vm11 = vmmov %vm14024_vm3  ;;  %7683 = vrot.lane.b32.xlu0 %v7680_v60, %s14047_s10  ;;  %v7846_v55 = vpop.f32.mrb[80].mxu0 }
0x1341   : > { %v7722_v1 = vsel %vm14038_vm11, %v7641_v27, %v7721_v38  ;;  %vm14039_vm4 = vmmov %vm14024_vm3  ;;  %v7853_v18 = vcombine.high %v7846_v55, %v7846_v55  ;;  %v7860_v40 = vrot.slane %v7846_v55, %v11411_v2  ;;  %v10807_v51 = vpop.f32.mrb[81].mxu0 }
0x1342   : > { %v7709_v63 = vsel %vm14039_vm4, %v7643_v46, %v7708_v35  ;;  %v7723_v52 = vsel %vm14040_vm5, %v7643_v46, %v7722_v1  ;;  %vm14041_vm3 = vmmov %vm14040_vm5  ;;  %v7849_v6 = vpop.f32.mrb[82].mxu0 }
0x1343   : > { %v7736_v54 = vsel %vm14041_vm3, %v7641_v27, %v7735_v22  ;;  %vm14043_vm8 = vmmov %vm14041_vm3  ;;  %7671 = vrot.lane.b32.xlu1 %v7668_v24, %s14053_s15  ;;  %v7868_v25 = vcombine.high %v7860_v40, %v7860_v40  ;;  %v7876_v32 = vrot.slane %v7860_v40, %v11411_v2  ;;  %v10808_v48 = vpop.f32.mrb[83].mxu0 }
0x1344   : > { %v7737_v23 = vsel %vm14042_vm10, %v7643_v46, %v7736_v54  ;;  %v7640_v12 = vsel %vm14043_vm8, %v7639_v15, %v7638_v28  ;;  %vm14045_vm12 = vmmov %vm14039_vm4  ;;  %vm14049_vm4 = vcmask 1046534   ;;  %v7867_v15 = vrot.slane %v7853_v18, %v11411_v2  ;;  %7669 = vrot.lane.b32.xlu0 %v7667_v39, %s14053_s15  ;;  %s14065_s15 = smov 108  }
0x1345   : > { %v7696_v26 = vsel %vm14045_vm12, %v7645_v41, %v7695_v62  ;;  %vm14046_vm7 = vmmov %vm14041_vm3  ;;  %v7738_v57 = vsel %vm14049_vm4, %v7645_v41, %v7737_v23  ;;  %vm14054_vm8 = vcmask 39936   ;;  %v7898_v30 = vcombine.high %v7876_v32, %v7876_v32  ;;  %8182 = vst.msk [vmem:[#allocation3] sm:$0x1] %vm3247_vm15, %v7876_v32 }
0x1346   : > { %v7710_v50 = vsel %vm14046_vm7, %v7645_v41, %v7709_v63  ;;  %vm14048_vm11 = vmmov %vm14042_vm10  ;;  %v7869_v11 = vcombine.high %v7867_v15, %v7867_v15  ;;  %v7883_v13 = vrot.slane %v7867_v15, %v11411_v2  ;;  %vm14055_vm12 = vcmask 32768  }
0x1347   : > { %v7724_v34 = vsel %vm14048_vm11, %v7645_v41, %v7723_v52  ;;  %vm14050_vm5 = vmmov %vm14042_vm10  ;;  %vm14052_vm10 = vcmask 1047559   ;;  %7910 = vst.msk [vmem:[#allocation2] sm:$0x1] %vm14055_vm12, %v7876_v32  ;;  %7685 = vrot.lane.b32.xlu1 %v7682_v45, %s14047_s10  ;;  %v7921_v16 = vrot.slane %v7876_v32, %v11414_v8  ;;  %s14063_s10 = smov 93   ;;  %v7929_v20 = vrot.slane %v7898_v30, %v11414_v8 }
0x1348   : > { %v7642_v59 = vsel %vm14050_vm5, %v7641_v27, %v7640_v12  ;;  %vm14051_vm3 = vmmov %vm14049_vm4  ;;  %v13099_v14 = vrot.slane %v7869_v11, %v11411_v2  ;;  %v13101_v53 = vcombine.high %v7883_v13, %v7883_v13  ;;  %8184 = vst.msk [vmem:[#allocation3 + $0x10] sm:$0x1] %vm3247_vm15, %v7898_v30  ;;  %7655 = vrot.lane.b32.xlu0 %v7654_v19, %s14044_s14  ;;  %s14064_s14 = smov 118   ;;  %v11142_v12 = vld [vmem:[%s11329_s13] sm:$0xff] }
0x1349   : > { %v7644_v4 = vsel %vm14051_vm3, %v7643_v46, %v7642_v59  ;;  %v7890_v46 = vrot.slane %v7868_v25, %v11411_v2  ;;  %vm14056_vm7 = vmmov %vm14055_vm12  ;;  %8186 = vst.msk [vmem:[#allocation3 + $0x20] sm:$0x1] %vm3247_vm15, %v7883_v13  ;;  %v7937_v60 = vrot.slane %v7883_v13, %v11414_v8  ;;  %vm14067_vm12 = vcmask 73768  }
0x134a   : > { %v7646_v5 = vsel %vm14052_vm10, %v7645_v41, %v7644_v4  ;;  %vm14057_vm11 = vmmov %vm14056_vm7  ;;  %v13116_v61 = vcombine.high %v13099_v14, %v13099_v14  ;;  %8187 = vst.msk [vmem:[#allocation3 + $0x28] sm:$0x1] %vm3247_vm15, %v13099_v14  ;;  %v13198_v28 = vrot.slane %v13099_v14, %v11414_v8  ;;  %v13236_v44 = vrot.slane %v13101_v53, %v11414_v8 }
0x134b   : > { %7648 = vst.msk [vmem:[#allocation4] sm:$0xff] %vm14054_vm8, %v7646_v5  ;;  %v13103_v33 = vcombine.high %v7890_v46, %v7890_v46  ;;  %vm14058_vm4 = vmmov %vm14056_vm7  ;;  %7699 = vrot.lane.b32.xlu1 %v7696_v26, %s14036_s16  ;;  %v7925_v7 = vrot.slane %v7890_v46, %v11414_v8  ;;  %s14066_s16 = smov 98  }
0x134c   : > { %7911 = vst.msk [vmem:[#allocation2 + $0x8] sm:$0x1] %vm14056_vm7, %v7890_v46  ;;  %vm14059_vm5 = vmmov %vm14058_vm4  ;;  %8190 = vrot.lane.b32.xlu0 %v7921_v16, %s11224_s26  ;;  %vm14068_vm7 = vcmask 80937   ;;  %v7949_v25 = vrot.slane %v13116_v61, %v11414_v8 }
0x134d   : > { %7912 = vst.msk [vmem:[#allocation2 + $0x10] sm:$0x1] %vm14057_vm11, %v7898_v30  ;;  %vm14060_vm3 = vmmov %vm14058_vm4  ;;  %v7933_v43 = vrot.slane %v13103_v33, %v11414_v8  ;;  %vm14069_vm11 = vcmask 121938  }
0x134e   : > { %7914 = vst.msk [vmem:[#allocation2 + $0x20] sm:$0x1] %vm14058_vm4, %v7883_v13  ;;  %vm14061_vm10 = vmmov %vm14060_vm3  ;;  %vm14070_vm4 = vcmask 115792  }
0x134f   : > { %8183 = vst.msk [vmem:[#allocation3 + $0x8] sm:$0x1] %vm3247_vm15, %v7890_v46  ;;  %8185 = vst.msk [vmem:[#allocation3 + $0x18] sm:$0x1] %vm3247_vm15, %v13103_v33  ;;  %7713 = vrot.lane.b32.xlu1 %v7710_v50, %s14029_s28 }
0x1350   : > { %7915 = vst.msk [vmem:[#allocation2 + $0x28] sm:$0x1] %vm14059_vm5, %v13099_v14  ;;  %vm14062_vm8 = vmmov %vm14060_vm3  ;;  %8254 = vrot.lane.b32.xlu0 %v7921_v16, %s13881_s29  ;;  %vm14071_vm5 = vcmask 162939  }
0x1351   : > { %8188 = vst.msk [vmem:[#allocation3 + $0x30] sm:$0x1] %vm3247_vm15, %v13101_v53  ;;  %8189 = vst.msk [vmem:[#allocation3 + $0x38] sm:$0x1] %vm3247_vm15, %v13116_v61 }
0x1352   : > { %7913 = vst.msk [vmem:[#allocation2 + $0x18] sm:$0x1] %vm14060_vm3, %v13103_v33  ;;  %vm14072_vm3 = vcmask 157816  }
0x1353   : > { %7916 = vst.msk [vmem:[#allocation2 + $0x30] sm:$0x1] %vm14061_vm10, %v13101_v53  ;;  %7727 = vrot.lane.b32.xlu1 %v7724_v34, %s14018_s17  ;;  %vm14073_vm10 = vcmask 203940   ;;  %v10262_v34 = vld [vmem:[%s13784_s4 + $0xc] sm:$0xf] }
0x1354   : > { %7917 = vst.msk [vmem:[#allocation2 + $0x38] sm:$0x1] %vm14062_vm8, %v13116_v61  ;;  %7950 = vrot.lane.b32.xlu0 %v7921_v16, %s11212_s9  ;;  %vm14074_vm8 = vcmask 199840  }
0x1357   : > { %7741 = vrot.lane.b32.xlu1 %v7738_v57, %s14013_s19 }
0x1358   : > { %8014 = vrot.lane.b32.xlu0 %v7921_v16, %s11214_s11 }
0x135b   : > { %8222 = vrot.lane.b32.xlu1 %v7921_v16, %s11226_s20 }
0x135c   : > { %8078 = vrot.lane.b32.xlu0 %v7921_v16, %s11215_s12 }
0x135f   : > { %8286 = vrot.lane.b32.xlu1 %v7921_v16, %s11227_s18 }
0x1360   : > { %8142 = vrot.lane.b32.xlu0 %v7921_v16, %s14063_s10 }
0x1363   : > { %7982 = vrot.lane.b32.xlu1 %v7921_v16, %s14064_s14 }
0x1364   : > { %8224 = vrot.lane.b32.xlu0 %v7925_v7, %s11226_s20 }
0x1367   : > { %8046 = vrot.lane.b32.xlu1 %v7921_v16, %s14065_s15 }
0x1368   : > { %8288 = vrot.lane.b32.xlu0 %v7925_v7, %s11227_s18 }
0x136b   : > { %8110 = vrot.lane.b32.xlu1 %v7921_v16, %s14066_s16 }
0x136c   : > { %7984 = vrot.lane.b32.xlu0 %v7925_v7, %s14064_s14 }
0x136f   : > { %8192 = vrot.lane.b32.xlu1 %v7925_v7, %s11224_s26 }
0x1370   : > { %8048 = vrot.lane.b32.xlu0 %v7925_v7, %s14065_s15 }
0x1373   : > { %8256 = vrot.lane.b32.xlu1 %v7925_v7, %s13881_s29 }
0x1374   : > { %8112 = vrot.lane.b32.xlu0 %v7925_v7, %s14066_s16 }
0x1377   : > { %7952 = vrot.lane.b32.xlu1 %v7925_v7, %s11212_s9 }
0x1378   : > { %8194 = vrot.lane.b32.xlu0 %v7929_v20, %s11224_s26 }
0x137b   : > { %8016 = vrot.lane.b32.xlu1 %v7925_v7, %s11214_s11 }
0x137c   : > { %8258 = vrot.lane.b32.xlu0 %v7929_v20, %s13881_s29 }
0x137f   : > { %8080 = vrot.lane.b32.xlu1 %v7925_v7, %s11215_s12 }
0x1380   : > { %7954 = vrot.lane.b32.xlu0 %v7929_v20, %s11212_s9 }
0x1383   : > { %8144 = vrot.lane.b32.xlu1 %v7925_v7, %s14063_s10 }
0x1384   : > { %8018 = vrot.lane.b32.xlu0 %v7929_v20, %s11214_s11 }
0x1387   : > { %8226 = vrot.lane.b32.xlu1 %v7929_v20, %s11226_s20 }
0x1388   : > { %8082 = vrot.lane.b32.xlu0 %v7929_v20, %s11215_s12 }
0x138b   : > { %8290 = vrot.lane.b32.xlu1 %v7929_v20, %s11227_s18 }
0x138c   : > { %8146 = vrot.lane.b32.xlu0 %v7929_v20, %s14063_s10 }
0x138f   : > { %7986 = vrot.lane.b32.xlu1 %v7929_v20, %s14064_s14 }
0x1390   : > { %8198 = vrot.lane.b32.xlu0 %v7937_v60, %s11224_s26 }
0x1393   : > { %8050 = vrot.lane.b32.xlu1 %v7929_v20, %s14065_s15 }
0x1394   : > { %8262 = vrot.lane.b32.xlu0 %v7937_v60, %s13881_s29 }
0x1397   : > { %8114 = vrot.lane.b32.xlu1 %v7929_v20, %s14066_s16 }
0x1398   : > { %7958 = vrot.lane.b32.xlu0 %v7937_v60, %s11212_s9 }
0x139b   : > { %8230 = vrot.lane.b32.xlu1 %v7937_v60, %s11226_s20 }
0x139c   : > { %8022 = vrot.lane.b32.xlu0 %v7937_v60, %s11214_s11 }
0x139e   : > { %v7740_v21 = vpop.permute.xlu0 %7739 }
0x139f   : > { %8294 = vrot.lane.b32.xlu1 %v7937_v60, %s11227_s18 }
0x13a0   : > { %8086 = vrot.lane.b32.xlu0 %v7937_v60, %s11215_s12 }
0x13a3   : > { %7990 = vrot.lane.b32.xlu1 %v7937_v60, %s14064_s14 }
0x13a4   : > { %8150 = vrot.lane.b32.xlu0 %v7937_v60, %s14063_s10 }
0x13a6   : > { %v7726_v9 = vpop.permute.xlu0 %7725 }
0x13a7   : > { %8054 = vrot.lane.b32.xlu1 %v7937_v60, %s14065_s15 }
0x13a8   : > { %8228 = vrot.lane.b32.xlu0 %v7933_v43, %s11226_s20 }
0x13aa   : > { %v7712_v27 = vpop.permute.xlu0 %7711 }
0x13ab   : > { %8118 = vrot.lane.b32.xlu1 %v7937_v60, %s14066_s16 }
0x13ac   : > { %8292 = vrot.lane.b32.xlu0 %v7933_v43, %s11227_s18 }
0x13ae   : > { %v7698_v29 = vpop.permute.xlu0 %7697 }
0x13af   : > { %8196 = vrot.lane.b32.xlu1 %v7933_v43, %s11224_s26 }
0x13b0   : > { %7988 = vrot.lane.b32.xlu0 %v7933_v43, %s14064_s14 }
0x13b1   : > { %v7658_v31 = vpop.permute.xlu1 %7657 }
0x13b2   : > { %7662 = vst.msk [vmem:[#allocation4 + $0x7] sm:$0x1] %vm14067_vm12, %v7658_v31  ;;  %v7684_v56 = vpop.permute.xlu0 %7683  ;;  %vm14075_vm12 = vcmask 244941  }
0x13b3   : > { %8260 = vrot.lane.b32.xlu1 %v7933_v43, %s13881_s29 }
0x13b4   : > { %8052 = vrot.lane.b32.xlu0 %v7933_v43, %s14065_s15 }
0x13b5   : > { %v7672_v37 = vpop.permute.xlu1 %7671 }
0x13b6   : > { %v7670_v38 = vpop.permute.xlu0 %7669 }
0x13b7   : > { %7956 = vrot.lane.b32.xlu1 %v7933_v43, %s11212_s9 }
0x13b8   : > { %8116 = vrot.lane.b32.xlu0 %v7933_v43, %s14066_s16 }
0x13b9   : > { %v7686_v22 = vpop.permute.xlu1 %7685 }
0x13ba   : > { %v7656_v39 = vpop.permute.xlu0 %7655 }
0x13bb   : > { %7661 = vst.msk [vmem:[#allocation4 - $0x1] sm:$0xfe] %vm14068_vm7, %v7656_v39  ;;  %8020 = vrot.lane.b32.xlu1 %v7933_v43, %s11214_s11  ;;  %vm14076_vm7 = vcmask 285942  }
0x13bc   : > { %7675 = vst.msk [vmem:[#allocation4 - $0x2] sm:$0xfc] %vm14069_vm11, %v7670_v38  ;;  %8232 = vrot.lane.b32.xlu0 %v13198_v28, %s11226_s20  ;;  %vm14077_vm11 = vcmask 326943  }
0x13bd   : > { %7676 = vst.msk [vmem:[#allocation4 + $0x6] sm:$0x3] %vm14070_vm4, %v7672_v37  ;;  %v7700_v10 = vpop.permute.xlu1 %7699  ;;  %vm14078_vm4 = vcmask 241864  }
0x13be   : > { %7689 = vst.msk [vmem:[#allocation4 - $0x3] sm:$0xf8] %vm14071_vm5, %v7684_v56  ;;  %v8191_v36 = vpop.permute.xlu0 %8190  ;;  %vm14079_vm5 = vcmask 283888  }
0x13bf   : > { %7690 = vst.msk [vmem:[#allocation4 + $0x5] sm:$0x7] %vm14072_vm3, %v7686_v22  ;;  %8084 = vrot.lane.b32.xlu1 %v7933_v43, %s11215_s12  ;;  %vm14080_vm3 = vcmask 32768  }
0x13c0   : > { %7703 = vst.msk [vmem:[#allocation4 - $0x4] sm:$0xf0] %vm14073_vm10, %v7698_v29  ;;  %8296 = vrot.lane.b32.xlu0 %v13198_v28, %s11227_s18  ;;  %vm14081_vm10 = vcmask 325912  }
0x13c1   : > { %7704 = vst.msk [vmem:[#allocation4 + $0x4] sm:$0xf] %vm14074_vm8, %v7700_v10  ;;  %v7714_v47 = vpop.permute.xlu1 %7713  ;;  %vm14082_vm8 = vmmov %vm14080_vm3 }
0x13c2   : > { %7717 = vst.msk [vmem:[#allocation4 - $0x5] sm:$0xe0] %vm14075_vm12, %v7712_v27  ;;  %v8255_v42 = vpop.permute.xlu0 %8254  ;;  %vm14083_vm12 = vmmov %vm14080_vm3 }
0x13c3   : > { %8214 = vst.msk [vmem:[#allocation3 + $0x1] sm:$0x1] %vm3247_vm15, %v8191_v36  ;;  %8278 = vst.msk [vmem:[#allocation3 + $0x3] sm:$0x1] %vm3247_vm15, %v8255_v42  ;;  %8148 = vrot.lane.b32.xlu1 %v7933_v43, %s14063_s10 }
0x13c4   : > { %7731 = vst.msk [vmem:[#allocation4 - $0x6] sm:$0xc0] %vm14076_vm7, %v7726_v9  ;;  %7992 = vrot.lane.b32.xlu0 %v13198_v28, %s14064_s14  ;;  %vm14084_vm7 = vmmov %vm14080_vm3 }
0x13c5   : > { %7745 = vst.msk [vmem:[#allocation4 - $0x7] sm:$0x80] %vm14077_vm11, %v7740_v21  ;;  %v7728_v19 = vpop.permute.xlu1 %7727  ;;  %vm14085_vm11 = vmmov %vm14080_vm3 }
0x13c6   : > { %7718 = vst.msk [vmem:[#allocation4 + $0x3] sm:$0x1f] %vm14078_vm4, %v7714_v47  ;;  %v7951_v62 = vpop.permute.xlu0 %7950  ;;  %vm14086_vm4 = vmmov %vm14080_vm3 }
0x13c7   : > { %7732 = vst.msk [vmem:[#allocation4 + $0x2] sm:$0x3f] %vm14079_vm5, %v7728_v19  ;;  %8200 = vrot.lane.b32.xlu1 %v13198_v28, %s11224_s26  ;;  %vm14087_vm5 = vmmov %vm14080_vm3 }
0x13c8   : > { %7974 = vst.msk [vmem:[#allocation2 + $0x1] sm:$0x1] %vm14080_vm3, %v7951_v62  ;;  %8056 = vrot.lane.b32.xlu0 %v13198_v28, %s14065_s15 }
0x13c9   : > { %v7742_v35 = vpop.permute.xlu1 %7741 }
0x13ca   : > { %7746 = vst.msk [vmem:[#allocation4 + $0x1] sm:$0x7f] %vm14081_vm10, %v7742_v35  ;;  %v8015_v1 = vpop.permute.xlu0 %8014  ;;  %vm14088_vm10 = vmmov %vm14080_vm3 }
0x13cb   : > { %8038 = vst.msk [vmem:[#allocation2 + $0x3] sm:$0x1] %vm14082_vm8, %v8015_v1  ;;  %8264 = vrot.lane.b32.xlu1 %v13198_v28, %s13881_s29  ;;  %vm14089_vm8 = vcmask 39936  }
0x13cc   : > { %8120 = vrot.lane.b32.xlu0 %v13198_v28, %s14066_s16 }
0x13cd   : > { %v8223_v41 = vpop.permute.xlu1 %8222 }
0x13ce   : > { %8246 = vst.msk [vmem:[#allocation3 + $0x2] sm:$0x1] %vm3247_vm15, %v8223_v41  ;;  %v8079_v63 = vpop.permute.xlu0 %8078 }
0x13cf   : > { %8102 = vst.msk [vmem:[#allocation2 + $0x5] sm:$0x1] %vm14083_vm12, %v8079_v63  ;;  %7960 = vrot.lane.b32.xlu1 %v13198_v28, %s11212_s9  ;;  %vm14090_vm12 = vmmov %vm14080_vm3 }
0x13d0   : > { %8202 = vrot.lane.b32.xlu0 %v13236_v44, %s11224_s26 }
0x13d1   : > { %v8287_v52 = vpop.permute.xlu1 %8286  ;;  %v7747_v54 = vld [vmem:[#allocation4] sm:$0xff] }
0x13d2   : > { %8310 = vst.msk [vmem:[#allocation3 + $0x4] sm:$0x1] %vm3247_vm15, %v8287_v52  ;;  %v8143_v23 = vpop.permute.xlu0 %8142  ;;  %v7750_v24 = vsub.f32 %v11142_v12, %v7747_v54 }
0x13d3   : > { %8166 = vst.msk [vmem:[#allocation2 + $0x7] sm:$0x1] %vm14084_vm7, %v8143_v23  ;;  %8024 = vrot.lane.b32.xlu1 %v13198_v28, %s11214_s11  ;;  %vm14091_vm7 = vmmov %vm14080_vm3 }
0x13d4   : > { %8266 = vrot.lane.b32.xlu0 %v13236_v44, %s13881_s29  ;;  %v7751_v45 = vpack.c.bf16 %v7750_v24, %v7750_v24 }
0x13d5   : > { %v7983_v26 = vpop.permute.xlu1 %7982 }
0x13d6   : > { %8006 = vst.msk [vmem:[#allocation2 + $0x2] sm:$0x1] %vm14085_vm11, %v7983_v26  ;;  %v8225_v50 = vpop.permute.xlu0 %8224  ;;  %v7763_v55 = vsel %vm255_vm1, %v7751_v45, 0  ;;  %vm14092_vm11 = vmmov %vm14080_vm3 }
0x13d7   : > { %8247 = vst.msk [vmem:[#allocation3 + $0xa] sm:$0x1] %vm3247_vm15, %v8225_v50  ;;  %10798 = vmatpush3.bf16.msra.mxu1 %v7763_v55  ;;  %8088 = vrot.lane.b32.xlu1 %v13198_v28, %s11215_s12 }
0x13d8   : > { %7962 = vrot.lane.b32.xlu0 %v13236_v44, %s11212_s9  ;;  %10809 = vmatprep.subr.mxu1 %v11208_v0 }
0x13d9   : > { %v8047_v57 = vpop.permute.xlu1 %8046  ;;  %v8318_v59 = vld [vmem:[#allocation3] sm:$0x1f] }
0x13da   : > { %8070 = vst.msk [vmem:[#allocation2 + $0x4] sm:$0x1] %vm14086_vm4, %v8047_v57  ;;  %v8289_v18 = vpop.permute.xlu0 %8288  ;;  %10800 = vmatmul.mubr.msk.bf16.vlgmr.msra.gmra.mrb[76].mxu1 %vm251_vm2, %v10262_v34  ;;  %vm14093_vm4 = vmmov %vm14080_vm3 }
0x13db   : > { %8311 = vst.msk [vmem:[#allocation3 + $0xc] sm:$0x1] %vm3247_vm15, %v8289_v18  ;;  %10810 = vmatpush3.msk.msra.mxu1 %vm2335_vm6, %v8318_v59  ;;  %8152 = vrot.lane.b32.xlu1 %v13198_v28, %s14063_s10 }
0x13dc   : > { %8026 = vrot.lane.b32.xlu0 %v13236_v44, %s11214_s11  ;;  %10811 = vmatprep.mubr.msk.f32.mxu1 %vm11209_vm0, %v11208_v0 }
0x13dd   : > { %v8111_v40 = vpop.permute.xlu1 %8110  ;;  %10819 = vmatprep.subr.mxu1 %v11208_v0 }
0x13de   : > { %8134 = vst.msk [vmem:[#allocation2 + $0x6] sm:$0x1] %vm14087_vm5, %v8111_v40  ;;  %v7985_v51 = vpop.permute.xlu0 %7984  ;;  %vm14094_vm5 = vmmov %vm14080_vm3 }
0x13df   : > { %8007 = vst.msk [vmem:[#allocation2 + $0xa] sm:$0x1] %vm14080_vm3, %v7985_v51  ;;  %8234 = vrot.lane.b32.xlu1 %v13236_v44, %s11226_s20 }
0x13e0   : > { %8090 = vrot.lane.b32.xlu0 %v13236_v44, %s11215_s12 }
0x13e1   : > { %v8193_v4 = vpop.permute.xlu1 %8192 }
0x13e2   : > { %8215 = vst.msk [vmem:[#allocation3 + $0x9] sm:$0x1] %vm3247_vm15, %v8193_v4  ;;  %v8049_v6 = vpop.permute.xlu0 %8048 }
0x13e3   : > { %8071 = vst.msk [vmem:[#allocation2 + $0xc] sm:$0x1] %vm14088_vm10, %v8049_v6  ;;  %8298 = vrot.lane.b32.xlu1 %v13236_v44, %s11227_s18  ;;  %vm14095_vm10 = vmmov %vm14080_vm3 }
0x13e4   : > { %8154 = vrot.lane.b32.xlu0 %v13236_v44, %s14063_s10 }
0x13e5   : > { %v8257_v5 = vpop.permute.xlu1 %8256  ;;  %v8174_v15 = vld [vmem:[#allocation2] sm:$0xff] }
0x13e6   : > { %8279 = vst.msk [vmem:[#allocation3 + $0xb] sm:$0x1] %vm3247_vm15, %v8257_v5  ;;  %10812 = vmatmul.mubr.msk.f32.vlgmr.msra.gmra.mrb[80].mxu1 %vm14089_vm8, %v8174_v15  ;;  %v8113_v32 = vpop.permute.xlu0 %8112  ;;  %vm14096_vm8 = vmmov %vm14080_vm3 }
0x13e7   : > { %8135 = vst.msk [vmem:[#allocation2 + $0xe] sm:$0x1] %vm14090_vm12, %v8113_v32  ;;  %7994 = vrot.lane.b32.xlu1 %v13236_v44, %s14064_s14  ;;  %10821 = vmatprep.mubr.msk.f32.mxu1 %vm11209_vm0, %v11208_v0  ;;  %vm14097_vm12 = vcmask 39936  }
0x13e8   : > { %8236 = vrot.lane.b32.xlu0 %v7949_v25, %s11226_s20 }
0x13e9   : > { %v7953_v48 = vpop.permute.xlu1 %7952 }
0x13ea   : > { %7975 = vst.msk [vmem:[#allocation2 + $0x9] sm:$0x1] %vm14091_vm7, %v7953_v48  ;;  %v8195_v11 = vpop.permute.xlu0 %8194  ;;  %vm14098_vm7 = vmmov %vm14080_vm3 }
0x13eb   : > { %8216 = vst.msk [vmem:[#allocation3 + $0x11] sm:$0x1] %vm3247_vm15, %v8195_v11  ;;  %8058 = vrot.lane.b32.xlu1 %v13236_v44, %s14065_s15 }
0x13ec   : > { %8300 = vrot.lane.b32.xlu0 %v7949_v25, %s11227_s18 }
0x13ed   : > { %v8017_v13 = vpop.permute.xlu1 %8016  ;;  %v8319_v46 = vld [vmem:[#allocation3 + $0x8] sm:$0x1f] }
0x13ee   : > { %8039 = vst.msk [vmem:[#allocation2 + $0xb] sm:$0x1] %vm14092_vm11, %v8017_v13  ;;  %v8259_v30 = vpop.permute.xlu0 %8258  ;;  %10815 = vmatpush3.msk.msra.mxu0 %vm2335_vm6, %v8319_v46  ;;  %vm14099_vm11 = vmmov %vm14080_vm3 }
0x13ef   : > { %8280 = vst.msk [vmem:[#allocation3 + $0x13] sm:$0x1] %vm3247_vm15, %v8259_v30  ;;  %8122 = vrot.lane.b32.xlu1 %v13236_v44, %s14066_s16  ;;  %10824 = vmatprep.subr.mxu0 %v11208_v0 }
0x13f0   : > { %7996 = vrot.lane.b32.xlu0 %v7949_v25, %s14064_s14 }
0x13f1   : > { %v8081_v14 = vpop.permute.xlu1 %8080 }
0x13f2   : > { %8103 = vst.msk [vmem:[#allocation2 + $0xd] sm:$0x1] %vm14093_vm4, %v8081_v14  ;;  %v7955_v53 = vpop.permute.xlu0 %7954  ;;  %vm14100_vm4 = vmmov %vm14080_vm3 }
0x13f3   : > { %7976 = vst.msk [vmem:[#allocation2 + $0x11] sm:$0x1] %vm14094_vm5, %v7955_v53  ;;  %8204 = vrot.lane.b32.xlu1 %v7949_v25, %s11224_s26  ;;  %vm14101_vm5 = vmmov %vm14080_vm3 }
0x13f4   : > { %8060 = vrot.lane.b32.xlu0 %v7949_v25, %s14065_s15 }
0x13f5   : > { %v8145_v33 = vpop.permute.xlu1 %8144 }
0x13f6   : > { %8167 = vst.msk [vmem:[#allocation2 + $0xf] sm:$0x1] %vm14080_vm3, %v8145_v33  ;;  %v8019_v16 = vpop.permute.xlu0 %8018 }
0x13f7   : > { %8040 = vst.msk [vmem:[#allocation2 + $0x13] sm:$0x1] %vm14095_vm10, %v8019_v16  ;;  %8268 = vrot.lane.b32.xlu1 %v7949_v25, %s13881_s29  ;;  %vm14102_vm10 = vmmov %vm14080_vm3 }
0x13f8   : > { %8124 = vrot.lane.b32.xlu0 %v7949_v25, %s14066_s16 }
0x13f9   : > { %v8227_v61 = vpop.permute.xlu1 %8226 }
0x13fa   : > { %8248 = vst.msk [vmem:[#allocation3 + $0x12] sm:$0x1] %vm3247_vm15, %v8227_v61  ;;  %v8083_v7 = vpop.permute.xlu0 %8082 }
0x13fb   : > { %8104 = vst.msk [vmem:[#allocation2 + $0x15] sm:$0x1] %vm14096_vm8, %v8083_v7  ;;  %7964 = vrot.lane.b32.xlu1 %v7949_v25, %s11212_s9  ;;  %vm14103_vm8 = vmmov %vm14097_vm12 }
0x13fd   : > { %v8291_v20 = vpop.permute.xlu1 %8290  ;;  %v8175_v60 = vld [vmem:[#allocation2 + $0x8] sm:$0xff] }
0x13fe   : > { %8312 = vst.msk [vmem:[#allocation3 + $0x14] sm:$0x1] %vm3247_vm15, %v8291_v20  ;;  %v8147_v21 = vpop.permute.xlu0 %8146  ;;  %10817 = vmatmul.mubr.msk.f32.vlgmr.msra.gmra.mrb[84].mxu0 %vm14097_vm12, %v8175_v60  ;;  %vm14104_vm12 = vmmov %vm14080_vm3 }
0x13ff   : > { %8168 = vst.msk [vmem:[#allocation2 + $0x17] sm:$0x1] %vm14098_vm7, %v8147_v21  ;;  %8028 = vrot.lane.b32.xlu1 %v7949_v25, %s11214_s11  ;;  %10826 = vmatprep.mubr.msk.f32.mxu0 %vm11209_vm0, %v11208_v0  ;;  %vm14105_vm7 = vmmov %vm14080_vm3 }
0x1401   : > { %v7987_v43 = vpop.permute.xlu1 %7986 }
0x1402   : > { %8008 = vst.msk [vmem:[#allocation2 + $0x12] sm:$0x1] %vm14099_vm11, %v7987_v43  ;;  %v8199_v9 = vpop.permute.xlu0 %8198  ;;  %vm14106_vm11 = vmmov %vm14080_vm3 }
0x1403   : > { %8218 = vst.msk [vmem:[#allocation3 + $0x21] sm:$0x1] %vm3247_vm15, %v8199_v9  ;;  %8092 = vrot.lane.b32.xlu1 %v7949_v25, %s11215_s12 }
0x1405   : > { %v8051_v27 = vpop.permute.xlu1 %8050  ;;  %v8320_v29 = vld [vmem:[#allocation3 + $0x10] sm:$0x1f] }
0x1406   : > { %8072 = vst.msk [vmem:[#allocation2 + $0x14] sm:$0x1] %vm14100_vm4, %v8051_v27  ;;  %10820 = vmatpush3.msk.msra.mxu1 %vm2335_vm6, %v8320_v29  ;;  %v8263_v31 = vpop.permute.xlu0 %8262  ;;  %vm14107_vm4 = vmmov %vm14080_vm3 }
0x1407   : > { %8282 = vst.msk [vmem:[#allocation3 + $0x23] sm:$0x1] %vm3247_vm15, %v8263_v31  ;;  %8156 = vrot.lane.b32.xlu1 %v7949_v25, %s14063_s10  ;;  %10829 = vmatprep.subr.mxu1 %v11208_v0 }
0x1409   : > { %v8115_v56 = vpop.permute.xlu1 %8114 }
0x140a   : > { %8136 = vst.msk [vmem:[#allocation2 + $0x16] sm:$0x1] %vm14101_vm5, %v8115_v56  ;;  %v7959_v37 = vpop.permute.xlu0 %7958  ;;  %vm14108_vm5 = vmmov %vm14080_vm3 }
0x140b   : > { %7978 = vst.msk [vmem:[#allocation2 + $0x21] sm:$0x1] %vm14080_vm3, %v7959_v37 }
0x140d   : > { %v8231_v38 = vpop.permute.xlu1 %8230 }
0x140e   : > { %8250 = vst.msk [vmem:[#allocation3 + $0x22] sm:$0x1] %vm3247_vm15, %v8231_v38  ;;  %v8023_v22 = vpop.permute.xlu0 %8022 }
0x140f   : > { %8042 = vst.msk [vmem:[#allocation2 + $0x23] sm:$0x1] %vm14102_vm10, %v8023_v22  ;;  %vm14109_vm10 = vmmov %vm14103_vm8 }
0x1411   : > { %v8295_v28 = vpop.permute.xlu1 %8294  ;;  %v8176_v39 = vld [vmem:[#allocation2 + $0x10] sm:$0xff] }
0x1412   : > { %8314 = vst.msk [vmem:[#allocation3 + $0x24] sm:$0x1] %vm3247_vm15, %v8295_v28  ;;  %10822 = vmatmul.mubr.msk.f32.vlgmr.msra.gmra.mrb[82].mxu1 %vm14103_vm8, %v8176_v39  ;;  %v8087_v10 = vpop.permute.xlu0 %8086  ;;  %vm14110_vm8 = vmmov %vm14080_vm3 }
0x1413   : > { %8106 = vst.msk [vmem:[#allocation2 + $0x25] sm:$0x1] %vm14104_vm12, %v8087_v10  ;;  %10831 = vmatprep.mubr.msk.f32.mxu1 %vm11209_vm0, %v11208_v0  ;;  %vm14111_vm12 = vmmov %vm14080_vm3  ;;  %v10283_v10 = vld [vmem:[%s13782_s2 + $0x10] sm:$0xf] }
0x1415   : > { %v7991_v36 = vpop.permute.xlu1 %7990 }
0x1416   : > { %8010 = vst.msk [vmem:[#allocation2 + $0x22] sm:$0x1] %vm14105_vm7, %v7991_v36  ;;  %v8151_v47 = vpop.permute.xlu0 %8150  ;;  %vm14112_vm7 = vmmov %vm14080_vm3 }
0x1417   : > { %8170 = vst.msk [vmem:[#allocation2 + $0x27] sm:$0x1] %vm14106_vm11, %v8151_v47  ;;  %vm14113_vm11 = vmmov %vm14080_vm3 }
0x1419   : > { %v8055_v42 = vpop.permute.xlu1 %8054  ;;  %v8322_v19 = vld [vmem:[#allocation3 + $0x20] sm:$0x1f] }
0x141a   : > { %8074 = vst.msk [vmem:[#allocation2 + $0x24] sm:$0x1] %vm14107_vm4, %v8055_v42  ;;  %10830 = vmatpush3.msk.msra.mxu1 %vm2335_vm6, %v8322_v19  ;;  %v8229_v62 = vpop.permute.xlu0 %8228  ;;  %vm14114_vm4 = vmmov %vm14080_vm3 }
0x141b   : > { %8249 = vst.msk [vmem:[#allocation3 + $0x1a] sm:$0x1] %vm3247_vm15, %v8229_v62  ;;  %10839 = vmatprep.subr.mxu1 %v11208_v0 }
0x141d   : > { %v8119_v35 = vpop.permute.xlu1 %8118 }
0x141e   : > { %8138 = vst.msk [vmem:[#allocation2 + $0x26] sm:$0x1] %vm14108_vm5, %v8119_v35  ;;  %v8293_v1 = vpop.permute.xlu0 %8292  ;;  %vm14115_vm5 = vmmov %vm14080_vm3 }
0x141f   : > { %8313 = vst.msk [vmem:[#allocation3 + $0x1c] sm:$0x1] %vm3247_vm15, %v8293_v1 }
0x1421   : > { %v8197_v41 = vpop.permute.xlu1 %8196 }
0x1422   : > { %8217 = vst.msk [vmem:[#allocation3 + $0x19] sm:$0x1] %vm3247_vm15, %v8197_v41  ;;  %v7989_v44 = vpop.permute.xlu0 %7988 }
0x1423   : > { %8009 = vst.msk [vmem:[#allocation2 + $0x1a] sm:$0x1] %vm14080_vm3, %v7989_v44 }
0x1425   : > { %v8261_v63 = vpop.permute.xlu1 %8260  ;;  %v8178_v52 = vld [vmem:[#allocation2 + $0x20] sm:$0xff] }
0x1426   : > { %8281 = vst.msk [vmem:[#allocation3 + $0x1b] sm:$0x1] %vm3247_vm15, %v8261_v63  ;;  %v8053_v54 = vpop.permute.xlu0 %8052  ;;  %10832 = vmatmul.mubr.msk.f32.vlgmr.msra.gmra.mrb[84].mxu1 %vm14109_vm10, %v8178_v52  ;;  %vm14116_vm10 = vmmov %vm14080_vm3 }
0x1427   : > { %8073 = vst.msk [vmem:[#allocation2 + $0x1c] sm:$0x1] %vm14110_vm8, %v8053_v54  ;;  %10841 = vmatprep.mubr.msk.f32.mxu1 %vm11209_vm0, %v11208_v0  ;;  %vm14117_vm8 = vcmask 39936  }
0x1429   : > { %v7957_v23 = vpop.permute.xlu1 %7956 }
0x142a   : > { %7977 = vst.msk [vmem:[#allocation2 + $0x19] sm:$0x1] %vm14111_vm12, %v7957_v23  ;;  %v8117_v12 = vpop.permute.xlu0 %8116  ;;  %vm14118_vm12 = vmmov %vm14080_vm3 }
0x142b   : > { %8137 = vst.msk [vmem:[#allocation2 + $0x1e] sm:$0x1] %vm14112_vm7, %v8117_v12  ;;  %vm14119_vm7 = vmmov %vm14080_vm3 }
0x142d   : > { %v8021_v24 = vpop.permute.xlu1 %8020  ;;  %v8321_v45 = vld [vmem:[#allocation3 + $0x18] sm:$0x1f] }
0x142e   : > { %8041 = vst.msk [vmem:[#allocation2 + $0x1b] sm:$0x1] %vm14113_vm11, %v8021_v24  ;;  %10825 = vmatpush3.msk.msra.mxu0 %vm2335_vm6, %v8321_v45  ;;  %v8233_v26 = vpop.permute.xlu0 %8232  ;;  %vm14120_vm11 = vmmov %vm14080_vm3 }
0x142f   : > { %8251 = vst.msk [vmem:[#allocation3 + $0x2a] sm:$0x1] %vm3247_vm15, %v8233_v26  ;;  %10834 = vmatprep.subr.mxu0 %v11208_v0 }
0x1431   : > { %v8085_v50 = vpop.permute.xlu1 %8084 }
0x1432   : > { %8105 = vst.msk [vmem:[#allocation2 + $0x1d] sm:$0x1] %vm14114_vm4, %v8085_v50  ;;  %v8297_v55 = vpop.permute.xlu0 %8296  ;;  %vm14121_vm4 = vmmov %vm14080_vm3 }
0x1433   : > { %8315 = vst.msk [vmem:[#allocation3 + $0x2c] sm:$0x1] %vm3247_vm15, %v8297_v55 }
0x1435   : > { %v8149_v34 = vpop.permute.xlu1 %8148 }
0x1436   : > { %8169 = vst.msk [vmem:[#allocation2 + $0x1f] sm:$0x1] %vm14115_vm5, %v8149_v34  ;;  %v7993_v57 = vpop.permute.xlu0 %7992  ;;  %vm14122_vm5 = vmmov %vm14080_vm3 }
0x1437   : > { %8011 = vst.msk [vmem:[#allocation2 + $0x2a] sm:$0x1] %vm14080_vm3, %v7993_v57 }
0x1439   : > { %v8201_v59 = vpop.permute.xlu1 %8200 }
0x143a   : > { %8219 = vst.msk [vmem:[#allocation3 + $0x29] sm:$0x1] %vm3247_vm15, %v8201_v59  ;;  %v8057_v18 = vpop.permute.xlu0 %8056 }
0x143b   : > { %8075 = vst.msk [vmem:[#allocation2 + $0x2c] sm:$0x1] %vm14116_vm10, %v8057_v18  ;;  %vm14123_vm10 = vmmov %vm14080_vm3 }
0x143d   : > { %v8265_v40 = vpop.permute.xlu1 %8264  ;;  %v8177_v51 = vld [vmem:[#allocation2 + $0x18] sm:$0xff] }
0x143e   : > { %8283 = vst.msk [vmem:[#allocation3 + $0x2b] sm:$0x1] %vm3247_vm15, %v8265_v40  ;;  %10827 = vmatmul.mubr.msk.f32.vlgmr.msra.gmra.mrb[86].mxu0 %vm14117_vm8, %v8177_v51  ;;  %v8121_v4 = vpop.permute.xlu0 %8120  ;;  %vm14124_vm8 = vmmov %vm14080_vm3 }
0x143f   : > { %8139 = vst.msk [vmem:[#allocation2 + $0x2e] sm:$0x1] %vm14118_vm12, %v8121_v4  ;;  %10836 = vmatprep.mubr.msk.f32.mxu0 %vm11209_vm0, %v11208_v0  ;;  %vm14125_vm12 = vcmask 39936  }
0x1441   : > { %v7961_v6 = vpop.permute.xlu1 %7960 }
0x1442   : > { %7979 = vst.msk [vmem:[#allocation2 + $0x29] sm:$0x1] %vm14119_vm7, %v7961_v6  ;;  %v8203_v5 = vpop.permute.xlu0 %8202  ;;  %vm14126_vm7 = vmmov %vm14080_vm3 }
0x1443   : > { %8220 = vst.msk [vmem:[#allocation3 + $0x31] sm:$0x1] %vm3247_vm15, %v8203_v5  ;;  %v10284_v5 = vld [vmem:[%s13783_s3 + $0x20] sm:$0xff] }
0x1445   : > { %v8025_v15 = vpop.permute.xlu1 %8024  ;;  %v8323_v25 = vld [vmem:[#allocation3 + $0x28] sm:$0x1f] }
0x1446   : > { %8043 = vst.msk [vmem:[#allocation2 + $0x2b] sm:$0x1] %vm14120_vm11, %v8025_v15  ;;  %v8267_v32 = vpop.permute.xlu0 %8266  ;;  %10835 = vmatpush3.msk.msra.mxu0 %vm2335_vm6, %v8323_v25  ;;  %vm14127_vm11 = vmmov %vm14080_vm3 }
0x1447   : > { %8284 = vst.msk [vmem:[#allocation3 + $0x33] sm:$0x1] %vm3247_vm15, %v8267_v32  ;;  %10844 = vmatprep.subr.mxu0 %v11208_v0 }
0x1449   : > { %v8089_v48 = vpop.permute.xlu1 %8088 }
0x144a   : > { %8107 = vst.msk [vmem:[#allocation2 + $0x2d] sm:$0x1] %vm14121_vm4, %v8089_v48  ;;  %v7963_v11 = vpop.permute.xlu0 %7962  ;;  %vm14128_vm4 = vmmov %vm14080_vm3 }
0x144b   : > { %7980 = vst.msk [vmem:[#allocation2 + $0x31] sm:$0x1] %vm14122_vm5, %v7963_v11  ;;  %vm14129_vm5 = vmmov %vm14080_vm3 }
0x144d   : > { %v8153_v13 = vpop.permute.xlu1 %8152 }
0x144e   : > { %8171 = vst.msk [vmem:[#allocation2 + $0x2f] sm:$0x1] %vm14080_vm3, %v8153_v13  ;;  %v8027_v46 = vpop.permute.xlu0 %8026 }
0x144f   : > { %8044 = vst.msk [vmem:[#allocation2 + $0x33] sm:$0x1] %vm14123_vm10, %v8027_v46  ;;  %vm14130_vm10 = vmmov %vm14080_vm3 }
0x1451   : > { %v8235_v30 = vpop.permute.xlu1 %8234 }
0x1452   : > { %8252 = vst.msk [vmem:[#allocation3 + $0x32] sm:$0x1] %vm3247_vm15, %v8235_v30  ;;  %v8091_v14 = vpop.permute.xlu0 %8090 }
0x1453   : > { %8108 = vst.msk [vmem:[#allocation2 + $0x35] sm:$0x1] %vm14124_vm8, %v8091_v14  ;;  %vm14131_vm8 = vmmov %vm14125_vm12 }
0x1455   : > { %v8299_v53 = vpop.permute.xlu1 %8298  ;;  %v8179_v33 = vld [vmem:[#allocation2 + $0x28] sm:$0xff] }
0x1456   : > { %8316 = vst.msk [vmem:[#allocation3 + $0x34] sm:$0x1] %vm3247_vm15, %v8299_v53  ;;  %v8155_v16 = vpop.permute.xlu0 %8154  ;;  %10837 = vmatmul.mubr.msk.f32.vlgmr.msra.gmra.mrb[88].mxu0 %vm14125_vm12, %v8179_v33  ;;  %vm14132_vm12 = vmmov %vm14080_vm3 }
0x1457   : > { %8172 = vst.msk [vmem:[#allocation2 + $0x37] sm:$0x1] %vm14126_vm7, %v8155_v16  ;;  %10846 = vmatprep.mubr.msk.f32.mxu0 %vm11209_vm0, %v11208_v0  ;;  %vm14133_vm7 = vmmov %vm14080_vm3 }
0x1459   : > { %v7995_v61 = vpop.permute.xlu1 %7994 }
0x145a   : > { %8012 = vst.msk [vmem:[#allocation2 + $0x32] sm:$0x1] %vm14127_vm11, %v7995_v61  ;;  %v8237_v7 = vpop.permute.xlu0 %8236  ;;  %vm14134_vm11 = vmmov %vm14080_vm3 }
0x145b   : > { %8253 = vst.msk [vmem:[#allocation3 + $0x3a] sm:$0x1] %vm3247_vm15, %v8237_v7 }
0x145d   : > { %v8059_v20 = vpop.permute.xlu1 %8058  ;;  %v8324_v60 = vld [vmem:[#allocation3 + $0x30] sm:$0x1f] }
0x145e   : > { %8076 = vst.msk [vmem:[#allocation2 + $0x34] sm:$0x1] %vm14128_vm4, %v8059_v20  ;;  %10840 = vmatpush3.msk.msra.mxu1 %vm2335_vm6, %v8324_v60  ;;  %v8301_v21 = vpop.permute.xlu0 %8300  ;;  %vm14135_vm4 = vmmov %vm14080_vm3 }
0x145f   : > { %8317 = vst.msk [vmem:[#allocation3 + $0x3c] sm:$0x1] %vm3247_vm15, %v8301_v21  ;;  %10849 = vmatprep.subr.bf16.mxu1 %v11208_v0 }
0x1461   : > { %v8123_v43 = vpop.permute.xlu1 %8122 }
0x1462   : > { %8140 = vst.msk [vmem:[#allocation2 + $0x36] sm:$0x1] %vm14129_vm5, %v8123_v43  ;;  %v7997_v9 = vpop.permute.xlu0 %7996  ;;  %vm14136_vm5 = vmmov %vm14080_vm3 }
0x1463   : > { %8013 = vst.msk [vmem:[#allocation2 + $0x3a] sm:$0x1] %vm14080_vm3, %v7997_v9  ;;  %vm14137_vm3 = vmmov %vm14131_vm8 }
0x1465   : > { %v8205_v27 = vpop.permute.xlu1 %8204 }
0x1466   : > { %8221 = vst.msk [vmem:[#allocation3 + $0x39] sm:$0x1] %vm3247_vm15, %v8205_v27  ;;  %v8061_v29 = vpop.permute.xlu0 %8060 }
0x1467   : > { %8077 = vst.msk [vmem:[#allocation2 + $0x3c] sm:$0x1] %vm14130_vm10, %v8061_v29 }
0x1469   : > { %v8269_v31 = vpop.permute.xlu1 %8268  ;;  %v8180_v56 = vld [vmem:[#allocation2 + $0x30] sm:$0xff] }
0x146a   : > { %8285 = vst.msk [vmem:[#allocation3 + $0x3b] sm:$0x1] %vm3247_vm15, %v8269_v31  ;;  %10842 = vmatmul.mubr.msk.f32.vlgmr.msra.gmra.mrb[86].mxu1 %vm14131_vm8, %v8180_v56  ;;  %v8125_v37 = vpop.permute.xlu0 %8124 }
0x146b   : > { %8141 = vst.msk [vmem:[#allocation2 + $0x3e] sm:$0x1] %vm14132_vm12, %v8125_v37  ;;  %10850 = vmatpush3.bf16.msra.mxu1 %v11337_v3  ;;  %10851 = vmatprep.mubr.msk.bf16.mxu1 %vm11209_vm0, %v11208_v0 }
0x146c   : > { %10865 = vmatprep.subr.mxu1 %v11208_v0 }
0x146d   : > { %v7965_v38 = vpop.permute.xlu1 %7964 }
0x146e   : > { %7981 = vst.msk [vmem:[#allocation2 + $0x39] sm:$0x1] %vm14133_vm7, %v7965_v38  ;;  %10852 = vmatmul.mubr.msk.bf16.vlgmr.msra.gmra.mrb[88].mxu1 %vm251_vm2, %v10283_v10  ;;  %vm14144_vm7 = vcmask 1046534  }
0x146f   : > { %10867 = vmatprep.mubr.msk.f32.mxu1 %vm11209_vm0, %v11208_v0 }
0x1471   : > { %v8029_v22 = vpop.permute.xlu1 %8028  ;;  %v8325_v28 = vld [vmem:[#allocation3 + $0x38] sm:$0x1f] }
0x1472   : > { %8045 = vst.msk [vmem:[#allocation2 + $0x3b] sm:$0x1] %vm14134_vm11, %v8029_v22  ;;  %10845 = vmatpush3.msk.msra.mxu0 %vm2335_vm6, %v8325_v28  ;;  %vm14138_vm6 = vcmask 1044484  }
0x1473   : > { %10855 = vmatprep.subr.mxu0 %v11208_v0  ;;  %vm14141_vm10 = vmmov %vm14138_vm6 }
0x1475   : > { %v8093_v39 = vpop.permute.xlu1 %8092 }
0x1476   : > { %8109 = vst.msk [vmem:[#allocation2 + $0x3d] sm:$0x1] %vm14135_vm4, %v8093_v39  ;;  %vm14146_vm4 = vmmov %vm14144_vm7 }
0x1479   : > { %v8157_v3 = vpop.permute.xlu1 %8156 }
0x147a   : > { %8173 = vst.msk [vmem:[#allocation2 + $0x3f] sm:$0x1] %vm14136_vm5, %v8157_v3 }
0x1481   : > { %v8181_v36 = vld [vmem:[#allocation2 + $0x38] sm:$0xff] }
0x1482   : > { %10847 = vmatmul.mubr.msk.f32.vlgmr.msra.gmra.mrb[90].mxu0 %vm14137_vm3, %v8181_v36  ;;  %vm14148_vm3 = vmmov %vm14138_vm6 }
0x1483   : > { %10857 = vmatprep.mubr.msk.f32.mxu0 %vm11209_vm0, %v11208_v0 }
0x14ad   : > { %v13422_v47 = vpop.f32.mrb[76].mxu1 }
0x14ae   : > { %v10801_v42 = vpop.f32.mrb[77].mxu1 }
0x14af   : > { %v7802_v19 = vpop.f32.mrb[78].mxu1 }
0x14b0   : > { %v10802_v62 = vpop.f32.mrb[79].mxu1 }
0x14b9   : > { %v13424_v35 = vpop.f32.mrb[80].mxu1 }
0x14ba   : > { %v10813_v1 = vpop.f32.mrb[81].mxu1  ;;  %v8934_v50 = vsel %vm251_vm2, %v13424_v35, -inf }
0x14d1   : > { %v13426_v41 = vpop.f32.mrb[84].mxu0 }
0x14d2   : > { %v10818_v44 = vpop.f32.mrb[85].mxu0  ;;  %v8937_v63 = vsel %vm251_vm2, %v13426_v41, -inf }
0x14d3   : > { %8938 = vmax.xlane.f32.xlu1 %v8937_v63 }
0x14e5   : > { %v13430_v52 = vpop.f32.mrb[82].mxu1 }
0x14e6   : > { %v10823_v54 = vpop.f32.mrb[83].mxu1  ;;  %v8940_v55 = vsel %vm251_vm2, %v13430_v52, -inf }
0x14f9   : > { %v13432_v23 = vpop.f32.mrb[84].mxu1 }
0x14fa   : > { %v10833_v12 = vpop.f32.mrb[85].mxu1  ;;  %v8946_v34 = vsel %vm251_vm2, %v13432_v23, -inf }
0x1511   : > { %v13434_v24 = vpop.f32.mrb[86].mxu0 }
0x1512   : > { %v10828_v45 = vpop.f32.mrb[87].mxu0  ;;  %v8943_v26 = vsel %vm251_vm2, %v13434_v24, -inf }
0x1513   : > { %8944 = vmax.xlane.f32.xlu0 %v8943_v26 }
0x1517   : > { %8935 = vmax.xlane.f32.xlu0 %v8934_v50 }
0x151b   : > { %8941 = vmax.xlane.f32.xlu0 %v8940_v55 }
0x151f   : > { %8947 = vmax.xlane.f32.xlu0 %v8946_v34 }
0x1529   : > { %v13444_v57 = vpop.f32.mrb[88].mxu0 }
0x152a   : > { %v10838_v59 = vpop.f32.mrb[89].mxu0  ;;  %v8949_v18 = vsel %vm251_vm2, %v13444_v57, -inf }
0x152b   : > { %8950 = vmax.xlane.f32.xlu1 %v8949_v18 }
0x153d   : > { %v8854_v40 = vpop.f32.mrb[86].mxu1 }
0x153e   : > { %v10843_v51 = vpop.f32.mrb[87].mxu1  ;;  %v8952_v4 = vsel %vm251_vm2, %v8854_v40, -inf }
0x153f   : > { %8953 = vmax.xlane.f32.xlu0 %v8952_v4 }
0x1541   : > { %v9093_v6 = vpop.f32.mrb[88].mxu1 }
0x1542   : > { %v10853_v15 = vpop.f32.mrb[89].mxu1 }
0x1543   : > { %v9096_v25 = vpop.f32.mrb[90].mxu1 }
0x1544   : > { %v10854_v32 = vpop.f32.mrb[91].mxu1 }
0x1555   : > { %9053 = vperm.xlu0 %10966, %v10284_v5   ;;  %v13452_v48 = vpop.f32.mrb[90].mxu0 }
0x1556   : > { %v10848_v11 = vpop.f32.mrb[91].mxu0  ;;  %v8955_v13 = vsel %vm251_vm2, %v13452_v48, -inf }
0x1557   : > { %8956 = vmax.xlane.f32.xlu1 %v8955_v13 }
0x1560   : > { %v8939_v54 = vpop.xlane.xlu1 %8938 }
0x1561   : > { %v8959_v12 = vsub.f32 %v13426_v41, %v8939_v54 }
0x1563   : > { %v8968_v45 = vmul.f32 1.442695, %v8959_v12 }
0x15a0   : > { %v13456_v46 = vpop.xlane.xlu0 %8944 }
0x15a1   : > { %v8961_v30 = vsub.f32 %v13434_v24, %v13456_v46 }
0x15a3   : > { %v8972_v55 = vmul.f32 1.442695, %v8961_v30 }
0x15a4   : > { %v13460_v14 = vpop.xlane.xlu0 %8935 }
0x15a5   : > { %v8958_v53 = vsub.f32 %v13424_v35, %v13460_v14 }
0x15a8   : > { %v13464_v33 = vpop.xlane.xlu0 %8941 }
0x15a9   : > { %v8960_v16 = vsub.f32 %v13430_v52, %v13464_v33 }
0x15ab   : > { %v8970_v35 = vmul.f32 1.442695, %v8960_v16 }
0x15ac   : > { %v13468_v61 = vpop.xlane.xlu0 %8947 }
0x15ad   : > { %v8962_v7 = vsub.f32 %v13432_v23, %v13468_v61 }
0x15af   : > { %v8974_v32 = vmul.f32 1.442695, %v8962_v7 }
0x15b8   : > { %v8951_v26 = vpop.xlane.xlu1 %8950 }
0x15b9   : > { %v8963_v34 = vsub.f32 %v13444_v57, %v8951_v26 }
0x15bb   : > { %v8976_v59 = vmul.f32 1.442695, %v8963_v34 }
0x15cc   : > { %v8954_v20 = vpop.xlane.xlu0 %8953 }
0x15cd   : > { %v8964_v62 = vsub.f32 %v8854_v40, %v8954_v20  ;;  %v8966_v40 = vmul.f32 1.442695, %v8958_v53 }
0x15cf   : > { %v8978_v1 = vmul.f32 1.442695, %v8964_v62 }
0x15d1   : > { %11092 = vpow2.f32 %v8978_v1 }
0x15d2   : > { %11094 = vpow2.f32 %v8968_v45 }
0x15d3   : > { %11096 = vpow2.f32 %v8972_v55 }
0x15d4   : > { %v9054_v60 = vpop.permute.xlu0 %9053  ;;  %11098 = vpow2.f32 %v8976_v59 }
0x15d5   : > { %v9094_v21 = vadd.f32 %v9093_v6, %v9054_v60  ;;  %11100 = vpow2.f32 %v8966_v40 }
0x15d7   : > { %v9100_v43 = vcombine.high %v9094_v21, %v9094_v21  ;;  %v9107_v9 = vrot.slane %v9094_v21, %v11411_v2 }
0x15d9   : > { %v9114_v27 = vrot.slane %v9100_v43, %v11411_v2  ;;  %v9115_v29 = vcombine.high %v9107_v9, %v9107_v9  ;;  %v9123_v31 = vrot.slane %v9107_v9, %v11411_v2 }
0x15db   : > { %v9116_v56 = vcombine.high %v9114_v27, %v9114_v27  ;;  %v9130_v37 = vrot.slane %v9114_v27, %v11411_v2  ;;  %v9137_v38 = vrot.slane %v9115_v29, %v11411_v2  ;;  %v9145_v22 = vcombine.high %v9123_v31, %v9123_v31  ;;  %9157 = vst.msk [vmem:[#allocation3] sm:$0x1] %vm3247_vm15, %v9123_v31  ;;  %v13504_v44 = vpop.eup %11092 }
0x15dc   : > { %v9168_v28 = vrot.slane %v9123_v31, %v11414_v8  ;;  %v9000_v63 = vsel %vm251_vm2, %v13504_v44, 0.0  ;;  %v13524_v24 = vpop.eup %11094 }
0x15dd   : > { %v9144_v39 = vrot.slane %v9116_v56, %v11411_v2  ;;  %9158 = vst.msk [vmem:[#allocation3 + $0x8] sm:$0x1] %vm3247_vm15, %v9137_v38  ;;  %9159 = vst.msk [vmem:[#allocation3 + $0x10] sm:$0x1] %vm3247_vm15, %v9145_v22  ;;  %v9147_v3 = vcombine.high %v9137_v38, %v9137_v38  ;;  %v9146_v10 = vcombine.high %v9130_v37, %v9130_v37  ;;  %v8985_v4 = vsel %vm251_vm2, %v13524_v24, 0.0  ;;  %v13530_v5 = vpop.eup %11096 }
0x15de   : > { %9161 = vst.msk [vmem:[#allocation3 + $0x20] sm:$0x1] %vm3247_vm15, %v9130_v37  ;;  %9293 = vrot.lane.b32.xlu0 %v9168_v28, %s11227_s18  ;;  %9197 = vrot.lane.b32.xlu1 %v9168_v28, %s11224_s26  ;;  %v9176_v42 = vrot.slane %v9145_v22, %v11414_v8  ;;  %v9172_v19 = vrot.slane %v9137_v38, %v11414_v8  ;;  %v8991_v15 = vsel %vm251_vm2, %v13530_v5, 0.0  ;;  %v13538_v25 = vpop.eup %11098 }
0x15df   : > { %9162 = vst.msk [vmem:[#allocation3 + $0x28] sm:$0x1] %vm3247_vm15, %v9144_v39  ;;  %9160 = vst.msk [vmem:[#allocation3 + $0x18] sm:$0x1] %vm3247_vm15, %v9147_v3  ;;  %v9148_v36 = vcombine.high %v9144_v39, %v9144_v39  ;;  %v9180_v2 = vrot.slane %v9147_v3, %v11414_v8  ;;  %v9184_v50 = vrot.slane %v9130_v37, %v11414_v8  ;;  %v13547_v11 = vpop.eup %11100 }
0x15e0   : > { %9163 = vst.msk [vmem:[#allocation3 + $0x30] sm:$0x1] %vm3247_vm15, %v9146_v10  ;;  %v9188_v41 = vrot.slane %v9144_v39, %v11414_v8  ;;  %v9192_v6 = vrot.slane %v9146_v10, %v11414_v8  ;;  %v8982_v13 = vsel %vm251_vm2, %v13547_v11, 0.0 }
0x15e1   : > { %9164 = vst.msk [vmem:[#allocation3 + $0x38] sm:$0x1] %vm3247_vm15, %v9148_v36  ;;  %v9196_v52 = vrot.slane %v9148_v36, %v11414_v8 }
0x15e2   : > { %9265 = vrot.lane.b32.xlu0 %v9176_v42, %s13881_s29  ;;  %9229 = vrot.lane.b32.xlu1 %v9168_v28, %s11226_s20 }
0x15e4   : > { %v8957_v18 = vpop.xlane.xlu1 %8956 }
0x15e5   : > { %v8965_v51 = vsub.f32 %v13452_v48, %v8957_v18  ;;  %v8997_v48 = vsel %vm251_vm2, %v13538_v25, 0.0 }
0x15e6   : > { %9203 = vrot.lane.b32.xlu0 %v9180_v2, %s11224_s26  ;;  %9261 = vrot.lane.b32.xlu1 %v9168_v28, %s13881_s29 }
0x15e7   : > { %v8980_v57 = vmul.f32 1.442695, %v8965_v51 }
0x15e9   : > { %11102 = vpow2.f32 %v8980_v57 }
0x15ea   : > { %9267 = vrot.lane.b32.xlu0 %v9180_v2, %s13881_s29  ;;  %9199 = vrot.lane.b32.xlu1 %v9172_v19, %s11224_s26  ;;  %11104 = vpow2.f32 %v8970_v35 }
0x15eb   : > { %11106 = vpow2.f32 %v8974_v32 }
0x15ee   : > { %9231 = vrot.lane.b32.xlu1 %v9172_v19, %s11226_s20 }
0x15f2   : > { %9263 = vrot.lane.b32.xlu1 %v9172_v19, %s13881_s29 }
0x15f3   : > { %v13552_v46 = vpop.eup %11102 }
0x15f4   : > { %v9003_v23 = vsel %vm251_vm2, %v13552_v46, 0.0  ;;  %v13557_v30 = vpop.eup %11104 }
0x15f5   : > { %v8988_v8 = vsel %vm251_vm2, %v13557_v30, 0.0  ;;  %v13561_v14 = vpop.eup %11106 }
0x15f6   : > { %9295 = vrot.lane.b32.xlu1 %v9172_v19, %s11227_s18  ;;  %v8994_v53 = vsel %vm251_vm2, %v13561_v14, 0.0 }
0x15fa   : > { %9201 = vrot.lane.b32.xlu1 %v9176_v42, %s11224_s26 }
0x15fe   : > { %9233 = vrot.lane.b32.xlu1 %v9176_v42, %s11226_s20 }
0x1602   : > { %9297 = vrot.lane.b32.xlu1 %v9176_v42, %s11227_s18 }
0x1606   : > { %9235 = vrot.lane.b32.xlu1 %v9180_v2, %s11226_s20 }
0x1609   : > { %9001 = vadd.xlane.f32.xlu0 %v9000_v63 }
0x160a   : > { %9299 = vrot.lane.b32.xlu1 %v9180_v2, %s11227_s18 }
0x161f   : > { %9205 = vrot.lane.b32.xlu0 %v9184_v50, %s11224_s26 }
0x1623   : > { %9269 = vrot.lane.b32.xlu0 %v9184_v50, %s13881_s29 }
0x1627   : > { %9207 = vrot.lane.b32.xlu0 %v9188_v41, %s11224_s26 }
0x162b   : > { %9271 = vrot.lane.b32.xlu0 %v9188_v41, %s13881_s29 }
0x162e   : > { %8986 = vadd.xlane.f32.xlu1 %v8985_v4 }
0x162f   : > { %9209 = vrot.lane.b32.xlu0 %v9192_v6, %s11224_s26 }
0x1632   : > { %8992 = vadd.xlane.f32.xlu1 %v8991_v15 }
0x1633   : > { %9273 = vrot.lane.b32.xlu0 %v9192_v6, %s13881_s29 }
0x1636   : > { %8998 = vadd.xlane.f32.xlu1 %v8997_v48 }
0x1637   : > { %9211 = vrot.lane.b32.xlu0 %v9196_v52, %s11224_s26  ;;  %s14161_s26 = smov 8  }
0x163a   : > { %8983 = vadd.xlane.f32.xlu1 %v8982_v13 }
0x163b   : > { %9275 = vrot.lane.b32.xlu0 %v9196_v52, %s13881_s29  ;;  %s14164_s29 = smov 32  }
0x163e   : > { %9004 = vadd.xlane.f32.xlu1 %v9003_v23 }
0x1642   : > { %8989 = vadd.xlane.f32.xlu1 %v8988_v8 }
0x1646   : > { %8995 = vadd.xlane.f32.xlu1 %v8994_v53 }
0x1650   : > { %v9294_v33 = vpop.permute.xlu0 %9293  ;;  %v9198_v16 = vpop.permute.xlu1 %9197 }
0x1651   : > { %9317 = vst.msk [vmem:[#allocation3 + $0x4] sm:$0x1] %vm3247_vm15, %v9294_v33  ;;  %9221 = vst.msk [vmem:[#allocation3 + $0x1] sm:$0x1] %vm3247_vm15, %v9198_v16 }
0x1654   : > { %v9266_v61 = vpop.permute.xlu0 %9265  ;;  %v9230_v7 = vpop.permute.xlu1 %9229 }
0x1655   : > { %9287 = vst.msk [vmem:[#allocation3 + $0x13] sm:$0x1] %vm3247_vm15, %v9266_v61  ;;  %9253 = vst.msk [vmem:[#allocation3 + $0x2] sm:$0x1] %vm3247_vm15, %v9230_v7 }
0x1657   : > { %9237 = vrot.lane.b32.xlu1 %v9184_v50, %s11226_s20 }
0x1658   : > { %v9204_v20 = vpop.permute.xlu0 %9203  ;;  %v9262_v60 = vpop.permute.xlu1 %9261 }
0x1659   : > { %9224 = vst.msk [vmem:[#allocation3 + $0x19] sm:$0x1] %vm3247_vm15, %v9204_v20  ;;  %9285 = vst.msk [vmem:[#allocation3 + $0x3] sm:$0x1] %vm3247_vm15, %v9262_v60 }
0x165b   : > { %9301 = vrot.lane.b32.xlu1 %v9184_v50, %s11227_s18 }
0x165c   : > { %v9268_v21 = vpop.permute.xlu0 %9267  ;;  %v9200_v43 = vpop.permute.xlu1 %9199 }
0x165d   : > { %9288 = vst.msk [vmem:[#allocation3 + $0x1b] sm:$0x1] %vm3247_vm15, %v9268_v21  ;;  %9222 = vst.msk [vmem:[#allocation3 + $0x9] sm:$0x1] %vm3247_vm15, %v9200_v43 }
0x165f   : > { %9239 = vrot.lane.b32.xlu1 %v9188_v41, %s11226_s20 }
0x1660   : > { %v9232_v9 = vpop.permute.xlu1 %9231 }
0x1661   : > { %9254 = vst.msk [vmem:[#allocation3 + $0xa] sm:$0x1] %vm3247_vm15, %v9232_v9 }
0x1663   : > { %9303 = vrot.lane.b32.xlu1 %v9188_v41, %s11227_s18 }
0x1664   : > { %v9264_v27 = vpop.permute.xlu1 %9263 }
0x1665   : > { %9286 = vst.msk [vmem:[#allocation3 + $0xb] sm:$0x1] %vm3247_vm15, %v9264_v27 }
0x1667   : > { %9241 = vrot.lane.b32.xlu1 %v9192_v6, %s11226_s20 }
0x1668   : > { %v9296_v29 = vpop.permute.xlu1 %9295 }
0x1669   : > { %9318 = vst.msk [vmem:[#allocation3 + $0xc] sm:$0x1] %vm3247_vm15, %v9296_v29 }
0x166b   : > { %9305 = vrot.lane.b32.xlu1 %v9192_v6, %s11227_s18 }
0x166c   : > { %v9202_v31 = vpop.permute.xlu1 %9201 }
0x166d   : > { %9223 = vst.msk [vmem:[#allocation3 + $0x11] sm:$0x1] %vm3247_vm15, %v9202_v31 }
0x166f   : > { %9243 = vrot.lane.b32.xlu1 %v9196_v52, %s11226_s20  ;;  %s14160_s20 = smov 16  }
0x1670   : > { %v9234_v56 = vpop.permute.xlu1 %9233 }
0x1671   : > { %9255 = vst.msk [vmem:[#allocation3 + $0x12] sm:$0x1] %vm3247_vm15, %v9234_v56 }
0x1673   : > { %9307 = vrot.lane.b32.xlu1 %v9196_v52, %s11227_s18  ;;  %s14153_s18 = smov 24  }
0x1674   : > { %v9298_v37 = vpop.permute.xlu1 %9297 }
0x1675   : > { %9319 = vst.msk [vmem:[#allocation3 + $0x14] sm:$0x1] %vm3247_vm15, %v9298_v37 }
0x1678   : > { %v9236_v38 = vpop.permute.xlu1 %9235 }
0x1679   : > { %9256 = vst.msk [vmem:[#allocation3 + $0x1a] sm:$0x1] %vm3247_vm15, %v9236_v38 }
0x167c   : > { %v9300_v22 = vpop.permute.xlu1 %9299 }
0x167d   : > { %9320 = vst.msk [vmem:[#allocation3 + $0x1c] sm:$0x1] %vm3247_vm15, %v9300_v22 }
0x1696   : > { %v9002_v28 = vpop.xlane.xlu0 %9001 }
0x169a   : > { %v9206_v39 = vpop.permute.xlu0 %9205 }
0x169b   : > { %9225 = vst.msk [vmem:[#allocation3 + $0x21] sm:$0x1] %vm3247_vm15, %v9206_v39  ;;  %v9327_v39 = vld [vmem:[#allocation3 + $0x10] sm:$0x1f] }
0x169e   : > { %v9270_v3 = vpop.permute.xlu0 %9269 }
0x169f   : > { %9289 = vst.msk [vmem:[#allocation3 + $0x23] sm:$0x1] %vm3247_vm15, %v9270_v3 }
0x16a2   : > { %v9208_v10 = vpop.permute.xlu0 %9207 }
0x16a3   : > { %9226 = vst.msk [vmem:[#allocation3 + $0x29] sm:$0x1] %vm3247_vm15, %v9208_v10 }
0x16a6   : > { %v9272_v36 = vpop.permute.xlu0 %9271 }
0x16a7   : > { %9290 = vst.msk [vmem:[#allocation3 + $0x2b] sm:$0x1] %vm3247_vm15, %v9272_v36  ;;  %v9326_v36 = vld [vmem:[#allocation3 + $0x8] sm:$0x1f] }
0x16aa   : > { %v9210_v42 = vpop.permute.xlu0 %9209 }
0x16ab   : > { %9227 = vst.msk [vmem:[#allocation3 + $0x31] sm:$0x1] %vm3247_vm15, %v9210_v42 }
0x16ae   : > { %v9274_v2 = vpop.permute.xlu0 %9273 }
0x16af   : > { %9291 = vst.msk [vmem:[#allocation3 + $0x33] sm:$0x1] %vm3247_vm15, %v9274_v2 }
0x16b2   : > { %v9212_v19 = vpop.permute.xlu0 %9211 }
0x16b3   : > { %9228 = vst.msk [vmem:[#allocation3 + $0x39] sm:$0x1] %vm3247_vm15, %v9212_v19 }
0x16b6   : > { %v9276_v62 = vpop.permute.xlu0 %9275 }
0x16b7   : > { %9292 = vst.msk [vmem:[#allocation3 + $0x3b] sm:$0x1] %vm3247_vm15, %v9276_v62  ;;  %v9328_v62 = vld [vmem:[#allocation3 + $0x18] sm:$0x1f] }
0x16bb   : > { %v8987_v1 = vpop.xlane.xlu1 %8986 }
0x16bf   : > { %v8993_v63 = vpop.xlane.xlu1 %8992 }
0x16c3   : > { %v8999_v54 = vpop.xlane.xlu1 %8998 }
0x16c7   : > { %v8984_v12 = vpop.xlane.xlu1 %8983 }
0x16c8   : > { %11108 = vrcp.f32 %v8984_v12 }
0x16c9   : > { %11110 = vrcp.f32 %v8987_v1 }
0x16ca   : > { %11112 = vrcp.f32 %v8993_v63 }
0x16cb   : > { %v9005_v45 = vpop.xlane.xlu1 %9004 }
0x16cf   : > { %v8990_v26 = vpop.xlane.xlu1 %8989 }
0x16d0   : > { %11114 = vrcp.f32 %v8990_v26 }
0x16d1   : > { %11116 = vrcp.f32 %v8999_v54 }
0x16d2   : > { %v11109_v50 = vpop.eup %11108  ;;  %11118 = vrcp.f32 %v9002_v28  ;;  %v9325_v28 = vld [vmem:[#allocation3] sm:$0x1f] }
0x16d3   : > { %v8996_v55 = vpop.xlane.xlu1 %8995  ;;  %v11111_v34 = vpop.eup %11110  ;;  %v9007_v59 = vmul.f32 %v11109_v50, %v13547_v11 }
0x16d4   : > { %11120 = vrcp.f32 %v8996_v55  ;;  %v9009_v18 = vmul.f32 %v11111_v34, %v13524_v24  ;;  %v11113_v40 = vpop.eup %11112 }
0x16d5   : > { %11122 = vrcp.f32 %v9005_v45  ;;  %v9022_v51 = vsel %vm251_vm2, %v9007_v59, 0.0  ;;  %v9013_v4 = vmul.f32 %v11113_v40, %v13530_v5 }
0x16d6   : > { %v9023_v15 = vsel %vm251_vm2, %v9009_v18, 0.0 }
0x16d7   : > { %v9238_v41 = vpop.permute.xlu1 %9237  ;;  %v9024_v48 = vadd.f32 %v9023_v15, %v9022_v51  ;;  %v9027_v23 = vsel %vm251_vm2, %v9013_v4, 0.0 }
0x16d8   : > { %9257 = vst.msk [vmem:[#allocation3 + $0x22] sm:$0x1] %vm3247_vm15, %v9238_v41 }
0x16da   : > { %v11115_v57 = vpop.eup %11114 }
0x16db   : > { %v9011_v6 = vmul.f32 %v11115_v57, %v13557_v30  ;;  %v9302_v35 = vpop.permute.xlu1 %9301  ;;  %v11117_v32 = vpop.eup %11116 }
0x16dc   : > { %9321 = vst.msk [vmem:[#allocation3 + $0x24] sm:$0x1] %vm3247_vm15, %v9302_v35  ;;  %v11119_v52 = vpop.eup %11118  ;;  %v9017_v8 = vmul.f32 %v11117_v32, %v13538_v25 }
0x16dd   : > { %v9025_v24 = vsel %vm251_vm2, %v9011_v6, 0.0  ;;  %v9019_v16 = vmul.f32 %v11119_v52, %v13504_v44 }
0x16de   : > { %v11121_v11 = vpop.eup %11120  ;;  %v9026_v13 = vadd.f32 %v9025_v24, %v9024_v48  ;;  %v9031_v20 = vsel %vm251_vm2, %v9017_v8, 0.0 }
0x16df   : > { %v9015_v5 = vmul.f32 %v11121_v11, %v13561_v14  ;;  %v9240_v53 = vpop.permute.xlu1 %9239  ;;  %v11123_v30 = vpop.eup %11122  ;;  %v9033_v14 = vsel %vm251_vm2, %v9019_v16, 0.0 }
0x16e0   : > { %9258 = vst.msk [vmem:[#allocation3 + $0x2a] sm:$0x1] %vm3247_vm15, %v9240_v53  ;;  %v9028_v33 = vadd.f32 %v9027_v23, %v9026_v13  ;;  %v9021_v60 = vmul.f32 %v11123_v30, %v13552_v46 }
0x16e1   : > { %v9029_v61 = vsel %vm251_vm2, %v9015_v5, 0.0 }
0x16e2   : > { %v9030_v7 = vadd.f32 %v9029_v61, %v9028_v33  ;;  %v9035_v9 = vsel %vm251_vm2, %v9021_v60, 0.0 }
0x16e3   : > { %v9304_v21 = vpop.permute.xlu1 %9303  ;;  %v9329_v2 = vld [vmem:[#allocation3 + $0x20] sm:$0x1f] }
0x16e4   : > { %9322 = vst.msk [vmem:[#allocation3 + $0x2c] sm:$0x1] %vm3247_vm15, %v9304_v21  ;;  %v9032_v25 = vadd.f32 %v9031_v20, %v9030_v7 }
0x16e6   : > { %v9034_v43 = vadd.f32 %v9033_v14, %v9032_v25 }
0x16e7   : > { %v9242_v27 = vpop.permute.xlu1 %9241 }
0x16e8   : > { %9259 = vst.msk [vmem:[#allocation3 + $0x32] sm:$0x1] %vm3247_vm15, %v9242_v27  ;;  %v9036_v44 = vadd.f32 %v9035_v9, %v9034_v43 }
0x16ea   : > { %v9037_v29 = vadd.f32 1e-07, %v9036_v44 }
0x16eb   : > { %v9306_v31 = vpop.permute.xlu1 %9305  ;;  %v9330_v54 = vld [vmem:[#allocation3 + $0x28] sm:$0x1f] }
0x16ec   : > { %9323 = vst.msk [vmem:[#allocation3 + $0x34] sm:$0x1] %vm3247_vm15, %v9306_v31  ;;  %11124 = vrcp.f32 %v9037_v29 }
0x16ef   : > { %v9244_v56 = vpop.permute.xlu1 %9243 }
0x16f0   : > { %9260 = vst.msk [vmem:[#allocation3 + $0x3a] sm:$0x1] %vm3247_vm15, %v9244_v56 }
0x16f3   : > { %v9308_v46 = vpop.permute.xlu1 %9307  ;;  %v9331_v63 = vld [vmem:[#allocation3 + $0x30] sm:$0x1f] }
0x16f4   : > { %9324 = vst.msk [vmem:[#allocation3 + $0x3c] sm:$0x1] %vm3247_vm15, %v9308_v46  ;;  %vm14140_vm15 = vcmask 1045509  }
0x16f5   : > { %vm14143_vm12 = vmmov %vm14140_vm15 }
0x16f6   : > { %v11125_v37 = vpop.eup %11124  ;;  %vm14147_vm5 = vmmov %vm14143_vm12 }
0x16f7   : > { %v9039_v38 = vmul.f32 %v11125_v37, %v9007_v59  ;;  %v9041_v22 = vmul.f32 %v11125_v37, %v9011_v6  ;;  %v9040_v3 = vmul.f32 %v11125_v37, %v9009_v18  ;;  %v9043_v10 = vmul.f32 %v11125_v37, %v9015_v5 }
0x16f8   : > { %v9042_v42 = vmul.f32 %v11125_v37, %v9013_v4  ;;  %v9045_v19 = vmul.f32 %v11125_v37, %v9019_v16  ;;  %v9044_v1 = vmul.f32 %v11125_v37, %v9017_v8  ;;  %v9046_v12 = vmul.f32 %v11125_v37, %v9021_v60 }
0x16f9   : > { %10856 = vmatpush3.msra.mxu0 %v9039_v38  ;;  %10866 = vmatpush3.msra.mxu1 %v9041_v22 }
0x16fa   : > { %10858 = vmatmul.mubr.msk.f32.vlgmr.msra.gmra.mrb[92].mxu0 %vm251_vm2, %v9325_v28  ;;  %10860 = vmatprep.subr.mxu0 %v11208_v0 }
0x16fb   : > { %10868 = vmatmul.mubr.msk.f32.vlgmr.msra.gmra.mrb[92].mxu1 %vm251_vm2, %v9327_v39  ;;  %10875 = vmatprep.subr.mxu1 %v11208_v0  ;;  %v9332_v45 = vld [vmem:[#allocation3 + $0x38] sm:$0x1f] }
0x16fc   : > { %10861 = vmatpush3.msra.mxu0 %v9040_v3  ;;  %10876 = vmatpush3.msra.mxu1 %v9043_v10 }
0x16fd   : > { %10862 = vmatprep.mubr.msk.f32.mxu0 %vm11209_vm0, %v11208_v0  ;;  %10870 = vmatprep.subr.mxu0 %v11208_v0 }
0x16fe   : > { %10877 = vmatprep.mubr.msk.f32.mxu1 %vm11209_vm0, %v11208_v0  ;;  %10885 = vmatprep.subr.mxu1 %v11208_v0 }
0x16ff   : > { %10863 = vmatmul.mubr.msk.f32.vlgmr.msra.gmra.mrb[94].mxu0 %vm251_vm2, %v9326_v36  ;;  %10878 = vmatmul.mubr.msk.f32.vlgmr.msra.gmra.mrb[94].mxu1 %vm251_vm2, %v9329_v2 }
0x1700   : > { %10871 = vmatpush3.msra.mxu0 %v9042_v42  ;;  %10886 = vmatpush3.msra.mxu1 %v9045_v19 }
0x1701   : > { %10872 = vmatprep.mubr.msk.f32.mxu0 %vm11209_vm0, %v11208_v0  ;;  %10880 = vmatprep.subr.mxu0 %v11208_v0 }
0x1702   : > { %10887 = vmatprep.mubr.msk.f32.mxu1 %vm11209_vm0, %v11208_v0  ;;  %10895 = vmatprep.subr.bf16.mxu1 %v11208_v0 }
0x1703   : > { %10873 = vmatmul.mubr.msk.f32.vlgmr.msra.gmra.mrb[96].mxu0 %vm251_vm2, %v9328_v62  ;;  %10888 = vmatmul.mubr.msk.f32.vlgmr.msra.gmra.mrb[96].mxu1 %vm251_vm2, %v9331_v63  ;;  %v10263_v62 = vld [vmem:[%s13785_s5 + $0x18] sm:$0xff]  ;;  %v10295_v63 = vld [vmem:[%s13785_s5 + $0x20] sm:$0xff] }
0x1704   : > { %10881 = vmatpush3.msra.mxu0 %v9044_v1  ;;  %10882 = vmatprep.mubr.msk.f32.mxu0 %vm11209_vm0, %v11208_v0  ;;  %v565_v1 = vld [vmem:[%s13785_s5] sm:$0xff] }
0x1705   : > { %10890 = vmatprep.subr.mxu0 %v11208_v0  ;;  %10897 = vmatprep.mubr.msk.bf16.mxu1 %vm11209_vm0, %v11208_v0 }
0x1707   : > { %10883 = vmatmul.mubr.msk.f32.vlgmr.msra.gmra.mrb[98].mxu0 %vm251_vm2, %v9330_v54  ;;  %v10231_v54 = vld [vmem:[%s13785_s5 + $0x10] sm:$0xff] }
0x1708   : > { %10891 = vmatpush3.msra.mxu0 %v9046_v12  ;;  %10892 = vmatprep.mubr.msk.f32.mxu0 %vm11209_vm0, %v11208_v0  ;;  %vm14139_vm0 = vcmask 1043459   ;;  %v10199_v12 = vld [vmem:[%s13785_s5 + $0x8] sm:$0xff] }
0x1709   : > { %vm14142_vm8 = vmmov %vm14139_vm0 }
0x170a   : > { %vm14145_vm11 = vmmov %vm14139_vm0 }
0x170b   : > { %10893 = vmatmul.mubr.msk.f32.vlgmr.msra.gmra.mrb[100].mxu0 %vm251_vm2, %v9332_v45 }
0x17cd   : > { %v9402_v26 = vpop.f32.mrb[92].mxu0 }
0x17ce   : > { %v9548_v50 = vpop.f32.mrb[92].mxu1  ;;  %v10859_v55 = vpop.f32.mrb[93].mxu0 }
0x17cf   : > { %v10869_v34 = vpop.f32.mrb[93].mxu1  ;;  %v9927_v57 = vrot.slane %v9548_v50, 6 }
0x17d2   : > { %v9475_v59 = vpop.f32.mrb[94].mxu0  ;;  %v9694_v18 = vpop.f32.mrb[94].mxu1 }
0x17d3   : > { %v9925_v41 = vrot.slane %v9475_v59, 7  ;;  %v10864_v40 = vpop.f32.mrb[95].mxu0  ;;  %v10879_v51 = vpop.f32.mrb[95].mxu1  ;;  %v9931_v53 = vrot.slane %v9694_v18, 4 }
0x17d4   : > { %v13714_v51 = vld [vmem:[%s11329_s13] sm:$0xff]  ;;  %s240_s13 = sand.u32 1, %s11198_s22  }
0x17d5   : > { %v9926_v4 = vsel %vm2950_vm13, %v9925_v41, %v9402_v26  ;;  %v9941_v6 = vsel %vm2953_vm14, %v9925_v41, %v9402_v26  ;;  %v9969_v35 = vsel %vm14138_vm6, %v9925_v41, %v9402_v26  ;;  %v9955_v0 = vsel %vm14139_vm0, %v9925_v41, %v9402_v26  ;;  %vm14149_vm6 = vmmov %vm14148_vm3  ;;  %s10084_s17 = scalar_lea.sflag [#allocation6], %s240_s13 }
0x17d6   : > { %v9621_v15 = vpop.f32.mrb[96].mxu0  ;;  %v9928_v32 = vsel %vm2953_vm14, %v9927_v57, %v9926_v4  ;;  %v9840_v48 = vpop.f32.mrb[96].mxu1  ;;  %v9970_v52 = vsel %vm14140_vm15, %v9927_v57, %v9969_v35  ;;  %v9956_v24 = vsel %vm14141_vm10, %v9927_v57, %v9955_v0  ;;  %v9942_v11 = vsel %vm14142_vm8, %v9927_v57, %v9941_v6  ;;  %vm14151_vm15 = vmmov %vm14146_vm4 }
0x17d7   : > { %v9929_v13 = vrot.slane %v9621_v15, 5  ;;  %v10874_v23 = vpop.f32.mrb[97].mxu0  ;;  %v10889_v8 = vpop.f32.mrb[97].mxu1  ;;  %v9983_v5 = vsel %vm14143_vm12, %v9925_v41, %v9402_v26  ;;  %vm14150_vm0 = vcmask 1047559   ;;  %vm14152_vm10 = vmmov %vm14147_vm5  ;;  %v9935_v43 = vrot.slane %v9840_v48, 2 }
0x17d8   : > { %v9984_v30 = vsel %vm14144_vm7, %v9927_v57, %v9983_v5  ;;  %vm14154_vm8 = vmmov %vm14150_vm0 }
0x17d9   : > { %v9930_v33 = vsel %vm14145_vm11, %v9929_v13, %v9928_v32  ;;  %v9971_v16 = vsel %vm14146_vm4, %v9929_v13, %v9970_v52  ;;  %v9957_v61 = vsel %vm14147_vm5, %v9929_v13, %v9956_v24  ;;  %v9943_v7 = vsel %vm14148_vm3, %v9929_v13, %v9942_v11  ;;  %vm14155_vm12 = vmmov %vm14147_vm5  ;;  %v10294_v32 = vld [vmem:[%s13784_s4 + $0x10] sm:$0xf] }
0x17da   : > { %v9767_v20 = vpop.f32.mrb[98].mxu0  ;;  %v9932_v60 = vsel %vm14149_vm6, %v9931_v53, %v9930_v33  ;;  %v9972_v21 = vsel %vm14150_vm0, %v9931_v53, %v9971_v16  ;;  %v9958_v25 = vsel %vm14151_vm15, %v9931_v53, %v9957_v61  ;;  %v9944_v14 = vsel %vm14152_vm10, %v9931_v53, %v9943_v7  ;;  %vm14156_vm7 = vmmov %vm14150_vm0 }
0x17db   : > { %v9933_v9 = vrot.slane %v9767_v20, 3  ;;  %9975 = vrot.lane.b32.xlu0 %v9972_v21, %s14153_s18  ;;  %v10884_v27 = vpop.f32.mrb[99].mxu0  ;;  %v9985_v44 = vsel %vm14154_vm8, %v9929_v13, %v9984_v30  ;;  %vm14157_vm11 = vmmov %vm14146_vm4  ;;  %vm14162_vm3 = vcmask 1043459   ;;  %vm14168_vm15 = vcmask 189568  }
0x17dc   : > { %vm14158_vm4 = vmmov %vm14150_vm0  ;;  %vm14169_vm10 = vcmask 326916   ;;  %vm14170_vm8 = vcmask 256192  }
0x17dd   : > { %v9934_v29 = vsel %vm14155_vm12, %v9933_v9, %v9932_v60  ;;  %v9959_v31 = vsel %vm14156_vm7, %v9933_v9, %v9958_v25  ;;  %v9945_v56 = vsel %vm14157_vm11, %v9933_v9, %v9944_v14  ;;  %v9973_v46 = vsel %vm2950_vm13, %v9935_v43, %v9933_v9  ;;  %vm14159_vm5 = vmmov %vm14157_vm11 }
0x17de   : > { %v9913_v37 = vpop.f32.mrb[100].mxu0  ;;  %v9946_v38 = vsel %vm14158_vm4, %v9935_v43, %v9945_v56  ;;  %v9986_v22 = vsel %vm2950_vm13, %v9933_v9, %v9931_v53  ;;  %v9936_v28 = vsel %vm14159_vm5, %v9935_v43, %v9934_v29  ;;  %vm14163_vm6 = vmmov %vm14150_vm0  ;;  %vm14167_vm0 = vcmask 261315  }
0x17df   : > { %v9937_v39 = vrot.slane %v9913_v37, 1  ;;  %9961 = vrot.lane.b32.xlu0 %v9959_v31, %s14160_s20  ;;  %v10894_v3 = vpop.f32.mrb[101].mxu0  ;;  %v9987_v10 = vsel %vm2953_vm14, %v9935_v43, %v9986_v22  ;;  %vm14171_vm12 = vcmask 322816  }
0x17e1   : > { %9949 = vrot.lane.b32.xlu1 %v9937_v39, %s14161_s26  ;;  %v9960_v36 = vsel %vm2950_vm13, %v9937_v39, %v9935_v43  ;;  %v9974_v42 = vsel %vm2953_vm14, %v9937_v39, %v9973_v46  ;;  %v9988_v2 = vsel %vm14162_vm3, %v9937_v39, %v9987_v10  ;;  %v9938_v19 = vsel %vm14163_vm6, %v9937_v39, %v9936_v28 }
0x17e2   : > { %9940 = vst.msk [vmem:[#allocation4] sm:$0xff] %vm251_vm2, %v9938_v19  ;;  %vm14165_vm13 = vcmask 130113   ;;  %vm14166_vm14 = vcmask 195714  }
0x17e3   : > { %9947 = vrot.lane.b32.xlu0 %v9946_v38, %s14161_s26  ;;  %s10160_s26 = sshll.u32 %s240_s13, 3 }
0x17e4   : > { %s242_s10 = scalar_lea.vmem [#allocation5], %s10160_s26 }
0x17e5   : > { %9963 = vrot.lane.b32.xlu1 %v9960_v36, %s14160_s20  ;;  %s10097_s14 = sshll.u32 %s242_s10, 4  ;;  %s13739_s14 = int_to_ptr.vmem [resolvable:$true] %s10097_s14 }
0x17e6   : > { %s11144_s9 = scalar_lea.vmem %s13739_s14, 128 }
0x17e7   : > { %9989 = vrot.lane.b32.xlu0 %v9985_v44, %s14164_s29  ;;  %p11145_p11 = scmp.ne.s32.totalorder %s13739_s14, %s11144_s9 }
0x17e9   : > { %9977 = vrot.lane.b32.xlu1 %v9974_v42, %s14153_s18  ;;  %p11146_p12 = pnand %p11145_p11, %p11308_p5 }
0x17eb   : > { %7756 = vperm.xlu0 %10966, %v10263_v62   ;;  %p11147_p13 = pneg %p11146_p12 }
0x17ed   : > { %9991 = vrot.lane.b32.xlu1 %v9988_v2, %s14164_s29  ;;  %s10298_s29 = sshll.u32 %s11291_s25, 7  ;;  %s11234_s25 = smov [#allocation5]  }
0x17ee   : > { %s13737_s19 = scalar_lea.hbm %s13786_s6, %s10298_s29  ;;  %s11148_s11 = sshll.u32 %s11234_s25, 4  ;;  %s11149_s11 = int_to_ptr.vmem [resolvable:$false] %s11148_s11 }
0x17ef   : > { %568 = vperm.xlu0 %10966, %v565_v1   ;;  %s11150_s12 = scalar_lea.vmem %s11149_s11, 256  ;;  %p11151_p0 = scmp.lt.s32.totalorder %s13739_s14, %s11149_s11 }
0x17f0   : > { %p11152_p1 = scmp.lt.s32.totalorder %s11150_s12, %s11144_s9 }
0x17f1   : > { %10006 = vperm.xlu1 %10967, %v10295_v63  }
0x17f2   : > { %p11153_p2 = por %p11152_p1, %p11151_p0 }
0x17f3   : > { %5368 = vperm.xlu0 %10966, %v10231_v54  }
0x17f4   : > { %p11154_p3 = pnand %p11153_p2, %p11147_p13 }
0x17f5   : > { %3093 = vperm.xlu1 %10967, %v10199_v12  }
0x184d   : > { %v9976_v45 = vpop.permute.xlu0 %9975 }
0x1851   : > { %v9962_v26 = vpop.permute.xlu0 %9961 }
0x1853   : > { %v9950_v50 = vpop.permute.xlu1 %9949 }
0x1854   : > { %9954 = vst.msk [vmem:[#allocation4 + $0x7] sm:$0x1] %vm5309_vm9, %v9950_v50 }
0x1855   : > { %v9948_v55 = vpop.permute.xlu0 %9947 }
0x1856   : > { %9953 = vst.msk [vmem:[#allocation4 - $0x1] sm:$0xfe] %vm14165_vm13, %v9948_v55 }
0x1857   : > { %9967 = vst.msk [vmem:[#allocation4 - $0x2] sm:$0xfc] %vm14166_vm14, %v9962_v26  ;;  %v9964_v34 = vpop.permute.xlu1 %9963 }
0x1858   : > { %9981 = vst.msk [vmem:[#allocation4 - $0x3] sm:$0xf8] %vm14167_vm0, %v9976_v45 }
0x1859   : > { %9968 = vst.msk [vmem:[#allocation4 + $0x6] sm:$0x3] %vm14168_vm15, %v9964_v34  ;;  %v9990_v59 = vpop.permute.xlu0 %9989 }
0x185a   : > { %9995 = vst.msk [vmem:[#allocation4 - $0x4] sm:$0xf0] %vm14169_vm10, %v9990_v59 }
0x185b   : > { %v9978_v18 = vpop.permute.xlu1 %9977 }
0x185c   : > { %9982 = vst.msk [vmem:[#allocation4 + $0x5] sm:$0x7] %vm14170_vm8, %v9978_v18 }
0x185f   : > { %v9992_v41 = vpop.permute.xlu1 %9991 }
0x1860   : > { %9996 = vst.msk [vmem:[#allocation4 + $0x4] sm:$0xf] %vm14171_vm12, %v9992_v41 }
0x1867   : > { %v9997_v40 = vld [vmem:[#allocation4] sm:$0xff] }
0x1868   : > { %v10000_v57 = vsub.f32 %v13714_v51, %v9997_v40 }
0x186a   : > { %v7757_v4 = vpop.permute.xlu0 %7756  ;;  %v10001_v6 = vpack.c.bf16 %v10000_v57, %v10000_v57 }
0x186b   : > { %v7800_v35 = vadd.f32 %v13422_v47, %v7757_v4 }
0x186c   : > { %v10013_v0 = vsel %vm255_vm1, %v10001_v6, 0  ;;  %vm14172_vm1 = vcmask 326656  }
0x186d   : > { %v7805_v15 = vmax.f32 %v7800_v35, 0.0  ;;  %10896 = vmatpush3.bf16.msra.mxu1 %v10013_v0 }
0x186e   : > { %v569_v16 = vpop.permute.xlu0 %568 }
0x186f   : > { %v7806_v48 = vadd.f32 %v13714_v51, %v7805_v15  ;;  %v612_v25 = vadd.f32 %v11409_v58, %v569_v16 }
0x1870   : > { %v10007_v52 = vpop.permute.xlu1 %10006  ;;  %10898 = vmatmul.mubr.msk.bf16.vlgmr.msra.gmra.mrb[100].mxu1 %vm251_vm2, %v10294_v32 }
0x1871   : > { %v10057_v24 = vmul.f32 0.5, %v7806_v48 }
0x1872   : > { %v5369_v9 = vpop.permute.xlu0 %5368 }
0x1873   : > { %11126 = vtanh.f32 %v10057_v24  ;;  %v5412_v44 = vadd.f32 %v12722_v49, %v5369_v9 }
0x1874   : > { %v3094_v11 = vpop.permute.xlu1 %3093 }
0x1875   : > { %v3137_v13 = vadd.f32 %v12154_v17, %v3094_v11  ;;  %v617_v17 = vmax.f32 %v612_v25, 0.0  ;;  %v5417_v31 = vmax.f32 %v5412_v44, 0.0 }
0x1877   : > { %v3142_v23 = vmax.f32 %v3137_v13, 0.0  ;;  %v618_v27 = vadd.f32 %v13714_v51, %v617_v17  ;;  %v5418_v37 = vadd.f32 %v13714_v51, %v5417_v31 }
0x1879   : > { %v3143_v53 = vadd.f32 %v13714_v51, %v3142_v23  ;;  %v10069_v29 = vmul.f32 0.5, %v618_v27 }
0x187d   : > { %v11127_v47 = vpop.eup %11126 }
0x187e   : > { %v10059_v8 = vadd.f32 1.0, %v11127_v47 }
0x1880   : > { %v10060_v5 = vmul.f32 0.5, %v10059_v8 }
0x1882   : > { %v10061_v30 = vmul.f32 %v10060_v5, %v3143_v53 }
0x1943   : > { %v10049_v33 = vpop.f32.mrb[100].mxu1 }
0x1944   : > { %v10050_v61 = vadd.f32 %v10049_v33, %v10007_v52  ;;  %v10899_v7 = vpop.f32.mrb[101].mxu1 }
0x1945   : > { %v10052_v20 = vpop.f32.mrb[102].mxu1 }
0x1946   : > { %v10055_v60 = vmax.f32 %v10050_v61, 0.0  ;;  %v10900_v21 = vpop.f32.mrb[103].mxu1 }
0x1948   : > { %v10056_v14 = vadd.f32 %v13714_v51, %v10055_v60 }
0x194a   : > { %v10063_v43 = vmul.f32 0.5, %v10056_v14 }
0x194c   : > { %11128 = vtanh.f32 %v10063_v43 }
0x194d   : > { %11130 = vtanh.f32 %v10069_v29 }
0x194e   : > { %11132 = vtanh.f32 %v10061_v30 }
0x1956   : > { %v11129_v56 = vpop.eup %11128 }
0x1957   : > { %v10065_v46 = vadd.f32 1.0, %v11129_v56  ;;  %v11131_v22 = vpop.eup %11130 }
0x1958   : > { %v10071_v28 = vadd.f32 1.0, %v11131_v22  ;;  %v11133_v39 = vpop.eup %11132 }
0x1959   : > { %v10066_v38 = vmul.f32 0.5, %v10065_v46 }
0x195a   : > { %v10072_v10 = vmul.f32 0.5, %v10071_v28 }
0x195b   : > { %v10067_v58 = vmul.f32 %v10066_v38, %v5418_v37 }
0x195d   : > { %11134 = vtanh.f32 %v10067_v58 }
0x1967   : > { %v11135_v3 = vpop.eup %11134 }
0x1968   : > { %v10073_v36 = vadd.f32 %v11135_v3, %v11133_v39 }
0x196a   : > { %v10074_v49 = vmul.f32 %v10073_v36, %v10072_v10 }
0x196c   : > { %v10075_v42 = vmul.f32 0.5, %v10074_v49 }
0x196e   : > { %11136 = vtanh.f32 %v10075_v42 }
0x196f   : > { %11138 = vtanh.f32 %v618_v27 }
0x1978   : > { %v11137_v2 = vpop.eup %11136 }
0x1979   : > { %v10077_v19 = vadd.f32 1.0, %v11137_v2  ;;  %v11139_v1 = vpop.eup %11138 }
0x197b   : > { %v10078_v62 = vmul.f32 0.5, %v10077_v19 }
0x197d   : > { %v10080_v63 = vmul.f32 %v11139_v1, %v10078_v62 }
0x197f   : > { %v10081_v54 = vadd.f32 %v13714_v51, %v10080_v63 }
0x1981   : > { %10082 = vst.msk [vmem:[%s242_s10] sm:$0xff] %vm14172_vm1, %v10081_v54 }
0x1982   : > { %11157 = shalt.err (!%p11154_p3)
}
0x1983   : > { %s11158_s28 = scalar_lea.hbm %s13737_s19, 128  ;;  %s11162_s13 = scalar_lea.hbm %s13786_s6, 256 }
0x1984   : > { %p11159_p4 = scmp.ne.s32.totalorder %s13737_s19, %s11158_s28  ;;  %p11163_p9 = scmp.lt.u32.totalorder %s13737_s19, %s13786_s6 }
0x1985   : > { %p11164_p10 = scmp.lt.u32.totalorder %s11162_s13, %s11158_s28  ;;  %p11166_p12 = scmp.lt.u32.totalorder %s11158_s28, %s13737_s19 }
0x1986   : > { %p11160_p7 = pnand %p11159_p4, %p11308_p5 }
0x1987   : > { %p11165_p11 = por %p11164_p10, %p11163_p9 }
0x1988   : > { %p11161_p8 = pneg %p11160_p7 }
0x1989   : > { %p11167_p13 = por %p11166_p12, %p11165_p11 }
0x198b   : > { %p11168_p0 = pnand %p11167_p13, %p11161_p8 }
0x198d   : > { %11171 = shalt.err (!%p11168_p0)
}
0x198e   : > { %10901 = dma.vmem_to_hbm [thread:$0]  (%p11308_p5), %s13739_s14, 128, %s13737_s19, %s10084_s17  }
0x198f PF: > { %p10907_p1 = scmp.ge.s32.totalorder %s11206_s24, 2  ;;  %s10109_s10 = sand.u32 1, %s11194_s21  }
0x1990   : > { %s10110_s15 = scalar_lea.sflag [#allocation6], %s10109_s10 }
0x1991   : > { %p10904_p2 = pnand %p10907_p1, %p11312_p6 }
0x1993   : > { %11189 = dma.done.wait (!%p10904_p2), %s10110_s15, 128  }
0x1994   : > { %11191 = vsyncadd (!%p10904_p2), %s10110_s15, 4294967168  ;;  %p16_p3 = scmp.ge.s32.totalorder %s11295_s27, 4   ;;  %s14173_s21 = smov %s11198_s22 }
0x1995   : > { %s14174_s22 = smov %s11202_s23  ;;  %s14175_s23 = smov %s11306_s30 }
0x1996   : > { %s14176_s24 = smov %s11295_s27  ;;  %18 = sbr.rel (!%p16_p3) target bundleno = 3 (0x3), region = 99 }
0x199d   :  { %10115 = vsyncpa [#allocation6], 1 }
0x199e   :  { %10117 = vsyncpa [#allocation6 + $0x1], 1 }

</bundles_post_ra>
